<compile_context>
chip_gen: v7x
topology: tpu7x:2x2x1
jax: 0.10.0
libtpu: 0.0.40
codegen_flags: <defaults>
</compile_context>

<pallas_src>
import numpy as np
import jax
import jax.numpy as jnp
from jax.experimental import pallas as pl
from jax.experimental.pallas import tpu as pltpu

B = 32                 # batch hard-coded by x.view(32, 1, 28, 28)
H = W = 28
K = 5
IMGS_PER_SLAB = 4      # images packed along the 128-lane dim
PITCH = 32             # lane pitch per image (28 cols + 4 zero pad lanes)
LANES = IMGS_PER_SLAB * PITCH          # 128
NSLAB = B // IMGS_PER_SLAB             # 8 slabs of 4 images
SLABS_PER_STEP = 4                     # 16 images per grid step
NSTEPS = NSLAB // SLABS_PER_STEP       # grid=(2,): one parallel step per v7x TC


def net_kernel(x_ref, t1b_ref, t2b_ref, bias_ref, rse_ref, colup_ref,
               tf1_ref, tf2_ref, sr2_ref, out_ref):
    f32 = jnp.float32

    def shl(v, k):     # result[:, c] = v[:, c + k]  (wrap lands in unread pad lanes)
        return v if k == 0 else pltpu.roll(v, shift=LANES - k, axis=1)

    def shr(v, k):     # result[:, c] = v[:, c - k]  (wrap pulls in exact-zero pad lanes)
        return v if k == 0 else pltpu.roll(v, shift=k, axis=1)

    def banded(w_ref, src, shift_fn):
        # sum_kj  W[kj] @ shift_fn(src, kj)   — row taps on the MXU, col taps on the XLU
        acc = jnp.dot(w_ref[0], shift_fn(src, 0), preferred_element_type=f32)
        for kj in range(1, K):
            acc = acc + jnp.dot(w_ref[kj], shift_fn(src, kj),
                                preferred_element_type=f32)
        return acc

    rse = rse_ref[...]          # (84, 71)  pool-row-sel + bilinear + row pad, 3-stack
    colup = colup_ref[...]      # (128,128) pool-col-sel + bilinear + col pad, per slot
    bias = bias_ref[...]        # (72, 128) conv2 bias on the stacked rows
    sr2 = sr2_ref[...]          # (14, 27)  final pool row select

    for g in range(SLABS_PER_STEP):            # 4 independent slabs, unrolled
        x = x_ref[g]                                           # (28, 128)

        # conv1 (1->1, k5, valid)
        c1 = banded(t1b_ref, x, shl)                           # (24, 128)

        # conv2 (1->3, k5) — 3 output channels stacked at row pitch 24
        c2 = banded(t2b_ref, c1, shl) + bias                   # (72, 128)

        # relu(maxpool 2x2): row-pair max, lane-pair max, relu (on the 3-stack)
        rm = jnp.maximum(c2[:-1, :], c2[1:, :])                # (71, 128)
        pm = jnp.maximum(jnp.maximum(rm, shl(rm, 1)), 0.0)

        # bilinear up x2 (align_corners) + zero-pad for fc1, folded into two
        # matmuls (rows then columns); the relu here is a no-op and is dropped.
        ur = jnp.dot(rse, pm, preferred_element_type=f32)      # (84, 128)
        pads = jnp.dot(ur, colup, preferred_element_type=f32)  # (84, 128)

        # fc1: ConvTranspose2d(3->1, k5); the 3 stacked channels are summed by
        # the banded matrices; relu.
        t1 = jnp.maximum(banded(tf1_ref, pads, shl), 0.0)      # (24, 128), cols 24..31 == 0

        # fc2: ConvTranspose2d(1->1, k5); the implicit zero padding is folded
        # into the banded matrices (rows) and right lane shifts (columns).
        t2 = banded(tf2_ref, t1, lambda v, kj: shr(v, K - 1 - kj))   # (28, 128)

        # relu(maxpool 2x2) + final relu (a single clamp at the end suffices)
        rm2 = jnp.maximum(t2[:-1, :], t2[1:, :])               # (27, 128)
        mm2 = jnp.maximum(rm2, shl(rm2, 1))
        o = jnp.dot(sr2, mm2, preferred_element_type=f32)      # (14, 128)
        out_ref[g] = jnp.maximum(o, 0.0)


def _bilinear_matrix(out_size, in_size):
    # align_corners=True bilinear interpolation matrix (nn.UpsamplingBilinear2d)
    M = np.zeros((out_size, in_size), np.float32)
    scale = (in_size - 1) / (out_size - 1)
    for i in range(out_size):
        src = i * scale
        p0 = int(np.floor(src))
        p1 = min(p0 + 1, in_size - 1)
        f = src - p0
        M[i, p0] += 1.0 - f
        M[i, p1] += f
    return M


def make_params():
    rng = np.random.RandomState(0)
    ca_kernel = rng.randint(2, size=(K, K)).astype(np.float32)          # frozen conv1
    w2 = rng.uniform(-0.2, 0.2, size=(3, 1, K, K)).astype(np.float32)
    b2 = rng.uniform(-0.2, 0.2, size=(3,)).astype(np.float32)
    wt1 = rng.uniform(-0.2, 0.2, size=(3, 1, K, K)).astype(np.float32)
    wt2 = rng.uniform(-0.2, 0.2, size=(1, 1, K, K)).astype(np.float32)
    return ca_kernel, w2, b2, wt1, wt2


def build_constants(w1, w2, b2, wt1, wt2):
    f32 = np.float32

    # conv1 banded LHS per column tap kj: T1[kj, i, i+ki] = w1[ki, kj]
    T1 = np.zeros((K, 24, 28), f32)
    for kj in range(K):
        for i in range(24):
            for ki in range(K):
                T1[kj, i, i + ki] = w1[ki, kj]

    # conv2 banded LHS, 3 output channels stacked at row pitch 24
    T2 = np.zeros((K, 72, 24), f32)
    for kj in range(K):
        for o in range(3):
            for i in range(20):
                for ki in range(K):
                    T2[kj, 24 * o + i, i + ki] = w2[o, 0, ki, kj]

    # per-channel conv2 bias broadcast over the valid rows of the stack
    Bias = np.zeros((72, LANES), f32)
    for o in range(3):
        Bias[24 * o: 24 * o + 20, :] = b2[o]

    # rows: pool-row select (even of 0..18) -> bilinear 10->20 -> embed@row 4,
    # block-placed per channel: out rows 28o+(0..27) from in rows 24o+(0..18)
    Rb = _bilinear_matrix(20, 10)
    Sr1 = np.zeros((10, 19), f32)
    Sr1[np.arange(10), 2 * np.arange(10)] = 1.0
    Erow28 = np.zeros((28, 20), f32)
    Erow28[np.arange(20) + 4, np.arange(20)] = 1.0
    RSE1 = (Erow28 @ Rb @ Sr1).astype(f32)                    # (28, 19)
    RSEs = np.zeros((84, 71), f32)
    for o in range(3):
        RSEs[28 * o: 28 * o + 28, 24 * o: 24 * o + 19] = RSE1

    # cols (block-diagonal per image slot): pool-col select (even cols 0..18)
    # -> bilinear 10->20 -> embed at within-slot column 4 (exact zeros elsewhere)
    ColUp = np.zeros((LANES, LANES), f32)
    for b in range(IMGS_PER_SLAB):
        for q in range(10):
            for t in range(20):
                ColUp[b * PITCH + 2 * q, b * PITCH + 4 + t] = Rb[t, q]

    # fc1 banded LHS per kj, summing the 3 stacked input channels (row pitch 28):
    # Tf1[kj, i, 28o+i+a] = wt1[o, 0, 4-a, 4-kj]
    Tf1 = np.zeros((K, 24, 84), f32)
    for kj in range(K):
        for o in range(3):
            for i in range(24):
                for a in range(K):
                    Tf1[kj, i, 28 * o + i + a] = wt1[o, 0, 4 - a, 4 - kj]

    # fc2 banded LHS per kj with the implicit row zero-padding folded in:
    # out row i reads t1 rows r in [i-4, i] ∩ [0, 23] with tap wt2[i-r, 4-kj]
    Tf2 = np.zeros((K, 28, 24), f32)
    for kj in range(K):
        for i in range(28):
            for r in range(max(0, i - 4), min(23, i) + 1):
                Tf2[kj, i, r] = wt2[0, 0, i - r, 4 - kj]

    # final maxpool row select (even rows 0..26 of the 27 row-pair maxima)
    Sr2 = np.zeros((14, 27), f32)
    Sr2[np.arange(14), 2 * np.arange(14)] = 1.0

    to_j = lambda a: jnp.asarray(a, jnp.float32)
    return tuple(map(to_j, (T1, T2, Bias, RSEs, ColUp, Tf1, Tf2, Sr2)))


def net_forward(x, consts):
    T1, T2, Bias, RSEs, ColUp, Tf1, Tf2, Sr2 = consts

    x = x.reshape(B, H, W).astype(jnp.float32)      # emulate x.view(32, 1, 28, 28)
    # pack 4 images per slab along the 128-lane dim (pitch 32, cols 28..31 = 0)
    xp = jnp.pad(x.reshape(NSLAB, IMGS_PER_SLAB, H, W),
                 ((0, 0), (0, 0), (0, 0), (0, PITCH - W)))
    xp = jnp.transpose(xp, (0, 2, 1, 3)).reshape(NSLAB, H, LANES)    # (8, 28, 128)

    def const_spec(arr):
        zeros = (0,) * arr.ndim
        return pl.BlockSpec(arr.shape, lambda s: zeros)

    out = pl.pallas_call(
        net_kernel,
        out_shape=jax.ShapeDtypeStruct((NSLAB, 14, LANES), jnp.float32),
        grid=(NSTEPS,),
        in_specs=[
            pl.BlockSpec((SLABS_PER_STEP, H, LANES), lambda s: (s, 0, 0)),
            const_spec(T1), const_spec(T2), const_spec(Bias),
            const_spec(RSEs), const_spec(ColUp),
            const_spec(Tf1), const_spec(Tf2), const_spec(Sr2),
        ],
        out_specs=pl.BlockSpec((SLABS_PER_STEP, 14, LANES), lambda s: (s, 0, 0)),
        compiler_params=pltpu.CompilerParams(dimension_semantics=("parallel",)),
    )(xp, T1, T2, Bias, RSEs, ColUp, Tf1, Tf2, Sr2)

    # unpack: (8, 14, 4, 32) -> take even within-slot cols -> (32, 1, 14, 14) NCHW
    o = out.reshape(NSLAB, 14, IMGS_PER_SLAB, PITCH)[:, :, :, 0:28:2]
    o = jnp.transpose(o, (0, 2, 1, 3)).reshape(B, 1, 14, 14)
    return o


if __name__ == "__main__":
    w1, w2, b2, wt1, wt2 = make_params()
    consts = build_constants(w1, w2, b2, wt1, wt2)
    x = jax.random.normal(jax.random.PRNGKey(0), (B, 1, 28, 28), dtype=jnp.float32)
    fwd = jax.jit(lambda xx: net_forward(xx, consts))
    y = jax.block_until_ready(fwd(x))
    assert y.shape == (B, 1, 14, 14), y.shape
    assert bool(jnp.all(jnp.isfinite(y))) and bool(jnp.all(y >= 0.0))
    print("KERNEL_OK")
</pallas_src>

<mosaic_0001>
module attributes {stable_mosaic.version = 11 : i64} {
  func.func @net_kernel(%arg0: i32, %arg1: memref<4x28x128xf32, #tpu.memory_space<vmem>>, %arg2: memref<5x24x28xf32, #tpu.memory_space<vmem>>, %arg3: memref<5x72x24xf32, #tpu.memory_space<vmem>>, %arg4: memref<72x128xf32, #tpu.memory_space<vmem>>, %arg5: memref<84x71xf32, #tpu.memory_space<vmem>>, %arg6: memref<128x128xf32, #tpu.memory_space<vmem>>, %arg7: memref<5x24x84xf32, #tpu.memory_space<vmem>>, %arg8: memref<5x28x24xf32, #tpu.memory_space<vmem>>, %arg9: memref<14x27xf32, #tpu.memory_space<vmem>>, %arg10: memref<4x14x128xf32, #tpu.memory_space<vmem>>) attributes {dimension_semantics = [#tpu.dimension_semantics<parallel>], iteration_bounds = array<i64: 2>, scalar_prefetch = 0 : i64, scratch_operands = 0 : i64, tpu.core_type = #tpu.core_type<tc>, window_params = [{transform_indices = @transform_0, window_bounds = array<i64: 4, 28, 128>}, {pipeline_mode = #tpu.pipeline_mode<synchronous>, transform_indices = @transform_1, window_bounds = array<i64: 5, 24, 28>}, {pipeline_mode = #tpu.pipeline_mode<synchronous>, transform_indices = @transform_2, window_bounds = array<i64: 5, 72, 24>}, {pipeline_mode = #tpu.pipeline_mode<synchronous>, transform_indices = @transform_3, window_bounds = array<i64: 72, 128>}, {pipeline_mode = #tpu.pipeline_mode<synchronous>, transform_indices = @transform_4, window_bounds = array<i64: 84, 71>}, {pipeline_mode = #tpu.pipeline_mode<synchronous>, transform_indices = @transform_5, window_bounds = array<i64: 128, 128>}, {pipeline_mode = #tpu.pipeline_mode<synchronous>, transform_indices = @transform_6, window_bounds = array<i64: 5, 24, 84>}, {pipeline_mode = #tpu.pipeline_mode<synchronous>, transform_indices = @transform_7, window_bounds = array<i64: 5, 28, 24>}, {pipeline_mode = #tpu.pipeline_mode<synchronous>, transform_indices = @transform_8, window_bounds = array<i64: 14, 27>}, {transform_indices = @transform_9, window_bounds = array<i64: 4, 14, 128>}]} {
    %c0 = arith.constant 0 : index
    %c0_0 = arith.constant 0 : index
    %0 = vector.load %arg5[%c0, %c0_0] : memref<84x71xf32, #tpu.memory_space<vmem>>, vector<84x71xf32>
    %c0_1 = arith.constant 0 : index
    %c0_2 = arith.constant 0 : index
    %1 = vector.load %arg6[%c0_1, %c0_2] : memref<128x128xf32, #tpu.memory_space<vmem>>, vector<128x128xf32>
    %c0_3 = arith.constant 0 : index
    %c0_4 = arith.constant 0 : index
    %2 = vector.load %arg4[%c0_3, %c0_4] : memref<72x128xf32, #tpu.memory_space<vmem>>, vector<72x128xf32>
    %c0_5 = arith.constant 0 : index
    %c0_6 = arith.constant 0 : index
    %3 = vector.load %arg9[%c0_5, %c0_6] : memref<14x27xf32, #tpu.memory_space<vmem>>, vector<14x27xf32>
    %c0_7 = arith.constant 0 : index
    %c0_8 = arith.constant 0 : index
    %c0_9 = arith.constant 0 : index
    %4 = vector.load %arg1[%c0_7, %c0_8, %c0_9] : memref<4x28x128xf32, #tpu.memory_space<vmem>>, vector<1x28x128xf32>
    %5 = vector.shape_cast %4 : vector<1x28x128xf32> to vector<28x128xf32>
    %c0_10 = arith.constant 0 : index
    %c0_11 = arith.constant 0 : index
    %c0_12 = arith.constant 0 : index
    %6 = vector.load %arg2[%c0_10, %c0_11, %c0_12] : memref<5x24x28xf32, #tpu.memory_space<vmem>>, vector<1x24x28xf32>
    %7 = vector.shape_cast %6 : vector<1x24x28xf32> to vector<24x28xf32>
    %cst = arith.constant dense<0.000000e+00> : vector<24x128xf32>
    %8 = tpu.matmul %7, %5, %cst {dimension_numbers = #tpu.dot_dimension_numbers<[1], [0], [0], [1], [0, 0, 1, 1], [], []>} : vector<24x28xf32>, vector<28x128xf32>, vector<24x128xf32> -> vector<24x128xf32>
    %c1 = arith.constant 1 : index
    %c0_13 = arith.constant 0 : index
    %c0_14 = arith.constant 0 : index
    %9 = vector.load %arg2[%c1, %c0_13, %c0_14] : memref<5x24x28xf32, #tpu.memory_space<vmem>>, vector<1x24x28xf32>
    %10 = vector.shape_cast %9 : vector<1x24x28xf32> to vector<24x28xf32>
    %c127_i32 = arith.constant 127 : i32
    %11 = tpu.dynamic_rotate %5 by %c127_i32 dim 1 : vector<28x128xf32>, i32 -> vector<28x128xf32>
    %cst_15 = arith.constant dense<0.000000e+00> : vector<24x128xf32>
    %12 = tpu.matmul %10, %11, %cst_15 {dimension_numbers = #tpu.dot_dimension_numbers<[1], [0], [0], [1], [0, 0, 1, 1], [], []>} : vector<24x28xf32>, vector<28x128xf32>, vector<24x128xf32> -> vector<24x128xf32>
    %13 = arith.addf %8, %12 : vector<24x128xf32>
    %c2 = arith.constant 2 : index
    %c0_16 = arith.constant 0 : index
    %c0_17 = arith.constant 0 : index
    %14 = vector.load %arg2[%c2, %c0_16, %c0_17] : memref<5x24x28xf32, #tpu.memory_space<vmem>>, vector<1x24x28xf32>
    %15 = vector.shape_cast %14 : vector<1x24x28xf32> to vector<24x28xf32>
    %c126_i32 = arith.constant 126 : i32
    %16 = tpu.dynamic_rotate %5 by %c126_i32 dim 1 : vector<28x128xf32>, i32 -> vector<28x128xf32>
    %cst_18 = arith.constant dense<0.000000e+00> : vector<24x128xf32>
    %17 = tpu.matmul %15, %16, %cst_18 {dimension_numbers = #tpu.dot_dimension_numbers<[1], [0], [0], [1], [0, 0, 1, 1], [], []>} : vector<24x28xf32>, vector<28x128xf32>, vector<24x128xf32> -> vector<24x128xf32>
    %18 = arith.addf %13, %17 : vector<24x128xf32>
    %c3 = arith.constant 3 : index
    %c0_19 = arith.constant 0 : index
    %c0_20 = arith.constant 0 : index
    %19 = vector.load %arg2[%c3, %c0_19, %c0_20] : memref<5x24x28xf32, #tpu.memory_space<vmem>>, vector<1x24x28xf32>
    %20 = vector.shape_cast %19 : vector<1x24x28xf32> to vector<24x28xf32>
    %c125_i32 = arith.constant 125 : i32
    %21 = tpu.dynamic_rotate %5 by %c125_i32 dim 1 : vector<28x128xf32>, i32 -> vector<28x128xf32>
    %cst_21 = arith.constant dense<0.000000e+00> : vector<24x128xf32>
    %22 = tpu.matmul %20, %21, %cst_21 {dimension_numbers = #tpu.dot_dimension_numbers<[1], [0], [0], [1], [0, 0, 1, 1], [], []>} : vector<24x28xf32>, vector<28x128xf32>, vector<24x128xf32> -> vector<24x128xf32>
    %23 = arith.addf %18, %22 : vector<24x128xf32>
    %c4 = arith.constant 4 : index
    %c0_22 = arith.constant 0 : index
    %c0_23 = arith.constant 0 : index
    %24 = vector.load %arg2[%c4, %c0_22, %c0_23] : memref<5x24x28xf32, #tpu.memory_space<vmem>>, vector<1x24x28xf32>
    %25 = vector.shape_cast %24 : vector<1x24x28xf32> to vector<24x28xf32>
    %c124_i32 = arith.constant 124 : i32
    %26 = tpu.dynamic_rotate %5 by %c124_i32 dim 1 : vector<28x128xf32>, i32 -> vector<28x128xf32>
    %cst_24 = arith.constant dense<0.000000e+00> : vector<24x128xf32>
    %27 = tpu.matmul %25, %26, %cst_24 {dimension_numbers = #tpu.dot_dimension_numbers<[1], [0], [0], [1], [0, 0, 1, 1], [], []>} : vector<24x28xf32>, vector<28x128xf32>, vector<24x128xf32> -> vector<24x128xf32>
    %28 = arith.addf %23, %27 : vector<24x128xf32>
    %c0_25 = arith.constant 0 : index
    %c0_26 = arith.constant 0 : index
    %c0_27 = arith.constant 0 : index
    %29 = vector.load %arg3[%c0_25, %c0_26, %c0_27] : memref<5x72x24xf32, #tpu.memory_space<vmem>>, vector<1x72x24xf32>
    %30 = vector.shape_cast %29 : vector<1x72x24xf32> to vector<72x24xf32>
    %cst_28 = arith.constant dense<0.000000e+00> : vector<72x128xf32>
    %31 = tpu.matmul %30, %28, %cst_28 {dimension_numbers = #tpu.dot_dimension_numbers<[1], [0], [0], [1], [0, 0, 1, 1], [], []>} : vector<72x24xf32>, vector<24x128xf32>, vector<72x128xf32> -> vector<72x128xf32>
    %c1_29 = arith.constant 1 : index
    %c0_30 = arith.constant 0 : index
    %c0_31 = arith.constant 0 : index
    %32 = vector.load %arg3[%c1_29, %c0_30, %c0_31] : memref<5x72x24xf32, #tpu.memory_space<vmem>>, vector<1x72x24xf32>
    %33 = vector.shape_cast %32 : vector<1x72x24xf32> to vector<72x24xf32>
    %c127_i32_32 = arith.constant 127 : i32
    %34 = tpu.dynamic_rotate %28 by %c127_i32_32 dim 1 : vector<24x128xf32>, i32 -> vector<24x128xf32>
    %cst_33 = arith.constant dense<0.000000e+00> : vector<72x128xf32>
    %35 = tpu.matmul %33, %34, %cst_33 {dimension_numbers = #tpu.dot_dimension_numbers<[1], [0], [0], [1], [0, 0, 1, 1], [], []>} : vector<72x24xf32>, vector<24x128xf32>, vector<72x128xf32> -> vector<72x128xf32>
    %36 = arith.addf %31, %35 : vector<72x128xf32>
    %c2_34 = arith.constant 2 : index
    %c0_35 = arith.constant 0 : index
    %c0_36 = arith.constant 0 : index
    %37 = vector.load %arg3[%c2_34, %c0_35, %c0_36] : memref<5x72x24xf32, #tpu.memory_space<vmem>>, vector<1x72x24xf32>
    %38 = vector.shape_cast %37 : vector<1x72x24xf32> to vector<72x24xf32>
    %c126_i32_37 = arith.constant 126 : i32
    %39 = tpu.dynamic_rotate %28 by %c126_i32_37 dim 1 : vector<24x128xf32>, i32 -> vector<24x128xf32>
    %cst_38 = arith.constant dense<0.000000e+00> : vector<72x128xf32>
    %40 = tpu.matmul %38, %39, %cst_38 {dimension_numbers = #tpu.dot_dimension_numbers<[1], [0], [0], [1], [0, 0, 1, 1], [], []>} : vector<72x24xf32>, vector<24x128xf32>, vector<72x128xf32> -> vector<72x128xf32>
    %41 = arith.addf %36, %40 : vector<72x128xf32>
    %c3_39 = arith.constant 3 : index
    %c0_40 = arith.constant 0 : index
    %c0_41 = arith.constant 0 : index
    %42 = vector.load %arg3[%c3_39, %c0_40, %c0_41] : memref<5x72x24xf32, #tpu.memory_space<vmem>>, vector<1x72x24xf32>
    %43 = vector.shape_cast %42 : vector<1x72x24xf32> to vector<72x24xf32>
    %c125_i32_42 = arith.constant 125 : i32
    %44 = tpu.dynamic_rotate %28 by %c125_i32_42 dim 1 : vector<24x128xf32>, i32 -> vector<24x128xf32>
    %cst_43 = arith.constant dense<0.000000e+00> : vector<72x128xf32>
    %45 = tpu.matmul %43, %44, %cst_43 {dimension_numbers = #tpu.dot_dimension_numbers<[1], [0], [0], [1], [0, 0, 1, 1], [], []>} : vector<72x24xf32>, vector<24x128xf32>, vector<72x128xf32> -> vector<72x128xf32>
    %46 = arith.addf %41, %45 : vector<72x128xf32>
    %c4_44 = arith.constant 4 : index
    %c0_45 = arith.constant 0 : index
    %c0_46 = arith.constant 0 : index
    %47 = vector.load %arg3[%c4_44, %c0_45, %c0_46] : memref<5x72x24xf32, #tpu.memory_space<vmem>>, vector<1x72x24xf32>
    %48 = vector.shape_cast %47 : vector<1x72x24xf32> to vector<72x24xf32>
    %c124_i32_47 = arith.constant 124 : i32
    %49 = tpu.dynamic_rotate %28 by %c124_i32_47 dim 1 : vector<24x128xf32>, i32 -> vector<24x128xf32>
    %cst_48 = arith.constant dense<0.000000e+00> : vector<72x128xf32>
    %50 = tpu.matmul %48, %49, %cst_48 {dimension_numbers = #tpu.dot_dimension_numbers<[1], [0], [0], [1], [0, 0, 1, 1], [], []>} : vector<72x24xf32>, vector<24x128xf32>, vector<72x128xf32> -> vector<72x128xf32>
    %51 = arith.addf %46, %50 : vector<72x128xf32>
    %52 = arith.addf %51, %2 : vector<72x128xf32>
    %53 = vector.extract_strided_slice %52 {offsets = [0, 0], sizes = [71, 128], strides = [1, 1]} : vector<72x128xf32> to vector<71x128xf32>
    %54 = vector.extract_strided_slice %52 {offsets = [1, 0], sizes = [71, 128], strides = [1, 1]} : vector<72x128xf32> to vector<71x128xf32>
    %55 = arith.maximumf %53, %54 : vector<71x128xf32>
    %c127_i32_49 = arith.constant 127 : i32
    %56 = tpu.dynamic_rotate %55 by %c127_i32_49 dim 1 : vector<71x128xf32>, i32 -> vector<71x128xf32>
    %57 = arith.maximumf %55, %56 : vector<71x128xf32>
    %cst_50 = arith.constant 0.000000e+00 : f32
    %58 = vector.broadcast %cst_50 : f32 to vector<71x128xf32>
    %59 = arith.maximumf %57, %58 : vector<71x128xf32>
    %cst_51 = arith.constant dense<0.000000e+00> : vector<84x128xf32>
    %60 = tpu.matmul %0, %59, %cst_51 {dimension_numbers = #tpu.dot_dimension_numbers<[1], [0], [0], [1], [0, 0, 1, 1], [], []>} : vector<84x71xf32>, vector<71x128xf32>, vector<84x128xf32> -> vector<84x128xf32>
    %cst_52 = arith.constant dense<0.000000e+00> : vector<84x128xf32>
    %61 = tpu.matmul %60, %1, %cst_52 {dimension_numbers = #tpu.dot_dimension_numbers<[1], [0], [0], [1], [0, 0, 1, 1], [], []>} : vector<84x128xf32>, vector<128x128xf32>, vector<84x128xf32> -> vector<84x128xf32>
    %c0_53 = arith.constant 0 : index
    %c0_54 = arith.constant 0 : index
    %c0_55 = arith.constant 0 : index
    %62 = vector.load %arg7[%c0_53, %c0_54, %c0_55] : memref<5x24x84xf32, #tpu.memory_space<vmem>>, vector<1x24x84xf32>
    %63 = vector.shape_cast %62 : vector<1x24x84xf32> to vector<24x84xf32>
    %cst_56 = arith.constant dense<0.000000e+00> : vector<24x128xf32>
    %64 = tpu.matmul %63, %61, %cst_56 {dimension_numbers = #tpu.dot_dimension_numbers<[1], [0], [0], [1], [0, 0, 1, 1], [], []>} : vector<24x84xf32>, vector<84x128xf32>, vector<24x128xf32> -> vector<24x128xf32>
    %c1_57 = arith.constant 1 : index
    %c0_58 = arith.constant 0 : index
    %c0_59 = arith.constant 0 : index
    %65 = vector.load %arg7[%c1_57, %c0_58, %c0_59] : memref<5x24x84xf32, #tpu.memory_space<vmem>>, vector<1x24x84xf32>
    %66 = vector.shape_cast %65 : vector<1x24x84xf32> to vector<24x84xf32>
    %c127_i32_60 = arith.constant 127 : i32
    %67 = tpu.dynamic_rotate %61 by %c127_i32_60 dim 1 : vector<84x128xf32>, i32 -> vector<84x128xf32>
    %cst_61 = arith.constant dense<0.000000e+00> : vector<24x128xf32>
    %68 = tpu.matmul %66, %67, %cst_61 {dimension_numbers = #tpu.dot_dimension_numbers<[1], [0], [0], [1], [0, 0, 1, 1], [], []>} : vector<24x84xf32>, vector<84x128xf32>, vector<24x128xf32> -> vector<24x128xf32>
    %69 = arith.addf %64, %68 : vector<24x128xf32>
    %c2_62 = arith.constant 2 : index
    %c0_63 = arith.constant 0 : index
    %c0_64 = arith.constant 0 : index
    %70 = vector.load %arg7[%c2_62, %c0_63, %c0_64] : memref<5x24x84xf32, #tpu.memory_space<vmem>>, vector<1x24x84xf32>
    %71 = vector.shape_cast %70 : vector<1x24x84xf32> to vector<24x84xf32>
    %c126_i32_65 = arith.constant 126 : i32
    %72 = tpu.dynamic_rotate %61 by %c126_i32_65 dim 1 : vector<84x128xf32>, i32 -> vector<84x128xf32>
    %cst_66 = arith.constant dense<0.000000e+00> : vector<24x128xf32>
    %73 = tpu.matmul %71, %72, %cst_66 {dimension_numbers = #tpu.dot_dimension_numbers<[1], [0], [0], [1], [0, 0, 1, 1], [], []>} : vector<24x84xf32>, vector<84x128xf32>, vector<24x128xf32> -> vector<24x128xf32>
    %74 = arith.addf %69, %73 : vector<24x128xf32>
    %c3_67 = arith.constant 3 : index
    %c0_68 = arith.constant 0 : index
    %c0_69 = arith.constant 0 : index
    %75 = vector.load %arg7[%c3_67, %c0_68, %c0_69] : memref<5x24x84xf32, #tpu.memory_space<vmem>>, vector<1x24x84xf32>
    %76 = vector.shape_cast %75 : vector<1x24x84xf32> to vector<24x84xf32>
    %c125_i32_70 = arith.constant 125 : i32
    %77 = tpu.dynamic_rotate %61 by %c125_i32_70 dim 1 : vector<84x128xf32>, i32 -> vector<84x128xf32>
    %cst_71 = arith.constant dense<0.000000e+00> : vector<24x128xf32>
    %78 = tpu.matmul %76, %77, %cst_71 {dimension_numbers = #tpu.dot_dimension_numbers<[1], [0], [0], [1], [0, 0, 1, 1], [], []>} : vector<24x84xf32>, vector<84x128xf32>, vector<24x128xf32> -> vector<24x128xf32>
    %79 = arith.addf %74, %78 : vector<24x128xf32>
    %c4_72 = arith.constant 4 : index
    %c0_73 = arith.constant 0 : index
    %c0_74 = arith.constant 0 : index
    %80 = vector.load %arg7[%c4_72, %c0_73, %c0_74] : memref<5x24x84xf32, #tpu.memory_space<vmem>>, vector<1x24x84xf32>
    %81 = vector.shape_cast %80 : vector<1x24x84xf32> to vector<24x84xf32>
    %c124_i32_75 = arith.constant 124 : i32
    %82 = tpu.dynamic_rotate %61 by %c124_i32_75 dim 1 : vector<84x128xf32>, i32 -> vector<84x128xf32>
    %cst_76 = arith.constant dense<0.000000e+00> : vector<24x128xf32>
    %83 = tpu.matmul %81, %82, %cst_76 {dimension_numbers = #tpu.dot_dimension_numbers<[1], [0], [0], [1], [0, 0, 1, 1], [], []>} : vector<24x84xf32>, vector<84x128xf32>, vector<24x128xf32> -> vector<24x128xf32>
    %84 = arith.addf %79, %83 : vector<24x128xf32>
    %cst_77 = arith.constant 0.000000e+00 : f32
    %85 = vector.broadcast %cst_77 : f32 to vector<24x128xf32>
    %86 = arith.maximumf %84, %85 : vector<24x128xf32>
    %c0_78 = arith.constant 0 : index
    %c0_79 = arith.constant 0 : index
    %c0_80 = arith.constant 0 : index
    %87 = vector.load %arg8[%c0_78, %c0_79, %c0_80] : memref<5x28x24xf32, #tpu.memory_space<vmem>>, vector<1x28x24xf32>
    %88 = vector.shape_cast %87 : vector<1x28x24xf32> to vector<28x24xf32>
    %c4_i32 = arith.constant 4 : i32
    %89 = tpu.dynamic_rotate %86 by %c4_i32 dim 1 : vector<24x128xf32>, i32 -> vector<24x128xf32>
    %cst_81 = arith.constant dense<0.000000e+00> : vector<28x128xf32>
    %90 = tpu.matmul %88, %89, %cst_81 {dimension_numbers = #tpu.dot_dimension_numbers<[1], [0], [0], [1], [0, 0, 1, 1], [], []>} : vector<28x24xf32>, vector<24x128xf32>, vector<28x128xf32> -> vector<28x128xf32>
    %c1_82 = arith.constant 1 : index
    %c0_83 = arith.constant 0 : index
    %c0_84 = arith.constant 0 : index
    %91 = vector.load %arg8[%c1_82, %c0_83, %c0_84] : memref<5x28x24xf32, #tpu.memory_space<vmem>>, vector<1x28x24xf32>
    %92 = vector.shape_cast %91 : vector<1x28x24xf32> to vector<28x24xf32>
    %c3_i32 = arith.constant 3 : i32
    %93 = tpu.dynamic_rotate %86 by %c3_i32 dim 1 : vector<24x128xf32>, i32 -> vector<24x128xf32>
    %cst_85 = arith.constant dense<0.000000e+00> : vector<28x128xf32>
    %94 = tpu.matmul %92, %93, %cst_85 {dimension_numbers = #tpu.dot_dimension_numbers<[1], [0], [0], [1], [0, 0, 1, 1], [], []>} : vector<28x24xf32>, vector<24x128xf32>, vector<28x128xf32> -> vector<28x128xf32>
    %95 = arith.addf %90, %94 : vector<28x128xf32>
    %c2_86 = arith.constant 2 : index
    %c0_87 = arith.constant 0 : index
    %c0_88 = arith.constant 0 : index
    %96 = vector.load %arg8[%c2_86, %c0_87, %c0_88] : memref<5x28x24xf32, #tpu.memory_space<vmem>>, vector<1x28x24xf32>
    %97 = vector.shape_cast %96 : vector<1x28x24xf32> to vector<28x24xf32>
    %c2_i32 = arith.constant 2 : i32
    %98 = tpu.dynamic_rotate %86 by %c2_i32 dim 1 : vector<24x128xf32>, i32 -> vector<24x128xf32>
    %cst_89 = arith.constant dense<0.000000e+00> : vector<28x128xf32>
    %99 = tpu.matmul %97, %98, %cst_89 {dimension_numbers = #tpu.dot_dimension_numbers<[1], [0], [0], [1], [0, 0, 1, 1], [], []>} : vector<28x24xf32>, vector<24x128xf32>, vector<28x128xf32> -> vector<28x128xf32>
    %100 = arith.addf %95, %99 : vector<28x128xf32>
    %c3_90 = arith.constant 3 : index
    %c0_91 = arith.constant 0 : index
    %c0_92 = arith.constant 0 : index
    %101 = vector.load %arg8[%c3_90, %c0_91, %c0_92] : memref<5x28x24xf32, #tpu.memory_space<vmem>>, vector<1x28x24xf32>
    %102 = vector.shape_cast %101 : vector<1x28x24xf32> to vector<28x24xf32>
    %c1_i32 = arith.constant 1 : i32
    %103 = tpu.dynamic_rotate %86 by %c1_i32 dim 1 : vector<24x128xf32>, i32 -> vector<24x128xf32>
    %cst_93 = arith.constant dense<0.000000e+00> : vector<28x128xf32>
    %104 = tpu.matmul %102, %103, %cst_93 {dimension_numbers = #tpu.dot_dimension_numbers<[1], [0], [0], [1], [0, 0, 1, 1], [], []>} : vector<28x24xf32>, vector<24x128xf32>, vector<28x128xf32> -> vector<28x128xf32>
    %105 = arith.addf %100, %104 : vector<28x128xf32>
    %c4_94 = arith.constant 4 : index
    %c0_95 = arith.constant 0 : index
    %c0_96 = arith.constant 0 : index
    %106 = vector.load %arg8[%c4_94, %c0_95, %c0_96] : memref<5x28x24xf32, #tpu.memory_space<vmem>>, vector<1x28x24xf32>
    %107 = vector.shape_cast %106 : vector<1x28x24xf32> to vector<28x24xf32>
    %cst_97 = arith.constant dense<0.000000e+00> : vector<28x128xf32>
    %108 = tpu.matmul %107, %86, %cst_97 {dimension_numbers = #tpu.dot_dimension_numbers<[1], [0], [0], [1], [0, 0, 1, 1], [], []>} : vector<28x24xf32>, vector<24x128xf32>, vector<28x128xf32> -> vector<28x128xf32>
    %109 = arith.addf %105, %108 : vector<28x128xf32>
    %110 = vector.extract_strided_slice %109 {offsets = [0, 0], sizes = [27, 128], strides = [1, 1]} : vector<28x128xf32> to vector<27x128xf32>
    %111 = vector.extract_strided_slice %109 {offsets = [1, 0], sizes = [27, 128], strides = [1, 1]} : vector<28x128xf32> to vector<27x128xf32>
    %112 = arith.maximumf %110, %111 : vector<27x128xf32>
    %c127_i32_98 = arith.constant 127 : i32
    %113 = tpu.dynamic_rotate %112 by %c127_i32_98 dim 1 : vector<27x128xf32>, i32 -> vector<27x128xf32>
    %114 = arith.maximumf %112, %113 : vector<27x128xf32>
    %cst_99 = arith.constant dense<0.000000e+00> : vector<14x128xf32>
    %115 = tpu.matmul %3, %114, %cst_99 {dimension_numbers = #tpu.dot_dimension_numbers<[1], [0], [0], [1], [0, 0, 1, 1], [], []>} : vector<14x27xf32>, vector<27x128xf32>, vector<14x128xf32> -> vector<14x128xf32>
    %cst_100 = arith.constant 0.000000e+00 : f32
    %116 = vector.broadcast %cst_100 : f32 to vector<14x128xf32>
    %117 = arith.maximumf %115, %116 : vector<14x128xf32>
    %c0_101 = arith.constant 0 : index
    %c0_102 = arith.constant 0 : index
    %c0_103 = arith.constant 0 : index
    %118 = vector.load %arg10[%c0_101, %c0_102, %c0_103] : memref<4x14x128xf32, #tpu.memory_space<vmem>>, vector<1x14x128xf32>
    %119 = vector.shape_cast %118 : vector<1x14x128xf32> to vector<14x128xf32>
    %120 = vector.shape_cast %117 : vector<14x128xf32> to vector<1x14x128xf32>
    tpu.vector_store %arg10[%c0_101, %c0_102, %c0_103], %120 {strides = array<i32>} : memref<4x14x128xf32, #tpu.memory_space<vmem>>, vector<1x14x128xf32>,
    %c1_104 = arith.constant 1 : index
    %c0_105 = arith.constant 0 : index
    %c0_106 = arith.constant 0 : index
    %121 = vector.load %arg1[%c1_104, %c0_105, %c0_106] : memref<4x28x128xf32, #tpu.memory_space<vmem>>, vector<1x28x128xf32>
    %122 = vector.shape_cast %121 : vector<1x28x128xf32> to vector<28x128xf32>
    %c0_107 = arith.constant 0 : index
    %c0_108 = arith.constant 0 : index
    %c0_109 = arith.constant 0 : index
    %123 = vector.load %arg2[%c0_107, %c0_108, %c0_109] : memref<5x24x28xf32, #tpu.memory_space<vmem>>, vector<1x24x28xf32>
    %124 = vector.shape_cast %123 : vector<1x24x28xf32> to vector<24x28xf32>
    %cst_110 = arith.constant dense<0.000000e+00> : vector<24x128xf32>
    %125 = tpu.matmul %124, %122, %cst_110 {dimension_numbers = #tpu.dot_dimension_numbers<[1], [0], [0], [1], [0, 0, 1, 1], [], []>} : vector<24x28xf32>, vector<28x128xf32>, vector<24x128xf32> -> vector<24x128xf32>
    %c1_111 = arith.constant 1 : index
    %c0_112 = arith.constant 0 : index
    %c0_113 = arith.constant 0 : index
    %126 = vector.load %arg2[%c1_111, %c0_112, %c0_113] : memref<5x24x28xf32, #tpu.memory_space<vmem>>, vector<1x24x28xf32>
    %127 = vector.shape_cast %126 : vector<1x24x28xf32> to vector<24x28xf32>
    %c127_i32_114 = arith.constant 127 : i32
    %128 = tpu.dynamic_rotate %122 by %c127_i32_114 dim 1 : vector<28x128xf32>, i32 -> vector<28x128xf32>
    %cst_115 = arith.constant dense<0.000000e+00> : vector<24x128xf32>
    %129 = tpu.matmul %127, %128, %cst_115 {dimension_numbers = #tpu.dot_dimension_numbers<[1], [0], [0], [1], [0, 0, 1, 1], [], []>} : vector<24x28xf32>, vector<28x128xf32>, vector<24x128xf32> -> vector<24x128xf32>
    %130 = arith.addf %125, %129 : vector<24x128xf32>
    %c2_116 = arith.constant 2 : index
    %c0_117 = arith.constant 0 : index
    %c0_118 = arith.constant 0 : index
    %131 = vector.load %arg2[%c2_116, %c0_117, %c0_118] : memref<5x24x28xf32, #tpu.memory_space<vmem>>, vector<1x24x28xf32>
    %132 = vector.shape_cast %131 : vector<1x24x28xf32> to vector<24x28xf32>
    %c126_i32_119 = arith.constant 126 : i32
    %133 = tpu.dynamic_rotate %122 by %c126_i32_119 dim 1 : vector<28x128xf32>, i32 -> vector<28x128xf32>
    %cst_120 = arith.constant dense<0.000000e+00> : vector<24x128xf32>
    %134 = tpu.matmul %132, %133, %cst_120 {dimension_numbers = #tpu.dot_dimension_numbers<[1], [0], [0], [1], [0, 0, 1, 1], [], []>} : vector<24x28xf32>, vector<28x128xf32>, vector<24x128xf32> -> vector<24x128xf32>
    %135 = arith.addf %130, %134 : vector<24x128xf32>
    %c3_121 = arith.constant 3 : index
    %c0_122 = arith.constant 0 : index
    %c0_123 = arith.constant 0 : index
    %136 = vector.load %arg2[%c3_121, %c0_122, %c0_123] : memref<5x24x28xf32, #tpu.memory_space<vmem>>, vector<1x24x28xf32>
    %137 = vector.shape_cast %136 : vector<1x24x28xf32> to vector<24x28xf32>
    %c125_i32_124 = arith.constant 125 : i32
    %138 = tpu.dynamic_rotate %122 by %c125_i32_124 dim 1 : vector<28x128xf32>, i32 -> vector<28x128xf32>
    %cst_125 = arith.constant dense<0.000000e+00> : vector<24x128xf32>
    %139 = tpu.matmul %137, %138, %cst_125 {dimension_numbers = #tpu.dot_dimension_numbers<[1], [0], [0], [1], [0, 0, 1, 1], [], []>} : vector<24x28xf32>, vector<28x128xf32>, vector<24x128xf32> -> vector<24x128xf32>
    %140 = arith.addf %135, %139 : vector<24x128xf32>
    %c4_126 = arith.constant 4 : index
    %c0_127 = arith.constant 0 : index
    %c0_128 = arith.constant 0 : index
    %141 = vector.load %arg2[%c4_126, %c0_127, %c0_128] : memref<5x24x28xf32, #tpu.memory_space<vmem>>, vector<1x24x28xf32>
    %142 = vector.shape_cast %141 : vector<1x24x28xf32> to vector<24x28xf32>
    %c124_i32_129 = arith.constant 124 : i32
    %143 = tpu.dynamic_rotate %122 by %c124_i32_129 dim 1 : vector<28x128xf32>, i32 -> vector<28x128xf32>
    %cst_130 = arith.constant dense<0.000000e+00> : vector<24x128xf32>
    %144 = tpu.matmul %142, %143, %cst_130 {dimension_numbers = #tpu.dot_dimension_numbers<[1], [0], [0], [1], [0, 0, 1, 1], [], []>} : vector<24x28xf32>, vector<28x128xf32>, vector<24x128xf32> -> vector<24x128xf32>
    %145 = arith.addf %140, %144 : vector<24x128xf32>
    %c0_131 = arith.constant 0 : index
    %c0_132 = arith.constant 0 : index
    %c0_133 = arith.constant 0 : index
    %146 = vector.load %arg3[%c0_131, %c0_132, %c0_133] : memref<5x72x24xf32, #tpu.memory_space<vmem>>, vector<1x72x24xf32>
    %147 = vector.shape_cast %146 : vector<1x72x24xf32> to vector<72x24xf32>
    %cst_134 = arith.constant dense<0.000000e+00> : vector<72x128xf32>
    %148 = tpu.matmul %147, %145, %cst_134 {dimension_numbers = #tpu.dot_dimension_numbers<[1], [0], [0], [1], [0, 0, 1, 1], [], []>} : vector<72x24xf32>, vector<24x128xf32>, vector<72x128xf32> -> vector<72x128xf32>
    %c1_135 = arith.constant 1 : index
    %c0_136 = arith.constant 0 : index
    %c0_137 = arith.constant 0 : index
    %149 = vector.load %arg3[%c1_135, %c0_136, %c0_137] : memref<5x72x24xf32, #tpu.memory_space<vmem>>, vector<1x72x24xf32>
    %150 = vector.shape_cast %149 : vector<1x72x24xf32> to vector<72x24xf32>
    %c127_i32_138 = arith.constant 127 : i32
    %151 = tpu.dynamic_rotate %145 by %c127_i32_138 dim 1 : vector<24x128xf32>, i32 -> vector<24x128xf32>
    %cst_139 = arith.constant dense<0.000000e+00> : vector<72x128xf32>
    %152 = tpu.matmul %150, %151, %cst_139 {dimension_numbers = #tpu.dot_dimension_numbers<[1], [0], [0], [1], [0, 0, 1, 1], [], []>} : vector<72x24xf32>, vector<24x128xf32>, vector<72x128xf32> -> vector<72x128xf32>
    %153 = arith.addf %148, %152 : vector<72x128xf32>
    %c2_140 = arith.constant 2 : index
    %c0_141 = arith.constant 0 : index
    %c0_142 = arith.constant 0 : index
    %154 = vector.load %arg3[%c2_140, %c0_141, %c0_142] : memref<5x72x24xf32, #tpu.memory_space<vmem>>, vector<1x72x24xf32>
    %155 = vector.shape_cast %154 : vector<1x72x24xf32> to vector<72x24xf32>
    %c126_i32_143 = arith.constant 126 : i32
    %156 = tpu.dynamic_rotate %145 by %c126_i32_143 dim 1 : vector<24x128xf32>, i32 -> vector<24x128xf32>
    %cst_144 = arith.constant dense<0.000000e+00> : vector<72x128xf32>
    %157 = tpu.matmul %155, %156, %cst_144 {dimension_numbers = #tpu.dot_dimension_numbers<[1], [0], [0], [1], [0, 0, 1, 1], [], []>} : vector<72x24xf32>, vector<24x128xf32>, vector<72x128xf32> -> vector<72x128xf32>
    %158 = arith.addf %153, %157 : vector<72x128xf32>
    %c3_145 = arith.constant 3 : index
    %c0_146 = arith.constant 0 : index
    %c0_147 = arith.constant 0 : index
    %159 = vector.load %arg3[%c3_145, %c0_146, %c0_147] : memref<5x72x24xf32, #tpu.memory_space<vmem>>, vector<1x72x24xf32>
    %160 = vector.shape_cast %159 : vector<1x72x24xf32> to vector<72x24xf32>
    %c125_i32_148 = arith.constant 125 : i32
    %161 = tpu.dynamic_rotate %145 by %c125_i32_148 dim 1 : vector<24x128xf32>, i32 -> vector<24x128xf32>
    %cst_149 = arith.constant dense<0.000000e+00> : vector<72x128xf32>
    %162 = tpu.matmul %160, %161, %cst_149 {dimension_numbers = #tpu.dot_dimension_numbers<[1], [0], [0], [1], [0, 0, 1, 1], [], []>} : vector<72x24xf32>, vector<24x128xf32>, vector<72x128xf32> -> vector<72x128xf32>
    %163 = arith.addf %158, %162 : vector<72x128xf32>
    %c4_150 = arith.constant 4 : index
    %c0_151 = arith.constant 0 : index
    %c0_152 = arith.constant 0 : index
    %164 = vector.load %arg3[%c4_150, %c0_151, %c0_152] : memref<5x72x24xf32, #tpu.memory_space<vmem>>, vector<1x72x24xf32>
    %165 = vector.shape_cast %164 : vector<1x72x24xf32> to vector<72x24xf32>
    %c124_i32_153 = arith.constant 124 : i32
    %166 = tpu.dynamic_rotate %145 by %c124_i32_153 dim 1 : vector<24x128xf32>, i32 -> vector<24x128xf32>
    %cst_154 = arith.constant dense<0.000000e+00> : vector<72x128xf32>
    %167 = tpu.matmul %165, %166, %cst_154 {dimension_numbers = #tpu.dot_dimension_numbers<[1], [0], [0], [1], [0, 0, 1, 1], [], []>} : vector<72x24xf32>, vector<24x128xf32>, vector<72x128xf32> -> vector<72x128xf32>
    %168 = arith.addf %163, %167 : vector<72x128xf32>
    %169 = arith.addf %168, %2 : vector<72x128xf32>
    %170 = vector.extract_strided_slice %169 {offsets = [0, 0], sizes = [71, 128], strides = [1, 1]} : vector<72x128xf32> to vector<71x128xf32>
    %171 = vector.extract_strided_slice %169 {offsets = [1, 0], sizes = [71, 128], strides = [1, 1]} : vector<72x128xf32> to vector<71x128xf32>
    %172 = arith.maximumf %170, %171 : vector<71x128xf32>
    %c127_i32_155 = arith.constant 127 : i32
    %173 = tpu.dynamic_rotate %172 by %c127_i32_155 dim 1 : vector<71x128xf32>, i32 -> vector<71x128xf32>
    %174 = arith.maximumf %172, %173 : vector<71x128xf32>
    %cst_156 = arith.constant 0.000000e+00 : f32
    %175 = vector.broadcast %cst_156 : f32 to vector<71x128xf32>
    %176 = arith.maximumf %174, %175 : vector<71x128xf32>
    %cst_157 = arith.constant dense<0.000000e+00> : vector<84x128xf32>
    %177 = tpu.matmul %0, %176, %cst_157 {dimension_numbers = #tpu.dot_dimension_numbers<[1], [0], [0], [1], [0, 0, 1, 1], [], []>} : vector<84x71xf32>, vector<71x128xf32>, vector<84x128xf32> -> vector<84x128xf32>
    %cst_158 = arith.constant dense<0.000000e+00> : vector<84x128xf32>
    %178 = tpu.matmul %177, %1, %cst_158 {dimension_numbers = #tpu.dot_dimension_numbers<[1], [0], [0], [1], [0, 0, 1, 1], [], []>} : vector<84x128xf32>, vector<128x128xf32>, vector<84x128xf32> -> vector<84x128xf32>
    %c0_159 = arith.constant 0 : index
    %c0_160 = arith.constant 0 : index
    %c0_161 = arith.constant 0 : index
    %179 = vector.load %arg7[%c0_159, %c0_160, %c0_161] : memref<5x24x84xf32, #tpu.memory_space<vmem>>, vector<1x24x84xf32>
    %180 = vector.shape_cast %179 : vector<1x24x84xf32> to vector<24x84xf32>
    %cst_162 = arith.constant dense<0.000000e+00> : vector<24x128xf32>
    %181 = tpu.matmul %180, %178, %cst_162 {dimension_numbers = #tpu.dot_dimension_numbers<[1], [0], [0], [1], [0, 0, 1, 1], [], []>} : vector<24x84xf32>, vector<84x128xf32>, vector<24x128xf32> -> vector<24x128xf32>
    %c1_163 = arith.constant 1 : index
    %c0_164 = arith.constant 0 : index
    %c0_165 = arith.constant 0 : index
    %182 = vector.load %arg7[%c1_163, %c0_164, %c0_165] : memref<5x24x84xf32, #tpu.memory_space<vmem>>, vector<1x24x84xf32>
    %183 = vector.shape_cast %182 : vector<1x24x84xf32> to vector<24x84xf32>
    %c127_i32_166 = arith.constant 127 : i32
    %184 = tpu.dynamic_rotate %178 by %c127_i32_166 dim 1 : vector<84x128xf32>, i32 -> vector<84x128xf32>
    %cst_167 = arith.constant dense<0.000000e+00> : vector<24x128xf32>
    %185 = tpu.matmul %183, %184, %cst_167 {dimension_numbers = #tpu.dot_dimension_numbers<[1], [0], [0], [1], [0, 0, 1, 1], [], []>} : vector<24x84xf32>, vector<84x128xf32>, vector<24x128xf32> -> vector<24x128xf32>
    %186 = arith.addf %181, %185 : vector<24x128xf32>
    %c2_168 = arith.constant 2 : index
    %c0_169 = arith.constant 0 : index
    %c0_170 = arith.constant 0 : index
    %187 = vector.load %arg7[%c2_168, %c0_169, %c0_170] : memref<5x24x84xf32, #tpu.memory_space<vmem>>, vector<1x24x84xf32>
    %188 = vector.shape_cast %187 : vector<1x24x84xf32> to vector<24x84xf32>
    %c126_i32_171 = arith.constant 126 : i32
    %189 = tpu.dynamic_rotate %178 by %c126_i32_171 dim 1 : vector<84x128xf32>, i32 -> vector<84x128xf32>
    %cst_172 = arith.constant dense<0.000000e+00> : vector<24x128xf32>
    %190 = tpu.matmul %188, %189, %cst_172 {dimension_numbers = #tpu.dot_dimension_numbers<[1], [0], [0], [1], [0, 0, 1, 1], [], []>} : vector<24x84xf32>, vector<84x128xf32>, vector<24x128xf32> -> vector<24x128xf32>
    %191 = arith.addf %186, %190 : vector<24x128xf32>
    %c3_173 = arith.constant 3 : index
    %c0_174 = arith.constant 0 : index
    %c0_175 = arith.constant 0 : index
    %192 = vector.load %arg7[%c3_173, %c0_174, %c0_175] : memref<5x24x84xf32, #tpu.memory_space<vmem>>, vector<1x24x84xf32>
    %193 = vector.shape_cast %192 : vector<1x24x84xf32> to vector<24x84xf32>
    %c125_i32_176 = arith.constant 125 : i32
    %194 = tpu.dynamic_rotate %178 by %c125_i32_176 dim 1 : vector<84x128xf32>, i32 -> vector<84x128xf32>
    %cst_177 = arith.constant dense<0.000000e+00> : vector<24x128xf32>
    %195 = tpu.matmul %193, %194, %cst_177 {dimension_numbers = #tpu.dot_dimension_numbers<[1], [0], [0], [1], [0, 0, 1, 1], [], []>} : vector<24x84xf32>, vector<84x128xf32>, vector<24x128xf32> -> vector<24x128xf32>
    %196 = arith.addf %191, %195 : vector<24x128xf32>
    %c4_178 = arith.constant 4 : index
    %c0_179 = arith.constant 0 : index
    %c0_180 = arith.constant 0 : index
    %197 = vector.load %arg7[%c4_178, %c0_179, %c0_180] : memref<5x24x84xf32, #tpu.memory_space<vmem>>, vector<1x24x84xf32>
    %198 = vector.shape_cast %197 : vector<1x24x84xf32> to vector<24x84xf32>
    %c124_i32_181 = arith.constant 124 : i32
    %199 = tpu.dynamic_rotate %178 by %c124_i32_181 dim 1 : vector<84x128xf32>, i32 -> vector<84x128xf32>
    %cst_182 = arith.constant dense<0.000000e+00> : vector<24x128xf32>
    %200 = tpu.matmul %198, %199, %cst_182 {dimension_numbers = #tpu.dot_dimension_numbers<[1], [0], [0], [1], [0, 0, 1, 1], [], []>} : vector<24x84xf32>, vector<84x128xf32>, vector<24x128xf32> -> vector<24x128xf32>
    %201 = arith.addf %196, %200 : vector<24x128xf32>
    %cst_183 = arith.constant 0.000000e+00 : f32
    %202 = vector.broadcast %cst_183 : f32 to vector<24x128xf32>
    %203 = arith.maximumf %201, %202 : vector<24x128xf32>
    %c0_184 = arith.constant 0 : index
    %c0_185 = arith.constant 0 : index
    %c0_186 = arith.constant 0 : index
    %204 = vector.load %arg8[%c0_184, %c0_185, %c0_186] : memref<5x28x24xf32, #tpu.memory_space<vmem>>, vector<1x28x24xf32>
    %205 = vector.shape_cast %204 : vector<1x28x24xf32> to vector<28x24xf32>
    %c4_i32_187 = arith.constant 4 : i32
    %206 = tpu.dynamic_rotate %203 by %c4_i32_187 dim 1 : vector<24x128xf32>, i32 -> vector<24x128xf32>
    %cst_188 = arith.constant dense<0.000000e+00> : vector<28x128xf32>
    %207 = tpu.matmul %205, %206, %cst_188 {dimension_numbers = #tpu.dot_dimension_numbers<[1], [0], [0], [1], [0, 0, 1, 1], [], []>} : vector<28x24xf32>, vector<24x128xf32>, vector<28x128xf32> -> vector<28x128xf32>
    %c1_189 = arith.constant 1 : index
    %c0_190 = arith.constant 0 : index
    %c0_191 = arith.constant 0 : index
    %208 = vector.load %arg8[%c1_189, %c0_190, %c0_191] : memref<5x28x24xf32, #tpu.memory_space<vmem>>, vector<1x28x24xf32>
    %209 = vector.shape_cast %208 : vector<1x28x24xf32> to vector<28x24xf32>
    %c3_i32_192 = arith.constant 3 : i32
    %210 = tpu.dynamic_rotate %203 by %c3_i32_192 dim 1 : vector<24x128xf32>, i32 -> vector<24x128xf32>
    %cst_193 = arith.constant dense<0.000000e+00> : vector<28x128xf32>
    %211 = tpu.matmul %209, %210, %cst_193 {dimension_numbers = #tpu.dot_dimension_numbers<[1], [0], [0], [1], [0, 0, 1, 1], [], []>} : vector<28x24xf32>, vector<24x128xf32>, vector<28x128xf32> -> vector<28x128xf32>
    %212 = arith.addf %207, %211 : vector<28x128xf32>
    %c2_194 = arith.constant 2 : index
    %c0_195 = arith.constant 0 : index
    %c0_196 = arith.constant 0 : index
    %213 = vector.load %arg8[%c2_194, %c0_195, %c0_196] : memref<5x28x24xf32, #tpu.memory_space<vmem>>, vector<1x28x24xf32>
    %214 = vector.shape_cast %213 : vector<1x28x24xf32> to vector<28x24xf32>
    %c2_i32_197 = arith.constant 2 : i32
    %215 = tpu.dynamic_rotate %203 by %c2_i32_197 dim 1 : vector<24x128xf32>, i32 -> vector<24x128xf32>
    %cst_198 = arith.constant dense<0.000000e+00> : vector<28x128xf32>
    %216 = tpu.matmul %214, %215, %cst_198 {dimension_numbers = #tpu.dot_dimension_numbers<[1], [0], [0], [1], [0, 0, 1, 1], [], []>} : vector<28x24xf32>, vector<24x128xf32>, vector<28x128xf32> -> vector<28x128xf32>
    %217 = arith.addf %212, %216 : vector<28x128xf32>
    %c3_199 = arith.constant 3 : index
    %c0_200 = arith.constant 0 : index
    %c0_201 = arith.constant 0 : index
    %218 = vector.load %arg8[%c3_199, %c0_200, %c0_201] : memref<5x28x24xf32, #tpu.memory_space<vmem>>, vector<1x28x24xf32>
    %219 = vector.shape_cast %218 : vector<1x28x24xf32> to vector<28x24xf32>
    %c1_i32_202 = arith.constant 1 : i32
    %220 = tpu.dynamic_rotate %203 by %c1_i32_202 dim 1 : vector<24x128xf32>, i32 -> vector<24x128xf32>
    %cst_203 = arith.constant dense<0.000000e+00> : vector<28x128xf32>
    %221 = tpu.matmul %219, %220, %cst_203 {dimension_numbers = #tpu.dot_dimension_numbers<[1], [0], [0], [1], [0, 0, 1, 1], [], []>} : vector<28x24xf32>, vector<24x128xf32>, vector<28x128xf32> -> vector<28x128xf32>
    %222 = arith.addf %217, %221 : vector<28x128xf32>
    %c4_204 = arith.constant 4 : index
    %c0_205 = arith.constant 0 : index
    %c0_206 = arith.constant 0 : index
    %223 = vector.load %arg8[%c4_204, %c0_205, %c0_206] : memref<5x28x24xf32, #tpu.memory_space<vmem>>, vector<1x28x24xf32>
    %224 = vector.shape_cast %223 : vector<1x28x24xf32> to vector<28x24xf32>
    %cst_207 = arith.constant dense<0.000000e+00> : vector<28x128xf32>
    %225 = tpu.matmul %224, %203, %cst_207 {dimension_numbers = #tpu.dot_dimension_numbers<[1], [0], [0], [1], [0, 0, 1, 1], [], []>} : vector<28x24xf32>, vector<24x128xf32>, vector<28x128xf32> -> vector<28x128xf32>
    %226 = arith.addf %222, %225 : vector<28x128xf32>
    %227 = vector.extract_strided_slice %226 {offsets = [0, 0], sizes = [27, 128], strides = [1, 1]} : vector<28x128xf32> to vector<27x128xf32>
    %228 = vector.extract_strided_slice %226 {offsets = [1, 0], sizes = [27, 128], strides = [1, 1]} : vector<28x128xf32> to vector<27x128xf32>
    %229 = arith.maximumf %227, %228 : vector<27x128xf32>
    %c127_i32_208 = arith.constant 127 : i32
    %230 = tpu.dynamic_rotate %229 by %c127_i32_208 dim 1 : vector<27x128xf32>, i32 -> vector<27x128xf32>
    %231 = arith.maximumf %229, %230 : vector<27x128xf32>
    %cst_209 = arith.constant dense<0.000000e+00> : vector<14x128xf32>
    %232 = tpu.matmul %3, %231, %cst_209 {dimension_numbers = #tpu.dot_dimension_numbers<[1], [0], [0], [1], [0, 0, 1, 1], [], []>} : vector<14x27xf32>, vector<27x128xf32>, vector<14x128xf32> -> vector<14x128xf32>
    %cst_210 = arith.constant 0.000000e+00 : f32
    %233 = vector.broadcast %cst_210 : f32 to vector<14x128xf32>
    %234 = arith.maximumf %232, %233 : vector<14x128xf32>
    %c1_211 = arith.constant 1 : index
    %c0_212 = arith.constant 0 : index
    %c0_213 = arith.constant 0 : index
    %235 = vector.load %arg10[%c1_211, %c0_212, %c0_213] : memref<4x14x128xf32, #tpu.memory_space<vmem>>, vector<1x14x128xf32>
    %236 = vector.shape_cast %235 : vector<1x14x128xf32> to vector<14x128xf32>
    %237 = vector.shape_cast %234 : vector<14x128xf32> to vector<1x14x128xf32>
    tpu.vector_store %arg10[%c1_211, %c0_212, %c0_213], %237 {strides = array<i32>} : memref<4x14x128xf32, #tpu.memory_space<vmem>>, vector<1x14x128xf32>,
    %c2_214 = arith.constant 2 : index
    %c0_215 = arith.constant 0 : index
    %c0_216 = arith.constant 0 : index
    %238 = vector.load %arg1[%c2_214, %c0_215, %c0_216] : memref<4x28x128xf32, #tpu.memory_space<vmem>>, vector<1x28x128xf32>
    %239 = vector.shape_cast %238 : vector<1x28x128xf32> to vector<28x128xf32>
    %c0_217 = arith.constant 0 : index
    %c0_218 = arith.constant 0 : index
    %c0_219 = arith.constant 0 : index
    %240 = vector.load %arg2[%c0_217, %c0_218, %c0_219] : memref<5x24x28xf32, #tpu.memory_space<vmem>>, vector<1x24x28xf32>
    %241 = vector.shape_cast %240 : vector<1x24x28xf32> to vector<24x28xf32>
    %cst_220 = arith.constant dense<0.000000e+00> : vector<24x128xf32>
    %242 = tpu.matmul %241, %239, %cst_220 {dimension_numbers = #tpu.dot_dimension_numbers<[1], [0], [0], [1], [0, 0, 1, 1], [], []>} : vector<24x28xf32>, vector<28x128xf32>, vector<24x128xf32> -> vector<24x128xf32>
    %c1_221 = arith.constant 1 : index
    %c0_222 = arith.constant 0 : index
    %c0_223 = arith.constant 0 : index
    %243 = vector.load %arg2[%c1_221, %c0_222, %c0_223] : memref<5x24x28xf32, #tpu.memory_space<vmem>>, vector<1x24x28xf32>
    %244 = vector.shape_cast %243 : vector<1x24x28xf32> to vector<24x28xf32>
    %c127_i32_224 = arith.constant 127 : i32
    %245 = tpu.dynamic_rotate %239 by %c127_i32_224 dim 1 : vector<28x128xf32>, i32 -> vector<28x128xf32>
    %cst_225 = arith.constant dense<0.000000e+00> : vector<24x128xf32>
    %246 = tpu.matmul %244, %245, %cst_225 {dimension_numbers = #tpu.dot_dimension_numbers<[1], [0], [0], [1], [0, 0, 1, 1], [], []>} : vector<24x28xf32>, vector<28x128xf32>, vector<24x128xf32> -> vector<24x128xf32>
    %247 = arith.addf %242, %246 : vector<24x128xf32>
    %c2_226 = arith.constant 2 : index
    %c0_227 = arith.constant 0 : index
    %c0_228 = arith.constant 0 : index
    %248 = vector.load %arg2[%c2_226, %c0_227, %c0_228] : memref<5x24x28xf32, #tpu.memory_space<vmem>>, vector<1x24x28xf32>
    %249 = vector.shape_cast %248 : vector<1x24x28xf32> to vector<24x28xf32>
    %c126_i32_229 = arith.constant 126 : i32
    %250 = tpu.dynamic_rotate %239 by %c126_i32_229 dim 1 : vector<28x128xf32>, i32 -> vector<28x128xf32>
    %cst_230 = arith.constant dense<0.000000e+00> : vector<24x128xf32>
    %251 = tpu.matmul %249, %250, %cst_230 {dimension_numbers = #tpu.dot_dimension_numbers<[1], [0], [0], [1], [0, 0, 1, 1], [], []>} : vector<24x28xf32>, vector<28x128xf32>, vector<24x128xf32> -> vector<24x128xf32>
    %252 = arith.addf %247, %251 : vector<24x128xf32>
    %c3_231 = arith.constant 3 : index
    %c0_232 = arith.constant 0 : index
    %c0_233 = arith.constant 0 : index
    %253 = vector.load %arg2[%c3_231, %c0_232, %c0_233] : memref<5x24x28xf32, #tpu.memory_space<vmem>>, vector<1x24x28xf32>
    %254 = vector.shape_cast %253 : vector<1x24x28xf32> to vector<24x28xf32>
    %c125_i32_234 = arith.constant 125 : i32
    %255 = tpu.dynamic_rotate %239 by %c125_i32_234 dim 1 : vector<28x128xf32>, i32 -> vector<28x128xf32>
    %cst_235 = arith.constant dense<0.000000e+00> : vector<24x128xf32>
    %256 = tpu.matmul %254, %255, %cst_235 {dimension_numbers = #tpu.dot_dimension_numbers<[1], [0], [0], [1], [0, 0, 1, 1], [], []>} : vector<24x28xf32>, vector<28x128xf32>, vector<24x128xf32> -> vector<24x128xf32>
    %257 = arith.addf %252, %256 : vector<24x128xf32>
    %c4_236 = arith.constant 4 : index
    %c0_237 = arith.constant 0 : index
    %c0_238 = arith.constant 0 : index
    %258 = vector.load %arg2[%c4_236, %c0_237, %c0_238] : memref<5x24x28xf32, #tpu.memory_space<vmem>>, vector<1x24x28xf32>
    %259 = vector.shape_cast %258 : vector<1x24x28xf32> to vector<24x28xf32>
    %c124_i32_239 = arith.constant 124 : i32
    %260 = tpu.dynamic_rotate %239 by %c124_i32_239 dim 1 : vector<28x128xf32>, i32 -> vector<28x128xf32>
    %cst_240 = arith.constant dense<0.000000e+00> : vector<24x128xf32>
    %261 = tpu.matmul %259, %260, %cst_240 {dimension_numbers = #tpu.dot_dimension_numbers<[1], [0], [0], [1], [0, 0, 1, 1], [], []>} : vector<24x28xf32>, vector<28x128xf32>, vector<24x128xf32> -> vector<24x128xf32>
    %262 = arith.addf %257, %261 : vector<24x128xf32>
    %c0_241 = arith.constant 0 : index
    %c0_242 = arith.constant 0 : index
    %c0_243 = arith.constant 0 : index
    %263 = vector.load %arg3[%c0_241, %c0_242, %c0_243] : memref<5x72x24xf32, #tpu.memory_space<vmem>>, vector<1x72x24xf32>
    %264 = vector.shape_cast %263 : vector<1x72x24xf32> to vector<72x24xf32>
    %cst_244 = arith.constant dense<0.000000e+00> : vector<72x128xf32>
    %265 = tpu.matmul %264, %262, %cst_244 {dimension_numbers = #tpu.dot_dimension_numbers<[1], [0], [0], [1], [0, 0, 1, 1], [], []>} : vector<72x24xf32>, vector<24x128xf32>, vector<72x128xf32> -> vector<72x128xf32>
    %c1_245 = arith.constant 1 : index
    %c0_246 = arith.constant 0 : index
    %c0_247 = arith.constant 0 : index
    %266 = vector.load %arg3[%c1_245, %c0_246, %c0_247] : memref<5x72x24xf32, #tpu.memory_space<vmem>>, vector<1x72x24xf32>
    %267 = vector.shape_cast %266 : vector<1x72x24xf32> to vector<72x24xf32>
    %c127_i32_248 = arith.constant 127 : i32
    %268 = tpu.dynamic_rotate %262 by %c127_i32_248 dim 1 : vector<24x128xf32>, i32 -> vector<24x128xf32>
    %cst_249 = arith.constant dense<0.000000e+00> : vector<72x128xf32>
    %269 = tpu.matmul %267, %268, %cst_249 {dimension_numbers = #tpu.dot_dimension_numbers<[1], [0], [0], [1], [0, 0, 1, 1], [], []>} : vector<72x24xf32>, vector<24x128xf32>, vector<72x128xf32> -> vector<72x128xf32>
    %270 = arith.addf %265, %269 : vector<72x128xf32>
    %c2_250 = arith.constant 2 : index
    %c0_251 = arith.constant 0 : index
    %c0_252 = arith.constant 0 : index
    %271 = vector.load %arg3[%c2_250, %c0_251, %c0_252] : memref<5x72x24xf32, #tpu.memory_space<vmem>>, vector<1x72x24xf32>
    %272 = vector.shape_cast %271 : vector<1x72x24xf32> to vector<72x24xf32>
    %c126_i32_253 = arith.constant 126 : i32
    %273 = tpu.dynamic_rotate %262 by %c126_i32_253 dim 1 : vector<24x128xf32>, i32 -> vector<24x128xf32>
    %cst_254 = arith.constant dense<0.000000e+00> : vector<72x128xf32>
    %274 = tpu.matmul %272, %273, %cst_254 {dimension_numbers = #tpu.dot_dimension_numbers<[1], [0], [0], [1], [0, 0, 1, 1], [], []>} : vector<72x24xf32>, vector<24x128xf32>, vector<72x128xf32> -> vector<72x128xf32>
    %275 = arith.addf %270, %274 : vector<72x128xf32>
    %c3_255 = arith.constant 3 : index
    %c0_256 = arith.constant 0 : index
    %c0_257 = arith.constant 0 : index
    %276 = vector.load %arg3[%c3_255, %c0_256, %c0_257] : memref<5x72x24xf32, #tpu.memory_space<vmem>>, vector<1x72x24xf32>
    %277 = vector.shape_cast %276 : vector<1x72x24xf32> to vector<72x24xf32>
    %c125_i32_258 = arith.constant 125 : i32
    %278 = tpu.dynamic_rotate %262 by %c125_i32_258 dim 1 : vector<24x128xf32>, i32 -> vector<24x128xf32>
    %cst_259 = arith.constant dense<0.000000e+00> : vector<72x128xf32>
    %279 = tpu.matmul %277, %278, %cst_259 {dimension_numbers = #tpu.dot_dimension_numbers<[1], [0], [0], [1], [0, 0, 1, 1], [], []>} : vector<72x24xf32>, vector<24x128xf32>, vector<72x128xf32> -> vector<72x128xf32>
    %280 = arith.addf %275, %279 : vector<72x128xf32>
    %c4_260 = arith.constant 4 : index
    %c0_261 = arith.constant 0 : index
    %c0_262 = arith.constant 0 : index
    %281 = vector.load %arg3[%c4_260, %c0_261, %c0_262] : memref<5x72x24xf32, #tpu.memory_space<vmem>>, vector<1x72x24xf32>
    %282 = vector.shape_cast %281 : vector<1x72x24xf32> to vector<72x24xf32>
    %c124_i32_263 = arith.constant 124 : i32
    %283 = tpu.dynamic_rotate %262 by %c124_i32_263 dim 1 : vector<24x128xf32>, i32 -> vector<24x128xf32>
    %cst_264 = arith.constant dense<0.000000e+00> : vector<72x128xf32>
    %284 = tpu.matmul %282, %283, %cst_264 {dimension_numbers = #tpu.dot_dimension_numbers<[1], [0], [0], [1], [0, 0, 1, 1], [], []>} : vector<72x24xf32>, vector<24x128xf32>, vector<72x128xf32> -> vector<72x128xf32>
    %285 = arith.addf %280, %284 : vector<72x128xf32>
    %286 = arith.addf %285, %2 : vector<72x128xf32>
    %287 = vector.extract_strided_slice %286 {offsets = [0, 0], sizes = [71, 128], strides = [1, 1]} : vector<72x128xf32> to vector<71x128xf32>
    %288 = vector.extract_strided_slice %286 {offsets = [1, 0], sizes = [71, 128], strides = [1, 1]} : vector<72x128xf32> to vector<71x128xf32>
    %289 = arith.maximumf %287, %288 : vector<71x128xf32>
    %c127_i32_265 = arith.constant 127 : i32
    %290 = tpu.dynamic_rotate %289 by %c127_i32_265 dim 1 : vector<71x128xf32>, i32 -> vector<71x128xf32>
    %291 = arith.maximumf %289, %290 : vector<71x128xf32>
    %cst_266 = arith.constant 0.000000e+00 : f32
    %292 = vector.broadcast %cst_266 : f32 to vector<71x128xf32>
    %293 = arith.maximumf %291, %292 : vector<71x128xf32>
    %cst_267 = arith.constant dense<0.000000e+00> : vector<84x128xf32>
    %294 = tpu.matmul %0, %293, %cst_267 {dimension_numbers = #tpu.dot_dimension_numbers<[1], [0], [0], [1], [0, 0, 1, 1], [], []>} : vector<84x71xf32>, vector<71x128xf32>, vector<84x128xf32> -> vector<84x128xf32>
    %cst_268 = arith.constant dense<0.000000e+00> : vector<84x128xf32>
    %295 = tpu.matmul %294, %1, %cst_268 {dimension_numbers = #tpu.dot_dimension_numbers<[1], [0], [0], [1], [0, 0, 1, 1], [], []>} : vector<84x128xf32>, vector<128x128xf32>, vector<84x128xf32> -> vector<84x128xf32>
    %c0_269 = arith.constant 0 : index
    %c0_270 = arith.constant 0 : index
    %c0_271 = arith.constant 0 : index
    %296 = vector.load %arg7[%c0_269, %c0_270, %c0_271] : memref<5x24x84xf32, #tpu.memory_space<vmem>>, vector<1x24x84xf32>
    %297 = vector.shape_cast %296 : vector<1x24x84xf32> to vector<24x84xf32>
    %cst_272 = arith.constant dense<0.000000e+00> : vector<24x128xf32>
    %298 = tpu.matmul %297, %295, %cst_272 {dimension_numbers = #tpu.dot_dimension_numbers<[1], [0], [0], [1], [0, 0, 1, 1], [], []>} : vector<24x84xf32>, vector<84x128xf32>, vector<24x128xf32> -> vector<24x128xf32>
    %c1_273 = arith.constant 1 : index
    %c0_274 = arith.constant 0 : index
    %c0_275 = arith.constant 0 : index
    %299 = vector.load %arg7[%c1_273, %c0_274, %c0_275] : memref<5x24x84xf32, #tpu.memory_space<vmem>>, vector<1x24x84xf32>
    %300 = vector.shape_cast %299 : vector<1x24x84xf32> to vector<24x84xf32>
    %c127_i32_276 = arith.constant 127 : i32
    %301 = tpu.dynamic_rotate %295 by %c127_i32_276 dim 1 : vector<84x128xf32>, i32 -> vector<84x128xf32>
    %cst_277 = arith.constant dense<0.000000e+00> : vector<24x128xf32>
    %302 = tpu.matmul %300, %301, %cst_277 {dimension_numbers = #tpu.dot_dimension_numbers<[1], [0], [0], [1], [0, 0, 1, 1], [], []>} : vector<24x84xf32>, vector<84x128xf32>, vector<24x128xf32> -> vector<24x128xf32>
    %303 = arith.addf %298, %302 : vector<24x128xf32>
    %c2_278 = arith.constant 2 : index
    %c0_279 = arith.constant 0 : index
    %c0_280 = arith.constant 0 : index
    %304 = vector.load %arg7[%c2_278, %c0_279, %c0_280] : memref<5x24x84xf32, #tpu.memory_space<vmem>>, vector<1x24x84xf32>
    %305 = vector.shape_cast %304 : vector<1x24x84xf32> to vector<24x84xf32>
    %c126_i32_281 = arith.constant 126 : i32
    %306 = tpu.dynamic_rotate %295 by %c126_i32_281 dim 1 : vector<84x128xf32>, i32 -> vector<84x128xf32>
    %cst_282 = arith.constant dense<0.000000e+00> : vector<24x128xf32>
    %307 = tpu.matmul %305, %306, %cst_282 {dimension_numbers = #tpu.dot_dimension_numbers<[1], [0], [0], [1], [0, 0, 1, 1], [], []>} : vector<24x84xf32>, vector<84x128xf32>, vector<24x128xf32> -> vector<24x128xf32>
    %308 = arith.addf %303, %307 : vector<24x128xf32>
    %c3_283 = arith.constant 3 : index
    %c0_284 = arith.constant 0 : index
    %c0_285 = arith.constant 0 : index
    %309 = vector.load %arg7[%c3_283, %c0_284, %c0_285] : memref<5x24x84xf32, #tpu.memory_space<vmem>>, vector<1x24x84xf32>
    %310 = vector.shape_cast %309 : vector<1x24x84xf32> to vector<24x84xf32>
    %c125_i32_286 = arith.constant 125 : i32
    %311 = tpu.dynamic_rotate %295 by %c125_i32_286 dim 1 : vector<84x128xf32>, i32 -> vector<84x128xf32>
    %cst_287 = arith.constant dense<0.000000e+00> : vector<24x128xf32>
    %312 = tpu.matmul %310, %311, %cst_287 {dimension_numbers = #tpu.dot_dimension_numbers<[1], [0], [0], [1], [0, 0, 1, 1], [], []>} : vector<24x84xf32>, vector<84x128xf32>, vector<24x128xf32> -> vector<24x128xf32>
    %313 = arith.addf %308, %312 : vector<24x128xf32>
    %c4_288 = arith.constant 4 : index
    %c0_289 = arith.constant 0 : index
    %c0_290 = arith.constant 0 : index
    %314 = vector.load %arg7[%c4_288, %c0_289, %c0_290] : memref<5x24x84xf32, #tpu.memory_space<vmem>>, vector<1x24x84xf32>
    %315 = vector.shape_cast %314 : vector<1x24x84xf32> to vector<24x84xf32>
    %c124_i32_291 = arith.constant 124 : i32
    %316 = tpu.dynamic_rotate %295 by %c124_i32_291 dim 1 : vector<84x128xf32>, i32 -> vector<84x128xf32>
    %cst_292 = arith.constant dense<0.000000e+00> : vector<24x128xf32>
    %317 = tpu.matmul %315, %316, %cst_292 {dimension_numbers = #tpu.dot_dimension_numbers<[1], [0], [0], [1], [0, 0, 1, 1], [], []>} : vector<24x84xf32>, vector<84x128xf32>, vector<24x128xf32> -> vector<24x128xf32>
    %318 = arith.addf %313, %317 : vector<24x128xf32>
    %cst_293 = arith.constant 0.000000e+00 : f32
    %319 = vector.broadcast %cst_293 : f32 to vector<24x128xf32>
    %320 = arith.maximumf %318, %319 : vector<24x128xf32>
    %c0_294 = arith.constant 0 : index
    %c0_295 = arith.constant 0 : index
    %c0_296 = arith.constant 0 : index
    %321 = vector.load %arg8[%c0_294, %c0_295, %c0_296] : memref<5x28x24xf32, #tpu.memory_space<vmem>>, vector<1x28x24xf32>
    %322 = vector.shape_cast %321 : vector<1x28x24xf32> to vector<28x24xf32>
    %c4_i32_297 = arith.constant 4 : i32
    %323 = tpu.dynamic_rotate %320 by %c4_i32_297 dim 1 : vector<24x128xf32>, i32 -> vector<24x128xf32>
    %cst_298 = arith.constant dense<0.000000e+00> : vector<28x128xf32>
    %324 = tpu.matmul %322, %323, %cst_298 {dimension_numbers = #tpu.dot_dimension_numbers<[1], [0], [0], [1], [0, 0, 1, 1], [], []>} : vector<28x24xf32>, vector<24x128xf32>, vector<28x128xf32> -> vector<28x128xf32>
    %c1_299 = arith.constant 1 : index
    %c0_300 = arith.constant 0 : index
    %c0_301 = arith.constant 0 : index
    %325 = vector.load %arg8[%c1_299, %c0_300, %c0_301] : memref<5x28x24xf32, #tpu.memory_space<vmem>>, vector<1x28x24xf32>
    %326 = vector.shape_cast %325 : vector<1x28x24xf32> to vector<28x24xf32>
    %c3_i32_302 = arith.constant 3 : i32
    %327 = tpu.dynamic_rotate %320 by %c3_i32_302 dim 1 : vector<24x128xf32>, i32 -> vector<24x128xf32>
    %cst_303 = arith.constant dense<0.000000e+00> : vector<28x128xf32>
    %328 = tpu.matmul %326, %327, %cst_303 {dimension_numbers = #tpu.dot_dimension_numbers<[1], [0], [0], [1], [0, 0, 1, 1], [], []>} : vector<28x24xf32>, vector<24x128xf32>, vector<28x128xf32> -> vector<28x128xf32>
    %329 = arith.addf %324, %328 : vector<28x128xf32>
    %c2_304 = arith.constant 2 : index
    %c0_305 = arith.constant 0 : index
    %c0_306 = arith.constant 0 : index
    %330 = vector.load %arg8[%c2_304, %c0_305, %c0_306] : memref<5x28x24xf32, #tpu.memory_space<vmem>>, vector<1x28x24xf32>
    %331 = vector.shape_cast %330 : vector<1x28x24xf32> to vector<28x24xf32>
    %c2_i32_307 = arith.constant 2 : i32
    %332 = tpu.dynamic_rotate %320 by %c2_i32_307 dim 1 : vector<24x128xf32>, i32 -> vector<24x128xf32>
    %cst_308 = arith.constant dense<0.000000e+00> : vector<28x128xf32>
    %333 = tpu.matmul %331, %332, %cst_308 {dimension_numbers = #tpu.dot_dimension_numbers<[1], [0], [0], [1], [0, 0, 1, 1], [], []>} : vector<28x24xf32>, vector<24x128xf32>, vector<28x128xf32> -> vector<28x128xf32>
    %334 = arith.addf %329, %333 : vector<28x128xf32>
    %c3_309 = arith.constant 3 : index
    %c0_310 = arith.constant 0 : index
    %c0_311 = arith.constant 0 : index
    %335 = vector.load %arg8[%c3_309, %c0_310, %c0_311] : memref<5x28x24xf32, #tpu.memory_space<vmem>>, vector<1x28x24xf32>
    %336 = vector.shape_cast %335 : vector<1x28x24xf32> to vector<28x24xf32>
    %c1_i32_312 = arith.constant 1 : i32
    %337 = tpu.dynamic_rotate %320 by %c1_i32_312 dim 1 : vector<24x128xf32>, i32 -> vector<24x128xf32>
    %cst_313 = arith.constant dense<0.000000e+00> : vector<28x128xf32>
    %338 = tpu.matmul %336, %337, %cst_313 {dimension_numbers = #tpu.dot_dimension_numbers<[1], [0], [0], [1], [0, 0, 1, 1], [], []>} : vector<28x24xf32>, vector<24x128xf32>, vector<28x128xf32> -> vector<28x128xf32>
    %339 = arith.addf %334, %338 : vector<28x128xf32>
    %c4_314 = arith.constant 4 : index
    %c0_315 = arith.constant 0 : index
    %c0_316 = arith.constant 0 : index
    %340 = vector.load %arg8[%c4_314, %c0_315, %c0_316] : memref<5x28x24xf32, #tpu.memory_space<vmem>>, vector<1x28x24xf32>
    %341 = vector.shape_cast %340 : vector<1x28x24xf32> to vector<28x24xf32>
    %cst_317 = arith.constant dense<0.000000e+00> : vector<28x128xf32>
    %342 = tpu.matmul %341, %320, %cst_317 {dimension_numbers = #tpu.dot_dimension_numbers<[1], [0], [0], [1], [0, 0, 1, 1], [], []>} : vector<28x24xf32>, vector<24x128xf32>, vector<28x128xf32> -> vector<28x128xf32>
    %343 = arith.addf %339, %342 : vector<28x128xf32>
    %344 = vector.extract_strided_slice %343 {offsets = [0, 0], sizes = [27, 128], strides = [1, 1]} : vector<28x128xf32> to vector<27x128xf32>
    %345 = vector.extract_strided_slice %343 {offsets = [1, 0], sizes = [27, 128], strides = [1, 1]} : vector<28x128xf32> to vector<27x128xf32>
    %346 = arith.maximumf %344, %345 : vector<27x128xf32>
    %c127_i32_318 = arith.constant 127 : i32
    %347 = tpu.dynamic_rotate %346 by %c127_i32_318 dim 1 : vector<27x128xf32>, i32 -> vector<27x128xf32>
    %348 = arith.maximumf %346, %347 : vector<27x128xf32>
    %cst_319 = arith.constant dense<0.000000e+00> : vector<14x128xf32>
    %349 = tpu.matmul %3, %348, %cst_319 {dimension_numbers = #tpu.dot_dimension_numbers<[1], [0], [0], [1], [0, 0, 1, 1], [], []>} : vector<14x27xf32>, vector<27x128xf32>, vector<14x128xf32> -> vector<14x128xf32>
    %cst_320 = arith.constant 0.000000e+00 : f32
    %350 = vector.broadcast %cst_320 : f32 to vector<14x128xf32>
    %351 = arith.maximumf %349, %350 : vector<14x128xf32>
    %c2_321 = arith.constant 2 : index
    %c0_322 = arith.constant 0 : index
    %c0_323 = arith.constant 0 : index
    %352 = vector.load %arg10[%c2_321, %c0_322, %c0_323] : memref<4x14x128xf32, #tpu.memory_space<vmem>>, vector<1x14x128xf32>
    %353 = vector.shape_cast %352 : vector<1x14x128xf32> to vector<14x128xf32>
    %354 = vector.shape_cast %351 : vector<14x128xf32> to vector<1x14x128xf32>
    tpu.vector_store %arg10[%c2_321, %c0_322, %c0_323], %354 {strides = array<i32>} : memref<4x14x128xf32, #tpu.memory_space<vmem>>, vector<1x14x128xf32>,
    %c3_324 = arith.constant 3 : index
    %c0_325 = arith.constant 0 : index
    %c0_326 = arith.constant 0 : index
    %355 = vector.load %arg1[%c3_324, %c0_325, %c0_326] : memref<4x28x128xf32, #tpu.memory_space<vmem>>, vector<1x28x128xf32>
    %356 = vector.shape_cast %355 : vector<1x28x128xf32> to vector<28x128xf32>
    %c0_327 = arith.constant 0 : index
    %c0_328 = arith.constant 0 : index
    %c0_329 = arith.constant 0 : index
    %357 = vector.load %arg2[%c0_327, %c0_328, %c0_329] : memref<5x24x28xf32, #tpu.memory_space<vmem>>, vector<1x24x28xf32>
    %358 = vector.shape_cast %357 : vector<1x24x28xf32> to vector<24x28xf32>
    %cst_330 = arith.constant dense<0.000000e+00> : vector<24x128xf32>
    %359 = tpu.matmul %358, %356, %cst_330 {dimension_numbers = #tpu.dot_dimension_numbers<[1], [0], [0], [1], [0, 0, 1, 1], [], []>} : vector<24x28xf32>, vector<28x128xf32>, vector<24x128xf32> -> vector<24x128xf32>
    %c1_331 = arith.constant 1 : index
    %c0_332 = arith.constant 0 : index
    %c0_333 = arith.constant 0 : index
    %360 = vector.load %arg2[%c1_331, %c0_332, %c0_333] : memref<5x24x28xf32, #tpu.memory_space<vmem>>, vector<1x24x28xf32>
    %361 = vector.shape_cast %360 : vector<1x24x28xf32> to vector<24x28xf32>
    %c127_i32_334 = arith.constant 127 : i32
    %362 = tpu.dynamic_rotate %356 by %c127_i32_334 dim 1 : vector<28x128xf32>, i32 -> vector<28x128xf32>
    %cst_335 = arith.constant dense<0.000000e+00> : vector<24x128xf32>
    %363 = tpu.matmul %361, %362, %cst_335 {dimension_numbers = #tpu.dot_dimension_numbers<[1], [0], [0], [1], [0, 0, 1, 1], [], []>} : vector<24x28xf32>, vector<28x128xf32>, vector<24x128xf32> -> vector<24x128xf32>
    %364 = arith.addf %359, %363 : vector<24x128xf32>
    %c2_336 = arith.constant 2 : index
    %c0_337 = arith.constant 0 : index
    %c0_338 = arith.constant 0 : index
    %365 = vector.load %arg2[%c2_336, %c0_337, %c0_338] : memref<5x24x28xf32, #tpu.memory_space<vmem>>, vector<1x24x28xf32>
    %366 = vector.shape_cast %365 : vector<1x24x28xf32> to vector<24x28xf32>
    %c126_i32_339 = arith.constant 126 : i32
    %367 = tpu.dynamic_rotate %356 by %c126_i32_339 dim 1 : vector<28x128xf32>, i32 -> vector<28x128xf32>
    %cst_340 = arith.constant dense<0.000000e+00> : vector<24x128xf32>
    %368 = tpu.matmul %366, %367, %cst_340 {dimension_numbers = #tpu.dot_dimension_numbers<[1], [0], [0], [1], [0, 0, 1, 1], [], []>} : vector<24x28xf32>, vector<28x128xf32>, vector<24x128xf32> -> vector<24x128xf32>
    %369 = arith.addf %364, %368 : vector<24x128xf32>
    %c3_341 = arith.constant 3 : index
    %c0_342 = arith.constant 0 : index
    %c0_343 = arith.constant 0 : index
    %370 = vector.load %arg2[%c3_341, %c0_342, %c0_343] : memref<5x24x28xf32, #tpu.memory_space<vmem>>, vector<1x24x28xf32>
    %371 = vector.shape_cast %370 : vector<1x24x28xf32> to vector<24x28xf32>
    %c125_i32_344 = arith.constant 125 : i32
    %372 = tpu.dynamic_rotate %356 by %c125_i32_344 dim 1 : vector<28x128xf32>, i32 -> vector<28x128xf32>
    %cst_345 = arith.constant dense<0.000000e+00> : vector<24x128xf32>
    %373 = tpu.matmul %371, %372, %cst_345 {dimension_numbers = #tpu.dot_dimension_numbers<[1], [0], [0], [1], [0, 0, 1, 1], [], []>} : vector<24x28xf32>, vector<28x128xf32>, vector<24x128xf32> -> vector<24x128xf32>
    %374 = arith.addf %369, %373 : vector<24x128xf32>
    %c4_346 = arith.constant 4 : index
    %c0_347 = arith.constant 0 : index
    %c0_348 = arith.constant 0 : index
    %375 = vector.load %arg2[%c4_346, %c0_347, %c0_348] : memref<5x24x28xf32, #tpu.memory_space<vmem>>, vector<1x24x28xf32>
    %376 = vector.shape_cast %375 : vector<1x24x28xf32> to vector<24x28xf32>
    %c124_i32_349 = arith.constant 124 : i32
    %377 = tpu.dynamic_rotate %356 by %c124_i32_349 dim 1 : vector<28x128xf32>, i32 -> vector<28x128xf32>
    %cst_350 = arith.constant dense<0.000000e+00> : vector<24x128xf32>
    %378 = tpu.matmul %376, %377, %cst_350 {dimension_numbers = #tpu.dot_dimension_numbers<[1], [0], [0], [1], [0, 0, 1, 1], [], []>} : vector<24x28xf32>, vector<28x128xf32>, vector<24x128xf32> -> vector<24x128xf32>
    %379 = arith.addf %374, %378 : vector<24x128xf32>
    %c0_351 = arith.constant 0 : index
    %c0_352 = arith.constant 0 : index
    %c0_353 = arith.constant 0 : index
    %380 = vector.load %arg3[%c0_351, %c0_352, %c0_353] : memref<5x72x24xf32, #tpu.memory_space<vmem>>, vector<1x72x24xf32>
    %381 = vector.shape_cast %380 : vector<1x72x24xf32> to vector<72x24xf32>
    %cst_354 = arith.constant dense<0.000000e+00> : vector<72x128xf32>
    %382 = tpu.matmul %381, %379, %cst_354 {dimension_numbers = #tpu.dot_dimension_numbers<[1], [0], [0], [1], [0, 0, 1, 1], [], []>} : vector<72x24xf32>, vector<24x128xf32>, vector<72x128xf32> -> vector<72x128xf32>
    %c1_355 = arith.constant 1 : index
    %c0_356 = arith.constant 0 : index
    %c0_357 = arith.constant 0 : index
    %383 = vector.load %arg3[%c1_355, %c0_356, %c0_357] : memref<5x72x24xf32, #tpu.memory_space<vmem>>, vector<1x72x24xf32>
    %384 = vector.shape_cast %383 : vector<1x72x24xf32> to vector<72x24xf32>
    %c127_i32_358 = arith.constant 127 : i32
    %385 = tpu.dynamic_rotate %379 by %c127_i32_358 dim 1 : vector<24x128xf32>, i32 -> vector<24x128xf32>
    %cst_359 = arith.constant dense<0.000000e+00> : vector<72x128xf32>
    %386 = tpu.matmul %384, %385, %cst_359 {dimension_numbers = #tpu.dot_dimension_numbers<[1], [0], [0], [1], [0, 0, 1, 1], [], []>} : vector<72x24xf32>, vector<24x128xf32>, vector<72x128xf32> -> vector<72x128xf32>
    %387 = arith.addf %382, %386 : vector<72x128xf32>
    %c2_360 = arith.constant 2 : index
    %c0_361 = arith.constant 0 : index
    %c0_362 = arith.constant 0 : index
    %388 = vector.load %arg3[%c2_360, %c0_361, %c0_362] : memref<5x72x24xf32, #tpu.memory_space<vmem>>, vector<1x72x24xf32>
    %389 = vector.shape_cast %388 : vector<1x72x24xf32> to vector<72x24xf32>
    %c126_i32_363 = arith.constant 126 : i32
    %390 = tpu.dynamic_rotate %379 by %c126_i32_363 dim 1 : vector<24x128xf32>, i32 -> vector<24x128xf32>
    %cst_364 = arith.constant dense<0.000000e+00> : vector<72x128xf32>
    %391 = tpu.matmul %389, %390, %cst_364 {dimension_numbers = #tpu.dot_dimension_numbers<[1], [0], [0], [1], [0, 0, 1, 1], [], []>} : vector<72x24xf32>, vector<24x128xf32>, vector<72x128xf32> -> vector<72x128xf32>
    %392 = arith.addf %387, %391 : vector<72x128xf32>
    %c3_365 = arith.constant 3 : index
    %c0_366 = arith.constant 0 : index
    %c0_367 = arith.constant 0 : index
    %393 = vector.load %arg3[%c3_365, %c0_366, %c0_367] : memref<5x72x24xf32, #tpu.memory_space<vmem>>, vector<1x72x24xf32>
    %394 = vector.shape_cast %393 : vector<1x72x24xf32> to vector<72x24xf32>
    %c125_i32_368 = arith.constant 125 : i32
    %395 = tpu.dynamic_rotate %379 by %c125_i32_368 dim 1 : vector<24x128xf32>, i32 -> vector<24x128xf32>
    %cst_369 = arith.constant dense<0.000000e+00> : vector<72x128xf32>
    %396 = tpu.matmul %394, %395, %cst_369 {dimension_numbers = #tpu.dot_dimension_numbers<[1], [0], [0], [1], [0, 0, 1, 1], [], []>} : vector<72x24xf32>, vector<24x128xf32>, vector<72x128xf32> -> vector<72x128xf32>
    %397 = arith.addf %392, %396 : vector<72x128xf32>
    %c4_370 = arith.constant 4 : index
    %c0_371 = arith.constant 0 : index
    %c0_372 = arith.constant 0 : index
    %398 = vector.load %arg3[%c4_370, %c0_371, %c0_372] : memref<5x72x24xf32, #tpu.memory_space<vmem>>, vector<1x72x24xf32>
    %399 = vector.shape_cast %398 : vector<1x72x24xf32> to vector<72x24xf32>
    %c124_i32_373 = arith.constant 124 : i32
    %400 = tpu.dynamic_rotate %379 by %c124_i32_373 dim 1 : vector<24x128xf32>, i32 -> vector<24x128xf32>
    %cst_374 = arith.constant dense<0.000000e+00> : vector<72x128xf32>
    %401 = tpu.matmul %399, %400, %cst_374 {dimension_numbers = #tpu.dot_dimension_numbers<[1], [0], [0], [1], [0, 0, 1, 1], [], []>} : vector<72x24xf32>, vector<24x128xf32>, vector<72x128xf32> -> vector<72x128xf32>
    %402 = arith.addf %397, %401 : vector<72x128xf32>
    %403 = arith.addf %402, %2 : vector<72x128xf32>
    %404 = vector.extract_strided_slice %403 {offsets = [0, 0], sizes = [71, 128], strides = [1, 1]} : vector<72x128xf32> to vector<71x128xf32>
    %405 = vector.extract_strided_slice %403 {offsets = [1, 0], sizes = [71, 128], strides = [1, 1]} : vector<72x128xf32> to vector<71x128xf32>
    %406 = arith.maximumf %404, %405 : vector<71x128xf32>
    %c127_i32_375 = arith.constant 127 : i32
    %407 = tpu.dynamic_rotate %406 by %c127_i32_375 dim 1 : vector<71x128xf32>, i32 -> vector<71x128xf32>
    %408 = arith.maximumf %406, %407 : vector<71x128xf32>
    %cst_376 = arith.constant 0.000000e+00 : f32
    %409 = vector.broadcast %cst_376 : f32 to vector<71x128xf32>
    %410 = arith.maximumf %408, %409 : vector<71x128xf32>
    %cst_377 = arith.constant dense<0.000000e+00> : vector<84x128xf32>
    %411 = tpu.matmul %0, %410, %cst_377 {dimension_numbers = #tpu.dot_dimension_numbers<[1], [0], [0], [1], [0, 0, 1, 1], [], []>} : vector<84x71xf32>, vector<71x128xf32>, vector<84x128xf32> -> vector<84x128xf32>
    %cst_378 = arith.constant dense<0.000000e+00> : vector<84x128xf32>
    %412 = tpu.matmul %411, %1, %cst_378 {dimension_numbers = #tpu.dot_dimension_numbers<[1], [0], [0], [1], [0, 0, 1, 1], [], []>} : vector<84x128xf32>, vector<128x128xf32>, vector<84x128xf32> -> vector<84x128xf32>
    %c0_379 = arith.constant 0 : index
    %c0_380 = arith.constant 0 : index
    %c0_381 = arith.constant 0 : index
    %413 = vector.load %arg7[%c0_379, %c0_380, %c0_381] : memref<5x24x84xf32, #tpu.memory_space<vmem>>, vector<1x24x84xf32>
    %414 = vector.shape_cast %413 : vector<1x24x84xf32> to vector<24x84xf32>
    %cst_382 = arith.constant dense<0.000000e+00> : vector<24x128xf32>
    %415 = tpu.matmul %414, %412, %cst_382 {dimension_numbers = #tpu.dot_dimension_numbers<[1], [0], [0], [1], [0, 0, 1, 1], [], []>} : vector<24x84xf32>, vector<84x128xf32>, vector<24x128xf32> -> vector<24x128xf32>
    %c1_383 = arith.constant 1 : index
    %c0_384 = arith.constant 0 : index
    %c0_385 = arith.constant 0 : index
    %416 = vector.load %arg7[%c1_383, %c0_384, %c0_385] : memref<5x24x84xf32, #tpu.memory_space<vmem>>, vector<1x24x84xf32>
    %417 = vector.shape_cast %416 : vector<1x24x84xf32> to vector<24x84xf32>
    %c127_i32_386 = arith.constant 127 : i32
    %418 = tpu.dynamic_rotate %412 by %c127_i32_386 dim 1 : vector<84x128xf32>, i32 -> vector<84x128xf32>
    %cst_387 = arith.constant dense<0.000000e+00> : vector<24x128xf32>
    %419 = tpu.matmul %417, %418, %cst_387 {dimension_numbers = #tpu.dot_dimension_numbers<[1], [0], [0], [1], [0, 0, 1, 1], [], []>} : vector<24x84xf32>, vector<84x128xf32>, vector<24x128xf32> -> vector<24x128xf32>
    %420 = arith.addf %415, %419 : vector<24x128xf32>
    %c2_388 = arith.constant 2 : index
    %c0_389 = arith.constant 0 : index
    %c0_390 = arith.constant 0 : index
    %421 = vector.load %arg7[%c2_388, %c0_389, %c0_390] : memref<5x24x84xf32, #tpu.memory_space<vmem>>, vector<1x24x84xf32>
    %422 = vector.shape_cast %421 : vector<1x24x84xf32> to vector<24x84xf32>
    %c126_i32_391 = arith.constant 126 : i32
    %423 = tpu.dynamic_rotate %412 by %c126_i32_391 dim 1 : vector<84x128xf32>, i32 -> vector<84x128xf32>
    %cst_392 = arith.constant dense<0.000000e+00> : vector<24x128xf32>
    %424 = tpu.matmul %422, %423, %cst_392 {dimension_numbers = #tpu.dot_dimension_numbers<[1], [0], [0], [1], [0, 0, 1, 1], [], []>} : vector<24x84xf32>, vector<84x128xf32>, vector<24x128xf32> -> vector<24x128xf32>
    %425 = arith.addf %420, %424 : vector<24x128xf32>
    %c3_393 = arith.constant 3 : index
    %c0_394 = arith.constant 0 : index
    %c0_395 = arith.constant 0 : index
    %426 = vector.load %arg7[%c3_393, %c0_394, %c0_395] : memref<5x24x84xf32, #tpu.memory_space<vmem>>, vector<1x24x84xf32>
    %427 = vector.shape_cast %426 : vector<1x24x84xf32> to vector<24x84xf32>
    %c125_i32_396 = arith.constant 125 : i32
    %428 = tpu.dynamic_rotate %412 by %c125_i32_396 dim 1 : vector<84x128xf32>, i32 -> vector<84x128xf32>
    %cst_397 = arith.constant dense<0.000000e+00> : vector<24x128xf32>
    %429 = tpu.matmul %427, %428, %cst_397 {dimension_numbers = #tpu.dot_dimension_numbers<[1], [0], [0], [1], [0, 0, 1, 1], [], []>} : vector<24x84xf32>, vector<84x128xf32>, vector<24x128xf32> -> vector<24x128xf32>
    %430 = arith.addf %425, %429 : vector<24x128xf32>
    %c4_398 = arith.constant 4 : index
    %c0_399 = arith.constant 0 : index
    %c0_400 = arith.constant 0 : index
    %431 = vector.load %arg7[%c4_398, %c0_399, %c0_400] : memref<5x24x84xf32, #tpu.memory_space<vmem>>, vector<1x24x84xf32>
    %432 = vector.shape_cast %431 : vector<1x24x84xf32> to vector<24x84xf32>
    %c124_i32_401 = arith.constant 124 : i32
    %433 = tpu.dynamic_rotate %412 by %c124_i32_401 dim 1 : vector<84x128xf32>, i32 -> vector<84x128xf32>
    %cst_402 = arith.constant dense<0.000000e+00> : vector<24x128xf32>
    %434 = tpu.matmul %432, %433, %cst_402 {dimension_numbers = #tpu.dot_dimension_numbers<[1], [0], [0], [1], [0, 0, 1, 1], [], []>} : vector<24x84xf32>, vector<84x128xf32>, vector<24x128xf32> -> vector<24x128xf32>
    %435 = arith.addf %430, %434 : vector<24x128xf32>
    %cst_403 = arith.constant 0.000000e+00 : f32
    %436 = vector.broadcast %cst_403 : f32 to vector<24x128xf32>
    %437 = arith.maximumf %435, %436 : vector<24x128xf32>
    %c0_404 = arith.constant 0 : index
    %c0_405 = arith.constant 0 : index
    %c0_406 = arith.constant 0 : index
    %438 = vector.load %arg8[%c0_404, %c0_405, %c0_406] : memref<5x28x24xf32, #tpu.memory_space<vmem>>, vector<1x28x24xf32>
    %439 = vector.shape_cast %438 : vector<1x28x24xf32> to vector<28x24xf32>
    %c4_i32_407 = arith.constant 4 : i32
    %440 = tpu.dynamic_rotate %437 by %c4_i32_407 dim 1 : vector<24x128xf32>, i32 -> vector<24x128xf32>
    %cst_408 = arith.constant dense<0.000000e+00> : vector<28x128xf32>
    %441 = tpu.matmul %439, %440, %cst_408 {dimension_numbers = #tpu.dot_dimension_numbers<[1], [0], [0], [1], [0, 0, 1, 1], [], []>} : vector<28x24xf32>, vector<24x128xf32>, vector<28x128xf32> -> vector<28x128xf32>
    %c1_409 = arith.constant 1 : index
    %c0_410 = arith.constant 0 : index
    %c0_411 = arith.constant 0 : index
    %442 = vector.load %arg8[%c1_409, %c0_410, %c0_411] : memref<5x28x24xf32, #tpu.memory_space<vmem>>, vector<1x28x24xf32>
    %443 = vector.shape_cast %442 : vector<1x28x24xf32> to vector<28x24xf32>
    %c3_i32_412 = arith.constant 3 : i32
    %444 = tpu.dynamic_rotate %437 by %c3_i32_412 dim 1 : vector<24x128xf32>, i32 -> vector<24x128xf32>
    %cst_413 = arith.constant dense<0.000000e+00> : vector<28x128xf32>
    %445 = tpu.matmul %443, %444, %cst_413 {dimension_numbers = #tpu.dot_dimension_numbers<[1], [0], [0], [1], [0, 0, 1, 1], [], []>} : vector<28x24xf32>, vector<24x128xf32>, vector<28x128xf32> -> vector<28x128xf32>
    %446 = arith.addf %441, %445 : vector<28x128xf32>
    %c2_414 = arith.constant 2 : index
    %c0_415 = arith.constant 0 : index
    %c0_416 = arith.constant 0 : index
    %447 = vector.load %arg8[%c2_414, %c0_415, %c0_416] : memref<5x28x24xf32, #tpu.memory_space<vmem>>, vector<1x28x24xf32>
    %448 = vector.shape_cast %447 : vector<1x28x24xf32> to vector<28x24xf32>
    %c2_i32_417 = arith.constant 2 : i32
    %449 = tpu.dynamic_rotate %437 by %c2_i32_417 dim 1 : vector<24x128xf32>, i32 -> vector<24x128xf32>
    %cst_418 = arith.constant dense<0.000000e+00> : vector<28x128xf32>
    %450 = tpu.matmul %448, %449, %cst_418 {dimension_numbers = #tpu.dot_dimension_numbers<[1], [0], [0], [1], [0, 0, 1, 1], [], []>} : vector<28x24xf32>, vector<24x128xf32>, vector<28x128xf32> -> vector<28x128xf32>
    %451 = arith.addf %446, %450 : vector<28x128xf32>
    %c3_419 = arith.constant 3 : index
    %c0_420 = arith.constant 0 : index
    %c0_421 = arith.constant 0 : index
    %452 = vector.load %arg8[%c3_419, %c0_420, %c0_421] : memref<5x28x24xf32, #tpu.memory_space<vmem>>, vector<1x28x24xf32>
    %453 = vector.shape_cast %452 : vector<1x28x24xf32> to vector<28x24xf32>
    %c1_i32_422 = arith.constant 1 : i32
    %454 = tpu.dynamic_rotate %437 by %c1_i32_422 dim 1 : vector<24x128xf32>, i32 -> vector<24x128xf32>
    %cst_423 = arith.constant dense<0.000000e+00> : vector<28x128xf32>
    %455 = tpu.matmul %453, %454, %cst_423 {dimension_numbers = #tpu.dot_dimension_numbers<[1], [0], [0], [1], [0, 0, 1, 1], [], []>} : vector<28x24xf32>, vector<24x128xf32>, vector<28x128xf32> -> vector<28x128xf32>
    %456 = arith.addf %451, %455 : vector<28x128xf32>
    %c4_424 = arith.constant 4 : index
    %c0_425 = arith.constant 0 : index
    %c0_426 = arith.constant 0 : index
    %457 = vector.load %arg8[%c4_424, %c0_425, %c0_426] : memref<5x28x24xf32, #tpu.memory_space<vmem>>, vector<1x28x24xf32>
    %458 = vector.shape_cast %457 : vector<1x28x24xf32> to vector<28x24xf32>
    %cst_427 = arith.constant dense<0.000000e+00> : vector<28x128xf32>
    %459 = tpu.matmul %458, %437, %cst_427 {dimension_numbers = #tpu.dot_dimension_numbers<[1], [0], [0], [1], [0, 0, 1, 1], [], []>} : vector<28x24xf32>, vector<24x128xf32>, vector<28x128xf32> -> vector<28x128xf32>
    %460 = arith.addf %456, %459 : vector<28x128xf32>
    %461 = vector.extract_strided_slice %460 {offsets = [0, 0], sizes = [27, 128], strides = [1, 1]} : vector<28x128xf32> to vector<27x128xf32>
    %462 = vector.extract_strided_slice %460 {offsets = [1, 0], sizes = [27, 128], strides = [1, 1]} : vector<28x128xf32> to vector<27x128xf32>
    %463 = arith.maximumf %461, %462 : vector<27x128xf32>
    %c127_i32_428 = arith.constant 127 : i32
    %464 = tpu.dynamic_rotate %463 by %c127_i32_428 dim 1 : vector<27x128xf32>, i32 -> vector<27x128xf32>
    %465 = arith.maximumf %463, %464 : vector<27x128xf32>
    %cst_429 = arith.constant dense<0.000000e+00> : vector<14x128xf32>
    %466 = tpu.matmul %3, %465, %cst_429 {dimension_numbers = #tpu.dot_dimension_numbers<[1], [0], [0], [1], [0, 0, 1, 1], [], []>} : vector<14x27xf32>, vector<27x128xf32>, vector<14x128xf32> -> vector<14x128xf32>
    %cst_430 = arith.constant 0.000000e+00 : f32
    %467 = vector.broadcast %cst_430 : f32 to vector<14x128xf32>
    %468 = arith.maximumf %466, %467 : vector<14x128xf32>
    %c3_431 = arith.constant 3 : index
    %c0_432 = arith.constant 0 : index
    %c0_433 = arith.constant 0 : index
    %469 = vector.load %arg10[%c3_431, %c0_432, %c0_433] : memref<4x14x128xf32, #tpu.memory_space<vmem>>, vector<1x14x128xf32>
    %470 = vector.shape_cast %469 : vector<1x14x128xf32> to vector<14x128xf32>
    %471 = vector.shape_cast %468 : vector<14x128xf32> to vector<1x14x128xf32>
    tpu.vector_store %arg10[%c3_431, %c0_432, %c0_433], %471 {strides = array<i32>} : memref<4x14x128xf32, #tpu.memory_space<vmem>>, vector<1x14x128xf32>,
    return
  }
  func.func @transform_0(%arg0: i32) -> (i32, i32, i32) {
    %c0_i32 = arith.constant 0 : i32
    %c0_i32_0 = arith.constant 0 : i32
    %c0_i32_1 = arith.constant 0 : i32
    return %arg0, %c0_i32, %c0_i32_0 : i32, i32, i32
  }
  func.func @transform_1(%arg0: i32) -> (i32, i32, i32) {
    %c0_i32 = arith.constant 0 : i32
    %c0_i32_0 = arith.constant 0 : i32
    %c0_i32_1 = arith.constant 0 : i32
    %c0_i32_2 = arith.constant 0 : i32
    return %c0_i32, %c0_i32_0, %c0_i32_1 : i32, i32, i32
  }
  func.func @transform_2(%arg0: i32) -> (i32, i32, i32) {
    %c0_i32 = arith.constant 0 : i32
    %c0_i32_0 = arith.constant 0 : i32
    %c0_i32_1 = arith.constant 0 : i32
    %c0_i32_2 = arith.constant 0 : i32
    return %c0_i32, %c0_i32_0, %c0_i32_1 : i32, i32, i32
  }
  func.func @transform_3(%arg0: i32) -> (i32, i32) {
    %c0_i32 = arith.constant 0 : i32
    %c0_i32_0 = arith.constant 0 : i32
    %c0_i32_1 = arith.constant 0 : i32
    return %c0_i32, %c0_i32_0 : i32, i32
  }
  func.func @transform_4(%arg0: i32) -> (i32, i32) {
    %c0_i32 = arith.constant 0 : i32
    %c0_i32_0 = arith.constant 0 : i32
    %c0_i32_1 = arith.constant 0 : i32
    return %c0_i32, %c0_i32_0 : i32, i32
  }
  func.func @transform_5(%arg0: i32) -> (i32, i32) {
    %c0_i32 = arith.constant 0 : i32
    %c0_i32_0 = arith.constant 0 : i32
    %c0_i32_1 = arith.constant 0 : i32
    return %c0_i32, %c0_i32_0 : i32, i32
  }
  func.func @transform_6(%arg0: i32) -> (i32, i32, i32) {
    %c0_i32 = arith.constant 0 : i32
    %c0_i32_0 = arith.constant 0 : i32
    %c0_i32_1 = arith.constant 0 : i32
    %c0_i32_2 = arith.constant 0 : i32
    return %c0_i32, %c0_i32_0, %c0_i32_1 : i32, i32, i32
  }
  func.func @transform_7(%arg0: i32) -> (i32, i32, i32) {
    %c0_i32 = arith.constant 0 : i32
    %c0_i32_0 = arith.constant 0 : i32
    %c0_i32_1 = arith.constant 0 : i32
    %c0_i32_2 = arith.constant 0 : i32
    return %c0_i32, %c0_i32_0, %c0_i32_1 : i32, i32, i32
  }
  func.func @transform_8(%arg0: i32) -> (i32, i32) {
    %c0_i32 = arith.constant 0 : i32
    %c0_i32_0 = arith.constant 0 : i32
    %c0_i32_1 = arith.constant 0 : i32
    return %c0_i32, %c0_i32_0 : i32, i32
  }
  func.func @transform_9(%arg0: i32) -> (i32, i32, i32) {
    %c0_i32 = arith.constant 0 : i32
    %c0_i32_0 = arith.constant 0 : i32
    %c0_i32_1 = arith.constant 0 : i32
    return %arg0, %c0_i32, %c0_i32_0 : i32, i32, i32
  }
}

</mosaic_0001>

<bundles_post_ra>
// kernel: _lambda_.1
= control target key start
LH: loop header
LB: loop body
LE: loop exit
PB: predicated region body
PF: predicated region fallthrough
CT: control target
= control target key end

     0   :  { %s18171_s30 = smov 0   ;;  %s21939_s0 = inlined_call_operand.vmem [shape: f32[8,28,128], index: 0, kind: input, shape index: {}]   ;;  %s21940_s1 = inlined_call_operand.vmem [shape: f32[5,24,28], index: 1, kind: input, shape index: {}]   ;;  %s21941_s2 = inlined_call_operand.vmem [shape: f32[5,72,24], index: 2, kind: input, shape index: {}]   ;;  %s21942_s3 = inlined_call_operand.vmem [shape: f32[72,128], index: 3, kind: input, shape index: {}]   ;;  %s21943_s4 = inlined_call_operand.vmem [shape: f32[84,71], index: 4, kind: input, shape index: {}]   ;;  %s21944_s5 = inlined_call_operand.vmem [shape: f32[128,128], index: 5, kind: input, shape index: {}]   ;;  %s21945_s6 = inlined_call_operand.vmem [shape: f32[5,24,84], index: 6, kind: input, shape index: {}]   ;;  %s21946_s7 = inlined_call_operand.vmem [shape: f32[5,28,24], index: 7, kind: input, shape index: {}]   ;;  %s21947_s8 = inlined_call_operand.vmem [shape: f32[14,27], index: 8, kind: input, shape index: {}]   ;;  %s21948_s9 = inlined_call_operand.vmem [shape: f32[8,14,128], index: 9, kind: output, shape index: {}]  }
   0x1 LB: > { %s11954_s10 = sadd.s32 4294967295, %s18107_s30   ;;  %p11958_p0 = scmp.ge.s32.totalorder %s18107_s30, 1  ;;  %s18107_s30 = sphi %s18171_s30, %s19_s30  }
   0x2   : > { %p289_p1 = scmp.lt.s32.totalorder %s18107_s30, 3 }
   0x4   : > { %p290_p2 = pnand %p11958_p0, %p289_p1 }
   0x5   : > { %s11959_s11 = sshll.u32 (!%p290_p2), %s11954_s10, 2  ;;  %v18109_v0 = vmov (!%p290_p2), 0.0|0.0   ;;  %vm18110_vm0 = vmmov (!%p290_p2), 0   ;;  %v18111_v1 = vmov (!%p290_p2), 0.0   ;;  %s18112_s16 = smov (!%p290_p2), 127   ;;  %vm408_vm1 = vcmask (!%p290_p2), 1043456  }
   0x6   : > { %293 = sbr.rel (%p290_p2) target bundleno = 9411 (0x24c3), region = 56  ;;  %p328_p3 = scmp.lt.s32.totalorder (!%p290_p2), %s11959_s11, 7  ;;  %16151 = vmatprep.subr.bf16.mxu0 (!%p290_p2), %v18109_v0  ;;  %16186 = vmatprep.subr.bf16.mxu1 (!%p290_p2), %v18109_v0  ;;  %vm18116_vm2 = vmmov (!%p290_p2), 1   ;;  %v11965_v19 = vld [vmem:[%s21940_s1 + $0x18] sm:$0xff] (!%p290_p2)  ;;  %vm398_vm4 = vcmask (!%p290_p2), 228352   ;;  %v11966_v21 = vld [vmem:[%s21940_s1 + $0x20] sm:$0xff] (!%p290_p2) }
   0x7   : > { %13791 = vmatprep.mubr.msk.f32.mxu0 (!%p290_p2), %vm18110_vm0, %v18111_v1  ;;  %13874 = vmatprep.mubr.msk.f32.mxu1 (!%p290_p2), %vm18110_vm0, %v18111_v1  ;;  %s18113_s17 = smov (!%p290_p2), 126   ;;  %s18114_s18 = smov (!%p290_p2), 125   ;;  %vm18208_vm3 = vmpackc.low (!%p290_p2), %vm408_vm1, %vm18116_vm2  ;;  %v11967_v22 = vld [vmem:[%s21940_s1 + $0x28] sm:$0xff] (!%p290_p2)  ;;  %v383_v27 = vld [vmem:[%s21940_s1] sm:$0xff] (!%p290_p2)  ;;  %vm930_vm5 = vcmask (!%p290_p2), 195584   ;;  %vm1709_vm6 = vcmask (!%p290_p2), 1046528  }
   0x8   : > { %s18115_s19 = smov (!%p290_p2), 124   ;;  %v384_v31 = vld [vmem:[%s21940_s1 + $0x8] sm:$0xff] (!%p290_p2)  ;;  %v385_v33 = vld [vmem:[%s21940_s1 + $0x10] sm:$0xff] (!%p290_p2)  ;;  %v11977_v42 = vld [vmem:[%s21940_s1 + $0x38] sm:$0xff] (!%p290_p2)  ;;  %vm1781_vm7 = vcmask (!%p290_p2), 580608   ;;  %vm2087_vm8 = vcmask (!%p290_p2), 687104  }
   0x9   : > { %v11976_v38 = vld [vmem:[%s21940_s1 + $0x30] sm:$0xff] (!%p290_p2)  ;;  %v11978_v44 = vld [vmem:[%s21940_s1 + $0x40] sm:$0xff] (!%p290_p2)  ;;  %v11983_v49 = vld [vmem:[%s21940_s1 + $0x48] sm:$0xff] (!%p290_p2)  ;;  %s18117_s20 = smov (!%p290_p2), 3   ;;  %s18118_s21 = smov (!%p290_p2), 4   ;;  %vm3214_vm9 = vcmask (!%p290_p2), 220160  }
   0xa   : > { %v11984_v53 = vld [vmem:[%s21940_s1 + $0x50] sm:$0xff] (!%p290_p2)  ;;  %v11985_v54 = vld [vmem:[%s21940_s1 + $0x58] sm:$0xff] (!%p290_p2)  ;;  %v11990_v55 = vld [vmem:[%s21940_s1 + $0x60] sm:$0xff] (!%p290_p2)  ;;  %s18119_s22 = smov (!%p290_p2), 2   ;;  %s18120_s23 = smov (!%p290_p2), 1   ;;  %vm3221_vm10 = vcmask (!%p290_p2), 1042432  }
   0xb   : > { %v11991_v56 = vld [vmem:[%s21940_s1 + $0x68] sm:$0xff] (!%p290_p2)  ;;  %v11992_v57 = vld [vmem:[%s21940_s1 + $0x70] sm:$0xff] (!%p290_p2)  ;;  %vm19238_vm11 = vmpackc.low (!%p290_p2), %vm3221_vm10, %vm18116_vm2 }
   0xc   : > { %v12595_v17 = vld [vmem:[%s21940_s1 + $0x68] sm:$0xff] (!%p290_p2) }
   0xd   : > { %s21954_s11 = smov (!%p328_p3, %s11959_s11), 7 }
   0xe   : > { %s12769_s12 = sshll.u32 %s21954_s11, 5  ;;  %s12770_s26 = sshll.u32 %s21954_s11, 4 }
   0xf   : > { %s18187_s15 = scalar_lea.vmem %s21939_s0, %s12769_s12  ;;  %s19369_s29 = scalar_lea.vmem %s21948_s9, %s12770_s26 }
  0x10   : > { %v379_v2 = vld [vmem:[%s18187_s15] sm:$0xff]  ;;  %v380_v3 = vld [vmem:[%s18187_s15 + $0x8] sm:$0xff]  ;;  %v381_v4 = vld [vmem:[%s18187_s15 + $0x10] sm:$0xff] }
  0x11   : > { %v17195_v5 = vpack.i.bf16 %v380_v3, %v379_v2  ;;  %v382_v6 = vld [vmem:[%s18187_s15 + $0x18] sm:$0xf]  ;;  %v16159_v8 = vpack.c.bf16 %v380_v3, %v379_v2 }
  0x12   : > { %v17200_v7 = vpack.i.bf16 %v382_v6, %v381_v4  ;;  %v16162_v9 = vpack.c.bf16 %v382_v6, %v381_v4 }
  0x13   : > { %17196 = vrot.lane.b32.xlu0 %v17195_v5, %s18112_s16  ;;  %17206 = vrot.lane.b32.xlu1 %v17195_v5, %s18113_s17 }
  0x17   : > { %17201 = vrot.lane.b32.xlu0 %v17200_v7, %s18112_s16  ;;  %17211 = vrot.lane.b32.xlu1 %v17200_v7, %s18113_s17 }
  0x1b   : > { %17216 = vrot.lane.b32.xlu0 %v17195_v5, %s18114_s18  ;;  %17221 = vrot.lane.b32.xlu1 %v17200_v7, %s18114_s18 }
  0x1f   : > { %17226 = vrot.lane.b32.xlu0 %v17195_v5, %s18115_s19  ;;  %17231 = vrot.lane.b32.xlu1 %v17200_v7, %s18115_s19 }
  0x85   : > { %v17197_v10 = vpop.permute.xlu0 %17196  ;;  %v17207_v20 = vpop.permute.xlu1 %17206 }
  0x86   : > { %v17199_v11 = vunpack.i.h.bf16 %v17197_v10  ;;  %v17198_v12 = vunpack.i.l.bf16 %v17197_v10  ;;  %v17209_v23 = vunpack.i.h.bf16 %v17207_v20  ;;  %v17208_v24 = vunpack.i.l.bf16 %v17207_v20  ;;  %v12024_v20 = vld [vmem:[%s21941_s2 + $0x90] sm:$0xff] }
  0x88   : > { %v16152_v13 = vpack.c.bf16 %v17199_v11, %v17198_v12  ;;  %v16166_v26 = vpack.c.bf16 %v17209_v23, %v17208_v24  ;;  %v12025_v23 = vld [vmem:[%s21941_s2 + $0x98] sm:$0xff] }
  0x89   : > { %v17202_v14 = vpop.permute.xlu0 %17201  ;;  %v17212_v25 = vpop.permute.xlu1 %17211 }
  0x8a   : > { %v17204_v15 = vunpack.i.h.bf16 %v17202_v14  ;;  %v17203_v16 = vunpack.i.l.bf16 %v17202_v14  ;;  %16153 = vmatpush3.bf16.msra.mxu0 %v16152_v13  ;;  %v17214_v28 = vunpack.i.h.bf16 %v17212_v25  ;;  %v17213_v29 = vunpack.i.l.bf16 %v17212_v25  ;;  %v11997_v14 = vld [vmem:[%s21941_s2 + $0x48] sm:$0xff]  ;;  %v12000_v25 = vld [vmem:[%s21941_s2 + $0x60] sm:$0xff] }
  0x8b   : > { %16154 = vmatprep.subr.bf16.mxu0 %v18109_v0 }
  0x8c   : > { %v16155_v18 = vpack.c.bf16 %v17204_v15, %v17203_v16  ;;  %v16169_v30 = vpack.c.bf16 %v17214_v28, %v17213_v29  ;;  %v12061_v28 = vld [vmem:[%s21941_s2 + $0x128] sm:$0xff]  ;;  %v12002_v29 = vld [vmem:[%s21941_s2 + $0x70] sm:$0xff] }
  0x8d   : > { %v17217_v32 = vpop.permute.xlu0 %17216  ;;  %v17222_v36 = vpop.permute.xlu1 %17221 }
  0x8e   : > { %16157 = vmatpush3.bf16.msk.msra.mxu0 %vm18208_vm3, %v16155_v18  ;;  %v17219_v34 = vunpack.i.h.bf16 %v17217_v32  ;;  %v17218_v35 = vunpack.i.l.bf16 %v17217_v32  ;;  %v17224_v39 = vunpack.i.h.bf16 %v17222_v36  ;;  %v17223_v40 = vunpack.i.l.bf16 %v17222_v36  ;;  %v12063_v32 = vld [vmem:[%s21941_s2 + $0x138] sm:$0xff]  ;;  %v12065_v36 = vld [vmem:[%s21941_s2 + $0x148] sm:$0xff] }
  0x8f   : > { %16158 = vmatprep.subr.bf16.mxu0 %v18109_v0 }
  0x90   : > { %v16173_v37 = vpack.c.bf16 %v17219_v34, %v17218_v35  ;;  %v16176_v41 = vpack.c.bf16 %v17224_v39, %v17223_v40  ;;  %v12064_v34 = vld [vmem:[%s21941_s2 + $0x140] sm:$0xff]  ;;  %v12005_v35 = vld [vmem:[%s21941_s2 + $0x88] sm:$0xff]  ;;  %v12067_v40 = vld [vmem:[%s21941_s2 + $0x158] sm:$0xff] }
  0x91   : > { %13792 = vmatmul.mubr.msk.f32.vlgmr.msra.gmra.mrb[0].mxu0 %vm398_vm4, %v11965_v19  ;;  %v17227_v43 = vpop.permute.xlu0 %17226  ;;  %v17232_v47 = vpop.permute.xlu1 %17231  ;;  %v11998_v19 = vld [vmem:[%s21941_s2 + $0x50] sm:$0xff]  ;;  %v906_v39 = vld [vmem:[%s21941_s2 + $0x8] sm:$0xff] }
  0x92   : > { %13794 = vmatprep.mubr.msk.f32.mxu0 %vm18110_vm0, %v18111_v1  ;;  %16160 = vmatpush3.bf16.msra.mxu0 %v16159_v8  ;;  %v17229_v45 = vunpack.i.h.bf16 %v17227_v43  ;;  %v17228_v46 = vunpack.i.l.bf16 %v17227_v43  ;;  %v17234_v50 = vunpack.i.h.bf16 %v17232_v47  ;;  %v17233_v51 = vunpack.i.l.bf16 %v17232_v47  ;;  %v908_v43 = vld [vmem:[%s21941_s2 + $0x18] sm:$0xff] }
  0x93   : > { %16161 = vmatprep.subr.bf16.mxu0 %v18109_v0  ;;  %v912_v47 = vld [vmem:[%s21941_s2 + $0x38] sm:$0xff] }
  0x94   : > { %v16180_v48 = vpack.c.bf16 %v17229_v45, %v17228_v46  ;;  %v16183_v52 = vpack.c.bf16 %v17234_v50, %v17233_v51  ;;  %v910_v45 = vld [vmem:[%s21941_s2 + $0x28] sm:$0xff]  ;;  %v911_v46 = vld [vmem:[%s21941_s2 + $0x30] sm:$0xff] }
  0x95   : > { %13795 = vmatmul.mubr.msk.f32.gmra.mrb[2].mxu0 %vm398_vm4, %v11966_v21 }
  0x96   : > { %13797 = vmatprep.mubr.msk.f32.mxu0 %vm18110_vm0, %v18111_v1  ;;  %16164 = vmatpush3.bf16.msk.msra.mxu0 %vm18208_vm3, %v16162_v9 }
  0x97   : > { %16165 = vmatprep.subr.bf16.mxu0 %v18109_v0 }
  0x99   : > { %13798 = vmatmul.mubr.msk.f32.gmra.mrb[4].mxu0 %vm398_vm4, %v11967_v22  ;;  %v11999_v22 = vld [vmem:[%s21941_s2 + $0x58] sm:$0xff] }
  0x9a   : > { %13808 = vmatprep.mubr.msk.f32.mxu0 %vm18110_vm0, %v18111_v1 }
  0x9d   : > { %13809 = vmatmul.mubr.msk.f32.vlgmr.msra.gmra.mrb[0].mxu0 %vm398_vm4, %v383_v27  ;;  %v12001_v27 = vld [vmem:[%s21941_s2 + $0x68] sm:$0xff] }
  0x9e   : > { %13811 = vmatprep.mubr.msk.f32.mxu0 %vm18110_vm0, %v18111_v1  ;;  %16167 = vmatpush3.bf16.msra.mxu0 %v16166_v26  ;;  %v12060_v26 = vld [vmem:[%s21941_s2 + $0x120] sm:$0xff] }
  0x9f   : > { %16168 = vmatprep.subr.bf16.mxu0 %v18109_v0 }
  0xa1   : > { %13812 = vmatmul.mubr.msk.f32.gmra.mrb[2].mxu0 %vm398_vm4, %v384_v31  ;;  %v12003_v31 = vld [vmem:[%s21941_s2 + $0x78] sm:$0xff] }
  0xa2   : > { %13814 = vmatprep.mubr.msk.f32.mxu0 %vm18110_vm0, %v18111_v1  ;;  %16171 = vmatpush3.bf16.msk.msra.mxu0 %vm18208_vm3, %v16169_v30  ;;  %v12062_v30 = vld [vmem:[%s21941_s2 + $0x130] sm:$0xff] }
  0xa3   : > { %16172 = vmatprep.subr.bf16.mxu0 %v18109_v0 }
  0xa5   : > { %13815 = vmatmul.mubr.msk.f32.gmra.mrb[4].mxu0 %vm398_vm4, %v385_v33  ;;  %v12004_v33 = vld [vmem:[%s21941_s2 + $0x80] sm:$0xff] }
  0xa6   : > { %13825 = vmatprep.mubr.msk.f32.mxu0 %vm18110_vm0, %v18111_v1 }
  0xa9   : > { %13826 = vmatmul.mubr.msk.f32.vlgmr.msra.gmra.mrb[0].mxu0 %vm398_vm4, %v11976_v38  ;;  %v12066_v38 = vld [vmem:[%s21941_s2 + $0x150] sm:$0xff] }
  0xaa   : > { %13828 = vmatprep.mubr.msk.f32.mxu0 %vm18110_vm0, %v18111_v1  ;;  %16174 = vmatpush3.bf16.msra.mxu0 %v16173_v37  ;;  %v905_v37 = vld [vmem:[%s21941_s2] sm:$0xff] }
  0xab   : > { %16175 = vmatprep.subr.bf16.mxu0 %v18109_v0 }
  0xad   : > { %13829 = vmatmul.mubr.msk.f32.gmra.mrb[2].mxu0 %vm398_vm4, %v11977_v42  ;;  %v12068_v42 = vld [vmem:[%s21941_s2 + $0x160] sm:$0xff] }
  0xae   : > { %13831 = vmatprep.mubr.msk.f32.mxu0 %vm18110_vm0, %v18111_v1  ;;  %16178 = vmatpush3.bf16.msk.msra.mxu0 %vm18208_vm3, %v16176_v41  ;;  %v907_v41 = vld [vmem:[%s21941_s2 + $0x10] sm:$0xff] }
  0xaf   : > { %16179 = vmatprep.subr.bf16.mxu0 %v18109_v0 }
  0xb1   : > { %13832 = vmatmul.mubr.msk.f32.gmra.mrb[4].mxu0 %vm398_vm4, %v11978_v44  ;;  %v909_v44 = vld [vmem:[%s21941_s2 + $0x20] sm:$0xff] }
  0xb2   : > { %13842 = vmatprep.mubr.msk.f32.mxu0 %vm18110_vm0, %v18111_v1 }
  0xb5   : > { %13843 = vmatmul.mubr.msk.f32.vlgmr.msra.gmra.mrb[0].mxu0 %vm398_vm4, %v11983_v49  ;;  %v913_v49 = vld [vmem:[%s21941_s2 + $0x40] sm:$0xff] }
  0xb6   : > { %13845 = vmatprep.mubr.msk.f32.mxu0 %vm18110_vm0, %v18111_v1  ;;  %16181 = vmatpush3.bf16.msra.mxu0 %v16180_v48 }
  0xb7   : > { %16182 = vmatprep.subr.bf16.mxu0 %v18109_v0 }
  0xb9   : > { %13846 = vmatmul.mubr.msk.f32.gmra.mrb[2].mxu0 %vm398_vm4, %v11984_v53 }
  0xba   : > { %13848 = vmatprep.mubr.msk.f32.mxu0 %vm18110_vm0, %v18111_v1  ;;  %16185 = vmatpush3.bf16.msk.msra.mxu0 %vm18208_vm3, %v16183_v52  ;;  %v12026_v52 = vld [vmem:[%s21941_s2 + $0xa0] sm:$0xff] }
  0xbb   : > { %16192 = vmatprep.subr.bf16.mxu0 %v18109_v0 }
  0xbd   : > { %13849 = vmatmul.mubr.msk.f32.gmra.mrb[4].mxu0 %vm398_vm4, %v11985_v54  ;;  %v12027_v54 = vld [vmem:[%s21941_s2 + $0xa8] sm:$0xff] }
  0xbe   : > { %13859 = vmatprep.mubr.msk.f32.mxu0 %vm18110_vm0, %v18111_v1 }
  0xc1   : > { %13860 = vmatmul.mubr.msk.f32.vlgmr.msra.gmra.mrb[0].mxu0 %vm398_vm4, %v11990_v55 }
  0xc2   : > { %13862 = vmatprep.mubr.msk.f32.mxu0 %vm18110_vm0, %v18111_v1 }
  0xc5   : > { %13863 = vmatmul.mubr.msk.f32.gmra.mrb[2].mxu0 %vm398_vm4, %v11991_v56  ;;  %v12028_v56 = vld [vmem:[%s21941_s2 + $0xb0] sm:$0xff] }
  0xc6   : > { %13865 = vmatprep.mubr.msk.f32.mxu0 %vm18110_vm0, %v18111_v1 }
  0xc9   : > { %13866 = vmatmul.mubr.msk.f32.gmra.mrb[4].mxu0 %vm398_vm4, %v11992_v57  ;;  %v12029_v57 = vld [vmem:[%s21941_s2 + $0xb8] sm:$0xff] }
  0xca   : > { %13940 = vmatprep.mubr.msk.f32.mxu0 %vm18110_vm0, %v18111_v1 }
 0x194   : > { %v888_v58 = vpop.f32.mrb[0].mxu0 }
 0x195   : > { %v13861_v59 = vpop.f32.mrb[1].mxu0 }
 0x196   : > { %v12031_v59 = vld [vmem:[%s21941_s2 + $0xc8] sm:$0xff] }
 0x198   : > { %v893_v60 = vpop.f32.mrb[2].mxu0 }
 0x199   : > { %v13864_v61 = vpop.f32.mrb[3].mxu0  ;;  %v17235_v62 = vpack.i.bf16 %v893_v60, %v888_v58  ;;  %v16190_v63 = vpack.c.bf16 %v893_v60, %v888_v58  ;;  %v12030_v58 = vld [vmem:[%s21941_s2 + $0xc0] sm:$0xff]  ;;  %v12032_v60 = vld [vmem:[%s21941_s2 + $0xd0] sm:$0xff] }
 0x19a   : > { %v12042_v61 = vld [vmem:[%s21941_s2 + $0xd8] sm:$0xff] }
 0x19b   : > { %17236 = vrot.lane.b32.xlu0 %v17235_v62, %s18112_s16 }
 0x19c   : > { %v898_v2 = vpop.f32.mrb[4].mxu0 }
 0x19d   : > { %928 = vrot.lane.b32.xlu1 %v898_v2, %s18112_s16  ;;  %v13867_v3 = vpop.f32.mrb[5].mxu0 }
 0x19e   : > { %v12046_v3 = vld [vmem:[%s21941_s2 + $0xf8] sm:$0xff] }
 0x19f   : > { %17241 = vrot.lane.b32.xlu0 %v17235_v62, %s18113_s17 }
 0x1a1   : > { %1219 = vrot.lane.b32.xlu1 %v898_v2, %s18113_s17 }
 0x1a3   : > { %17246 = vrot.lane.b32.xlu0 %v17235_v62, %s18114_s18 }
 0x1a5   : > { %17251 = vrot.lane.b32.xlu1 %v17235_v62, %s18115_s19  ;;  %v12043_v62 = vld [vmem:[%s21941_s2 + $0xe0] sm:$0xff] }
 0x1a7   : > { %1381 = vrot.lane.b32.xlu0 %v898_v2, %s18114_s18 }
 0x1a9   : > { %1543 = vrot.lane.b32.xlu1 %v898_v2, %s18115_s19 }
 0x20d   : > { %v17237_v4 = vpop.permute.xlu0 %17236 }
 0x20e   : > { %v17239_v5 = vunpack.i.h.bf16 %v17237_v4  ;;  %v17238_v6 = vunpack.i.l.bf16 %v17237_v4  ;;  %v12047_v4 = vld [vmem:[%s21941_s2 + $0x100] sm:$0xff] }
 0x20f   : > { %v929_v7 = vpop.permute.xlu1 %928 }
 0x210   : > { %v16187_v8 = vpack.c.bf16 %v17239_v5, %v17238_v6  ;;  %v12048_v5 = vld [vmem:[%s21941_s2 + $0x108] sm:$0xff]  ;;  %v12049_v6 = vld [vmem:[%s21941_s2 + $0x110] sm:$0xff] }
 0x211   : > { %v17242_v9 = vpop.permute.xlu0 %17241 }
 0x212   : > { %v17244_v10 = vunpack.i.h.bf16 %v17242_v9  ;;  %v17243_v11 = vunpack.i.l.bf16 %v17242_v9  ;;  %16188 = vmatpush3.bf16.msra.mxu1 %v16187_v8 }
 0x213   : > { %v18329_v12 = vpop.permute.xlu1 %1219  ;;  %13872 = vmatprep.subr.mxu1 %v18111_v1 }
 0x214   : > { %v18332_v13 = vpack.c.bf16 %v17244_v10, %v17243_v11 }
 0x215   : > { %v17247_v48 = vpop.permute.xlu0 %17246 }
 0x216   : > { %13873 = vmatpush3.msra.mxu1 %v929_v7  ;;  %16194 = vmatpush3.bf16.msra.mxu0 %v18332_v13  ;;  %v17249_v50 = vunpack.i.h.bf16 %v17247_v48  ;;  %v17248_v51 = vunpack.i.l.bf16 %v17247_v48  ;;  %v12050_v7 = vld [vmem:[%s21941_s2 + $0x118] sm:$0xff] }
 0x217   : > { %13875 = vmatmul.mubr.msk.f32.vlgmr.msra.gmra.mrb[0].mxu1 %vm930_vm5, %v11997_v14  ;;  %16189 = vmatprep.subr.bf16.mxu1 %v18109_v0  ;;  %v17252_v15 = vpop.permute.xlu1 %17251 }
 0x218   : > { %v17254_v16 = vunpack.i.h.bf16 %v17252_v15  ;;  %v17253_v18 = vunpack.i.l.bf16 %v17252_v15  ;;  %16191 = vmatpush3.bf16.msra.mxu1 %v16190_v63  ;;  %13938 = vmatprep.subr.mxu0 %v18111_v1  ;;  %v16196_v53 = vpack.c.bf16 %v17249_v50, %v17248_v51  ;;  %v12044_v63 = vld [vmem:[%s21941_s2 + $0xe8] sm:$0xff] }
 0x219   : > { %13877 = vmatprep.mubr.msk.f32.mxu1 %vm18110_vm0, %v18111_v1  ;;  %13905 = vmatprep.subr.mxu1 %v18111_v1  ;;  %v1382_v55 = vpop.permute.xlu0 %1381 }
 0x21a   : > { %v16199_v21 = vpack.c.bf16 %v17254_v16, %v17253_v18  ;;  %13939 = vmatpush3.msra.mxu0 %v18329_v12 }
 0x21b   : > { %13878 = vmatmul.mubr.msk.f32.gmra.mrb[2].mxu1 %vm930_vm5, %v11998_v19  ;;  %16198 = vmatprep.subr.bf16.mxu0 %v18109_v0  ;;  %v1544_v24 = vpop.permute.xlu1 %1543 }
 0x21c   : > { %13906 = vmatpush3.msra.mxu1 %v898_v2  ;;  %13941 = vmatmul.mubr.msk.f32.vlgmr.msra.gmra.mrb[6].mxu0 %vm930_vm5, %v12024_v20  ;;  %v12045_v2 = vld [vmem:[%s21941_s2 + $0xf0] sm:$0xff] }
 0x21d   : > { %16200 = vmatpush3.bf16.msra.mxu0 %v16199_v21  ;;  %13880 = vmatprep.mubr.msk.f32.mxu1 %vm18110_vm0, %v18111_v1 }
 0x21e   : > { %14004 = vmatprep.subr.mxu0 %v18111_v1  ;;  %16915 = vmatprep.subr.bf16.mxu1 %v18109_v0 }
 0x21f   : > { %13881 = vmatmul.mubr.msk.f32.gmra.mrb[4].mxu1 %vm930_vm5, %v11999_v22  ;;  %13943 = vmatprep.mubr.msk.f32.mxu0 %vm18110_vm0, %v18111_v1 }
 0x220   : > { %13883 = vmatprep.mubr.msk.f32.mxu1 %vm18110_vm0, %v18111_v1  ;;  %13944 = vmatmul.mubr.msk.f32.gmra.mrb[8].mxu0 %vm930_vm5, %v12025_v23 }
 0x221   : > { %14005 = vmatpush3.msra.mxu0 %v1544_v24  ;;  %14006 = vmatprep.mubr.msk.f32.mxu0 %vm18110_vm0, %v18111_v1 }
 0x222   : > { %16213 = vmatprep.subr.bf16.mxu0 %v18109_v0 }
 0x223   : > { %13884 = vmatmul.mubr.msk.f32.gmra.mrb[6].mxu1 %vm930_vm5, %v12000_v25 }
 0x224   : > { %13886 = vmatprep.mubr.msk.f32.mxu1 %vm18110_vm0, %v18111_v1  ;;  %14007 = vmatmul.mubr.msk.f32.vlgmr.msra.gmra.mrb[10].mxu0 %vm930_vm5, %v12060_v26 }
 0x225   : > { %14009 = vmatprep.mubr.msk.f32.mxu0 %vm18110_vm0, %v18111_v1 }
 0x227   : > { %13887 = vmatmul.mubr.msk.f32.gmra.mrb[8].mxu1 %vm930_vm5, %v12001_v27 }
 0x228   : > { %13889 = vmatprep.mubr.msk.f32.mxu1 %vm18110_vm0, %v18111_v1  ;;  %14010 = vmatmul.mubr.msk.f32.gmra.mrb[12].mxu0 %vm930_vm5, %v12061_v28 }
 0x229   : > { %14012 = vmatprep.mubr.msk.f32.mxu0 %vm18110_vm0, %v18111_v1 }
 0x22b   : > { %13890 = vmatmul.mubr.msk.f32.gmra.mrb[10].mxu1 %vm930_vm5, %v12002_v29 }
 0x22c   : > { %13892 = vmatprep.mubr.msk.f32.mxu1 %vm18110_vm0, %v18111_v1  ;;  %14013 = vmatmul.mubr.msk.f32.gmra.mrb[14].mxu0 %vm930_vm5, %v12062_v30 }
 0x22d   : > { %14015 = vmatprep.mubr.msk.f32.mxu0 %vm18110_vm0, %v18111_v1 }
 0x22f   : > { %13893 = vmatmul.mubr.msk.f32.gmra.mrb[12].mxu1 %vm930_vm5, %v12003_v31 }
 0x230   : > { %13895 = vmatprep.mubr.msk.f32.mxu1 %vm18110_vm0, %v18111_v1  ;;  %14016 = vmatmul.mubr.msk.f32.gmra.mrb[16].mxu0 %vm930_vm5, %v12063_v32 }
 0x231   : > { %14018 = vmatprep.mubr.msk.f32.mxu0 %vm18110_vm0, %v18111_v1 }
 0x233   : > { %13896 = vmatmul.mubr.msk.f32.gmra.mrb[14].mxu1 %vm930_vm5, %v12004_v33 }
 0x234   : > { %13898 = vmatprep.mubr.msk.f32.mxu1 %vm18110_vm0, %v18111_v1  ;;  %14019 = vmatmul.mubr.msk.f32.gmra.mrb[18].mxu0 %vm930_vm5, %v12064_v34 }
 0x235   : > { %14021 = vmatprep.mubr.msk.f32.mxu0 %vm18110_vm0, %v18111_v1 }
 0x237   : > { %13899 = vmatmul.mubr.msk.f32.gmra.mrb[16].mxu1 %vm930_vm5, %v12005_v35 }
 0x238   : > { %13907 = vmatprep.mubr.msk.f32.mxu1 %vm18110_vm0, %v18111_v1  ;;  %14022 = vmatmul.mubr.msk.f32.gmra.mrb[20].mxu0 %vm930_vm5, %v12065_v36 }
 0x239   : > { %14024 = vmatprep.mubr.msk.f32.mxu0 %vm18110_vm0, %v18111_v1 }
 0x23b   : > { %13908 = vmatmul.mubr.msk.f32.vlgmr.msra.gmra.mrb[18].mxu1 %vm930_vm5, %v905_v37 }
 0x23c   : > { %16917 = vmatpush3.bf16.msra.mxu1 %v18332_v13  ;;  %13910 = vmatprep.mubr.msk.f32.mxu1 %vm18110_vm0, %v18111_v1 }
 0x23d   : > { %16916 = vmatprep.subr.mxu1 %v18111_v1  ;;  %14025 = vmatmul.mubr.msk.f32.gmra.mrb[22].mxu0 %vm930_vm5, %v12066_v38 }
 0x23e   : > { %14027 = vmatprep.mubr.msk.f32.mxu0 %vm18110_vm0, %v18111_v1 }
 0x23f   : > { %13911 = vmatmul.mubr.msk.f32.gmra.mrb[20].mxu1 %vm930_vm5, %v906_v39 }
 0x240   : > { %16918 = vmatpush3.msra.mxu1 %v18329_v12  ;;  %13913 = vmatprep.mubr.msk.f32.mxu1 %vm18110_vm0, %v18111_v1 }
 0x241   : > { %16195 = vmatprep.subr.bf16.mxu1 %v18109_v0  ;;  %14028 = vmatmul.mubr.msk.f32.gmra.mrb[24].mxu0 %vm930_vm5, %v12067_v40 }
 0x242   : > { %14030 = vmatprep.mubr.msk.f32.mxu0 %vm18110_vm0, %v18111_v1 }
 0x243   : > { %13914 = vmatmul.mubr.msk.f32.gmra.mrb[22].mxu1 %vm930_vm5, %v907_v41 }
 0x244   : > { %13916 = vmatprep.mubr.msk.f32.mxu1 %vm18110_vm0, %v18111_v1 }
 0x245   : > { %14031 = vmatmul.mubr.msk.f32.gmra.mrb[26].mxu0 %vm930_vm5, %v12068_v42 }
 0x246   : > { %14116 = vmatprep.mubr.msk.f32.mxu0 %vm18110_vm0, %v18111_v1 }
 0x247   : > { %13917 = vmatmul.mubr.msk.f32.gmra.mrb[24].mxu1 %vm930_vm5, %v908_v43 }
 0x248   : > { %13919 = vmatprep.mubr.msk.f32.mxu1 %vm18110_vm0, %v18111_v1 }
 0x24b   : > { %13920 = vmatmul.mubr.msk.f32.gmra.mrb[26].mxu1 %vm930_vm5, %v909_v44 }
 0x24c   : > { %13922 = vmatprep.mubr.msk.f32.mxu1 %vm18110_vm0, %v18111_v1 }
 0x24f   : > { %13923 = vmatmul.mubr.msk.f32.gmra.mrb[28].mxu1 %vm930_vm5, %v910_v45 }
 0x250   : > { %13925 = vmatprep.mubr.msk.f32.mxu1 %vm18110_vm0, %v18111_v1 }
 0x253   : > { %13926 = vmatmul.mubr.msk.f32.gmra.mrb[30].mxu1 %vm930_vm5, %v911_v46 }
 0x254   : > { %13928 = vmatprep.mubr.msk.f32.mxu1 %vm18110_vm0, %v18111_v1 }
 0x257   : > { %13929 = vmatmul.mubr.msk.f32.gmra.mrb[32].mxu1 %vm930_vm5, %v912_v47 }
 0x258   : > { %13931 = vmatprep.mubr.msk.f32.mxu1 %vm18110_vm0, %v18111_v1 }
 0x25b   : > { %13932 = vmatmul.mubr.msk.f32.gmra.mrb[34].mxu1 %vm930_vm5, %v913_v49 }
 0x25c   : > { %13946 = vmatprep.mubr.msk.f32.mxu1 %vm18110_vm0, %v18111_v1 }
 0x25f   : > { %13947 = vmatmul.mubr.msk.f32.vlgmr.msra.gmra.mrb[36].mxu1 %vm930_vm5, %v12026_v52 }
 0x260   : > { %16197 = vmatpush3.bf16.msra.mxu1 %v16196_v53  ;;  %13949 = vmatprep.mubr.msk.f32.mxu1 %vm18110_vm0, %v18111_v1 }
 0x261   : > { %13971 = vmatprep.subr.mxu1 %v18111_v1 }
 0x263   : > { %13950 = vmatmul.mubr.msk.f32.gmra.mrb[38].mxu1 %vm930_vm5, %v12027_v54 }
 0x264   : > { %13972 = vmatpush3.msra.mxu1 %v1382_v55  ;;  %13952 = vmatprep.mubr.msk.f32.mxu1 %vm18110_vm0, %v18111_v1 }
 0x265   : > { %16201 = vmatprep.subr.bf16.mxu1 %v18109_v0 }
 0x267   : > { %13953 = vmatmul.mubr.msk.f32.gmra.mrb[40].mxu1 %vm930_vm5, %v12028_v56 }
 0x268   : > { %13955 = vmatprep.mubr.msk.f32.mxu1 %vm18110_vm0, %v18111_v1 }
 0x26b   : > { %13956 = vmatmul.mubr.msk.f32.gmra.mrb[42].mxu1 %vm930_vm5, %v12029_v57 }
 0x26c   : > { %13958 = vmatprep.mubr.msk.f32.mxu1 %vm18110_vm0, %v18111_v1 }
 0x26f   : > { %13959 = vmatmul.mubr.msk.f32.gmra.mrb[44].mxu1 %vm930_vm5, %v12030_v58 }
 0x270   : > { %13961 = vmatprep.mubr.msk.f32.mxu1 %vm18110_vm0, %v18111_v1 }
 0x273   : > { %13962 = vmatmul.mubr.msk.f32.gmra.mrb[46].mxu1 %vm930_vm5, %v12031_v59 }
 0x274   : > { %13964 = vmatprep.mubr.msk.f32.mxu1 %vm18110_vm0, %v18111_v1 }
 0x277   : > { %13965 = vmatmul.mubr.msk.f32.gmra.mrb[48].mxu1 %vm930_vm5, %v12032_v60 }
 0x278   : > { %13973 = vmatprep.mubr.msk.f32.mxu1 %vm18110_vm0, %v18111_v1 }
 0x27b   : > { %13974 = vmatmul.mubr.msk.f32.vlgmr.msra.gmra.mrb[50].mxu1 %vm930_vm5, %v12042_v61 }
 0x27c   : > { %13976 = vmatprep.mubr.msk.f32.mxu1 %vm18110_vm0, %v18111_v1 }
 0x27f   : > { %13977 = vmatmul.mubr.msk.f32.gmra.mrb[52].mxu1 %vm930_vm5, %v12043_v62 }
 0x280   : > { %13979 = vmatprep.mubr.msk.f32.mxu1 %vm18110_vm0, %v18111_v1 }
 0x283   : > { %13980 = vmatmul.mubr.msk.f32.gmra.mrb[54].mxu1 %vm930_vm5, %v12044_v63 }
 0x284   : > { %13982 = vmatprep.mubr.msk.f32.mxu1 %vm18110_vm0, %v18111_v1 }
 0x287   : > { %13983 = vmatmul.mubr.msk.f32.gmra.mrb[56].mxu1 %vm930_vm5, %v12045_v2 }
 0x288   : > { %13985 = vmatprep.mubr.msk.f32.mxu1 %vm18110_vm0, %v18111_v1 }
 0x28b   : > { %13986 = vmatmul.mubr.msk.f32.gmra.mrb[58].mxu1 %vm930_vm5, %v12046_v3 }
 0x28c   : > { %13988 = vmatprep.mubr.msk.f32.mxu1 %vm18110_vm0, %v18111_v1 }
 0x28f   : > { %13989 = vmatmul.mubr.msk.f32.gmra.mrb[60].mxu1 %vm930_vm5, %v12047_v4 }
 0x290   : > { %13991 = vmatprep.mubr.msk.f32.mxu1 %vm18110_vm0, %v18111_v1 }
 0x293   : > { %13992 = vmatmul.mubr.msk.f32.gmra.mrb[62].mxu1 %vm930_vm5, %v12048_v5 }
 0x294   : > { %13994 = vmatprep.mubr.msk.f32.mxu1 %vm18110_vm0, %v18111_v1 }
 0x297   : > { %13995 = vmatmul.mubr.msk.f32.gmra.mrb[64].mxu1 %vm930_vm5, %v12049_v6 }
 0x298   : > { %13997 = vmatprep.mubr.msk.f32.mxu1 %vm18110_vm0, %v18111_v1 }
 0x29b   : > { %13998 = vmatmul.mubr.msk.f32.gmra.mrb[66].mxu1 %vm930_vm5, %v12050_v7 }
 0x29c   : > { %14051 = vmatprep.mubr.msk.f32.mxu1 %vm18110_vm0, %v18111_v1 }
 0x2ea   : > { %v1024_v8 = vpop.f32.mrb[0].mxu1 }
 0x2eb   : > { %v13876_v9 = vpop.f32.mrb[1].mxu1 }
 0x2ee   : > { %v1029_v10 = vpop.f32.mrb[2].mxu1 }
 0x2ef   : > { %v13879_v11 = vpop.f32.mrb[3].mxu1  ;;  %v1314_v12 = vpop.f32.mrb[6].mxu0 }
 0x2f0   : > { %v13942_v13 = vpop.f32.mrb[7].mxu0 }
 0x2f2   : > { %v1034_v14 = vpop.f32.mrb[4].mxu1 }
 0x2f3   : > { %v13882_v15 = vpop.f32.mrb[5].mxu1  ;;  %v1319_v16 = vpop.f32.mrb[8].mxu0 }
 0x2f4   : > { %v13945_v18 = vpop.f32.mrb[9].mxu0 }
 0x2f6   : > { %v1039_v19 = vpop.f32.mrb[6].mxu1 }
 0x2f7   : > { %v13885_v20 = vpop.f32.mrb[7].mxu1  ;;  %v18619_v21 = vpop.f32.mrb[10].mxu0 }
 0x2f8   : > { %v14008_v22 = vpop.f32.mrb[11].mxu0 }
 0x2fa   : > { %v1044_v23 = vpop.f32.mrb[8].mxu1 }
 0x2fb   : > { %v13888_v24 = vpop.f32.mrb[9].mxu1  ;;  %v18621_v25 = vpop.f32.mrb[12].mxu0 }
 0x2fc   : > { %v14011_v26 = vpop.f32.mrb[13].mxu0 }
 0x2fe   : > { %v1049_v27 = vpop.f32.mrb[10].mxu1 }
 0x2ff   : > { %v13891_v28 = vpop.f32.mrb[11].mxu1  ;;  %v18623_v29 = vpop.f32.mrb[14].mxu0 }
 0x300   : > { %v14014_v30 = vpop.f32.mrb[15].mxu0 }
 0x302   : > { %v1054_v31 = vpop.f32.mrb[12].mxu1 }
 0x303   : > { %v13894_v32 = vpop.f32.mrb[13].mxu1  ;;  %v18625_v33 = vpop.f32.mrb[16].mxu0 }
 0x304   : > { %v14017_v34 = vpop.f32.mrb[17].mxu0 }
 0x306   : > { %v1059_v35 = vpop.f32.mrb[14].mxu1 }
 0x307   : > { %v13897_v36 = vpop.f32.mrb[15].mxu1  ;;  %v18627_v37 = vpop.f32.mrb[18].mxu0 }
 0x308   : > { %v14020_v38 = vpop.f32.mrb[19].mxu0 }
 0x30a   : > { %v1064_v39 = vpop.f32.mrb[16].mxu1 }
 0x30b   : > { %v13900_v40 = vpop.f32.mrb[17].mxu1  ;;  %v18629_v41 = vpop.f32.mrb[20].mxu0 }
 0x30c   : > { %v14023_v42 = vpop.f32.mrb[21].mxu0 }
 0x30e   : > { %v1161_v43 = vpop.f32.mrb[18].mxu1 }
 0x30f   : > { %v1162_v44 = vadd.f32 %v1161_v43, %v1024_v8  ;;  %v13909_v45 = vpop.f32.mrb[19].mxu1 }
 0x310   : > { %v18631_v46 = vpop.f32.mrb[22].mxu0 }
 0x311   : > { %v1358_v47 = vadd.f32 %v1314_v12, %v1162_v44  ;;  %v14026_v48 = vpop.f32.mrb[23].mxu0 }
 0x312   : > { %v1166_v49 = vpop.f32.mrb[20].mxu1 }
 0x313   : > { %v1167_v50 = vadd.f32 %v1166_v49, %v1029_v10  ;;  %v13912_v51 = vpop.f32.mrb[21].mxu1 }
 0x314   : > { %v18633_v52 = vpop.f32.mrb[24].mxu0 }
 0x315   : > { %v1359_v53 = vadd.f32 %v1319_v16, %v1167_v50  ;;  %v14029_v54 = vpop.f32.mrb[25].mxu0  ;;  %v368_v50 = vld [vmem:[%s21942_s3] sm:$0xff] }
 0x316   : > { %v1171_v55 = vpop.f32.mrb[22].mxu1 }
 0x317   : > { %v1172_v56 = vadd.f32 %v1171_v55, %v1034_v14  ;;  %v13915_v57 = vpop.f32.mrb[23].mxu1 }
 0x318   : > { %v18635_v58 = vpop.f32.mrb[26].mxu0 }
 0x319   : > { %v14032_v59 = vpop.f32.mrb[27].mxu0 }
 0x31a   : > { %v1176_v60 = vpop.f32.mrb[24].mxu1 }
 0x31b   : > { %v1177_v61 = vadd.f32 %v1176_v60, %v1039_v19  ;;  %v13918_v62 = vpop.f32.mrb[25].mxu1 }
 0x31e   : > { %v1181_v63 = vpop.f32.mrb[26].mxu1 }
 0x31f   : > { %v1182_v2 = vadd.f32 %v1181_v63, %v1044_v23  ;;  %v13921_v3 = vpop.f32.mrb[27].mxu1 }
 0x322   : > { %v1186_v4 = vpop.f32.mrb[28].mxu1 }
 0x323   : > { %v1187_v5 = vadd.f32 %v1186_v4, %v1049_v27  ;;  %v13924_v6 = vpop.f32.mrb[29].mxu1 }
 0x326   : > { %v1191_v7 = vpop.f32.mrb[30].mxu1 }
 0x327   : > { %v1192_v8 = vadd.f32 %v1191_v7, %v1054_v31  ;;  %v13927_v9 = vpop.f32.mrb[31].mxu1 }
 0x32a   : > { %v1196_v10 = vpop.f32.mrb[32].mxu1 }
 0x32b   : > { %v1197_v11 = vadd.f32 %v1196_v10, %v1059_v35  ;;  %v13930_v12 = vpop.f32.mrb[33].mxu1 }
 0x32e   : > { %v1201_v13 = vpop.f32.mrb[34].mxu1 }
 0x32f   : > { %v1202_v14 = vadd.f32 %v1201_v13, %v1064_v39  ;;  %v13933_v15 = vpop.f32.mrb[35].mxu1 }
 0x332   : > { %v1324_v16 = vpop.f32.mrb[36].mxu1 }
 0x333   : > { %v1360_v18 = vadd.f32 %v1324_v16, %v1172_v56  ;;  %v13948_v20 = vpop.f32.mrb[37].mxu1  ;;  %v369_v56 = vld [vmem:[%s21942_s3 + $0x8] sm:$0xff]  ;;  %v372_v16 = vld [vmem:[%s21942_s3 + $0x20] sm:$0xff] }
 0x336   : > { %v1329_v19 = vpop.f32.mrb[38].mxu1 }
 0x337   : > { %v1361_v22 = vadd.f32 %v1329_v19, %v1177_v61  ;;  %v13951_v24 = vpop.f32.mrb[39].mxu1 }
 0x33a   : > { %v1334_v23 = vpop.f32.mrb[40].mxu1 }
 0x33b   : > { %v1362_v26 = vadd.f32 %v1334_v23, %v1182_v2  ;;  %v13954_v28 = vpop.f32.mrb[41].mxu1 }
 0x33e   : > { %v1339_v27 = vpop.f32.mrb[42].mxu1 }
 0x33f   : > { %v1363_v30 = vadd.f32 %v1339_v27, %v1187_v5  ;;  %v13957_v32 = vpop.f32.mrb[43].mxu1  ;;  %v373_v27 = vld [vmem:[%s21942_s3 + $0x28] sm:$0xff] }
 0x342   : > { %v1344_v31 = vpop.f32.mrb[44].mxu1 }
 0x343   : > { %v1364_v34 = vadd.f32 %v1344_v31, %v1192_v8  ;;  %v13960_v36 = vpop.f32.mrb[45].mxu1  ;;  %v371_v8 = vld [vmem:[%s21942_s3 + $0x18] sm:$0xff] }
 0x346   : > { %v1349_v35 = vpop.f32.mrb[46].mxu1 }
 0x347   : > { %v18637_v38 = vadd.f32 %v1349_v35, %v1197_v11  ;;  %v13963_v39 = vpop.f32.mrb[47].mxu1 }
 0x34a   : > { %v1354_v40 = vpop.f32.mrb[48].mxu1 }
 0x34b   : > { %v18639_v42 = vadd.f32 %v1354_v40, %v1202_v14  ;;  %v13966_v43 = vpop.f32.mrb[49].mxu1  ;;  %v374_v40 = vld [vmem:[%s21942_s3 + $0x30] sm:$0xff] }
 0x34e   : > { %v1476_v44 = vpop.f32.mrb[50].mxu1 }
 0x34f   : > { %v1520_v45 = vadd.f32 %v1476_v44, %v1358_v47  ;;  %v13975_v48 = vpop.f32.mrb[51].mxu1 }
 0x351   : > { %v1682_v49 = vadd.f32 %v18619_v21, %v1520_v45  ;;  %v370_v21 = vld [vmem:[%s21942_s3 + $0x10] sm:$0xff] }
 0x352   : > { %v1481_v51 = vpop.f32.mrb[52].mxu1 }
 0x353   : > { %v1521_v54 = vadd.f32 %v1481_v51, %v1359_v53  ;;  %v13978_v55 = vpop.f32.mrb[53].mxu1  ;;  %v1691_v57 = vadd.f32 %v1682_v49, %v368_v50 }
 0x355   : > { %v1683_v59 = vadd.f32 %v18621_v25, %v1521_v54  ;;  %v1710_v63 = vrot.slane %v1691_v57, 1  ;;  %v375_v54 = vld [vmem:[%s21942_s3 + $0x38] sm:$0xff] }
 0x356   : > { %v1486_v60 = vpop.f32.mrb[54].mxu1 }
 0x357   : > { %v1692_v61 = vadd.f32 %v1683_v59, %v369_v56  ;;  %v1522_v47 = vadd.f32 %v1486_v60, %v1360_v18  ;;  %v13981_v62 = vpop.f32.mrb[55].mxu1 }
 0x359   : > { %v1711_v2 = vrot.slane %v1692_v61, 1  ;;  %v1684_v53 = vadd.f32 %v18623_v29, %v1522_v47  ;;  %v376_v47 = vld [vmem:[%s21942_s3 + $0x40] sm:$0xff] }
 0x35a   : > { %v1491_v3 = vpop.f32.mrb[56].mxu1 }
 0x35b   : > { %v1693_v4 = vadd.f32 %v1684_v53, %v370_v21  ;;  %v1523_v5 = vadd.f32 %v1491_v3, %v1361_v22  ;;  %v13984_v6 = vpop.f32.mrb[57].mxu1  ;;  %v1712_v7 = vsel %vm1709_vm6, %v1710_v63, %v1711_v2 }
 0x35c   : > { %v18654_v25 = vmax.f32 %v1691_v57, %v1712_v7  ;;  %v352_v7 = vld [vmem:[%s21944_s5] sm:$0xff] }
 0x35d   : > { %v1713_v9 = vrot.slane %v1693_v4, 1  ;;  %v1685_v10 = vadd.f32 %v18625_v33, %v1523_v5 }
 0x35e   : > { %v1496_v11 = vpop.f32.mrb[58].mxu1 }
 0x35f   : > { %v1524_v12 = vadd.f32 %v1496_v11, %v1362_v26  ;;  %v13987_v13 = vpop.f32.mrb[59].mxu1  ;;  %v1714_v29 = vsel %vm1709_vm6, %v1711_v2, %v1713_v9  ;;  %v1694_v14 = vadd.f32 %v1685_v10, %v371_v8  ;;  %v353_v8 = vld [vmem:[%s21944_s5 + $0x8] sm:$0xff]  ;;  %v355_v11 = vld [vmem:[%s21944_s5 + $0x18] sm:$0xff] }
 0x360   : > { %v18661_v15 = vmax.f32 %v1692_v61, %v1714_v29  ;;  %v18728_v10 = vpack.c.bf16 %v353_v8, %v352_v7  ;;  %v356_v13 = vld [vmem:[%s21944_s5 + $0x20] sm:$0xff]  ;;  %v357_v29 = vld [vmem:[%s21944_s5 + $0x28] sm:$0xff] }
 0x361   : > { %v1686_v18 = vadd.f32 %v18627_v37, %v1524_v12  ;;  %v1715_v20 = vrot.slane %v1694_v14, 1  ;;  %v341_v8 = vld [vmem:[%s21943_s4] sm:$0xff] }
 0x362   : > { %v1501_v19 = vpop.f32.mrb[60].mxu1  ;;  %v17255_v22 = vpack.i.bf16 %v18661_v15, %v18654_v25  ;;  %16215 = vmatpush3.bf16.msra.mxu0 %v18728_v10 }
 0x363   : > { %v1525_v33 = vadd.f32 %v1501_v19, %v1363_v30  ;;  %v13990_v24 = vpop.f32.mrb[61].mxu1  ;;  %v1695_v23 = vadd.f32 %v1686_v18, %v372_v16  ;;  %v1716_v26 = vsel %vm1709_vm6, %v1713_v9, %v1715_v20  ;;  %v354_v9 = vld [vmem:[%s21944_s5 + $0x10] sm:$0xff]  ;;  %16216 = vmatprep.subr.bf16.mxu0 %v18109_v0  ;;  %v359_v18 = vld [vmem:[%s21944_s5 + $0x38] sm:$0xff]  ;;  %v360_v19 = vld [vmem:[%s21944_s5 + $0x40] sm:$0xff] }
 0x364   : > { %17256 = vrot.lane.b32.xlu0 %v17255_v22, %s18112_s16  ;;  %v18671_v28 = vmax.f32 %v1693_v4, %v1716_v26  ;;  %v18734_v12 = vpack.c.bf16 %v355_v11, %v354_v9  ;;  %v358_v16 = vld [vmem:[%s21944_s5 + $0x30] sm:$0xff]  ;;  %v361_v22 = vld [vmem:[%s21944_s5 + $0x48] sm:$0xff]  ;;  %v345_v9 = vld [vmem:[%s21943_s4 + $0x20] sm:$0xff] }
 0x365   : > { %v1717_v32 = vrot.slane %v1695_v23, 1  ;;  %v1687_v37 = vadd.f32 %v18629_v41, %v1525_v33  ;;  %v18764_v33 = vpack.c.bf16 %v361_v22, %v360_v19  ;;  %v362_v24 = vld [vmem:[%s21944_s5 + $0x50] sm:$0xff]  ;;  %v346_v11 = vld [vmem:[%s21943_s4 + $0x28] sm:$0xff] }
 0x366   : > { %v1506_v31 = vpop.f32.mrb[62].mxu1  ;;  %16218 = vmatpush3.bf16.msra.mxu0 %v18734_v12  ;;  %v351_v19 = vld [vmem:[%s21943_s4 + $0x50] sm:$0xf] }
 0x367   : > { %v13993_v36 = vpop.f32.mrb[63].mxu1  ;;  %v1526_v35 = vadd.f32 %v1506_v31, %v1364_v34  ;;  %v1718_v30 = vsel %vm1709_vm6, %v1715_v20, %v1717_v32  ;;  %v1696_v39 = vadd.f32 %v1687_v37, %v373_v27  ;;  %16219 = vmatprep.subr.bf16.mxu0 %v18109_v0  ;;  %v18754_v20 = vpack.c.bf16 %v359_v18, %v358_v16  ;;  %v364_v27 = vld [vmem:[%s21944_s5 + $0x60] sm:$0xff]  ;;  %v366_v31 = vld [vmem:[%s21944_s5 + $0x70] sm:$0xff]  ;;  %v350_v18 = vld [vmem:[%s21943_s4 + $0x48] sm:$0xff] }
 0x368   : > { %v18681_v43 = vmax.f32 %v1694_v14, %v1718_v30  ;;  %v18744_v14 = vpack.c.bf16 %v357_v29, %v356_v13  ;;  %v367_v36 = vld [vmem:[%s21944_s5 + $0x78] sm:$0xff]  ;;  %v347_v13 = vld [vmem:[%s21943_s4 + $0x30] sm:$0xff]  ;;  %v349_v16 = vld [vmem:[%s21943_s4 + $0x40] sm:$0xff] }
 0x369   : > { %v1688_v44 = vadd.f32 %v18631_v46, %v1526_v35  ;;  %v1719_v45 = vrot.slane %v1696_v39, 1  ;;  %v18794_v35 = vpack.c.bf16 %v367_v36, %v366_v31  ;;  %v348_v29 = vld [vmem:[%s21943_s4 + $0x38] sm:$0xff] }
 0x36a   : > { %v1511_v48 = vpop.f32.mrb[64].mxu1  ;;  %v17260_v49 = vpack.i.bf16 %v18681_v43, %v18671_v28  ;;  %16221 = vmatpush3.bf16.msra.mxu0 %v18744_v14 }
 0x36b   : > { %v1697_v41 = vadd.f32 %v1688_v44, %v374_v40  ;;  %v13996_v50 = vpop.f32.mrb[65].mxu1  ;;  %v1527_v34 = vadd.f32 %v1511_v48, %v18637_v38  ;;  %v1720_v51 = vsel %vm1709_vm6, %v1717_v32, %v1719_v45  ;;  %16222 = vmatprep.subr.bf16.mxu0 %v18109_v0  ;;  %v365_v32 = vld [vmem:[%s21944_s5 + $0x68] sm:$0xff] }
 0x36c   : > { %17261 = vrot.lane.b32.xlu1 %v17260_v49, %s18112_s16  ;;  %v18692_v55 = vmax.f32 %v1695_v23, %v1720_v51  ;;  %v363_v23 = vld [vmem:[%s21944_s5 + $0x58] sm:$0xff]  ;;  %v18784_v37 = vpack.c.bf16 %v365_v32, %v364_v27 }
 0x36d   : > { %v1721_v46 = vrot.slane %v1697_v41, 1  ;;  %v1689_v56 = vadd.f32 %v18633_v52, %v1527_v34  ;;  %v18774_v26 = vpack.c.bf16 %v363_v23, %v362_v24 }
 0x36e   : > { %v1516_v57 = vpop.f32.mrb[66].mxu1  ;;  %16224 = vmatpush3.bf16.msra.mxu0 %v18754_v20 }
 0x36f   : > { %v1698_v59 = vadd.f32 %v1689_v56, %v375_v54  ;;  %v13999_v60 = vpop.f32.mrb[67].mxu1  ;;  %v1528_v61 = vadd.f32 %v1516_v57, %v18639_v42  ;;  %v1722_v38 = vsel %vm1709_vm6, %v1719_v45, %v1721_v46  ;;  %16225 = vmatprep.subr.bf16.mxu0 %v18109_v0 }
 0x370   : > { %v18700_v62 = vmax.f32 %v1696_v39, %v1722_v38 }
 0x371   : > { %v1723_v21 = vrot.slane %v1698_v59, 1  ;;  %v1690_v63 = vadd.f32 %v18635_v58, %v1528_v61 }
 0x372   : > { %v17265_v2 = vpack.i.bf16 %v18700_v62, %v18692_v55  ;;  %16227 = vmatpush3.bf16.msra.mxu0 %v18764_v33 }
 0x373   : > { %v1699_v52 = vadd.f32 %v1690_v63, %v376_v47  ;;  %v1724_v53 = vsel %vm1709_vm6, %v1721_v46, %v1723_v21  ;;  %16228 = vmatprep.subr.bf16.mxu0 %v18109_v0 }
 0x374   : > { %17266 = vrot.lane.b32.xlu0 %v17265_v2, %s18112_s16  ;;  %v18707_v42 = vmax.f32 %v1697_v41, %v1724_v53 }
 0x375   : > { %v1725_v3 = vrot.slane %v1699_v52, 1 }
 0x376   : > { %16230 = vmatpush3.bf16.msra.mxu0 %v18774_v26 }
 0x377   : > { %v18709_v4 = vmax.f32 %v1699_v52, %v1725_v3  ;;  %v1726_v5 = vsel %vm1709_vm6, %v1723_v21, %v1725_v3  ;;  %16231 = vmatprep.subr.bf16.mxu0 %v18109_v0 }
 0x378   : > { %v18712_v6 = vmax.f32 %v1698_v59, %v1726_v5 }
 0x379   : > { %1761 = vrot.lane.b32.xlu0 %v18709_v4, %s18112_s16 }
 0x37a   : > { %v17270_v58 = vpack.i.bf16 %v18712_v6, %v18707_v42  ;;  %16233 = vmatpush3.bf16.msra.mxu0 %v18784_v37 }
 0x37b   : > { %16234 = vmatprep.subr.bf16.mxu0 %v18109_v0 }
 0x37c   : > { %17271 = vrot.lane.b32.xlu1 %v17270_v58, %s18112_s16 }
 0x37e   : > { %16236 = vmatpush3.bf16.msra.mxu0 %v18794_v35 }
 0x3d6   : > { %v17257_v30 = vpop.permute.xlu0 %17256 }
 0x3d7   : > { %v17259_v39 = vunpack.i.h.bf16 %v17257_v30  ;;  %v17258_v40 = vunpack.i.l.bf16 %v17257_v30 }
 0x3d9   : > { %v1764_v44 = vmax.f32 %v18661_v15, %v17259_v39  ;;  %v1763_v45 = vmax.f32 %v18654_v25, %v17258_v40 }
 0x3db   : > { %v1773_v48 = vmax.f32 %v1764_v44, 0.0  ;;  %v1772_v49 = vmax.f32 %v1763_v45, 0.0 }
 0x3dd   : > { %v16202_v41 = vpack.c.bf16 %v1773_v48, %v1772_v49 }
 0x3de   : > { %v17262_v50 = vpop.permute.xlu1 %17261 }
 0x3df   : > { %v17264_v34 = vunpack.i.h.bf16 %v17262_v50  ;;  %v17263_v51 = vunpack.i.l.bf16 %v17262_v50  ;;  %16203 = vmatpush3.bf16.msra.mxu1 %v16202_v41 }
 0x3e0   : > { %16204 = vmatprep.subr.bf16.mxu1 %v18109_v0 }
 0x3e1   : > { %v1766_v54 = vmax.f32 %v18681_v43, %v17264_v34  ;;  %v1765_v46 = vmax.f32 %v18671_v28, %v17263_v51 }
 0x3e3   : > { %v1775_v56 = vmax.f32 %v1766_v54, 0.0  ;;  %v1774_v57 = vmax.f32 %v1765_v46, 0.0 }
 0x3e5   : > { %v16205_v59 = vpack.c.bf16 %v1775_v56, %v1774_v57 }
 0x3e6   : > { %v17267_v60 = vpop.permute.xlu0 %17266 }
 0x3e7   : > { %v17269_v15 = vunpack.i.h.bf16 %v17267_v60  ;;  %v17268_v61 = vunpack.i.l.bf16 %v17267_v60  ;;  %16206 = vmatpush3.bf16.msra.mxu1 %v16205_v59 }
 0x3e8   : > { %16207 = vmatprep.subr.bf16.mxu1 %v18109_v0 }
 0x3e9   : > { %v1768_v25 = vmax.f32 %v18700_v62, %v17269_v15  ;;  %v1767_v38 = vmax.f32 %v18692_v55, %v17268_v61 }
 0x3eb   : > { %v1777_v47 = vmax.f32 %v1768_v25, 0.0  ;;  %v1776_v21 = vmax.f32 %v1767_v38, 0.0  ;;  %v1762_v3 = vpop.permute.xlu0 %1761 }
 0x3ec   : > { %v1771_v62 = vmax.f32 %v18709_v4, %v1762_v3  ;;  %v343_v4 = vld [vmem:[%s21943_s4 + $0x10] sm:$0xff] }
 0x3ed   : > { %v16208_v63 = vpack.c.bf16 %v1777_v47, %v1776_v21 }
 0x3ee   : > { %v17272_v2 = vpop.permute.xlu1 %17271  ;;  %v1780_v55 = vmax.f32 %v1771_v62, 0.0 }
 0x3ef   : > { %v17274_v43 = vunpack.i.h.bf16 %v17272_v2  ;;  %v17273_v52 = vunpack.i.l.bf16 %v17272_v2  ;;  %16209 = vmatpush3.bf16.msra.mxu1 %v16208_v63 }
 0x3f0   : > { %16210 = vmatprep.subr.bf16.mxu1 %v18109_v0 }
 0x3f1   : > { %v1770_v28 = vmax.f32 %v18712_v6, %v17274_v43  ;;  %v1769_v53 = vmax.f32 %v18707_v42, %v17273_v52  ;;  %v342_v42 = vld [vmem:[%s21943_s4 + $0x8] sm:$0xff]  ;;  %v344_v6 = vld [vmem:[%s21943_s4 + $0x18] sm:$0xff] }
 0x3f3   : > { %v1779_v5 = vmax.f32 %v1770_v28, 0.0  ;;  %v1778_v58 = vmax.f32 %v1769_v53, 0.0 }
 0x3f5   : > { %v16211_v7 = vpack.c.bf16 %v1779_v5, %v1778_v58 }
 0x3f7   : > { %16212 = vmatpush3.bf16.msra.mxu1 %v16211_v7 }
 0x3f8   : > { %14049 = vmatprep.subr.mxu1 %v18111_v1 }
 0x3fb   : > { %14050 = vmatpush3.msk.msra.mxu1 %vm1709_vm6, %v1780_v55 }
 0x3fc   : > { %14052 = vmatmul.mubr.msk.f32.vlgmr.msra.gmra.mrb[68].mxu1 %vm1781_vm7, %v341_v8  ;;  %16237 = vmatprep.subr.bf16.mxu1 %v18109_v0 }
 0x3fd   : > { %14054 = vmatprep.mubr.msk.f32.mxu1 %vm18110_vm0, %v18111_v1 }
 0x400   : > { %14055 = vmatmul.mubr.msk.f32.gmra.mrb[70].mxu1 %vm1781_vm7, %v342_v42 }
 0x401   : > { %14057 = vmatprep.mubr.msk.f32.mxu1 %vm18110_vm0, %v18111_v1 }
 0x404   : > { %14058 = vmatmul.mubr.msk.f32.gmra.mrb[72].mxu1 %vm1781_vm7, %v343_v4 }
 0x405   : > { %14060 = vmatprep.mubr.msk.f32.mxu1 %vm18110_vm0, %v18111_v1 }
 0x408   : > { %14061 = vmatmul.mubr.msk.f32.gmra.mrb[74].mxu1 %vm1781_vm7, %v344_v6 }
 0x409   : > { %14063 = vmatprep.mubr.msk.f32.mxu1 %vm18110_vm0, %v18111_v1 }
 0x40c   : > { %14064 = vmatmul.mubr.msk.f32.gmra.mrb[76].mxu1 %vm1781_vm7, %v345_v9 }
 0x40d   : > { %14066 = vmatprep.mubr.msk.f32.mxu1 %vm18110_vm0, %v18111_v1 }
 0x410   : > { %14067 = vmatmul.mubr.msk.f32.gmra.mrb[78].mxu1 %vm1781_vm7, %v346_v11 }
 0x411   : > { %14069 = vmatprep.mubr.msk.f32.mxu1 %vm18110_vm0, %v18111_v1 }
 0x414   : > { %14070 = vmatmul.mubr.msk.f32.gmra.mrb[80].mxu1 %vm1781_vm7, %v347_v13 }
 0x415   : > { %14072 = vmatprep.mubr.msk.f32.mxu1 %vm18110_vm0, %v18111_v1 }
 0x418   : > { %14073 = vmatmul.mubr.msk.f32.gmra.mrb[82].mxu1 %vm1781_vm7, %v348_v29 }
 0x419   : > { %14075 = vmatprep.mubr.msk.f32.mxu1 %vm18110_vm0, %v18111_v1 }
 0x41c   : > { %14076 = vmatmul.mubr.msk.f32.gmra.mrb[84].mxu1 %vm1781_vm7, %v349_v16 }
 0x41d   : > { %14078 = vmatprep.mubr.msk.f32.mxu1 %vm18110_vm0, %v18111_v1 }
 0x420   : > { %14079 = vmatmul.mubr.msk.f32.gmra.mrb[86].mxu1 %vm1781_vm7, %v350_v18 }
 0x421   : > { %14081 = vmatprep.mubr.msk.f32.mxu1 %vm18110_vm0, %v18111_v1 }
 0x424   : > { %14082 = vmatmul.mubr.msk.f32.gmra.mrb[88].mxu1 %vm1781_vm7, %v351_v19 }
 0x425   : > { %14171 = vmatprep.mubr.msk.f32.mxu1 %vm18110_vm0, %v18111_v1 }
 0x4cf   : > { %v1884_v22 = vpop.f32.mrb[68].mxu1 }
 0x4d0   : > { %v14053_v24 = vpop.f32.mrb[69].mxu1  ;;  %14117 = vmatmul.mubr.f32.vlgmr.msra.gmra.mrb[28].mxu0 %v1884_v22 }
 0x4d1   : > { %14119 = vmatprep.mubr.msk.f32.mxu0 %vm18110_vm0, %v18111_v1 }
 0x4d3   : > { %v1889_v23 = vpop.f32.mrb[70].mxu1 }
 0x4d4   : > { %v14056_v27 = vpop.f32.mrb[71].mxu1  ;;  %14120 = vmatmul.mubr.f32.gmra.mrb[30].mxu0 %v1889_v23 }
 0x4d5   : > { %14122 = vmatprep.mubr.msk.f32.mxu0 %vm18110_vm0, %v18111_v1 }
 0x4d7   : > { %v1894_v32 = vpop.f32.mrb[72].mxu1 }
 0x4d8   : > { %v14059_v31 = vpop.f32.mrb[73].mxu1  ;;  %14123 = vmatmul.mubr.f32.gmra.mrb[32].mxu0 %v1894_v32 }
 0x4d9   : > { %14125 = vmatprep.mubr.msk.f32.mxu0 %vm18110_vm0, %v18111_v1 }
 0x4db   : > { %v1899_v36 = vpop.f32.mrb[74].mxu1 }
 0x4dc   : > { %v14062_v30 = vpop.f32.mrb[75].mxu1  ;;  %14126 = vmatmul.mubr.f32.gmra.mrb[34].mxu0 %v1899_v36 }
 0x4dd   : > { %14128 = vmatprep.mubr.msk.f32.mxu0 %vm18110_vm0, %v18111_v1 }
 0x4df   : > { %v1904_v39 = vpop.f32.mrb[76].mxu1 }
 0x4e0   : > { %v14065_v40 = vpop.f32.mrb[77].mxu1  ;;  %14129 = vmatmul.mubr.f32.gmra.mrb[36].mxu0 %v1904_v39 }
 0x4e1   : > { %14131 = vmatprep.mubr.msk.f32.mxu0 %vm18110_vm0, %v18111_v1 }
 0x4e3   : > { %v1909_v44 = vpop.f32.mrb[78].mxu1 }
 0x4e4   : > { %v14068_v45 = vpop.f32.mrb[79].mxu1  ;;  %14132 = vmatmul.mubr.f32.gmra.mrb[38].mxu0 %v1909_v44 }
 0x4e5   : > { %14134 = vmatprep.mubr.msk.f32.mxu0 %vm18110_vm0, %v18111_v1 }
 0x4e7   : > { %v1914_v48 = vpop.f32.mrb[80].mxu1 }
 0x4e8   : > { %v14071_v49 = vpop.f32.mrb[81].mxu1  ;;  %14135 = vmatmul.mubr.f32.gmra.mrb[40].mxu0 %v1914_v48 }
 0x4e9   : > { %14137 = vmatprep.mubr.msk.f32.mxu0 %vm18110_vm0, %v18111_v1 }
 0x4eb   : > { %v1919_v41 = vpop.f32.mrb[82].mxu1 }
 0x4ec   : > { %v14074_v50 = vpop.f32.mrb[83].mxu1  ;;  %14138 = vmatmul.mubr.f32.gmra.mrb[42].mxu0 %v1919_v41 }
 0x4ed   : > { %14140 = vmatprep.mubr.msk.f32.mxu0 %vm18110_vm0, %v18111_v1 }
 0x4ef   : > { %v1924_v34 = vpop.f32.mrb[84].mxu1 }
 0x4f0   : > { %v14077_v51 = vpop.f32.mrb[85].mxu1  ;;  %14141 = vmatmul.mubr.f32.gmra.mrb[44].mxu0 %v1924_v34 }
 0x4f1   : > { %14143 = vmatprep.mubr.msk.f32.mxu0 %vm18110_vm0, %v18111_v1 }
 0x4f3   : > { %v1929_v54 = vpop.f32.mrb[86].mxu1 }
 0x4f4   : > { %v14080_v46 = vpop.f32.mrb[87].mxu1  ;;  %14144 = vmatmul.mubr.f32.gmra.mrb[46].mxu0 %v1929_v54 }
 0x4f5   : > { %14146 = vmatprep.mubr.msk.f32.mxu0 %vm18110_vm0, %v18111_v1 }
 0x4f7   : > { %v1934_v56 = vpop.f32.mrb[88].mxu1 }
 0x4f8   : > { %14147 = vmatmul.mubr.f32.gmra.mrb[48].mxu0 %v1934_v56  ;;  %v14083_v57 = vpop.f32.mrb[89].mxu1 }
 0x4f9   : > { %v12090_v57 = vld [vmem:[%s21945_s6 + $0x18] sm:$0xff] }
 0x5a3   : > { %v18899_v59 = vpop.f32.mrb[28].mxu0 }
 0x5a4   : > { %v14118_v60 = vpop.f32.mrb[29].mxu0 }
 0x5a7   : > { %v18901_v15 = vpop.f32.mrb[30].mxu0 }
 0x5a8   : > { %v14121_v61 = vpop.f32.mrb[31].mxu0  ;;  %v17275_v25 = vpack.i.bf16 %v18901_v15, %v18899_v59  ;;  %v16253_v38 = vpack.c.bf16 %v18901_v15, %v18899_v59  ;;  %v12092_v59 = vld [vmem:[%s21945_s6 + $0x28] sm:$0xff] }
 0x5a9   : > { %v12091_v61 = vld [vmem:[%s21945_s6 + $0x20] sm:$0xff] }
 0x5aa   : > { %17276 = vrot.lane.b32.xlu1 %v17275_v25, %s18112_s16 }
 0x5ab   : > { %v18908_v47 = vpop.f32.mrb[32].mxu0 }
 0x5ac   : > { %v14124_v21 = vpop.f32.mrb[33].mxu0 }
 0x5ad   : > { %v2058_v21 = vld [vmem:[%s21945_s6] sm:$0xff] }
 0x5af   : > { %v18910_v63 = vpop.f32.mrb[34].mxu0 }
 0x5b0   : > { %v14127_v2 = vpop.f32.mrb[35].mxu0  ;;  %v17280_v43 = vpack.i.bf16 %v18910_v63, %v18908_v47  ;;  %v16256_v52 = vpack.c.bf16 %v18910_v63, %v18908_v47 }
 0x5b2   : > { %17281 = vrot.lane.b32.xlu0 %v17280_v43, %s18112_s16 }
 0x5b3   : > { %v18917_v28 = vpop.f32.mrb[36].mxu0 }
 0x5b4   : > { %v14130_v53 = vpop.f32.mrb[37].mxu0 }
 0x5b7   : > { %v18919_v3 = vpop.f32.mrb[38].mxu0 }
 0x5b8   : > { %v14133_v5 = vpop.f32.mrb[39].mxu0  ;;  %v17285_v58 = vpack.i.bf16 %v18919_v3, %v18917_v28  ;;  %v16259_v62 = vpack.c.bf16 %v18919_v3, %v18917_v28  ;;  %v2059_v28 = vld [vmem:[%s21945_s6 + $0x8] sm:$0xff] }
 0x5ba   : > { %17286 = vrot.lane.b32.xlu1 %v17285_v58, %s18112_s16 }
 0x5bb   : > { %v18926_v7 = vpop.f32.mrb[40].mxu0 }
 0x5bc   : > { %v14136_v55 = vpop.f32.mrb[41].mxu0 }
 0x5bf   : > { %v18928_v8 = vpop.f32.mrb[42].mxu0 }
 0x5c0   : > { %v14139_v42 = vpop.f32.mrb[43].mxu0  ;;  %v17290_v4 = vpack.i.bf16 %v18928_v8, %v18926_v7  ;;  %v16262_v6 = vpack.c.bf16 %v18928_v8, %v18926_v7 }
 0x5c2   : > { %17291 = vrot.lane.b32.xlu0 %v17290_v4, %s18112_s16 }
 0x5c3   : > { %v18935_v9 = vpop.f32.mrb[44].mxu0 }
 0x5c4   : > { %v14142_v11 = vpop.f32.mrb[45].mxu0 }
 0x5c7   : > { %v18937_v13 = vpop.f32.mrb[46].mxu0 }
 0x5c8   : > { %v14145_v29 = vpop.f32.mrb[47].mxu0  ;;  %v17295_v16 = vpack.i.bf16 %v18937_v13, %v18935_v9  ;;  %v16265_v18 = vpack.c.bf16 %v18937_v13, %v18935_v9 }
 0x5ca   : > { %17296 = vrot.lane.b32.xlu1 %v17295_v16, %s18112_s16 }
 0x5cb   : > { %v18944_v19 = vpop.f32.mrb[48].mxu0 }
 0x5cc   : > { %2085 = vrot.lane.b32.xlu0 %v18944_v19, %s18112_s16  ;;  %v14148_v22 = vpop.f32.mrb[49].mxu0 }
 0x5cd   : > { %v12101_v22 = vld [vmem:[%s21945_s6 + $0x30] sm:$0xff] }
 0x5ce   : > { %17301 = vrot.lane.b32.xlu1 %v17275_v25, %s18113_s17 }
 0x5d0   : > { %17306 = vrot.lane.b32.xlu0 %v17280_v43, %s18113_s17 }
 0x5d2   : > { %17311 = vrot.lane.b32.xlu1 %v17285_v58, %s18113_s17 }
 0x5d4   : > { %17316 = vrot.lane.b32.xlu0 %v17290_v4, %s18113_s17 }
 0x5d6   : > { %17321 = vrot.lane.b32.xlu1 %v17295_v16, %s18113_s17 }
 0x5d8   : > { %2296 = vrot.lane.b32.xlu0 %v18944_v19, %s18113_s17 }
 0x5da   : > { %17326 = vrot.lane.b32.xlu1 %v17275_v25, %s18114_s18 }
 0x5dc   : > { %17331 = vrot.lane.b32.xlu0 %v17280_v43, %s18114_s18 }
 0x5de   : > { %17336 = vrot.lane.b32.xlu1 %v17285_v58, %s18114_s18 }
 0x5e0   : > { %17341 = vrot.lane.b32.xlu0 %v17290_v4, %s18114_s18 }
 0x5e2   : > { %17346 = vrot.lane.b32.xlu1 %v17295_v16, %s18114_s18 }
 0x5e4   : > { %2417 = vrot.lane.b32.xlu0 %v18944_v19, %s18114_s18 }
 0x5e6   : > { %17351 = vrot.lane.b32.xlu1 %v17275_v25, %s18115_s19 }
 0x5e8   : > { %17356 = vrot.lane.b32.xlu0 %v17280_v43, %s18115_s19 }
 0x5ea   : > { %17361 = vrot.lane.b32.xlu1 %v17285_v58, %s18115_s19 }
 0x5ec   : > { %17366 = vrot.lane.b32.xlu0 %v17290_v4, %s18115_s19 }
 0x5ee   : > { %17371 = vrot.lane.b32.xlu1 %v17295_v16, %s18115_s19 }
 0x5f0   : > { %2538 = vrot.lane.b32.xlu0 %v18944_v19, %s18115_s19 }
 0x61c   : > { %v17277_v24 = vpop.permute.xlu1 %17276 }
 0x61d   : > { %v17279_v23 = vunpack.i.h.bf16 %v17277_v24  ;;  %v17278_v27 = vunpack.i.l.bf16 %v17277_v24 }
 0x61f   : > { %v16238_v32 = vpack.c.bf16 %v17279_v23, %v17278_v27 }
 0x621   : > { %16239 = vmatpush3.bf16.msra.mxu1 %v16238_v32 }
 0x622   : > { %16240 = vmatprep.subr.bf16.mxu1 %v18109_v0 }
 0x624   : > { %v17282_v31 = vpop.permute.xlu0 %17281 }
 0x625   : > { %v17284_v36 = vunpack.i.h.bf16 %v17282_v31  ;;  %v17283_v30 = vunpack.i.l.bf16 %v17282_v31  ;;  %v12102_v31 = vld [vmem:[%s21945_s6 + $0x38] sm:$0xff] }
 0x627   : > { %v16241_v39 = vpack.c.bf16 %v17284_v36, %v17283_v30 }
 0x629   : > { %16242 = vmatpush3.bf16.msra.mxu1 %v16241_v39 }
 0x62a   : > { %16243 = vmatprep.subr.bf16.mxu1 %v18109_v0 }
 0x62c   : > { %v17287_v40 = vpop.permute.xlu1 %17286 }
 0x62d   : > { %v17289_v44 = vunpack.i.h.bf16 %v17287_v40  ;;  %v17288_v45 = vunpack.i.l.bf16 %v17287_v40 }
 0x62f   : > { %v16244_v48 = vpack.c.bf16 %v17289_v44, %v17288_v45  ;;  %v12103_v44 = vld [vmem:[%s21945_s6 + $0x40] sm:$0xff] }
 0x631   : > { %16245 = vmatpush3.bf16.msra.mxu1 %v16244_v48 }
 0x632   : > { %16246 = vmatprep.subr.bf16.mxu1 %v18109_v0 }
 0x634   : > { %v17292_v49 = vpop.permute.xlu0 %17291 }
 0x635   : > { %v17294_v41 = vunpack.i.h.bf16 %v17292_v49  ;;  %v17293_v50 = vunpack.i.l.bf16 %v17292_v49 }
 0x637   : > { %v16247_v34 = vpack.c.bf16 %v17294_v41, %v17293_v50 }
 0x639   : > { %16248 = vmatpush3.bf16.msra.mxu1 %v16247_v34 }
 0x63a   : > { %16249 = vmatprep.subr.bf16.mxu1 %v18109_v0 }
 0x63c   : > { %v17297_v51 = vpop.permute.xlu1 %17296 }
 0x63d   : > { %v17299_v54 = vunpack.i.h.bf16 %v17297_v51  ;;  %v17298_v46 = vunpack.i.l.bf16 %v17297_v51 }
 0x63e   : > { %v2086_v60 = vpop.permute.xlu0 %2085 }
 0x63f   : > { %v16250_v56 = vpack.c.bf16 %v17299_v54, %v17298_v46 }
 0x640   : > { %v17302_v15 = vpop.permute.xlu1 %17301 }
 0x641   : > { %16251 = vmatpush3.bf16.msra.mxu1 %v16250_v56  ;;  %v17304_v25 = vunpack.i.h.bf16 %v17302_v15 }
 0x642   : > { %14169 = vmatprep.subr.mxu1 %v18111_v1  ;;  %v17307_v47 = vpop.permute.xlu0 %17306 }
 0x643   : > { %v17309_v2 = vunpack.i.h.bf16 %v17307_v47  ;;  %v17308_v43 = vunpack.i.l.bf16 %v17307_v47 }
 0x645   : > { %14170 = vmatpush3.msk.msra.mxu1 %vm408_vm1, %v2086_v60  ;;  %v16271_v53 = vpack.c.bf16 %v17309_v2, %v17308_v43 }
 0x646   : > { %16252 = vmatprep.subr.bf16.mxu1 %v18109_v0  ;;  %14172 = vmatmul.mubr.msk.f32.vlgmr.msra.gmra.mrb[90].mxu1 %vm2087_vm8, %v12090_v57  ;;  %v17317_v58 = vpop.permute.xlu0 %17316 }
 0x647   : > { %16254 = vmatpush3.bf16.msra.mxu1 %v16253_v38  ;;  %14174 = vmatprep.mubr.msk.f32.mxu1 %vm18110_vm0, %v18111_v1  ;;  %v17303_v38 = vunpack.i.l.bf16 %v17302_v15  ;;  %v17319_v55 = vunpack.i.h.bf16 %v17317_v58  ;;  %v17318_v8 = vunpack.i.l.bf16 %v17317_v58 }
 0x648   : > { %16255 = vmatprep.subr.bf16.mxu1 %v18109_v0 }
 0x649   : > { %v16268_v63 = vpack.c.bf16 %v17304_v25, %v17303_v38  ;;  %v16277_v4 = vpack.c.bf16 %v17319_v55, %v17318_v8 }
 0x64a   : > { %14175 = vmatmul.mubr.msk.f32.gmra.mrb[92].mxu1 %vm2087_vm8, %v12091_v61  ;;  %v2297_v11 = vpop.permute.xlu0 %2296 }
 0x64b   : > { %16257 = vmatpush3.bf16.msra.mxu1 %v16256_v52  ;;  %14177 = vmatprep.mubr.msk.f32.mxu1 %vm18110_vm0, %v18111_v1  ;;  %v17312_v52 = vpop.permute.xlu1 %17311 }
 0x64c   : > { %16258 = vmatprep.subr.bf16.mxu1 %v18109_v0  ;;  %v17314_v3 = vunpack.i.h.bf16 %v17312_v52  ;;  %v17313_v5 = vunpack.i.l.bf16 %v17312_v52 }
 0x64e   : > { %14178 = vmatmul.mubr.msk.f32.gmra.mrb[94].mxu1 %vm2087_vm8, %v12092_v59  ;;  %v16274_v7 = vpack.c.bf16 %v17314_v3, %v17313_v5  ;;  %v12108_v59 = vld [vmem:[%s21945_s6 + $0x48] sm:$0xff] }
 0x64f   : > { %16260 = vmatpush3.bf16.msra.mxu1 %v16259_v62  ;;  %14202 = vmatprep.mubr.msk.f32.mxu1 %vm18110_vm0, %v18111_v1  ;;  %v2060_v62 = vld [vmem:[%s21945_s6 + $0x10] sm:$0xff]  ;;  %v17322_v42 = vpop.permute.xlu1 %17321 }
 0x650   : > { %16261 = vmatprep.subr.bf16.mxu1 %v18109_v0  ;;  %v17323_v9 = vunpack.i.l.bf16 %v17322_v42 }
 0x653   : > { %16263 = vmatpush3.bf16.msra.mxu1 %v16262_v6  ;;  %v17324_v6 = vunpack.i.h.bf16 %v17322_v42  ;;  %v17327_v13 = vpop.permute.xlu1 %17326  ;;  %v12115_v42 = vld [vmem:[%s21945_s6 + $0x60] sm:$0xff] }
 0x654   : > { %16264 = vmatprep.subr.bf16.mxu1 %v18109_v0  ;;  %v17329_v16 = vunpack.i.h.bf16 %v17327_v13 }
 0x655   : > { %v16280_v29 = vpack.c.bf16 %v17324_v6, %v17323_v9  ;;  %v12116_v6 = vld [vmem:[%s21945_s6 + $0x68] sm:$0xff]  ;;  %v12117_v9 = vld [vmem:[%s21945_s6 + $0x70] sm:$0xff] }
 0x657   : > { %16266 = vmatpush3.bf16.msra.mxu1 %v16265_v18  ;;  %v17328_v18 = vunpack.i.l.bf16 %v17327_v13  ;;  %v17337_v32 = vpop.permute.xlu1 %17336 }
 0x658   : > { %14200 = vmatprep.subr.mxu1 %v18111_v1  ;;  %v17339_v30 = vunpack.i.h.bf16 %v17337_v32  ;;  %v17338_v39 = vunpack.i.l.bf16 %v17337_v32 }
 0x659   : > { %v16283_v24 = vpack.c.bf16 %v17329_v16, %v17328_v18 }
 0x65a   : > { %v16289_v45 = vpack.c.bf16 %v17339_v30, %v17338_v39 }
 0x65b   : > { %14201 = vmatpush3.msk.msra.mxu1 %vm408_vm1, %v18944_v19  ;;  %v17332_v19 = vpop.permute.xlu0 %17331  ;;  %v17347_v41 = vpop.permute.xlu1 %17346 }
 0x65c   : > { %16267 = vmatprep.subr.bf16.mxu1 %v18109_v0  ;;  %14203 = vmatmul.mubr.msk.f32.vlgmr.msra.gmra.mrb[90].mxu1 %vm2087_vm8, %v2058_v21  ;;  %v17334_v23 = vunpack.i.h.bf16 %v17332_v19  ;;  %v17333_v27 = vunpack.i.l.bf16 %v17332_v19  ;;  %v17349_v34 = vunpack.i.h.bf16 %v17347_v41  ;;  %v17348_v51 = vunpack.i.l.bf16 %v17347_v41  ;;  %v12109_v21 = vld [vmem:[%s21945_s6 + $0x50] sm:$0xff] }
 0x65d   : > { %16269 = vmatpush3.bf16.msra.mxu1 %v16268_v63  ;;  %14205 = vmatprep.mubr.msk.f32.mxu1 %vm18110_vm0, %v18111_v1 }
 0x65e   : > { %16270 = vmatprep.subr.bf16.mxu1 %v18109_v0  ;;  %v16286_v36 = vpack.c.bf16 %v17334_v23, %v17333_v27  ;;  %v16295_v56 = vpack.c.bf16 %v17349_v34, %v17348_v51  ;;  %v12124_v51 = vld [vmem:[%s21946_s7 + $0x30] sm:$0xff] }
 0x65f   : > { %v17342_v40 = vpop.permute.xlu0 %17341  ;;  %v17352_v46 = vpop.permute.xlu1 %17351 }
 0x660   : > { %14206 = vmatmul.mubr.msk.f32.gmra.mrb[92].mxu1 %vm2087_vm8, %v2059_v28  ;;  %v17344_v48 = vunpack.i.h.bf16 %v17342_v40  ;;  %v17343_v49 = vunpack.i.l.bf16 %v17342_v40  ;;  %v17354_v57 = vunpack.i.h.bf16 %v17352_v46  ;;  %v17353_v60 = vunpack.i.l.bf16 %v17352_v46  ;;  %v12110_v28 = vld [vmem:[%s21945_s6 + $0x58] sm:$0xff] }
 0x661   : > { %16272 = vmatpush3.bf16.msra.mxu1 %v16271_v53  ;;  %14208 = vmatprep.mubr.msk.f32.mxu1 %vm18110_vm0, %v18111_v1 }
 0x662   : > { %16273 = vmatprep.subr.bf16.mxu1 %v18109_v0  ;;  %v16292_v50 = vpack.c.bf16 %v17344_v48, %v17343_v49  ;;  %v16298_v15 = vpack.c.bf16 %v17354_v57, %v17353_v60  ;;  %v12125_v57 = vld [vmem:[%s21946_s7 + $0x38] sm:$0xf]  ;;  %v2638_v60 = vld [vmem:[%s21946_s7] sm:$0xff] }
 0x663   : > { %v2418_v54 = vpop.permute.xlu0 %2417  ;;  %v17362_v47 = vpop.permute.xlu1 %17361 }
 0x664   : > { %14209 = vmatmul.mubr.msk.f32.gmra.mrb[94].mxu1 %vm2087_vm8, %v2060_v62  ;;  %v17364_v2 = vunpack.i.h.bf16 %v17362_v47  ;;  %v17363_v43 = vunpack.i.l.bf16 %v17362_v47 }
 0x665   : > { %16275 = vmatpush3.bf16.msra.mxu1 %v16274_v7  ;;  %14233 = vmatprep.mubr.msk.f32.mxu1 %vm18110_vm0, %v18111_v1 }
 0x666   : > { %16276 = vmatprep.subr.bf16.mxu1 %v18109_v0  ;;  %v16304_v53 = vpack.c.bf16 %v17364_v2, %v17363_v43  ;;  %v12134_v2 = vld [vmem:[%s21946_s7 + $0x40] sm:$0xff] }
 0x667   : > { %v17357_v61 = vpop.permute.xlu0 %17356  ;;  %v17372_v58 = vpop.permute.xlu1 %17371 }
 0x668   : > { %v17359_v25 = vunpack.i.h.bf16 %v17357_v61  ;;  %v17358_v38 = vunpack.i.l.bf16 %v17357_v61  ;;  %v17374_v7 = vunpack.i.h.bf16 %v17372_v58  ;;  %v17373_v55 = vunpack.i.l.bf16 %v17372_v58  ;;  %v12143_v58 = vld [vmem:[%s21946_s7 + $0x68] sm:$0xff] }
 0x669   : > { %16278 = vmatpush3.bf16.msra.mxu1 %v16277_v4 }
 0x66a   : > { %16279 = vmatprep.subr.bf16.mxu1 %v18109_v0  ;;  %v16301_v63 = vpack.c.bf16 %v17359_v25, %v17358_v38  ;;  %v16310_v8 = vpack.c.bf16 %v17374_v7, %v17373_v55  ;;  %v2640_v25 = vld [vmem:[%s21946_s7 + $0x10] sm:$0xff]  ;;  %v12145_v7 = vld [vmem:[%s21946_s7 + $0x78] sm:$0xf]  ;;  %v12150_v55 = vld [vmem:[%s21946_s7 + $0x80] sm:$0xff] }
 0x66b   : > { %v17367_v52 = vpop.permute.xlu0 %17366 }
 0x66c   : > { %v17369_v3 = vunpack.i.h.bf16 %v17367_v52  ;;  %v17368_v5 = vunpack.i.l.bf16 %v17367_v52  ;;  %v12135_v52 = vld [vmem:[%s21946_s7 + $0x48] sm:$0xff] }
 0x66d   : > { %16281 = vmatpush3.bf16.msra.mxu1 %v16280_v29 }
 0x66e   : > { %14231 = vmatprep.subr.mxu1 %v18111_v1  ;;  %v16307_v62 = vpack.c.bf16 %v17369_v3, %v17368_v5  ;;  %v12137_v3 = vld [vmem:[%s21946_s7 + $0x58] sm:$0xf]  ;;  %v12142_v5 = vld [vmem:[%s21946_s7 + $0x60] sm:$0xff] }
 0x66f   : > { %v2539_v4 = vpop.permute.xlu0 %2538 }
 0x671   : > { %14232 = vmatpush3.msk.msra.mxu1 %vm408_vm1, %v2297_v11 }
 0x672   : > { %16282 = vmatprep.subr.bf16.mxu1 %v18109_v0  ;;  %14234 = vmatmul.mubr.msk.f32.vlgmr.msra.gmra.mrb[90].mxu1 %vm2087_vm8, %v12101_v22  ;;  %v12122_v22 = vld [vmem:[%s21946_s7 + $0x20] sm:$0xff] }
 0x673   : > { %16284 = vmatpush3.bf16.msra.mxu1 %v16283_v24  ;;  %14236 = vmatprep.mubr.msk.f32.mxu1 %vm18110_vm0, %v18111_v1 }
 0x674   : > { %16285 = vmatprep.subr.bf16.mxu1 %v18109_v0  ;;  %14310 = vmatprep.mubr.msk.f32.mxu0 %vm930_vm5, %v12122_v22 }
 0x676   : > { %14237 = vmatmul.mubr.msk.f32.gmra.mrb[92].mxu1 %vm2087_vm8, %v12102_v31 }
 0x677   : > { %16287 = vmatpush3.bf16.msra.mxu1 %v16286_v36  ;;  %14239 = vmatprep.mubr.msk.f32.mxu1 %vm18110_vm0, %v18111_v1 }
 0x678   : > { %16288 = vmatprep.subr.bf16.mxu1 %v18109_v0 }
 0x67a   : > { %14240 = vmatmul.mubr.msk.f32.gmra.mrb[94].mxu1 %vm2087_vm8, %v12103_v44 }
 0x67b   : > { %16290 = vmatpush3.bf16.msra.mxu1 %v16289_v45  ;;  %14264 = vmatprep.mubr.msk.f32.mxu1 %vm18110_vm0, %v18111_v1 }
 0x67c   : > { %16291 = vmatprep.subr.bf16.mxu1 %v18109_v0 }
 0x67f   : > { %16293 = vmatpush3.bf16.msra.mxu1 %v16292_v50  ;;  %v12123_v50 = vld [vmem:[%s21946_s7 + $0x28] sm:$0xff] }
 0x680   : > { %16294 = vmatprep.subr.bf16.mxu1 %v18109_v0 }
 0x683   : > { %16296 = vmatpush3.bf16.msra.mxu1 %v16295_v56 }
 0x684   : > { %14262 = vmatprep.subr.mxu1 %v18111_v1 }
 0x687   : > { %14263 = vmatpush3.msk.msra.mxu1 %vm408_vm1, %v2418_v54 }
 0x688   : > { %16297 = vmatprep.subr.bf16.mxu1 %v18109_v0  ;;  %14265 = vmatmul.mubr.msk.f32.vlgmr.msra.gmra.mrb[90].mxu1 %vm2087_vm8, %v12108_v59 }
 0x689   : > { %16299 = vmatpush3.bf16.msra.mxu1 %v16298_v15  ;;  %14267 = vmatprep.mubr.msk.f32.mxu1 %vm18110_vm0, %v18111_v1  ;;  %v2639_v15 = vld [vmem:[%s21946_s7 + $0x8] sm:$0xff] }
 0x68a   : > { %16300 = vmatprep.subr.bf16.mxu1 %v18109_v0 }
 0x68c   : > { %14268 = vmatmul.mubr.msk.f32.gmra.mrb[92].mxu1 %vm2087_vm8, %v12109_v21 }
 0x68d   : > { %16302 = vmatpush3.bf16.msra.mxu1 %v16301_v63  ;;  %14270 = vmatprep.mubr.msk.f32.mxu1 %vm18110_vm0, %v18111_v1  ;;  %v2641_v63 = vld [vmem:[%s21946_s7 + $0x18] sm:$0xf] }
 0x68e   : > { %16303 = vmatprep.subr.bf16.mxu1 %v18109_v0 }
 0x690   : > { %14271 = vmatmul.mubr.msk.f32.gmra.mrb[94].mxu1 %vm2087_vm8, %v12110_v28  ;;  %v12136_v28 = vld [vmem:[%s21946_s7 + $0x50] sm:$0xff] }
 0x691   : > { %16305 = vmatpush3.bf16.msra.mxu1 %v16304_v53  ;;  %14295 = vmatprep.mubr.msk.f32.mxu1 %vm18110_vm0, %v18111_v1 }
 0x692   : > { %16306 = vmatprep.subr.bf16.mxu1 %v18109_v0 }
 0x695   : > { %16308 = vmatpush3.bf16.msra.mxu1 %v16307_v62  ;;  %v12144_v62 = vld [vmem:[%s21946_s7 + $0x70] sm:$0xff] }
 0x696   : > { %16309 = vmatprep.subr.bf16.mxu1 %v18109_v0 }
 0x699   : > { %16311 = vmatpush3.bf16.msra.mxu1 %v16310_v8  ;;  %v12151_v8 = vld [vmem:[%s21946_s7 + $0x88] sm:$0xff] }
 0x69a   : > { %14293 = vmatprep.subr.mxu1 %v18111_v1 }
 0x69d   : > { %14294 = vmatpush3.msk.msra.mxu1 %vm408_vm1, %v2539_v4  ;;  %v12153_v4 = vld [vmem:[%s21946_s7 + $0x98] sm:$0xf] }
 0x69e   : > { %14296 = vmatmul.mubr.msk.f32.vlgmr.msra.gmra.mrb[90].mxu1 %vm2087_vm8, %v12115_v42  ;;  %16377 = vmatprep.subr.bf16.mxu1 %v18109_v0  ;;  %v12152_v42 = vld [vmem:[%s21946_s7 + $0x90] sm:$0xff] }
 0x69f   : > { %14298 = vmatprep.mubr.msk.f32.mxu1 %vm18110_vm0, %v18111_v1 }
 0x6a2   : > { %14299 = vmatmul.mubr.msk.f32.gmra.mrb[92].mxu1 %vm2087_vm8, %v12116_v6 }
 0x6a3   : > { %14301 = vmatprep.mubr.msk.f32.mxu1 %vm18110_vm0, %v18111_v1 }
 0x6a6   : > { %14302 = vmatmul.mubr.msk.f32.gmra.mrb[94].mxu1 %vm2087_vm8, %v12117_v9 }
 0x6a7   : > { %14466 = vmatprep.mubr.msk.f32.mxu1 %vm18110_vm0, %v18111_v1 }
 0x771   : > { %v2618_v11 = vpop.f32.mrb[90].mxu1 }
 0x772   : > { %v14297_v13 = vpop.f32.mrb[91].mxu1  ;;  %v2635_v16 = vmax.f32 %v2618_v11, 0.0 }
 0x775   : > { %v2623_v29 = vpop.f32.mrb[92].mxu1 }
 0x776   : > { %v2636_v18 = vmax.f32 %v2623_v29, 0.0  ;;  %v14300_v19 = vpop.f32.mrb[93].mxu1 }
 0x778   : > { %v17375_v24 = vpack.i.bf16 %v2636_v18, %v2635_v16  ;;  %v19114_v27 = vpack.c.bf16 %v2636_v18, %v2635_v16 }
 0x779   : > { %v2628_v23 = vpop.f32.mrb[94].mxu1 }
 0x77a   : > { %v19116_v32 = vmax.f32 %v2628_v23, 0.0  ;;  %17376 = vrot.lane.b32.xlu1 %v17375_v24, %s18117_s20  ;;  %v14303_v31 = vpop.f32.mrb[95].mxu1 }
 0x77c   : > { %2657 = vrot.lane.b32.xlu0 %v19116_v32, %s18117_s20 }
 0x77e   : > { %17381 = vrot.lane.b32.xlu1 %v17375_v24, %s18118_s21 }
 0x780   : > { %2646 = vrot.lane.b32.xlu0 %v19116_v32, %s18118_s21 }
 0x782   : > { %17386 = vrot.lane.b32.xlu1 %v17375_v24, %s18119_s22 }
 0x784   : > { %2862 = vrot.lane.b32.xlu0 %v19116_v32, %s18119_s22 }
 0x786   : > { %17391 = vrot.lane.b32.xlu1 %v17375_v24, %s18120_s23 }
 0x788   : > { %2974 = vrot.lane.b32.xlu0 %v19116_v32, %s18120_s23 }
 0x7ec   : > { %v17377_v36 = vpop.permute.xlu1 %17376 }
 0x7ed   : > { %v17379_v30 = vunpack.i.h.bf16 %v17377_v36  ;;  %v17378_v39 = vunpack.i.l.bf16 %v17377_v36 }
 0x7ee   : > { %v2658_v49 = vpop.permute.xlu0 %2657 }
 0x7ef   : > { %v16312_v40 = vpack.c.bf16 %v17379_v30, %v17378_v39  ;;  %v12161_v30 = vld [vmem:[%s18187_s15 + $0x20] sm:$0xff]  ;;  %v12162_v39 = vld [vmem:[%s18187_s15 + $0x28] sm:$0xff] }
 0x7f0   : > { %v17382_v44 = vpop.permute.xlu1 %17381 }
 0x7f1   : > { %v17384_v45 = vunpack.i.h.bf16 %v17382_v44  ;;  %v17383_v48 = vunpack.i.l.bf16 %v17382_v44  ;;  %16313 = vmatprep.subr.bf16.mxu0 %v16312_v40  ;;  %v19219_v44 = vld [vmem:[%s18187_s15 + $0x38] sm:$0xf] }
 0x7f2   : > { %16315 = vmatpush3.bf16.msra.mxu0 %v16312_v40  ;;  %v2647_v56 = vpop.permute.xlu0 %2646  ;;  %v19216_v40 = vld [vmem:[%s18187_s15 + $0x30] sm:$0xff] }
 0x7f3   : > { %14308 = vmatprep.subr.mxu0 %v2658_v49  ;;  %v16316_v34 = vpack.c.bf16 %v17384_v45, %v17383_v48 }
 0x7f4   : > { %v17387_v41 = vpop.permute.xlu1 %17386 }
 0x7f5   : > { %v17389_v54 = vunpack.i.h.bf16 %v17387_v41  ;;  %v17388_v46 = vunpack.i.l.bf16 %v17387_v41  ;;  %v17405_v41 = vpack.i.bf16 %v12162_v39, %v12161_v30 }
 0x7f6   : > { %14309 = vmatpush3.msra.mxu0 %v2658_v49  ;;  %v2863_v21 = vpop.permute.xlu0 %2862  ;;  %v377_v49 = vld [vmem:[%s21947_s8] sm:$0xff] }
 0x7f7   : > { %14311 = vmatmul.mubr.msk.f32.vlgmr.msra.gmra.mrb[50].mxu0 %vm930_vm5, %v12123_v50  ;;  %16317 = vmatprep.subr.bf16.mxu0 %v16316_v34  ;;  %v16320_v61 = vpack.c.bf16 %v17389_v54, %v17388_v46  ;;  %v17410_v50 = vpack.i.bf16 %v19219_v44, %v19216_v40 }
 0x7f8   : > { %16319 = vmatpush3.bf16.msra.mxu0 %v16316_v34  ;;  %14313 = vmatprep.mubr.msk.f32.mxu0 %vm930_vm5, %v12124_v51  ;;  %v17392_v59 = vpop.permute.xlu1 %17391 }
 0x7f9   : > { %14320 = vmatprep.subr.mxu0 %v2647_v56  ;;  %v17394_v38 = vunpack.i.h.bf16 %v17392_v59  ;;  %v17393_v47 = vunpack.i.l.bf16 %v17392_v59 }
 0x7fa   : > { %v2975_v53 = vpop.permute.xlu0 %2974 }
 0x7fb   : > { %14314 = vmatmul.mubr.msk.f32.gmra.mrb[52].mxu0 %vm930_vm5, %v12125_v57  ;;  %v16324_v43 = vpack.c.bf16 %v17394_v38, %v17393_v47 }
 0x7fc   : > { %14321 = vmatpush3.msra.mxu0 %v2647_v56  ;;  %14322 = vmatprep.mubr.msk.f32.mxu0 %vm930_vm5, %v2638_v60 }
 0x7fd   : > { %16321 = vmatprep.subr.bf16.mxu0 %v16320_v61 }
 0x7ff   : > { %14323 = vmatmul.mubr.msk.f32.vlgmr.msra.gmra.mrb[50].mxu0 %vm930_vm5, %v2639_v15 }
 0x800   : > { %16323 = vmatpush3.bf16.msra.mxu0 %v16320_v61  ;;  %14325 = vmatprep.mubr.msk.f32.mxu0 %vm930_vm5, %v2640_v25 }
 0x801   : > { %14332 = vmatprep.subr.mxu0 %v2863_v21 }
 0x803   : > { %14326 = vmatmul.mubr.msk.f32.gmra.mrb[52].mxu0 %vm930_vm5, %v2641_v63 }
 0x804   : > { %14333 = vmatpush3.msra.mxu0 %v2863_v21  ;;  %14334 = vmatprep.mubr.msk.f32.mxu0 %vm930_vm5, %v12134_v2 }
 0x805   : > { %16325 = vmatprep.subr.bf16.mxu0 %v16324_v43 }
 0x807   : > { %14335 = vmatmul.mubr.msk.f32.vlgmr.msra.gmra.mrb[50].mxu0 %vm930_vm5, %v12135_v52 }
 0x808   : > { %16327 = vmatpush3.bf16.msra.mxu0 %v16324_v43  ;;  %14337 = vmatprep.mubr.msk.f32.mxu0 %vm930_vm5, %v12136_v28 }
 0x809   : > { %14344 = vmatprep.subr.mxu0 %v2975_v53 }
 0x80b   : > { %14338 = vmatmul.mubr.msk.f32.gmra.mrb[52].mxu0 %vm930_vm5, %v12137_v3  ;;  %v378_v3 = vld [vmem:[%s21947_s8 + $0x8] sm:$0x3f] }
 0x80c   : > { %14345 = vmatpush3.msra.mxu0 %v2975_v53  ;;  %14346 = vmatprep.mubr.msk.f32.mxu0 %vm930_vm5, %v12142_v5 }
 0x80d   : > { %16329 = vmatprep.subr.bf16.mxu0 %v19114_v27 }
 0x80f   : > { %14347 = vmatmul.mubr.msk.f32.vlgmr.msra.gmra.mrb[50].mxu0 %vm930_vm5, %v12143_v58  ;;  %v12165_v58 = vld [vmem:[%s21940_s1 + $0x18] sm:$0xff] }
 0x810   : > { %16331 = vmatpush3.bf16.msra.mxu0 %v19114_v27  ;;  %14349 = vmatprep.mubr.msk.f32.mxu0 %vm930_vm5, %v12144_v62  ;;  %v16350_v62 = vpack.c.bf16 %v12162_v39, %v12161_v30 }
 0x811   : > { %14356 = vmatprep.subr.mxu0 %v19116_v32 }
 0x813   : > { %14350 = vmatmul.mubr.msk.f32.gmra.mrb[52].mxu0 %vm930_vm5, %v12145_v7  ;;  %v12166_v7 = vld [vmem:[%s21940_s1 + $0x20] sm:$0xff] }
 0x814   : > { %14357 = vmatpush3.msra.mxu0 %v19116_v32  ;;  %14358 = vmatprep.mubr.msk.f32.mxu0 %vm930_vm5, %v12150_v55  ;;  %v16353_v55 = vpack.c.bf16 %v19219_v44, %v19216_v40  ;;  %v12177_v44 = vld [vmem:[%s21940_s1 + $0x38] sm:$0xff] }
 0x817   : > { %14359 = vmatmul.mubr.msk.f32.vlgmr.msra.gmra.mrb[50].mxu0 %vm930_vm5, %v12151_v8 }
 0x818   : > { %14361 = vmatprep.mubr.msk.f32.mxu0 %vm930_vm5, %v12152_v42  ;;  %v12167_v42 = vld [vmem:[%s21940_s1 + $0x28] sm:$0xff] }
 0x81b   : > { %14362 = vmatmul.mubr.msk.f32.gmra.mrb[52].mxu0 %vm930_vm5, %v12153_v4 }
 0x81c   : > { %14372 = vmatprep.mubr.msk.f32.mxu0 %vm3214_vm9, %v377_v49 }
 0x8ea   : > { %v14360_v6 = vpop.f32.mrb[50].mxu0 }
 0x8eb   : > { %v3188_v9 = vrot.slane %v14360_v6, 1  ;;  %v3160_v11 = vpop.f32.mrb[51].mxu0 }
 0x8ec   : > { %v3187_v13 = vrot.slane %v3160_v11, 1 }
 0x8ee   : > { %v3189_v29 = vsel %vm1709_vm6, %v3187_v13, %v3188_v9  ;;  %v14363_v16 = vpop.f32.mrb[52].mxu0  ;;  %v3309_v13 = vld [vmem:[%s21940_s1] sm:$0xff] }
 0x8ef   : > { %v3198_v18 = vmax.f32 %v3160_v11, %v3189_v29  ;;  %v3192_v19 = vrot.slane %v14363_v16, 1  ;;  %v3170_v22 = vpop.f32.mrb[53].mxu0 }
 0x8f0   : > { %v3190_v24 = vrot.slane %v3170_v22, 1 }
 0x8f1   : > { %v3201_v32 = vmax.f32 %v14363_v16, %v3192_v19 }
 0x8f2   : > { %v3193_v23 = vsel %vm1709_vm6, %v3190_v24, %v3192_v19  ;;  %v3191_v27 = vsel %vm1709_vm6, %v3188_v9, %v3190_v24  ;;  %v3310_v19 = vld [vmem:[%s21940_s1 + $0x8] sm:$0xff]  ;;  %v3311_v24 = vld [vmem:[%s21940_s1 + $0x10] sm:$0xff] }
 0x8f3   : > { %v3200_v31 = vmax.f32 %v3170_v22, %v3193_v23  ;;  %v3199_v36 = vmax.f32 %v14360_v6, %v3191_v27 }
 0x8f5   : > { %v17400_v45 = vpack.i.bf16 %v3201_v32, %v3200_v31  ;;  %v17395_v48 = vpack.i.bf16 %v3199_v36, %v3198_v18 }
 0x8f7   : > { %17401 = vrot.lane.b32.xlu0 %v17400_v45, %s18112_s16  ;;  %17396 = vrot.lane.b32.xlu1 %v17395_v48, %s18112_s16  ;;  %v12178_v48 = vld [vmem:[%s21940_s1 + $0x40] sm:$0xff] }
 0x8fb   : > { %17406 = vrot.lane.b32.xlu1 %v17405_v41, %s18112_s16  ;;  %17411 = vrot.lane.b32.xlu0 %v17410_v50, %s18112_s16 }
 0x8ff   : > { %17416 = vrot.lane.b32.xlu1 %v17405_v41, %s18113_s17  ;;  %17421 = vrot.lane.b32.xlu0 %v17410_v50, %s18113_s17 }
 0x903   : > { %17426 = vrot.lane.b32.xlu1 %v17405_v41, %s18114_s18  ;;  %17431 = vrot.lane.b32.xlu0 %v17410_v50, %s18114_s18 }
 0x907   : > { %17436 = vrot.lane.b32.xlu1 %v17405_v41, %s18115_s19  ;;  %17441 = vrot.lane.b32.xlu0 %v17410_v50, %s18115_s19 }
 0x969   : > { %v17402_v34 = vpop.permute.xlu0 %17401  ;;  %v17397_v51 = vpop.permute.xlu1 %17396 }
 0x96a   : > { %v17404_v54 = vunpack.i.h.bf16 %v17402_v34  ;;  %v17403_v46 = vunpack.i.l.bf16 %v17402_v34  ;;  %v17399_v56 = vunpack.i.h.bf16 %v17397_v51  ;;  %v17398_v57 = vunpack.i.l.bf16 %v17397_v51  ;;  %v12183_v51 = vld [vmem:[%s21940_s1 + $0x48] sm:$0xff] }
 0x96c   : > { %v3213_v60 = vmax.f32 %v3201_v32, %v17404_v54  ;;  %v3212_v61 = vmax.f32 %v3200_v31, %v17403_v46  ;;  %v3211_v59 = vmax.f32 %v3199_v36, %v17399_v56  ;;  %v3210_v15 = vmax.f32 %v3198_v18, %v17398_v57  ;;  %v12176_v36 = vld [vmem:[%s21940_s1 + $0x30] sm:$0xff] }
 0x96d   : > { %v17407_v38 = vpop.permute.xlu1 %17406  ;;  %v17412_v43 = vpop.permute.xlu0 %17411  ;;  %v12184_v57 = vld [vmem:[%s21940_s1 + $0x50] sm:$0xff] }
 0x96e   : > { %v16332_v25 = vpack.c.bf16 %v3211_v59, %v3210_v15  ;;  %v16336_v21 = vpack.c.bf16 %v3213_v60, %v3212_v61  ;;  %v17409_v63 = vunpack.i.h.bf16 %v17407_v38  ;;  %v17408_v2 = vunpack.i.l.bf16 %v17407_v38  ;;  %v12185_v60 = vld [vmem:[%s21940_s1 + $0x58] sm:$0xff]  ;;  %v12190_v61 = vld [vmem:[%s21940_s1 + $0x60] sm:$0xff]  ;;  %v12191_v59 = vld [vmem:[%s21940_s1 + $0x68] sm:$0xff] }
 0x96f   : > { %v17414_v28 = vunpack.i.h.bf16 %v17412_v43  ;;  %v17413_v53 = vunpack.i.l.bf16 %v17412_v43  ;;  %v12192_v15 = vld [vmem:[%s21940_s1 + $0x70] sm:$0xff] }
 0x970   : > { %16333 = vmatprep.subr.bf16.mxu0 %v16332_v25  ;;  %v16343_v52 = vpack.c.bf16 %v17409_v63, %v17408_v2 }
 0x971   : > { %16335 = vmatpush3.bf16.msra.mxu0 %v16332_v25  ;;  %v16346_v5 = vpack.c.bf16 %v17414_v28, %v17413_v53  ;;  %v17417_v8 = vpop.permute.xlu1 %17416  ;;  %v17422_v9 = vpop.permute.xlu0 %17421 }
 0x972   : > { %16338 = vmatprep.subr.msk.bf16.mxu0 %vm19238_vm11, %v16336_v21  ;;  %v17419_v4 = vunpack.i.h.bf16 %v17417_v8  ;;  %v17418_v6 = vunpack.i.l.bf16 %v17417_v8  ;;  %v17424_v29 = vunpack.i.h.bf16 %v17422_v9  ;;  %v17423_v16 = vunpack.i.l.bf16 %v17422_v9  ;;  %v3828_v8 = vld [vmem:[%s21941_s2 + $0x18] sm:$0xff] }
 0x973   : > { %v3832_v9 = vld [vmem:[%s21941_s2 + $0x38] sm:$0xff] }
 0x974   : > { %v16357_v11 = vpack.c.bf16 %v17419_v4, %v17418_v6  ;;  %v16360_v18 = vpack.c.bf16 %v17424_v29, %v17423_v16  ;;  %v3830_v4 = vld [vmem:[%s21941_s2 + $0x28] sm:$0xff]  ;;  %v3831_v6 = vld [vmem:[%s21941_s2 + $0x30] sm:$0xff] }
 0x975   : > { %16341 = vmatpush3.bf16.msk.msra.mxu0 %vm19238_vm11, %v16336_v21  ;;  %v17427_v22 = vpop.permute.xlu1 %17426  ;;  %v17432_v32 = vpop.permute.xlu0 %17431 }
 0x976   : > { %16342 = vmatprep.subr.bf16.mxu0 %v18109_v0  ;;  %v17429_v23 = vunpack.i.h.bf16 %v17427_v22  ;;  %v17428_v27 = vunpack.i.l.bf16 %v17427_v22  ;;  %v17434_v30 = vunpack.i.h.bf16 %v17432_v32  ;;  %v17433_v39 = vunpack.i.l.bf16 %v17432_v32 }
 0x978   : > { %14373 = vmatmul.mubr.msk.f32.vlgmr.msra.gmra.mrb[54].mxu0 %vm3214_vm9, %v378_v3  ;;  %v16364_v31 = vpack.c.bf16 %v17429_v23, %v17428_v27  ;;  %v16367_v40 = vpack.c.bf16 %v17434_v30, %v17433_v39  ;;  %v12197_v23 = vld [vmem:[%s21941_s2 + $0x48] sm:$0xff] }
 0x979   : > { %16344 = vmatpush3.bf16.msra.mxu0 %v16343_v52  ;;  %14383 = vmatprep.mubr.msk.f32.mxu0 %vm18110_vm0, %v18111_v1  ;;  %v17437_v45 = vpop.permute.xlu1 %17436  ;;  %v17442_v50 = vpop.permute.xlu0 %17441 }
 0x97a   : > { %16345 = vmatprep.subr.bf16.mxu0 %v18109_v0  ;;  %v17439_v49 = vunpack.i.h.bf16 %v17437_v45  ;;  %v17438_v41 = vunpack.i.l.bf16 %v17437_v45  ;;  %v17444_v54 = vunpack.i.h.bf16 %v17442_v50  ;;  %v17443_v46 = vunpack.i.l.bf16 %v17442_v50  ;;  %v12199_v45 = vld [vmem:[%s21941_s2 + $0x58] sm:$0xff]  ;;  %v12243_v50 = vld [vmem:[%s21941_s2 + $0xe0] sm:$0xff] }
 0x97c   : > { %v16371_v34 = vpack.c.bf16 %v17439_v49, %v17438_v41  ;;  %v16374_v56 = vpack.c.bf16 %v17444_v54, %v17443_v46  ;;  %v12200_v41 = vld [vmem:[%s21941_s2 + $0x60] sm:$0xff]  ;;  %v12202_v54 = vld [vmem:[%s21941_s2 + $0x70] sm:$0xff] }
 0x97d   : > { %16348 = vmatpush3.bf16.msk.msra.mxu0 %vm18208_vm3, %v16346_v5  ;;  %v12245_v46 = vld [vmem:[%s21941_s2 + $0xf0] sm:$0xff] }
 0x97e   : > { %16349 = vmatprep.subr.bf16.mxu0 %v18109_v0 }
 0x980   : > { %14384 = vmatmul.mubr.msk.f32.vlgmr.msra.gmra.mrb[56].mxu0 %vm398_vm4, %v12165_v58 }
 0x981   : > { %14386 = vmatprep.mubr.msk.f32.mxu0 %vm18110_vm0, %v18111_v1  ;;  %16351 = vmatpush3.bf16.msra.mxu0 %v16350_v62  ;;  %v3825_v62 = vld [vmem:[%s21941_s2] sm:$0xff] }
 0x982   : > { %16352 = vmatprep.subr.bf16.mxu0 %v18109_v0 }
 0x984   : > { %14387 = vmatmul.mubr.msk.f32.gmra.mrb[58].mxu0 %vm398_vm4, %v12166_v7  ;;  %v3826_v7 = vld [vmem:[%s21941_s2 + $0x8] sm:$0xff] }
 0x985   : > { %14389 = vmatprep.mubr.msk.f32.mxu0 %vm18110_vm0, %v18111_v1  ;;  %16355 = vmatpush3.bf16.msk.msra.mxu0 %vm18208_vm3, %v16353_v55  ;;  %v3827_v55 = vld [vmem:[%s21941_s2 + $0x10] sm:$0xff] }
 0x986   : > { %16356 = vmatprep.subr.bf16.mxu0 %v18109_v0 }
 0x988   : > { %14390 = vmatmul.mubr.msk.f32.gmra.mrb[60].mxu0 %vm398_vm4, %v12167_v42  ;;  %v3829_v42 = vld [vmem:[%s21941_s2 + $0x20] sm:$0xff] }
 0x989   : > { %14400 = vmatprep.mubr.msk.f32.mxu0 %vm18110_vm0, %v18111_v1 }
 0x98c   : > { %14401 = vmatmul.mubr.msk.f32.vlgmr.msra.gmra.mrb[56].mxu0 %vm398_vm4, %v3309_v13 }
 0x98d   : > { %14403 = vmatprep.mubr.msk.f32.mxu0 %vm18110_vm0, %v18111_v1  ;;  %16358 = vmatpush3.bf16.msra.mxu0 %v16357_v11  ;;  %v3833_v11 = vld [vmem:[%s21941_s2 + $0x40] sm:$0xff] }
 0x98e   : > { %16359 = vmatprep.subr.bf16.mxu0 %v18109_v0 }
 0x990   : > { %14404 = vmatmul.mubr.msk.f32.gmra.mrb[58].mxu0 %vm398_vm4, %v3310_v19 }
 0x991   : > { %14406 = vmatprep.mubr.msk.f32.mxu0 %vm18110_vm0, %v18111_v1  ;;  %16362 = vmatpush3.bf16.msk.msra.mxu0 %vm18208_vm3, %v16360_v18 }
 0x992   : > { %16363 = vmatprep.subr.bf16.mxu0 %v18109_v0 }
 0x994   : > { %14407 = vmatmul.mubr.msk.f32.gmra.mrb[60].mxu0 %vm398_vm4, %v3311_v24 }
 0x995   : > { %14417 = vmatprep.mubr.msk.f32.mxu0 %vm18110_vm0, %v18111_v1 }
 0x998   : > { %14418 = vmatmul.mubr.msk.f32.vlgmr.msra.gmra.mrb[56].mxu0 %vm398_vm4, %v12176_v36 }
 0x999   : > { %14420 = vmatprep.mubr.msk.f32.mxu0 %vm18110_vm0, %v18111_v1  ;;  %16365 = vmatpush3.bf16.msra.mxu0 %v16364_v31 }
 0x99a   : > { %16366 = vmatprep.subr.bf16.mxu0 %v18109_v0 }
 0x99c   : > { %14421 = vmatmul.mubr.msk.f32.gmra.mrb[58].mxu0 %vm398_vm4, %v12177_v44 }
 0x99d   : > { %14423 = vmatprep.mubr.msk.f32.mxu0 %vm18110_vm0, %v18111_v1  ;;  %16369 = vmatpush3.bf16.msk.msra.mxu0 %vm18208_vm3, %v16367_v40  ;;  %v12198_v40 = vld [vmem:[%s21941_s2 + $0x50] sm:$0xff] }
 0x99e   : > { %16370 = vmatprep.subr.bf16.mxu0 %v18109_v0 }
 0x9a0   : > { %14424 = vmatmul.mubr.msk.f32.gmra.mrb[60].mxu0 %vm398_vm4, %v12178_v48  ;;  %v12242_v48 = vld [vmem:[%s21941_s2 + $0xd8] sm:$0xff] }
 0x9a1   : > { %14434 = vmatprep.mubr.msk.f32.mxu0 %vm18110_vm0, %v18111_v1 }
 0x9a4   : > { %14435 = vmatmul.mubr.msk.f32.vlgmr.msra.gmra.mrb[56].mxu0 %vm398_vm4, %v12183_v51  ;;  %v12244_v51 = vld [vmem:[%s21941_s2 + $0xe8] sm:$0xff] }
 0x9a5   : > { %14437 = vmatprep.mubr.msk.f32.mxu0 %vm18110_vm0, %v18111_v1  ;;  %16372 = vmatpush3.bf16.msra.mxu0 %v16371_v34  ;;  %v12201_v34 = vld [vmem:[%s21941_s2 + $0x68] sm:$0xff] }
 0x9a6   : > { %16373 = vmatprep.subr.bf16.mxu0 %v18109_v0 }
 0x9a8   : > { %14438 = vmatmul.mubr.msk.f32.gmra.mrb[58].mxu0 %vm398_vm4, %v12184_v57  ;;  %v12246_v57 = vld [vmem:[%s21941_s2 + $0xf8] sm:$0xff] }
 0x9a9   : > { %14440 = vmatprep.mubr.msk.f32.mxu0 %vm18110_vm0, %v18111_v1  ;;  %16376 = vmatpush3.bf16.msk.msra.mxu0 %vm18208_vm3, %v16374_v56  ;;  %v12203_v56 = vld [vmem:[%s21941_s2 + $0x78] sm:$0xff] }
 0x9aa   : > { %16380 = vmatprep.subr.bf16.mxu0 %v18109_v0 }
 0x9ac   : > { %14441 = vmatmul.mubr.msk.f32.gmra.mrb[60].mxu0 %vm398_vm4, %v12185_v60  ;;  %v12204_v60 = vld [vmem:[%s21941_s2 + $0x80] sm:$0xff] }
 0x9ad   : > { %14451 = vmatprep.mubr.msk.f32.mxu0 %vm18110_vm0, %v18111_v1 }
 0x9b0   : > { %14452 = vmatmul.mubr.msk.f32.vlgmr.msra.gmra.mrb[56].mxu0 %vm398_vm4, %v12190_v61  ;;  %v12247_v61 = vld [vmem:[%s21941_s2 + $0x100] sm:$0xff] }
 0x9b1   : > { %14454 = vmatprep.mubr.msk.f32.mxu0 %vm18110_vm0, %v18111_v1 }
 0x9b4   : > { %14455 = vmatmul.mubr.msk.f32.gmra.mrb[58].mxu0 %vm398_vm4, %v12191_v59 }
 0x9b5   : > { %14457 = vmatprep.mubr.msk.f32.mxu0 %vm18110_vm0, %v18111_v1 }
 0x9b8   : > { %14458 = vmatmul.mubr.msk.f32.gmra.mrb[60].mxu0 %vm398_vm4, %v12192_v15  ;;  %v12205_v15 = vld [vmem:[%s21941_s2 + $0x88] sm:$0xff] }
 0x9b9   : > { %14499 = vmatprep.mubr.msk.f32.mxu0 %vm18110_vm0, %v18111_v1 }
 0xa4b   : > { %v14374_v25 = vpop.f32.mrb[54].mxu0 }
 0xa4c   : > { %v3301_v38 = vmax.f32 %v14374_v25, 0.0  ;;  %v3291_v21 = vpop.f32.mrb[55].mxu0  ;;  %v12248_v25 = vld [vmem:[%s21941_s2 + $0x108] sm:$0xff] }
 0xa4d   : > { %v3300_v63 = vmax.f32 %v3291_v21, 0.0 }
 0xa4e   : > { %3303 = vst [vmem:[%s19369_s29 + $0x8] sm:$0x3f] %v3301_v38 }
 0xa4f   : > { %3302 = vst [vmem:[%s19369_s29] sm:$0xff] %v3300_v63  ;;  %v12224_v63 = vld [vmem:[%s21941_s2 + $0x90] sm:$0xff] }
 0xa83   : > { %v3808_v2 = vpop.f32.mrb[56].mxu0 }
 0xa84   : > { %v14453_v43 = vpop.f32.mrb[57].mxu0 }
 0xa87   : > { %v3813_v52 = vpop.f32.mrb[58].mxu0 }
 0xa88   : > { %v14456_v28 = vpop.f32.mrb[59].mxu0  ;;  %v17445_v53 = vpack.i.bf16 %v3813_v52, %v3808_v2  ;;  %v16381_v3 = vpack.c.bf16 %v3813_v52, %v3808_v2  ;;  %v12249_v2 = vld [vmem:[%s21941_s2 + $0x110] sm:$0xff]  ;;  %v12225_v52 = vld [vmem:[%s21941_s2 + $0x98] sm:$0xff] }
 0xa89   : > { %v12250_v28 = vld [vmem:[%s21941_s2 + $0x118] sm:$0xff] }
 0xa8a   : > { %17446 = vrot.lane.b32.xlu1 %v17445_v53, %s18112_s16  ;;  %16382 = vmatpush3.bf16.msra.mxu0 %v16381_v3  ;;  %v12226_v3 = vld [vmem:[%s21941_s2 + $0xa0] sm:$0xff] }
 0xa8b   : > { %v3818_v5 = vpop.f32.mrb[60].mxu0  ;;  %14497 = vmatprep.subr.mxu0 %v18111_v1 }
 0xa8c   : > { %3847 = vrot.lane.b32.xlu0 %v3818_v5, %s18112_s16  ;;  %v14459_v58 = vpop.f32.mrb[61].mxu0 }
 0xa8d   : > { %v12228_v58 = vld [vmem:[%s21941_s2 + $0xb0] sm:$0xff] }
 0xa8e   : > { %17451 = vrot.lane.b32.xlu1 %v17445_v53, %s18113_s17  ;;  %14498 = vmatpush3.msra.mxu0 %v3818_v5 }
 0xa8f   : > { %14500 = vmatmul.mubr.msk.f32.vlgmr.msra.gmra.mrb[62].mxu0 %vm930_vm5, %v3825_v62  ;;  %16386 = vmatprep.subr.bf16.mxu0 %v18109_v0  ;;  %v12229_v62 = vld [vmem:[%s21941_s2 + $0xb8] sm:$0xff] }
 0xa90   : > { %4136 = vrot.lane.b32.xlu0 %v3818_v5, %s18113_s17  ;;  %14502 = vmatprep.mubr.msk.f32.mxu0 %vm18110_vm0, %v18111_v1 }
 0xa92   : > { %17456 = vrot.lane.b32.xlu1 %v17445_v53, %s18114_s18 }
 0xa93   : > { %14503 = vmatmul.mubr.msk.f32.gmra.mrb[64].mxu0 %vm930_vm5, %v3826_v7  ;;  %v12230_v7 = vld [vmem:[%s21941_s2 + $0xc0] sm:$0xff] }
 0xa94   : > { %17461 = vrot.lane.b32.xlu0 %v17445_v53, %s18115_s19  ;;  %14505 = vmatprep.mubr.msk.f32.mxu0 %vm18110_vm0, %v18111_v1 }
 0xa96   : > { %4297 = vrot.lane.b32.xlu1 %v3818_v5, %s18114_s18 }
 0xa97   : > { %14506 = vmatmul.mubr.msk.f32.gmra.mrb[66].mxu0 %vm930_vm5, %v3827_v55  ;;  %v12231_v55 = vld [vmem:[%s21941_s2 + $0xc8] sm:$0xff] }
 0xa98   : > { %4458 = vrot.lane.b32.xlu0 %v3818_v5, %s18115_s19  ;;  %14508 = vmatprep.mubr.msk.f32.mxu0 %vm18110_vm0, %v18111_v1  ;;  %v12227_v5 = vld [vmem:[%s21941_s2 + $0xa8] sm:$0xff] }
 0xa9b   : > { %14509 = vmatmul.mubr.msk.f32.gmra.mrb[68].mxu0 %vm930_vm5, %v3828_v8  ;;  %v12232_v8 = vld [vmem:[%s21941_s2 + $0xd0] sm:$0xff] }
 0xa9c   : > { %14511 = vmatprep.mubr.msk.f32.mxu0 %vm18110_vm0, %v18111_v1 }
 0xa9f   : > { %14512 = vmatmul.mubr.msk.f32.gmra.mrb[70].mxu0 %vm930_vm5, %v3829_v42  ;;  %v12260_v42 = vld [vmem:[%s21941_s2 + $0x120] sm:$0xff] }
 0xaa0   : > { %14514 = vmatprep.mubr.msk.f32.mxu0 %vm18110_vm0, %v18111_v1 }
 0xaa3   : > { %14515 = vmatmul.mubr.msk.f32.gmra.mrb[72].mxu0 %vm930_vm5, %v3830_v4  ;;  %v12261_v4 = vld [vmem:[%s21941_s2 + $0x128] sm:$0xff] }
 0xaa4   : > { %14517 = vmatprep.mubr.msk.f32.mxu0 %vm18110_vm0, %v18111_v1 }
 0xaa7   : > { %14518 = vmatmul.mubr.msk.f32.gmra.mrb[74].mxu0 %vm930_vm5, %v3831_v6  ;;  %v12262_v6 = vld [vmem:[%s21941_s2 + $0x130] sm:$0xff] }
 0xaa8   : > { %14520 = vmatprep.mubr.msk.f32.mxu0 %vm18110_vm0, %v18111_v1 }
 0xaab   : > { %14521 = vmatmul.mubr.msk.f32.gmra.mrb[76].mxu0 %vm930_vm5, %v3832_v9  ;;  %v12263_v9 = vld [vmem:[%s21941_s2 + $0x138] sm:$0xff] }
 0xaac   : > { %14523 = vmatprep.mubr.msk.f32.mxu0 %vm18110_vm0, %v18111_v1 }
 0xaaf   : > { %14524 = vmatmul.mubr.msk.f32.gmra.mrb[78].mxu0 %vm930_vm5, %v3833_v11  ;;  %v12264_v11 = vld [vmem:[%s21941_s2 + $0x140] sm:$0xff] }
 0xab0   : > { %14565 = vmatprep.mubr.msk.f32.mxu0 %vm18110_vm0, %v18111_v1 }
 0xafc   : > { %v17447_v13 = vpop.permute.xlu1 %17446 }
 0xafd   : > { %v17449_v29 = vunpack.i.h.bf16 %v17447_v13  ;;  %v17448_v16 = vunpack.i.l.bf16 %v17447_v13  ;;  %v12265_v13 = vld [vmem:[%s21941_s2 + $0x148] sm:$0xff] }
 0xafe   : > { %v3848_v27 = vpop.permute.xlu0 %3847 }
 0xaff   : > { %v16378_v18 = vpack.c.bf16 %v17449_v29, %v17448_v16  ;;  %v12266_v16 = vld [vmem:[%s21941_s2 + $0x150] sm:$0xff] }
 0xb00   : > { %v17452_v19 = vpop.permute.xlu1 %17451 }
 0xb01   : > { %v17454_v22 = vunpack.i.h.bf16 %v17452_v19  ;;  %v17453_v24 = vunpack.i.l.bf16 %v17452_v19  ;;  %16379 = vmatpush3.bf16.msra.mxu1 %v16378_v18 }
 0xb02   : > { %14464 = vmatprep.subr.mxu1 %v18111_v1  ;;  %v4137_v44 = vpop.permute.xlu0 %4136 }
 0xb03   : > { %v16384_v31 = vpack.c.bf16 %v17454_v22, %v17453_v24  ;;  %v12267_v22 = vld [vmem:[%s21941_s2 + $0x158] sm:$0xff] }
 0xb04   : > { %v17457_v32 = vpop.permute.xlu1 %17456 }
 0xb05   : > { %v17459_v36 = vunpack.i.h.bf16 %v17457_v32  ;;  %v17458_v30 = vunpack.i.l.bf16 %v17457_v32  ;;  %14465 = vmatpush3.msra.mxu1 %v3848_v27  ;;  %v12268_v27 = vld [vmem:[%s21941_s2 + $0x160] sm:$0xff] }
 0xb06   : > { %14467 = vmatmul.mubr.msk.f32.vlgmr.msra.gmra.mrb[96].mxu1 %vm930_vm5, %v12197_v23  ;;  %16383 = vmatprep.subr.bf16.mxu1 %v18109_v0  ;;  %v17462_v59 = vpop.permute.xlu0 %17461 }
 0xb07   : > { %v16387_v39 = vpack.c.bf16 %v17459_v36, %v17458_v30  ;;  %16385 = vmatpush3.bf16.msra.mxu1 %v16384_v31  ;;  %14469 = vmatprep.mubr.msk.f32.mxu1 %vm18110_vm0, %v18111_v1  ;;  %v17464_v38 = vunpack.i.h.bf16 %v17462_v59  ;;  %v17463_v21 = vunpack.i.l.bf16 %v17462_v59 }
 0xb08   : > { %14530 = vmatprep.subr.mxu1 %v18111_v1  ;;  %v4298_v49 = vpop.permute.xlu1 %4297 }
 0xb09   : > { %16388 = vmatpush3.bf16.msra.mxu0 %v16387_v39  ;;  %v16390_v43 = vpack.c.bf16 %v17464_v38, %v17463_v21 }
 0xb0a   : > { %14470 = vmatmul.mubr.msk.f32.gmra.mrb[98].mxu1 %vm930_vm5, %v12198_v40  ;;  %14563 = vmatprep.subr.mxu0 %v18111_v1  ;;  %v4459_v53 = vpop.permute.xlu0 %4458 }
 0xb0b   : > { %14531 = vmatpush3.msra.mxu1 %v4137_v44  ;;  %14472 = vmatprep.mubr.msk.f32.mxu1 %vm18110_vm0, %v18111_v1 }
 0xb0c   : > { %16389 = vmatprep.subr.bf16.mxu1 %v18109_v0 }
 0xb0d   : > { %14564 = vmatpush3.msra.mxu0 %v4298_v49 }
 0xb0e   : > { %14473 = vmatmul.mubr.msk.f32.gmra.mrb[100].mxu1 %vm930_vm5, %v12199_v45  ;;  %14566 = vmatmul.mubr.msk.f32.vlgmr.msra.gmra.mrb[80].mxu0 %vm930_vm5, %v12242_v48 }
 0xb0f   : > { %14475 = vmatprep.mubr.msk.f32.mxu1 %vm18110_vm0, %v18111_v1  ;;  %14568 = vmatprep.mubr.msk.f32.mxu0 %vm18110_vm0, %v18111_v1 }
 0xb10   : > { %16392 = vmatprep.subr.bf16.mxu0 %v18109_v0 }
 0xb12   : > { %14476 = vmatmul.mubr.msk.f32.gmra.mrb[102].mxu1 %vm930_vm5, %v12200_v41  ;;  %14569 = vmatmul.mubr.msk.f32.gmra.mrb[82].mxu0 %vm930_vm5, %v12243_v50 }
 0xb13   : > { %14478 = vmatprep.mubr.msk.f32.mxu1 %vm18110_vm0, %v18111_v1  ;;  %14571 = vmatprep.mubr.msk.f32.mxu0 %vm18110_vm0, %v18111_v1 }
 0xb16   : > { %14479 = vmatmul.mubr.msk.f32.gmra.mrb[104].mxu1 %vm930_vm5, %v12201_v34  ;;  %14572 = vmatmul.mubr.msk.f32.gmra.mrb[84].mxu0 %vm930_vm5, %v12244_v51 }
 0xb17   : > { %14481 = vmatprep.mubr.msk.f32.mxu1 %vm18110_vm0, %v18111_v1  ;;  %14574 = vmatprep.mubr.msk.f32.mxu0 %vm18110_vm0, %v18111_v1 }
 0xb1a   : > { %14482 = vmatmul.mubr.msk.f32.gmra.mrb[106].mxu1 %vm930_vm5, %v12202_v54  ;;  %14575 = vmatmul.mubr.msk.f32.gmra.mrb[86].mxu0 %vm930_vm5, %v12245_v46 }
 0xb1b   : > { %14484 = vmatprep.mubr.msk.f32.mxu1 %vm18110_vm0, %v18111_v1  ;;  %14577 = vmatprep.mubr.msk.f32.mxu0 %vm18110_vm0, %v18111_v1 }
 0xb1e   : > { %14485 = vmatmul.mubr.msk.f32.gmra.mrb[108].mxu1 %vm930_vm5, %v12203_v56  ;;  %14578 = vmatmul.mubr.msk.f32.gmra.mrb[88].mxu0 %vm930_vm5, %v12246_v57 }
 0xb1f   : > { %14487 = vmatprep.mubr.msk.f32.mxu1 %vm18110_vm0, %v18111_v1  ;;  %14580 = vmatprep.mubr.msk.f32.mxu0 %vm18110_vm0, %v18111_v1 }
 0xb22   : > { %14488 = vmatmul.mubr.msk.f32.gmra.mrb[110].mxu1 %vm930_vm5, %v12204_v60  ;;  %14581 = vmatmul.mubr.msk.f32.gmra.mrb[90].mxu0 %vm930_vm5, %v12247_v61 }
 0xb23   : > { %14490 = vmatprep.mubr.msk.f32.mxu1 %vm18110_vm0, %v18111_v1  ;;  %14583 = vmatprep.mubr.msk.f32.mxu0 %vm18110_vm0, %v18111_v1 }
 0xb26   : > { %14491 = vmatmul.mubr.msk.f32.gmra.mrb[112].mxu1 %vm930_vm5, %v12205_v15  ;;  %14584 = vmatmul.mubr.msk.f32.gmra.mrb[92].mxu0 %vm930_vm5, %v12248_v25 }
 0xb27   : > { %14532 = vmatprep.mubr.msk.f32.mxu1 %vm18110_vm0, %v18111_v1  ;;  %14586 = vmatprep.mubr.msk.f32.mxu0 %vm18110_vm0, %v18111_v1 }
 0xb2a   : > { %14533 = vmatmul.mubr.msk.f32.vlgmr.msra.gmra.mrb[114].mxu1 %vm930_vm5, %v12224_v63  ;;  %14587 = vmatmul.mubr.msk.f32.gmra.mrb[94].mxu0 %vm930_vm5, %v12249_v2 }
 0xb2b   : > { %16391 = vmatpush3.bf16.msra.mxu1 %v16390_v43  ;;  %14535 = vmatprep.mubr.msk.f32.mxu1 %vm18110_vm0, %v18111_v1 }
 0xb2c   : > { %14596 = vmatprep.subr.mxu1 %v18111_v1  ;;  %14589 = vmatprep.mubr.msk.f32.mxu0 %vm18110_vm0, %v18111_v1 }
 0xb2e   : > { %14536 = vmatmul.mubr.msk.f32.gmra.mrb[116].mxu1 %vm930_vm5, %v12225_v52  ;;  %14590 = vmatmul.mubr.msk.f32.gmra.mrb[96].mxu0 %vm930_vm5, %v12250_v28 }
 0xb2f   : > { %14597 = vmatpush3.msra.mxu1 %v4459_v53  ;;  %14538 = vmatprep.mubr.msk.f32.mxu1 %vm18110_vm0, %v18111_v1 }
 0xb30   : > { %14643 = vmatprep.mubr.msk.f32.mxu0 %vm18110_vm0, %v18111_v1  ;;  %16404 = vmatprep.subr.bf16.mxu1 %v18109_v0 }
 0xb32   : > { %14539 = vmatmul.mubr.msk.f32.gmra.mrb[118].mxu1 %vm930_vm5, %v12226_v3 }
 0xb33   : > { %14541 = vmatprep.mubr.msk.f32.mxu1 %vm18110_vm0, %v18111_v1 }
 0xb36   : > { %14542 = vmatmul.mubr.msk.f32.gmra.mrb[120].mxu1 %vm930_vm5, %v12227_v5 }
 0xb37   : > { %14544 = vmatprep.mubr.msk.f32.mxu1 %vm18110_vm0, %v18111_v1 }
 0xb3a   : > { %14545 = vmatmul.mubr.msk.f32.gmra.mrb[122].mxu1 %vm930_vm5, %v12228_v58 }
 0xb3b   : > { %14547 = vmatprep.mubr.msk.f32.mxu1 %vm18110_vm0, %v18111_v1 }
 0xb3e   : > { %14548 = vmatmul.mubr.msk.f32.gmra.mrb[124].mxu1 %vm930_vm5, %v12229_v62 }
 0xb3f   : > { %14550 = vmatprep.mubr.msk.f32.mxu1 %vm18110_vm0, %v18111_v1 }
 0xb42   : > { %14551 = vmatmul.mubr.msk.f32.gmra.mrb[126].mxu1 %vm930_vm5, %v12230_v7 }
 0xb43   : > { %14553 = vmatprep.mubr.msk.f32.mxu1 %vm18110_vm0, %v18111_v1 }
 0xb46   : > { %14554 = vmatmul.mubr.msk.f32.gmra.mrb[128].mxu1 %vm930_vm5, %v12231_v55 }
 0xb47   : > { %14556 = vmatprep.mubr.msk.f32.mxu1 %vm18110_vm0, %v18111_v1 }
 0xb4a   : > { %14557 = vmatmul.mubr.msk.f32.gmra.mrb[130].mxu1 %vm930_vm5, %v12232_v8 }
 0xb4b   : > { %14598 = vmatprep.mubr.msk.f32.mxu1 %vm18110_vm0, %v18111_v1 }
 0xb4e   : > { %14599 = vmatmul.mubr.msk.f32.vlgmr.msra.gmra.mrb[132].mxu1 %vm930_vm5, %v12260_v42 }
 0xb4f   : > { %14601 = vmatprep.mubr.msk.f32.mxu1 %vm18110_vm0, %v18111_v1  ;;  %16406 = vmatpush3.bf16.msra.mxu1 %v18728_v10 }
 0xb50   : > { %16407 = vmatprep.subr.bf16.mxu1 %v18109_v0 }
 0xb52   : > { %14602 = vmatmul.mubr.msk.f32.gmra.mrb[134].mxu1 %vm930_vm5, %v12261_v4 }
 0xb53   : > { %14604 = vmatprep.mubr.msk.f32.mxu1 %vm18110_vm0, %v18111_v1  ;;  %16409 = vmatpush3.bf16.msra.mxu1 %v18734_v12 }
 0xb54   : > { %16410 = vmatprep.subr.bf16.mxu1 %v18109_v0 }
 0xb56   : > { %14605 = vmatmul.mubr.msk.f32.gmra.mrb[136].mxu1 %vm930_vm5, %v12262_v6 }
 0xb57   : > { %14607 = vmatprep.mubr.msk.f32.mxu1 %vm18110_vm0, %v18111_v1  ;;  %16412 = vmatpush3.bf16.msra.mxu1 %v18744_v14 }
 0xb58   : > { %16413 = vmatprep.subr.bf16.mxu1 %v18109_v0 }
 0xb5a   : > { %14608 = vmatmul.mubr.msk.f32.gmra.mrb[138].mxu1 %vm930_vm5, %v12263_v9 }
 0xb5b   : > { %14610 = vmatprep.mubr.msk.f32.mxu1 %vm18110_vm0, %v18111_v1  ;;  %16415 = vmatpush3.bf16.msra.mxu1 %v18754_v20 }
 0xb5c   : > { %16416 = vmatprep.subr.bf16.mxu1 %v18109_v0 }
 0xb5e   : > { %14611 = vmatmul.mubr.msk.f32.gmra.mrb[140].mxu1 %vm930_vm5, %v12264_v11 }
 0xb5f   : > { %14613 = vmatprep.mubr.msk.f32.mxu1 %vm18110_vm0, %v18111_v1  ;;  %16418 = vmatpush3.bf16.msra.mxu1 %v18764_v33 }
 0xb60   : > { %16419 = vmatprep.subr.bf16.mxu1 %v18109_v0 }
 0xb62   : > { %14614 = vmatmul.mubr.msk.f32.gmra.mrb[142].mxu1 %vm930_vm5, %v12265_v13  ;;  %v4079_v29 = vpop.f32.mrb[62].mxu0 }
 0xb63   : > { %14616 = vmatprep.mubr.msk.f32.mxu1 %vm18110_vm0, %v18111_v1  ;;  %v14501_v18 = vpop.f32.mrb[63].mxu0  ;;  %16421 = vmatpush3.bf16.msra.mxu1 %v18774_v26 }
 0xb64   : > { %16422 = vmatprep.subr.bf16.mxu1 %v18109_v0 }
 0xb66   : > { %14617 = vmatmul.mubr.msk.f32.gmra.mrb[144].mxu1 %vm930_vm5, %v12266_v16  ;;  %v4084_v19 = vpop.f32.mrb[64].mxu0 }
 0xb67   : > { %14619 = vmatprep.mubr.msk.f32.mxu1 %vm18110_vm0, %v18111_v1  ;;  %v14504_v24 = vpop.f32.mrb[65].mxu0  ;;  %16424 = vmatpush3.bf16.msra.mxu1 %v18784_v37 }
 0xb68   : > { %16425 = vmatprep.subr.bf16.mxu1 %v18109_v0 }
 0xb6a   : > { %14620 = vmatmul.mubr.msk.f32.gmra.mrb[146].mxu1 %vm930_vm5, %v12267_v22  ;;  %v4089_v23 = vpop.f32.mrb[66].mxu0 }
 0xb6b   : > { %14622 = vmatprep.mubr.msk.f32.mxu1 %vm18110_vm0, %v18111_v1  ;;  %v14507_v32 = vpop.f32.mrb[67].mxu0  ;;  %16427 = vmatpush3.bf16.msra.mxu1 %v18794_v35 }
 0xb6e   : > { %14623 = vmatmul.mubr.msk.f32.gmra.mrb[148].mxu1 %vm930_vm5, %v12268_v27  ;;  %v4094_v31 = vpop.f32.mrb[68].mxu0 }
 0xb6f   : > { %v14510_v36 = vpop.f32.mrb[69].mxu0  ;;  %14708 = vmatprep.mubr.msk.f32.mxu1 %vm18110_vm0, %v18111_v1 }
 0xb72   : > { %v4099_v30 = vpop.f32.mrb[70].mxu0 }
 0xb73   : > { %v14513_v39 = vpop.f32.mrb[71].mxu0 }
 0xb76   : > { %v4104_v40 = vpop.f32.mrb[72].mxu0 }
 0xb77   : > { %v14516_v44 = vpop.f32.mrb[73].mxu0 }
 0xb7a   : > { %v4109_v45 = vpop.f32.mrb[74].mxu0 }
 0xb7b   : > { %v14519_v48 = vpop.f32.mrb[75].mxu0 }
 0xb7e   : > { %v4114_v49 = vpop.f32.mrb[76].mxu0 }
 0xb7f   : > { %v14522_v41 = vpop.f32.mrb[77].mxu0 }
 0xb82   : > { %v4119_v50 = vpop.f32.mrb[78].mxu0 }
 0xb83   : > { %v14525_v34 = vpop.f32.mrb[79].mxu0 }
 0xbd9   : > { %v3942_v51 = vpop.f32.mrb[96].mxu1 }
 0xbda   : > { %v4080_v54 = vadd.f32 %v4079_v29, %v3942_v51  ;;  %v14468_v46 = vpop.f32.mrb[97].mxu1 }
 0xbdd   : > { %v3947_v56 = vpop.f32.mrb[98].mxu1 }
 0xbde   : > { %v4085_v57 = vadd.f32 %v4084_v19, %v3947_v56  ;;  %v14471_v60 = vpop.f32.mrb[99].mxu1 }
 0xbe1   : > { %v3952_v61 = vpop.f32.mrb[100].mxu1  ;;  %v4392_v59 = vpop.f32.mrb[80].mxu0 }
 0xbe2   : > { %v4090_v15 = vadd.f32 %v4089_v23, %v3952_v61  ;;  %v14474_v25 = vpop.f32.mrb[101].mxu1  ;;  %v14567_v38 = vpop.f32.mrb[81].mxu0 }
 0xbe5   : > { %v3957_v21 = vpop.f32.mrb[102].mxu1  ;;  %v4397_v63 = vpop.f32.mrb[82].mxu0 }
 0xbe6   : > { %v4095_v2 = vadd.f32 %v4094_v31, %v3957_v21  ;;  %v14477_v43 = vpop.f32.mrb[103].mxu1  ;;  %v14570_v52 = vpop.f32.mrb[83].mxu0 }
 0xbe9   : > { %v3962_v28 = vpop.f32.mrb[104].mxu1  ;;  %v4402_v53 = vpop.f32.mrb[84].mxu0 }
 0xbea   : > { %v4100_v3 = vadd.f32 %v4099_v30, %v3962_v28  ;;  %v14480_v5 = vpop.f32.mrb[105].mxu1  ;;  %v14573_v58 = vpop.f32.mrb[85].mxu0 }
 0xbed   : > { %v3967_v62 = vpop.f32.mrb[106].mxu1  ;;  %v4407_v7 = vpop.f32.mrb[86].mxu0 }
 0xbee   : > { %v4105_v55 = vadd.f32 %v4104_v40, %v3967_v62  ;;  %v14483_v8 = vpop.f32.mrb[107].mxu1  ;;  %v14576_v42 = vpop.f32.mrb[87].mxu0 }
 0xbf1   : > { %v3972_v4 = vpop.f32.mrb[108].mxu1  ;;  %v4412_v6 = vpop.f32.mrb[88].mxu0 }
 0xbf2   : > { %v4110_v9 = vadd.f32 %v4109_v45, %v3972_v4  ;;  %v14486_v11 = vpop.f32.mrb[109].mxu1  ;;  %v14579_v13 = vpop.f32.mrb[89].mxu0 }
 0xbf5   : > { %v3977_v29 = vpop.f32.mrb[110].mxu1  ;;  %v4417_v16 = vpop.f32.mrb[90].mxu0 }
 0xbf6   : > { %v4115_v18 = vadd.f32 %v4114_v49, %v3977_v29  ;;  %v14489_v19 = vpop.f32.mrb[111].mxu1  ;;  %v14582_v22 = vpop.f32.mrb[91].mxu0 }
 0xbf9   : > { %v3982_v24 = vpop.f32.mrb[112].mxu1  ;;  %v4422_v23 = vpop.f32.mrb[92].mxu0 }
 0xbfa   : > { %v4120_v27 = vadd.f32 %v4119_v50, %v3982_v24  ;;  %v14492_v32 = vpop.f32.mrb[113].mxu1  ;;  %v14585_v31 = vpop.f32.mrb[93].mxu0 }
 0xbfd   : > { %v4231_v36 = vpop.f32.mrb[114].mxu1  ;;  %v4427_v30 = vpop.f32.mrb[94].mxu0 }
 0xbfe   : > { %v4275_v39 = vadd.f32 %v4231_v36, %v4080_v54  ;;  %v14534_v40 = vpop.f32.mrb[115].mxu1  ;;  %v14588_v44 = vpop.f32.mrb[95].mxu0 }
 0xbff   : > { %v18037_v40 = vld [vmem:[%s21942_s3 + $0x10] sm:$0xff] }
 0xc00   : > { %v4436_v48 = vadd.f32 %v4392_v59, %v4275_v39 }
 0xc01   : > { %v4236_v41 = vpop.f32.mrb[116].mxu1  ;;  %v4432_v45 = vpop.f32.mrb[96].mxu0 }
 0xc02   : > { %v4276_v34 = vadd.f32 %v4236_v41, %v4085_v57  ;;  %v14537_v51 = vpop.f32.mrb[117].mxu1  ;;  %v14591_v46 = vpop.f32.mrb[97].mxu0 }
 0xc04   : > { %v4437_v56 = vadd.f32 %v4397_v63, %v4276_v34 }
 0xc05   : > { %v4241_v49 = vpop.f32.mrb[118].mxu1 }
 0xc06   : > { %v4277_v60 = vadd.f32 %v4241_v49, %v4090_v15  ;;  %v14540_v61 = vpop.f32.mrb[119].mxu1 }
 0xc08   : > { %v4438_v25 = vadd.f32 %v4402_v53, %v4277_v60 }
 0xc09   : > { %v4246_v38 = vpop.f32.mrb[120].mxu1 }
 0xc0a   : > { %v4278_v50 = vadd.f32 %v4246_v38, %v4095_v2  ;;  %v14543_v21 = vpop.f32.mrb[121].mxu1 }
 0xc0c   : > { %v4439_v43 = vadd.f32 %v4407_v7, %v4278_v50 }
 0xc0d   : > { %v4251_v52 = vpop.f32.mrb[122].mxu1 }
 0xc0e   : > { %v4279_v28 = vadd.f32 %v4251_v52, %v4100_v3  ;;  %v14546_v54 = vpop.f32.mrb[123].mxu1 }
 0xc10   : > { %v4440_v5 = vadd.f32 %v4412_v6, %v4279_v28  ;;  %v18039_v28 = vld [vmem:[%s21942_s3 + $0x20] sm:$0xff] }
 0xc11   : > { %v4256_v58 = vpop.f32.mrb[124].mxu1 }
 0xc12   : > { %v4280_v59 = vadd.f32 %v4256_v58, %v4105_v55  ;;  %v14549_v62 = vpop.f32.mrb[125].mxu1  ;;  %v18035_v55 = vld [vmem:[%s21942_s3] sm:$0xff] }
 0xc14   : > { %v4441_v8 = vadd.f32 %v4417_v16, %v4280_v59 }
 0xc15   : > { %v4261_v57 = vpop.f32.mrb[126].mxu1 }
 0xc16   : > { %v4281_v42 = vadd.f32 %v4261_v57, %v4110_v9  ;;  %v14552_v4 = vpop.f32.mrb[127].mxu1 }
 0xc18   : > { %v4442_v63 = vadd.f32 %v4422_v23, %v4281_v42 }
 0xc19   : > { %v4266_v11 = vpop.f32.mrb[128].mxu1 }
 0xc1a   : > { %v4282_v15 = vadd.f32 %v4266_v11, %v4115_v18  ;;  %v14555_v13 = vpop.f32.mrb[129].mxu1  ;;  %v18036_v18 = vld [vmem:[%s21942_s3 + $0x8] sm:$0xff] }
 0xc1c   : > { %v4443_v53 = vadd.f32 %v4427_v30, %v4282_v15 }
 0xc1d   : > { %v4271_v29 = vpop.f32.mrb[130].mxu1 }
 0xc1e   : > { %v4283_v2 = vadd.f32 %v4271_v29, %v4120_v27  ;;  %v14558_v19 = vpop.f32.mrb[131].mxu1 }
 0xc20   : > { %v19676_v7 = vadd.f32 %v4432_v45, %v4283_v2 }
 0xc21   : > { %v4553_v3 = vpop.f32.mrb[132].mxu1 }
 0xc22   : > { %v4597_v22 = vadd.f32 %v4553_v3, %v4436_v48  ;;  %v14600_v6 = vpop.f32.mrb[133].mxu1 }
 0xc24   : > { %v4606_v9 = vadd.f32 %v18035_v55, %v4597_v22  ;;  %v18041_v22 = vld [vmem:[%s21942_s3 + $0x30] sm:$0xff] }
 0xc25   : > { %v4558_v24 = vpop.f32.mrb[134].mxu1 }
 0xc26   : > { %v4598_v16 = vadd.f32 %v4558_v24, %v4437_v56  ;;  %v14603_v23 = vpop.f32.mrb[135].mxu1  ;;  %v4624_v31 = vrot.slane %v4606_v9, 1  ;;  %v18038_v56 = vld [vmem:[%s21942_s3 + $0x18] sm:$0xff] }
 0xc28   : > { %v4607_v32 = vadd.f32 %v18036_v18, %v4598_v16 }
 0xc29   : > { %v4563_v27 = vpop.f32.mrb[136].mxu1 }
 0xc2a   : > { %v4625_v36 = vrot.slane %v4607_v32, 1  ;;  %v4599_v30 = vadd.f32 %v4563_v27, %v4438_v25  ;;  %v14606_v39 = vpop.f32.mrb[137].mxu1 }
 0xc2c   : > { %v4608_v44 = vadd.f32 %v18037_v40, %v4599_v30  ;;  %v4626_v48 = vsel %vm1709_vm6, %v4624_v31, %v4625_v36 }
 0xc2d   : > { %v4568_v41 = vpop.f32.mrb[138].mxu1  ;;  %v19688_v45 = vmax.f32 %v4606_v9, %v4626_v48 }
 0xc2e   : > { %v4627_v34 = vrot.slane %v4608_v44, 1  ;;  %v4600_v51 = vadd.f32 %v4568_v41, %v4439_v43  ;;  %v14609_v46 = vpop.f32.mrb[139].mxu1 }
 0xc30   : > { %v4609_v49 = vadd.f32 %v18038_v56, %v4600_v51  ;;  %v4628_v60 = vsel %vm1709_vm6, %v4625_v36, %v4627_v34 }
 0xc31   : > { %v4573_v61 = vpop.f32.mrb[140].mxu1  ;;  %v4651_v25 = vmax.f32 %v4607_v32, %v4628_v60 }
 0xc32   : > { %v4629_v38 = vrot.slane %v4609_v49, 1  ;;  %v4601_v50 = vadd.f32 %v4573_v61, %v4440_v5  ;;  %v14612_v21 = vpop.f32.mrb[141].mxu1  ;;  %v18040_v5 = vld [vmem:[%s21942_s3 + $0x28] sm:$0xff] }
 0xc33   : > { %v17465_v52 = vpack.i.bf16 %v4651_v25, %v19688_v45 }
 0xc34   : > { %v4610_v43 = vadd.f32 %v18039_v28, %v4601_v50  ;;  %v4630_v54 = vsel %vm1709_vm6, %v4627_v34, %v4629_v38 }
 0xc35   : > { %v4578_v58 = vpop.f32.mrb[142].mxu1  ;;  %17466 = vrot.lane.b32.xlu1 %v17465_v52, %s18112_s16  ;;  %v4652_v59 = vmax.f32 %v4608_v44, %v4630_v54  ;;  %v18043_v44 = vld [vmem:[%s21942_s3 + $0x40] sm:$0xff] }
 0xc36   : > { %v4631_v62 = vrot.slane %v4610_v43, 1  ;;  %v4602_v57 = vadd.f32 %v4578_v58, %v4441_v8  ;;  %v14615_v42 = vpop.f32.mrb[143].mxu1 }
 0xc38   : > { %v4611_v4 = vadd.f32 %v18040_v5, %v4602_v57  ;;  %v4632_v11 = vsel %vm1709_vm6, %v4629_v38, %v4631_v62 }
 0xc39   : > { %v4583_v15 = vpop.f32.mrb[144].mxu1  ;;  %v4653_v13 = vmax.f32 %v4609_v49, %v4632_v11 }
 0xc3a   : > { %v4633_v29 = vrot.slane %v4611_v4, 1  ;;  %v4603_v2 = vadd.f32 %v4583_v15, %v4442_v63  ;;  %v14618_v19 = vpop.f32.mrb[145].mxu1  ;;  %v18042_v63 = vld [vmem:[%s21942_s3 + $0x38] sm:$0xff] }
 0xc3b   : > { %v17470_v3 = vpack.i.bf16 %v4653_v13, %v4652_v59 }
 0xc3c   : > { %v4612_v6 = vadd.f32 %v18041_v22, %v4603_v2  ;;  %v4634_v8 = vsel %vm1709_vm6, %v4631_v62, %v4633_v29 }
 0xc3d   : > { %v4588_v24 = vpop.f32.mrb[146].mxu1  ;;  %17471 = vrot.lane.b32.xlu0 %v17470_v3, %s18112_s16  ;;  %v4654_v55 = vmax.f32 %v4610_v43, %v4634_v8 }
 0xc3e   : > { %v4635_v9 = vrot.slane %v4612_v6, 1  ;;  %v4604_v16 = vadd.f32 %v4588_v24, %v4443_v53  ;;  %v14621_v23 = vpop.f32.mrb[147].mxu1 }
 0xc40   : > { %v4613_v18 = vadd.f32 %v18042_v63, %v4604_v16  ;;  %v4636_v32 = vsel %vm1709_vm6, %v4633_v29, %v4635_v9 }
 0xc41   : > { %v4593_v27 = vpop.f32.mrb[148].mxu1  ;;  %v4655_v31 = vmax.f32 %v4611_v4, %v4636_v32  ;;  %v18045_v32 = vld [vmem:[%s21943_s4 + $0x8] sm:$0xff] }
 0xc42   : > { %v4637_v36 = vrot.slane %v4613_v18, 1  ;;  %v4605_v30 = vadd.f32 %v4593_v27, %v19676_v7  ;;  %v14624_v39 = vpop.f32.mrb[149].mxu1  ;;  %v18046_v27 = vld [vmem:[%s21943_s4 + $0x10] sm:$0xff] }
 0xc43   : > { %v17475_v40 = vpack.i.bf16 %v4655_v31, %v4654_v55  ;;  %v18050_v39 = vld [vmem:[%s21943_s4 + $0x30] sm:$0xff] }
 0xc44   : > { %v4614_v53 = vadd.f32 %v18043_v44, %v4605_v30  ;;  %v4638_v48 = vsel %vm1709_vm6, %v4635_v9, %v4637_v36  ;;  %v18049_v30 = vld [vmem:[%s21943_s4 + $0x28] sm:$0xff]  ;;  %v18052_v44 = vld [vmem:[%s21943_s4 + $0x40] sm:$0xff] }
 0xc45   : > { %17476 = vrot.lane.b32.xlu1 %v17475_v40, %s18112_s16  ;;  %v4656_v41 = vmax.f32 %v4612_v6, %v4638_v48  ;;  %v18051_v40 = vld [vmem:[%s21943_s4 + $0x38] sm:$0xff]  ;;  %v18054_v48 = vld [vmem:[%s21943_s4 + $0x50] sm:$0xf] }
 0xc46   : > { %v4639_v34 = vrot.slane %v4614_v53, 1 }
 0xc48   : > { %v4658_v51 = vmax.f32 %v4614_v53, %v4639_v34  ;;  %v4640_v46 = vsel %vm1709_vm6, %v4637_v36, %v4639_v34  ;;  %v18048_v36 = vld [vmem:[%s21943_s4 + $0x20] sm:$0xff]  ;;  %v18053_v53 = vld [vmem:[%s21943_s4 + $0x48] sm:$0xff] }
 0xc49   : > { %v4657_v56 = vmax.f32 %v4613_v18, %v4640_v46  ;;  %v18044_v18 = vld [vmem:[%s21943_s4] sm:$0xff] }
 0xc4a   : > { %4675 = vrot.lane.b32.xlu1 %v4658_v51, %s18112_s16 }
 0xc4b   : > { %v17480_v7 = vpack.i.bf16 %v4657_v56, %v4656_v41 }
 0xc4d   : > { %17481 = vrot.lane.b32.xlu0 %v17480_v7, %s18112_s16 }
 0xca7   : > { %v17467_v49 = vpop.permute.xlu1 %17466 }
 0xca8   : > { %v17469_v60 = vunpack.i.h.bf16 %v17467_v49  ;;  %v17468_v61 = vunpack.i.l.bf16 %v17467_v49 }
 0xcaa   : > { %v4678_v38 = vmax.f32 %v4651_v25, %v17469_v60  ;;  %v4677_v50 = vmax.f32 %v19688_v45, %v17468_v61 }
 0xcac   : > { %v4687_v21 = vmax.f32 %v4678_v38, 0.0  ;;  %v4686_v52 = vmax.f32 %v4677_v50, 0.0 }
 0xcae   : > { %v16393_v28 = vpack.c.bf16 %v4687_v21, %v4686_v52 }
 0xcaf   : > { %v17472_v43 = vpop.permute.xlu0 %17471 }
 0xcb0   : > { %v17474_v54 = vunpack.i.h.bf16 %v17472_v43  ;;  %v17473_v58 = vunpack.i.l.bf16 %v17472_v43  ;;  %16394 = vmatpush3.bf16.msra.mxu0 %v16393_v28 }
 0xcb1   : > { %16395 = vmatprep.subr.bf16.mxu0 %v18109_v0 }
 0xcb2   : > { %v4680_v62 = vmax.f32 %v4653_v13, %v17474_v54  ;;  %v4679_v57 = vmax.f32 %v4652_v59, %v17473_v58 }
 0xcb4   : > { %v4689_v42 = vmax.f32 %v4680_v62, 0.0  ;;  %v4688_v5 = vmax.f32 %v4679_v57, 0.0 }
 0xcb6   : > { %v16396_v4 = vpack.c.bf16 %v4689_v42, %v4688_v5 }
 0xcb7   : > { %v17477_v11 = vpop.permute.xlu1 %17476 }
 0xcb8   : > { %v17479_v15 = vunpack.i.h.bf16 %v17477_v11  ;;  %v17478_v29 = vunpack.i.l.bf16 %v17477_v11  ;;  %16397 = vmatpush3.bf16.msra.mxu0 %v16396_v4 }
 0xcb9   : > { %16398 = vmatprep.subr.bf16.mxu0 %v18109_v0 }
 0xcba   : > { %v4682_v45 = vmax.f32 %v4655_v31, %v17479_v15  ;;  %v4681_v25 = vmax.f32 %v4654_v55, %v17478_v29  ;;  %v18047_v31 = vld [vmem:[%s21943_s4 + $0x18] sm:$0xff] }
 0xcbc   : > { %v4691_v2 = vmax.f32 %v4682_v45, 0.0  ;;  %v4690_v19 = vmax.f32 %v4681_v25, 0.0  ;;  %v4676_v24 = vpop.permute.xlu1 %4675 }
 0xcbd   : > { %v4685_v23 = vmax.f32 %v4658_v51, %v4676_v24 }
 0xcbe   : > { %v16399_v3 = vpack.c.bf16 %v4691_v2, %v4690_v19 }
 0xcbf   : > { %v17482_v22 = vpop.permute.xlu0 %17481  ;;  %v4694_v55 = vmax.f32 %v4685_v23, 0.0 }
 0xcc0   : > { %v17484_v6 = vunpack.i.h.bf16 %v17482_v22  ;;  %v17483_v8 = vunpack.i.l.bf16 %v17482_v22  ;;  %16400 = vmatpush3.bf16.msra.mxu0 %v16399_v3 }
 0xcc1   : > { %16401 = vmatprep.subr.bf16.mxu0 %v18109_v0 }
 0xcc2   : > { %v4684_v59 = vmax.f32 %v4657_v56, %v17484_v6  ;;  %v4683_v13 = vmax.f32 %v4656_v41, %v17483_v8 }
 0xcc4   : > { %v4693_v9 = vmax.f32 %v4684_v59, 0.0  ;;  %v4692_v16 = vmax.f32 %v4683_v13, 0.0 }
 0xcc6   : > { %v16402_v63 = vpack.c.bf16 %v4693_v9, %v4692_v16 }
 0xcc8   : > { %16403 = vmatpush3.bf16.msra.mxu0 %v16402_v63 }
 0xcc9   : > { %14641 = vmatprep.subr.mxu0 %v18111_v1 }
 0xccc   : > { %14642 = vmatpush3.msk.msra.mxu0 %vm1709_vm6, %v4694_v55 }
 0xccd   : > { %14644 = vmatmul.mubr.msk.f32.vlgmr.msra.gmra.mrb[98].mxu0 %vm1781_vm7, %v18044_v18  ;;  %16428 = vmatprep.subr.bf16.mxu0 %v18109_v0 }
 0xcce   : > { %14646 = vmatprep.mubr.msk.f32.mxu0 %vm18110_vm0, %v18111_v1 }
 0xcd1   : > { %14647 = vmatmul.mubr.msk.f32.gmra.mrb[100].mxu0 %vm1781_vm7, %v18045_v32 }
 0xcd2   : > { %14649 = vmatprep.mubr.msk.f32.mxu0 %vm18110_vm0, %v18111_v1 }
 0xcd5   : > { %14650 = vmatmul.mubr.msk.f32.gmra.mrb[102].mxu0 %vm1781_vm7, %v18046_v27 }
 0xcd6   : > { %14652 = vmatprep.mubr.msk.f32.mxu0 %vm18110_vm0, %v18111_v1 }
 0xcd9   : > { %14653 = vmatmul.mubr.msk.f32.gmra.mrb[104].mxu0 %vm1781_vm7, %v18047_v31 }
 0xcda   : > { %14655 = vmatprep.mubr.msk.f32.mxu0 %vm18110_vm0, %v18111_v1 }
 0xcdd   : > { %14656 = vmatmul.mubr.msk.f32.gmra.mrb[106].mxu0 %vm1781_vm7, %v18048_v36 }
 0xcde   : > { %14658 = vmatprep.mubr.msk.f32.mxu0 %vm18110_vm0, %v18111_v1 }
 0xce1   : > { %14659 = vmatmul.mubr.msk.f32.gmra.mrb[108].mxu0 %vm1781_vm7, %v18049_v30 }
 0xce2   : > { %14661 = vmatprep.mubr.msk.f32.mxu0 %vm18110_vm0, %v18111_v1 }
 0xce5   : > { %14662 = vmatmul.mubr.msk.f32.gmra.mrb[110].mxu0 %vm1781_vm7, %v18050_v39 }
 0xce6   : > { %14664 = vmatprep.mubr.msk.f32.mxu0 %vm18110_vm0, %v18111_v1 }
 0xce9   : > { %14665 = vmatmul.mubr.msk.f32.gmra.mrb[112].mxu0 %vm1781_vm7, %v18051_v40 }
 0xcea   : > { %14667 = vmatprep.mubr.msk.f32.mxu0 %vm18110_vm0, %v18111_v1 }
 0xced   : > { %14668 = vmatmul.mubr.msk.f32.gmra.mrb[114].mxu0 %vm1781_vm7, %v18052_v44 }
 0xcee   : > { %14670 = vmatprep.mubr.msk.f32.mxu0 %vm18110_vm0, %v18111_v1 }
 0xcf1   : > { %14671 = vmatmul.mubr.msk.f32.gmra.mrb[116].mxu0 %vm1781_vm7, %v18053_v53 }
 0xcf2   : > { %14673 = vmatprep.mubr.msk.f32.mxu0 %vm18110_vm0, %v18111_v1 }
 0xcf5   : > { %14674 = vmatmul.mubr.msk.f32.gmra.mrb[118].mxu0 %vm1781_vm7, %v18054_v48 }
 0xcf6   : > { %14763 = vmatprep.mubr.msk.f32.mxu0 %vm18110_vm0, %v18111_v1 }
 0xda0   : > { %v4764_v41 = vpop.f32.mrb[98].mxu0 }
 0xda1   : > { %v14645_v34 = vpop.f32.mrb[99].mxu0  ;;  %14709 = vmatmul.mubr.f32.vlgmr.msra.gmra.mrb[150].mxu1 %v4764_v41 }
 0xda2   : > { %14711 = vmatprep.mubr.msk.f32.mxu1 %vm18110_vm0, %v18111_v1 }
 0xda4   : > { %v4769_v51 = vpop.f32.mrb[100].mxu0 }
 0xda5   : > { %v14648_v46 = vpop.f32.mrb[101].mxu0  ;;  %14712 = vmatmul.mubr.f32.gmra.mrb[152].mxu1 %v4769_v51 }
 0xda6   : > { %14714 = vmatprep.mubr.msk.f32.mxu1 %vm18110_vm0, %v18111_v1 }
 0xda8   : > { %v4774_v56 = vpop.f32.mrb[102].mxu0 }
 0xda9   : > { %v14651_v7 = vpop.f32.mrb[103].mxu0  ;;  %14715 = vmatmul.mubr.f32.gmra.mrb[154].mxu1 %v4774_v56 }
 0xdaa   : > { %14717 = vmatprep.mubr.msk.f32.mxu1 %vm18110_vm0, %v18111_v1 }
 0xdac   : > { %v4779_v49 = vpop.f32.mrb[104].mxu0 }
 0xdad   : > { %v14654_v60 = vpop.f32.mrb[105].mxu0  ;;  %14718 = vmatmul.mubr.f32.gmra.mrb[156].mxu1 %v4779_v49 }
 0xdae   : > { %14720 = vmatprep.mubr.msk.f32.mxu1 %vm18110_vm0, %v18111_v1 }
 0xdb0   : > { %v4784_v61 = vpop.f32.mrb[106].mxu0 }
 0xdb1   : > { %v14657_v38 = vpop.f32.mrb[107].mxu0  ;;  %14721 = vmatmul.mubr.f32.gmra.mrb[158].mxu1 %v4784_v61 }
 0xdb2   : > { %14723 = vmatprep.mubr.msk.f32.mxu1 %vm18110_vm0, %v18111_v1 }
 0xdb4   : > { %v4789_v50 = vpop.f32.mrb[108].mxu0 }
 0xdb5   : > { %v14660_v21 = vpop.f32.mrb[109].mxu0  ;;  %14724 = vmatmul.mubr.f32.gmra.mrb[160].mxu1 %v4789_v50 }
 0xdb6   : > { %14726 = vmatprep.mubr.msk.f32.mxu1 %vm18110_vm0, %v18111_v1 }
 0xdb8   : > { %v4794_v52 = vpop.f32.mrb[110].mxu0 }
 0xdb9   : > { %v14663_v28 = vpop.f32.mrb[111].mxu0  ;;  %14727 = vmatmul.mubr.f32.gmra.mrb[162].mxu1 %v4794_v52 }
 0xdba   : > { %14729 = vmatprep.mubr.msk.f32.mxu1 %vm18110_vm0, %v18111_v1 }
 0xdbc   : > { %v4799_v43 = vpop.f32.mrb[112].mxu0 }
 0xdbd   : > { %v14666_v54 = vpop.f32.mrb[113].mxu0  ;;  %14730 = vmatmul.mubr.f32.gmra.mrb[164].mxu1 %v4799_v43 }
 0xdbe   : > { %14732 = vmatprep.mubr.msk.f32.mxu1 %vm18110_vm0, %v18111_v1 }
 0xdc0   : > { %v4804_v58 = vpop.f32.mrb[114].mxu0 }
 0xdc1   : > { %v14669_v62 = vpop.f32.mrb[115].mxu0  ;;  %14733 = vmatmul.mubr.f32.gmra.mrb[166].mxu1 %v4804_v58 }
 0xdc2   : > { %14735 = vmatprep.mubr.msk.f32.mxu1 %vm18110_vm0, %v18111_v1 }
 0xdc4   : > { %v4809_v57 = vpop.f32.mrb[116].mxu0 }
 0xdc5   : > { %v14672_v42 = vpop.f32.mrb[117].mxu0  ;;  %14736 = vmatmul.mubr.f32.gmra.mrb[168].mxu1 %v4809_v57 }
 0xdc6   : > { %14738 = vmatprep.mubr.msk.f32.mxu1 %vm18110_vm0, %v18111_v1 }
 0xdc8   : > { %v4814_v5 = vpop.f32.mrb[118].mxu0 }
 0xdc9   : > { %14739 = vmatmul.mubr.f32.gmra.mrb[170].mxu1 %v4814_v5  ;;  %v14675_v4 = vpop.f32.mrb[119].mxu0 }
 0xe74   : > { %v19815_v11 = vpop.f32.mrb[150].mxu1 }
 0xe75   : > { %v14710_v15 = vpop.f32.mrb[151].mxu1 }
 0xe76   : > { %v12290_v15 = vld [vmem:[%s21945_s6 + $0x18] sm:$0xff] }
 0xe78   : > { %v19817_v29 = vpop.f32.mrb[152].mxu1 }
 0xe79   : > { %v14713_v45 = vpop.f32.mrb[153].mxu1  ;;  %v17485_v25 = vpack.i.bf16 %v19817_v29, %v19815_v11  ;;  %v16444_v2 = vpack.c.bf16 %v19817_v29, %v19815_v11  ;;  %v12292_v11 = vld [vmem:[%s21945_s6 + $0x28] sm:$0xff] }
 0xe7b   : > { %17486 = vrot.lane.b32.xlu0 %v17485_v25, %s18112_s16 }
 0xe7c   : > { %v19824_v19 = vpop.f32.mrb[154].mxu1 }
 0xe7d   : > { %v14716_v3 = vpop.f32.mrb[155].mxu1 }
 0xe80   : > { %v19826_v22 = vpop.f32.mrb[156].mxu1 }
 0xe81   : > { %v14719_v6 = vpop.f32.mrb[157].mxu1  ;;  %v17490_v8 = vpack.i.bf16 %v19826_v22, %v19824_v19  ;;  %v16447_v59 = vpack.c.bf16 %v19826_v22, %v19824_v19  ;;  %v4938_v22 = vld [vmem:[%s21945_s6] sm:$0xff] }
 0xe83   : > { %17491 = vrot.lane.b32.xlu1 %v17490_v8, %s18112_s16 }
 0xe84   : > { %v19833_v13 = vpop.f32.mrb[158].mxu1 }
 0xe85   : > { %v14722_v24 = vpop.f32.mrb[159].mxu1 }
 0xe86   : > { %v4939_v24 = vld [vmem:[%s21945_s6 + $0x8] sm:$0xff] }
 0xe88   : > { %v19835_v9 = vpop.f32.mrb[160].mxu1 }
 0xe89   : > { %v14725_v16 = vpop.f32.mrb[161].mxu1  ;;  %v17495_v23 = vpack.i.bf16 %v19835_v9, %v19833_v13  ;;  %v16450_v63 = vpack.c.bf16 %v19835_v9, %v19833_v13 }
 0xe8b   : > { %17496 = vrot.lane.b32.xlu0 %v17495_v23, %s18112_s16 }
 0xe8c   : > { %v19842_v55 = vpop.f32.mrb[162].mxu1 }
 0xe8d   : > { %v14728_v18 = vpop.f32.mrb[163].mxu1 }
 0xe90   : > { %v19844_v32 = vpop.f32.mrb[164].mxu1 }
 0xe91   : > { %v14731_v27 = vpop.f32.mrb[165].mxu1  ;;  %v17500_v31 = vpack.i.bf16 %v19844_v32, %v19842_v55  ;;  %v16453_v36 = vpack.c.bf16 %v19844_v32, %v19842_v55  ;;  %v4940_v55 = vld [vmem:[%s21945_s6 + $0x10] sm:$0xff] }
 0xe93   : > { %17501 = vrot.lane.b32.xlu1 %v17500_v31, %s18112_s16 }
 0xe94   : > { %v19851_v30 = vpop.f32.mrb[166].mxu1 }
 0xe95   : > { %v14734_v39 = vpop.f32.mrb[167].mxu1 }
 0xe98   : > { %v19853_v40 = vpop.f32.mrb[168].mxu1 }
 0xe99   : > { %v14737_v44 = vpop.f32.mrb[169].mxu1  ;;  %v17505_v53 = vpack.i.bf16 %v19853_v40, %v19851_v30  ;;  %v16456_v48 = vpack.c.bf16 %v19853_v40, %v19851_v30 }
 0xe9b   : > { %17506 = vrot.lane.b32.xlu0 %v17505_v53, %s18112_s16 }
 0xe9c   : > { %v19860_v41 = vpop.f32.mrb[170].mxu1 }
 0xe9d   : > { %4964 = vrot.lane.b32.xlu1 %v19860_v41, %s18112_s16  ;;  %v14740_v34 = vpop.f32.mrb[171].mxu1 }
 0xe9f   : > { %17511 = vrot.lane.b32.xlu0 %v17485_v25, %s18113_s17 }
 0xea1   : > { %17516 = vrot.lane.b32.xlu1 %v17490_v8, %s18113_s17 }
 0xea3   : > { %17521 = vrot.lane.b32.xlu0 %v17495_v23, %s18113_s17 }
 0xea5   : > { %17526 = vrot.lane.b32.xlu1 %v17500_v31, %s18113_s17 }
 0xea7   : > { %17531 = vrot.lane.b32.xlu0 %v17505_v53, %s18113_s17 }
 0xea9   : > { %5173 = vrot.lane.b32.xlu1 %v19860_v41, %s18113_s17 }
 0xeab   : > { %17536 = vrot.lane.b32.xlu0 %v17485_v25, %s18114_s18 }
 0xead   : > { %17541 = vrot.lane.b32.xlu1 %v17490_v8, %s18114_s18 }
 0xeaf   : > { %17546 = vrot.lane.b32.xlu0 %v17495_v23, %s18114_s18 }
 0xeb1   : > { %17551 = vrot.lane.b32.xlu1 %v17500_v31, %s18114_s18 }
 0xeb3   : > { %17556 = vrot.lane.b32.xlu0 %v17505_v53, %s18114_s18 }
 0xeb5   : > { %5293 = vrot.lane.b32.xlu1 %v19860_v41, %s18114_s18 }
 0xeb7   : > { %17561 = vrot.lane.b32.xlu0 %v17485_v25, %s18115_s19  ;;  %v12291_v25 = vld [vmem:[%s21945_s6 + $0x20] sm:$0xff] }
 0xeb9   : > { %17566 = vrot.lane.b32.xlu1 %v17490_v8, %s18115_s19 }
 0xebb   : > { %17571 = vrot.lane.b32.xlu0 %v17495_v23, %s18115_s19 }
 0xebd   : > { %17576 = vrot.lane.b32.xlu1 %v17500_v31, %s18115_s19 }
 0xebf   : > { %17581 = vrot.lane.b32.xlu0 %v17505_v53, %s18115_s19 }
 0xec1   : > { %5413 = vrot.lane.b32.xlu1 %v19860_v41, %s18115_s19 }
 0xeed   : > { %v17487_v51 = vpop.permute.xlu0 %17486 }
 0xeee   : > { %v17489_v46 = vunpack.i.h.bf16 %v17487_v51  ;;  %v17488_v56 = vunpack.i.l.bf16 %v17487_v51  ;;  %v12301_v51 = vld [vmem:[%s21945_s6 + $0x30] sm:$0xff] }
 0xef0   : > { %v16429_v7 = vpack.c.bf16 %v17489_v46, %v17488_v56 }
 0xef2   : > { %16430 = vmatpush3.bf16.msra.mxu0 %v16429_v7 }
 0xef3   : > { %16431 = vmatprep.subr.bf16.mxu0 %v18109_v0 }
 0xef5   : > { %v17492_v49 = vpop.permute.xlu1 %17491 }
 0xef6   : > { %v17494_v60 = vunpack.i.h.bf16 %v17492_v49  ;;  %v17493_v61 = vunpack.i.l.bf16 %v17492_v49 }
 0xef8   : > { %v16432_v38 = vpack.c.bf16 %v17494_v60, %v17493_v61  ;;  %v12302_v60 = vld [vmem:[%s21945_s6 + $0x38] sm:$0xff] }
 0xefa   : > { %16433 = vmatpush3.bf16.msra.mxu0 %v16432_v38 }
 0xefb   : > { %16434 = vmatprep.subr.bf16.mxu0 %v18109_v0 }
 0xefd   : > { %v17497_v50 = vpop.permute.xlu0 %17496 }
 0xefe   : > { %v17499_v21 = vunpack.i.h.bf16 %v17497_v50  ;;  %v17498_v52 = vunpack.i.l.bf16 %v17497_v50 }
 0xf00   : > { %v16435_v28 = vpack.c.bf16 %v17499_v21, %v17498_v52  ;;  %v12303_v52 = vld [vmem:[%s21945_s6 + $0x40] sm:$0xff] }
 0xf02   : > { %16436 = vmatpush3.bf16.msra.mxu0 %v16435_v28 }
 0xf03   : > { %16437 = vmatprep.subr.bf16.mxu0 %v18109_v0 }
 0xf05   : > { %v17502_v43 = vpop.permute.xlu1 %17501 }
 0xf06   : > { %v17504_v54 = vunpack.i.h.bf16 %v17502_v43  ;;  %v17503_v58 = vunpack.i.l.bf16 %v17502_v43 }
 0xf08   : > { %v16438_v62 = vpack.c.bf16 %v17504_v54, %v17503_v58 }
 0xf0a   : > { %16439 = vmatpush3.bf16.msra.mxu0 %v16438_v62 }
 0xf0b   : > { %16440 = vmatprep.subr.bf16.mxu0 %v18109_v0 }
 0xf0d   : > { %v17507_v57 = vpop.permute.xlu0 %17506 }
 0xf0e   : > { %v17509_v42 = vunpack.i.h.bf16 %v17507_v57  ;;  %v17508_v5 = vunpack.i.l.bf16 %v17507_v57 }
 0xf0f   : > { %v4965_v45 = vpop.permute.xlu1 %4964 }
 0xf10   : > { %v16441_v4 = vpack.c.bf16 %v17509_v42, %v17508_v5 }
 0xf11   : > { %v17512_v29 = vpop.permute.xlu0 %17511 }
 0xf12   : > { %16442 = vmatpush3.bf16.msra.mxu0 %v16441_v4  ;;  %v17513_v19 = vunpack.i.l.bf16 %v17512_v29 }
 0xf13   : > { %14761 = vmatprep.subr.mxu0 %v18111_v1  ;;  %v17517_v3 = vpop.permute.xlu1 %17516 }
 0xf14   : > { %v17519_v8 = vunpack.i.h.bf16 %v17517_v3 }
 0xf15   : > { %v17522_v13 = vpop.permute.xlu0 %17521 }
 0xf16   : > { %14762 = vmatpush3.msk.msra.mxu0 %vm408_vm1, %v4965_v45  ;;  %v17524_v16 = vunpack.i.h.bf16 %v17522_v13  ;;  %v17523_v23 = vunpack.i.l.bf16 %v17522_v13 }
 0xf17   : > { %16443 = vmatprep.subr.bf16.mxu0 %v18109_v0  ;;  %14764 = vmatmul.mubr.msk.f32.vlgmr.msra.gmra.mrb[120].mxu0 %vm2087_vm8, %v12290_v15 }
 0xf18   : > { %16445 = vmatpush3.bf16.msra.mxu0 %v16444_v2  ;;  %14766 = vmatprep.mubr.msk.f32.mxu0 %vm18110_vm0, %v18111_v1  ;;  %v17514_v2 = vunpack.i.h.bf16 %v17512_v29  ;;  %v16465_v18 = vpack.c.bf16 %v17524_v16, %v17523_v23  ;;  %v12308_v29 = vld [vmem:[%s21945_s6 + $0x48] sm:$0xff] }
 0xf19   : > { %16446 = vmatprep.subr.bf16.mxu0 %v18109_v0  ;;  %v17532_v31 = vpop.permute.xlu0 %17531 }
 0xf1a   : > { %v16459_v6 = vpack.c.bf16 %v17514_v2, %v17513_v19  ;;  %v17534_v30 = vunpack.i.h.bf16 %v17532_v31  ;;  %v17533_v39 = vunpack.i.l.bf16 %v17532_v31 }
 0xf1b   : > { %14767 = vmatmul.mubr.msk.f32.gmra.mrb[122].mxu0 %vm2087_vm8, %v12291_v25 }
 0xf1c   : > { %16448 = vmatpush3.bf16.msra.mxu0 %v16447_v59  ;;  %14769 = vmatprep.mubr.msk.f32.mxu0 %vm18110_vm0, %v18111_v1  ;;  %v17518_v59 = vunpack.i.l.bf16 %v17517_v3  ;;  %v16471_v53 = vpack.c.bf16 %v17534_v30, %v17533_v39  ;;  %v12316_v39 = vld [vmem:[%s21945_s6 + $0x68] sm:$0xff] }
 0xf1d   : > { %16449 = vmatprep.subr.bf16.mxu0 %v18109_v0  ;;  %v17537_v44 = vpop.permute.xlu0 %17536 }
 0xf1e   : > { %v16462_v9 = vpack.c.bf16 %v17519_v8, %v17518_v59 }
 0xf1f   : > { %14770 = vmatmul.mubr.msk.f32.gmra.mrb[124].mxu0 %vm2087_vm8, %v12292_v11 }
 0xf20   : > { %16451 = vmatpush3.bf16.msra.mxu0 %v16450_v63  ;;  %14794 = vmatprep.mubr.msk.f32.mxu0 %vm18110_vm0, %v18111_v1  ;;  %v17527_v63 = vpop.permute.xlu1 %17526 }
 0xf21   : > { %16452 = vmatprep.subr.bf16.mxu0 %v18109_v0  ;;  %v17529_v32 = vunpack.i.h.bf16 %v17527_v63  ;;  %v17528_v27 = vunpack.i.l.bf16 %v17527_v63  ;;  %v17547_v49 = vpop.permute.xlu0 %17546 }
 0xf22   : > { %v17549_v38 = vunpack.i.h.bf16 %v17547_v49  ;;  %v17548_v50 = vunpack.i.l.bf16 %v17547_v49 }
 0xf24   : > { %16454 = vmatpush3.bf16.msra.mxu0 %v16453_v36  ;;  %v16468_v36 = vpack.c.bf16 %v17529_v32, %v17528_v27  ;;  %v5174_v40 = vpop.permute.xlu1 %5173  ;;  %v16480_v28 = vpack.c.bf16 %v17549_v38, %v17548_v50 }
 0xf25   : > { %16455 = vmatprep.subr.bf16.mxu0 %v18109_v0  ;;  %v17557_v58 = vpop.permute.xlu0 %17556 }
 0xf26   : > { %v17559_v57 = vunpack.i.h.bf16 %v17557_v58  ;;  %v17558_v42 = vunpack.i.l.bf16 %v17557_v58 }
 0xf28   : > { %16457 = vmatpush3.bf16.msra.mxu0 %v16456_v48  ;;  %v17539_v48 = vunpack.i.h.bf16 %v17537_v44  ;;  %v17542_v34 = vpop.permute.xlu1 %17541  ;;  %v16486_v15 = vpack.c.bf16 %v17559_v57, %v17558_v42  ;;  %v12323_v57 = vld [vmem:[%s21946_s7 + $0x28] sm:$0xff] }
 0xf29   : > { %14792 = vmatprep.subr.mxu0 %v18111_v1  ;;  %v17544_v56 = vunpack.i.h.bf16 %v17542_v34  ;;  %v17543_v7 = vunpack.i.l.bf16 %v17542_v34  ;;  %v17562_v4 = vpop.permute.xlu0 %17561 }
 0xf2a   : > { %v17564_v45 = vunpack.i.h.bf16 %v17562_v4  ;;  %v17563_v25 = vunpack.i.l.bf16 %v17562_v4 }
 0xf2b   : > { %v16477_v61 = vpack.c.bf16 %v17544_v56, %v17543_v7 }
 0xf2c   : > { %14793 = vmatpush3.msk.msra.mxu0 %vm408_vm1, %v19860_v41  ;;  %v17538_v41 = vunpack.i.l.bf16 %v17537_v44  ;;  %v17552_v21 = vpop.permute.xlu1 %17551  ;;  %v16489_v2 = vpack.c.bf16 %v17564_v45, %v17563_v25  ;;  %v12325_v25 = vld [vmem:[%s21946_s7 + $0x38] sm:$0xf] }
 0xf2d   : > { %16458 = vmatprep.subr.bf16.mxu0 %v18109_v0  ;;  %14795 = vmatmul.mubr.msk.f32.vlgmr.msra.gmra.mrb[120].mxu0 %vm2087_vm8, %v4938_v22  ;;  %v17554_v43 = vunpack.i.h.bf16 %v17552_v21  ;;  %v17553_v54 = vunpack.i.l.bf16 %v17552_v21  ;;  %v17572_v22 = vpop.permute.xlu0 %17571 }
 0xf2e   : > { %16460 = vmatpush3.bf16.msra.mxu0 %v16459_v6  ;;  %14797 = vmatprep.mubr.msk.f32.mxu0 %vm18110_vm0, %v18111_v1  ;;  %v16474_v46 = vpack.c.bf16 %v17539_v48, %v17538_v41  ;;  %v12309_v6 = vld [vmem:[%s21945_s6 + $0x50] sm:$0xff]  ;;  %v17574_v59 = vunpack.i.h.bf16 %v17572_v22  ;;  %v17573_v13 = vunpack.i.l.bf16 %v17572_v22 }
 0xf2f   : > { %16461 = vmatprep.subr.bf16.mxu0 %v18109_v0  ;;  %v16483_v62 = vpack.c.bf16 %v17554_v43, %v17553_v54 }
 0xf30   : > { %v5294_v5 = vpop.permute.xlu1 %5293  ;;  %v16495_v16 = vpack.c.bf16 %v17574_v59, %v17573_v13  ;;  %v5516_v59 = vld [vmem:[%s21946_s7 + $0x18] sm:$0xf]  ;;  %v12334_v13 = vld [vmem:[%s21946_s7 + $0x40] sm:$0xff] }
 0xf31   : > { %14798 = vmatmul.mubr.msk.f32.gmra.mrb[122].mxu0 %vm2087_vm8, %v4939_v24 }
 0xf32   : > { %16463 = vmatpush3.bf16.msra.mxu0 %v16462_v9  ;;  %14800 = vmatprep.mubr.msk.f32.mxu0 %vm18110_vm0, %v18111_v1  ;;  %v12310_v9 = vld [vmem:[%s21945_s6 + $0x58] sm:$0xff] }
 0xf33   : > { %16464 = vmatprep.subr.bf16.mxu0 %v18109_v0 }
 0xf34   : > { %v17567_v11 = vpop.permute.xlu1 %17566 }
 0xf35   : > { %14801 = vmatmul.mubr.msk.f32.gmra.mrb[124].mxu0 %vm2087_vm8, %v4940_v55  ;;  %v17569_v19 = vunpack.i.h.bf16 %v17567_v11  ;;  %v17568_v3 = vunpack.i.l.bf16 %v17567_v11  ;;  %v17582_v55 = vpop.permute.xlu0 %17581  ;;  %v5513_v11 = vld [vmem:[%s21946_s7] sm:$0xff] }
 0xf36   : > { %16466 = vmatpush3.bf16.msra.mxu0 %v16465_v18  ;;  %14825 = vmatprep.mubr.msk.f32.mxu0 %vm18110_vm0, %v18111_v1  ;;  %v17584_v32 = vunpack.i.h.bf16 %v17582_v55  ;;  %v17583_v27 = vunpack.i.l.bf16 %v17582_v55  ;;  %v12342_v55 = vld [vmem:[%s21946_s7 + $0x60] sm:$0xff] }
 0xf37   : > { %16467 = vmatprep.subr.bf16.mxu0 %v18109_v0  ;;  %v16492_v8 = vpack.c.bf16 %v17569_v19, %v17568_v3  ;;  %v5514_v19 = vld [vmem:[%s21946_s7 + $0x8] sm:$0xff]  ;;  %v5515_v3 = vld [vmem:[%s21946_s7 + $0x10] sm:$0xff] }
 0xf38   : > { %v17577_v24 = vpop.permute.xlu1 %17576  ;;  %v16501_v31 = vpack.c.bf16 %v17584_v32, %v17583_v27  ;;  %v12344_v32 = vld [vmem:[%s21946_s7 + $0x70] sm:$0xff]  ;;  %v12345_v27 = vld [vmem:[%s21946_s7 + $0x78] sm:$0xf] }
 0xf39   : > { %v17579_v23 = vunpack.i.h.bf16 %v17577_v24  ;;  %v17578_v63 = vunpack.i.l.bf16 %v17577_v24 }
 0xf3a   : > { %16469 = vmatpush3.bf16.msra.mxu0 %v16468_v36  ;;  %v12315_v36 = vld [vmem:[%s21945_s6 + $0x60] sm:$0xff] }
 0xf3b   : > { %16470 = vmatprep.subr.bf16.mxu0 %v18109_v0  ;;  %v16498_v18 = vpack.c.bf16 %v17579_v23, %v17578_v63  ;;  %v12337_v63 = vld [vmem:[%s21946_s7 + $0x58] sm:$0xf] }
 0xf3c   : > { %v5414_v30 = vpop.permute.xlu1 %5413 }
 0xf3e   : > { %16472 = vmatpush3.bf16.msra.mxu0 %v16471_v53 }
 0xf3f   : > { %14823 = vmatprep.subr.mxu0 %v18111_v1 }
 0xf42   : > { %14824 = vmatpush3.msk.msra.mxu0 %vm408_vm1, %v5174_v40  ;;  %v12317_v40 = vld [vmem:[%s21945_s6 + $0x70] sm:$0xff] }
 0xf43   : > { %16473 = vmatprep.subr.bf16.mxu0 %v18109_v0  ;;  %14826 = vmatmul.mubr.msk.f32.vlgmr.msra.gmra.mrb[120].mxu0 %vm2087_vm8, %v12301_v51 }
 0xf44   : > { %16475 = vmatpush3.bf16.msra.mxu0 %v16474_v46  ;;  %14828 = vmatprep.mubr.msk.f32.mxu0 %vm18110_vm0, %v18111_v1  ;;  %v12322_v46 = vld [vmem:[%s21946_s7 + $0x20] sm:$0xff] }
 0xf45   : > { %16476 = vmatprep.subr.bf16.mxu0 %v18109_v0  ;;  %14902 = vmatprep.mubr.msk.f32.mxu1 %vm930_vm5, %v12322_v46 }
 0xf47   : > { %14829 = vmatmul.mubr.msk.f32.gmra.mrb[122].mxu0 %vm2087_vm8, %v12302_v60 }
 0xf48   : > { %16478 = vmatpush3.bf16.msra.mxu0 %v16477_v61  ;;  %14831 = vmatprep.mubr.msk.f32.mxu0 %vm18110_vm0, %v18111_v1 }
 0xf49   : > { %16479 = vmatprep.subr.bf16.mxu0 %v18109_v0 }
 0xf4b   : > { %14832 = vmatmul.mubr.msk.f32.gmra.mrb[124].mxu0 %vm2087_vm8, %v12303_v52 }
 0xf4c   : > { %16481 = vmatpush3.bf16.msra.mxu0 %v16480_v28  ;;  %14856 = vmatprep.mubr.msk.f32.mxu0 %vm18110_vm0, %v18111_v1 }
 0xf4d   : > { %16482 = vmatprep.subr.bf16.mxu0 %v18109_v0 }
 0xf50   : > { %16484 = vmatpush3.bf16.msra.mxu0 %v16483_v62 }
 0xf51   : > { %16485 = vmatprep.subr.bf16.mxu0 %v18109_v0 }
 0xf54   : > { %16487 = vmatpush3.bf16.msra.mxu0 %v16486_v15 }
 0xf55   : > { %14854 = vmatprep.subr.mxu0 %v18111_v1 }
 0xf58   : > { %14855 = vmatpush3.msk.msra.mxu0 %vm408_vm1, %v5294_v5  ;;  %v12324_v5 = vld [vmem:[%s21946_s7 + $0x30] sm:$0xff] }
 0xf59   : > { %16488 = vmatprep.subr.bf16.mxu0 %v18109_v0  ;;  %14857 = vmatmul.mubr.msk.f32.vlgmr.msra.gmra.mrb[120].mxu0 %vm2087_vm8, %v12308_v29 }
 0xf5a   : > { %16490 = vmatpush3.bf16.msra.mxu0 %v16489_v2  ;;  %14859 = vmatprep.mubr.msk.f32.mxu0 %vm18110_vm0, %v18111_v1 }
 0xf5b   : > { %16491 = vmatprep.subr.bf16.mxu0 %v18109_v0 }
 0xf5d   : > { %14860 = vmatmul.mubr.msk.f32.gmra.mrb[122].mxu0 %vm2087_vm8, %v12309_v6 }
 0xf5e   : > { %16493 = vmatpush3.bf16.msra.mxu0 %v16492_v8  ;;  %14862 = vmatprep.mubr.msk.f32.mxu0 %vm18110_vm0, %v18111_v1 }
 0xf5f   : > { %16494 = vmatprep.subr.bf16.mxu0 %v18109_v0 }
 0xf61   : > { %14863 = vmatmul.mubr.msk.f32.gmra.mrb[124].mxu0 %vm2087_vm8, %v12310_v9  ;;  %v12335_v9 = vld [vmem:[%s21946_s7 + $0x48] sm:$0xff] }
 0xf62   : > { %16496 = vmatpush3.bf16.msra.mxu0 %v16495_v16  ;;  %14887 = vmatprep.mubr.msk.f32.mxu0 %vm18110_vm0, %v18111_v1  ;;  %v12336_v16 = vld [vmem:[%s21946_s7 + $0x50] sm:$0xff] }
 0xf63   : > { %16497 = vmatprep.subr.bf16.mxu0 %v18109_v0 }
 0xf66   : > { %16499 = vmatpush3.bf16.msra.mxu0 %v16498_v18  ;;  %v12343_v18 = vld [vmem:[%s21946_s7 + $0x68] sm:$0xff] }
 0xf67   : > { %16500 = vmatprep.subr.bf16.mxu0 %v18109_v0 }
 0xf6a   : > { %16502 = vmatpush3.bf16.msra.mxu0 %v16501_v31  ;;  %v12350_v31 = vld [vmem:[%s21946_s7 + $0x80] sm:$0xff] }
 0xf6b   : > { %14885 = vmatprep.subr.mxu0 %v18111_v1 }
 0xf6e   : > { %14886 = vmatpush3.msk.msra.mxu0 %vm408_vm1, %v5414_v30  ;;  %v12352_v30 = vld [vmem:[%s21946_s7 + $0x90] sm:$0xff] }
 0xf6f   : > { %14888 = vmatmul.mubr.msk.f32.vlgmr.msra.gmra.mrb[120].mxu0 %vm2087_vm8, %v12315_v36  ;;  %16568 = vmatprep.subr.bf16.mxu0 %v18109_v0  ;;  %v12351_v36 = vld [vmem:[%s21946_s7 + $0x88] sm:$0xff] }
 0xf70   : > { %14890 = vmatprep.mubr.msk.f32.mxu0 %vm18110_vm0, %v18111_v1 }
 0xf73   : > { %14891 = vmatmul.mubr.msk.f32.gmra.mrb[122].mxu0 %vm2087_vm8, %v12316_v39  ;;  %v12353_v39 = vld [vmem:[%s21946_s7 + $0x98] sm:$0xf] }
 0xf74   : > { %14893 = vmatprep.mubr.msk.f32.mxu0 %vm18110_vm0, %v18111_v1 }
 0xf77   : > { %14894 = vmatmul.mubr.msk.f32.gmra.mrb[124].mxu0 %vm2087_vm8, %v12317_v40  ;;  %v18055_v40 = vld [vmem:[%s21947_s8] sm:$0xff] }
 0xf78   : > { %15058 = vmatprep.mubr.msk.f32.mxu0 %vm18110_vm0, %v18111_v1 }
0x1042   : > { %v5493_v44 = vpop.f32.mrb[120].mxu0 }
0x1043   : > { %v14889_v53 = vpop.f32.mrb[121].mxu0  ;;  %v5510_v41 = vmax.f32 %v5493_v44, 0.0 }
0x1046   : > { %v5498_v48 = vpop.f32.mrb[122].mxu0 }
0x1047   : > { %v5511_v34 = vmax.f32 %v5498_v48, 0.0  ;;  %v14892_v51 = vpop.f32.mrb[123].mxu0 }
0x1049   : > { %v17585_v56 = vpack.i.bf16 %v5511_v34, %v5510_v41  ;;  %v20030_v49 = vpack.c.bf16 %v5511_v34, %v5510_v41 }
0x104a   : > { %v5503_v7 = vpop.f32.mrb[124].mxu0 }
0x104b   : > { %v20032_v60 = vmax.f32 %v5503_v7, 0.0  ;;  %17586 = vrot.lane.b32.xlu0 %v17585_v56, %s18117_s20  ;;  %v14895_v61 = vpop.f32.mrb[125].mxu0 }
0x104d   : > { %5531 = vrot.lane.b32.xlu1 %v20032_v60, %s18117_s20 }
0x104f   : > { %17591 = vrot.lane.b32.xlu0 %v17585_v56, %s18118_s21 }
0x1051   : > { %5521 = vrot.lane.b32.xlu1 %v20032_v60, %s18118_s21 }
0x1053   : > { %17596 = vrot.lane.b32.xlu0 %v17585_v56, %s18119_s22 }
0x1055   : > { %5735 = vrot.lane.b32.xlu1 %v20032_v60, %s18119_s22 }
0x1057   : > { %17601 = vrot.lane.b32.xlu0 %v17585_v56, %s18120_s23 }
0x1059   : > { %5846 = vrot.lane.b32.xlu1 %v20032_v60, %s18120_s23 }
0x10bd   : > { %v17587_v38 = vpop.permute.xlu0 %17586 }
0x10be   : > { %v17589_v50 = vunpack.i.h.bf16 %v17587_v38  ;;  %v17588_v21 = vunpack.i.l.bf16 %v17587_v38 }
0x10bf   : > { %v5532_v58 = vpop.permute.xlu1 %5531 }
0x10c0   : > { %v16503_v52 = vpack.c.bf16 %v17589_v50, %v17588_v21 }
0x10c1   : > { %v17592_v28 = vpop.permute.xlu0 %17591 }
0x10c2   : > { %v17594_v43 = vunpack.i.h.bf16 %v17592_v28  ;;  %v17593_v54 = vunpack.i.l.bf16 %v17592_v28  ;;  %16504 = vmatprep.subr.bf16.mxu1 %v16503_v52  ;;  %v12364_v28 = vld [vmem:[%s18187_s15 + $0x48] sm:$0xff] }
0x10c3   : > { %16506 = vmatpush3.bf16.msra.mxu1 %v16503_v52  ;;  %v5522_v45 = vpop.permute.xlu1 %5521  ;;  %v12363_v52 = vld [vmem:[%s18187_s15 + $0x40] sm:$0xff] }
0x10c4   : > { %14900 = vmatprep.subr.mxu1 %v5532_v58  ;;  %v16507_v42 = vpack.c.bf16 %v17594_v43, %v17593_v54  ;;  %v12365_v43 = vld [vmem:[%s18187_s15 + $0x50] sm:$0xff]  ;;  %v12366_v54 = vld [vmem:[%s18187_s15 + $0x58] sm:$0xf] }
0x10c5   : > { %v17597_v62 = vpop.permute.xlu0 %17596 }
0x10c6   : > { %v17599_v4 = vunpack.i.h.bf16 %v17597_v62  ;;  %v17598_v15 = vunpack.i.l.bf16 %v17597_v62 }
0x10c7   : > { %14901 = vmatpush3.msra.mxu1 %v5532_v58  ;;  %v5736_v8 = vpop.permute.xlu1 %5735 }
0x10c8   : > { %14903 = vmatmul.mubr.msk.f32.vlgmr.msra.gmra.mrb[172].mxu1 %vm930_vm5, %v12323_v57  ;;  %16508 = vmatprep.subr.bf16.mxu1 %v16507_v42  ;;  %v16511_v29 = vpack.c.bf16 %v17599_v4, %v17598_v15  ;;  %v17615_v57 = vpack.i.bf16 %v12364_v28, %v12363_v52 }
0x10c9   : > { %16510 = vmatpush3.bf16.msra.mxu1 %v16507_v42  ;;  %14905 = vmatprep.mubr.msk.f32.mxu1 %vm930_vm5, %v12324_v5  ;;  %v17602_v2 = vpop.permute.xlu0 %17601  ;;  %v17620_v42 = vpack.i.bf16 %v12366_v54, %v12365_v43 }
0x10ca   : > { %14912 = vmatprep.subr.mxu1 %v5522_v45  ;;  %v17604_v22 = vunpack.i.h.bf16 %v17602_v2  ;;  %v17603_v6 = vunpack.i.l.bf16 %v17602_v2 }
0x10cb   : > { %v5847_v23 = vpop.permute.xlu1 %5846 }
0x10cc   : > { %14906 = vmatmul.mubr.msk.f32.gmra.mrb[174].mxu1 %vm930_vm5, %v12325_v25  ;;  %v16515_v24 = vpack.c.bf16 %v17604_v22, %v17603_v6 }
0x10cd   : > { %14913 = vmatpush3.msra.mxu1 %v5522_v45  ;;  %14914 = vmatprep.mubr.msk.f32.mxu1 %vm930_vm5, %v5513_v11 }
0x10ce   : > { %16512 = vmatprep.subr.bf16.mxu1 %v16511_v29 }
0x10d0   : > { %14915 = vmatmul.mubr.msk.f32.vlgmr.msra.gmra.mrb[172].mxu1 %vm930_vm5, %v5514_v19 }
0x10d1   : > { %16514 = vmatpush3.bf16.msra.mxu1 %v16511_v29  ;;  %14917 = vmatprep.mubr.msk.f32.mxu1 %vm930_vm5, %v5515_v3 }
0x10d2   : > { %14924 = vmatprep.subr.mxu1 %v5736_v8 }
0x10d4   : > { %14918 = vmatmul.mubr.msk.f32.gmra.mrb[174].mxu1 %vm930_vm5, %v5516_v59 }
0x10d5   : > { %14925 = vmatpush3.msra.mxu1 %v5736_v8  ;;  %14926 = vmatprep.mubr.msk.f32.mxu1 %vm930_vm5, %v12334_v13 }
0x10d6   : > { %16516 = vmatprep.subr.bf16.mxu1 %v16515_v24 }
0x10d8   : > { %14927 = vmatmul.mubr.msk.f32.vlgmr.msra.gmra.mrb[172].mxu1 %vm930_vm5, %v12335_v9 }
0x10d9   : > { %16518 = vmatpush3.bf16.msra.mxu1 %v16515_v24  ;;  %14929 = vmatprep.mubr.msk.f32.mxu1 %vm930_vm5, %v12336_v16 }
0x10da   : > { %14936 = vmatprep.subr.mxu1 %v5847_v23 }
0x10dc   : > { %14930 = vmatmul.mubr.msk.f32.gmra.mrb[174].mxu1 %vm930_vm5, %v12337_v63  ;;  %v18056_v63 = vld [vmem:[%s21947_s8 + $0x8] sm:$0x3f] }
0x10dd   : > { %14937 = vmatpush3.msra.mxu1 %v5847_v23  ;;  %14938 = vmatprep.mubr.msk.f32.mxu1 %vm930_vm5, %v12342_v55 }
0x10de   : > { %16520 = vmatprep.subr.bf16.mxu1 %v20030_v49 }
0x10e0   : > { %14939 = vmatmul.mubr.msk.f32.vlgmr.msra.gmra.mrb[172].mxu1 %vm930_vm5, %v12343_v18  ;;  %v12367_v18 = vld [vmem:[%s21940_s1 + $0x18] sm:$0xff] }
0x10e1   : > { %16522 = vmatpush3.bf16.msra.mxu1 %v20030_v49  ;;  %14941 = vmatprep.mubr.msk.f32.mxu1 %vm930_vm5, %v12344_v32  ;;  %v16541_v32 = vpack.c.bf16 %v12364_v28, %v12363_v52 }
0x10e2   : > { %14948 = vmatprep.subr.mxu1 %v20032_v60 }
0x10e4   : > { %14942 = vmatmul.mubr.msk.f32.gmra.mrb[174].mxu1 %vm930_vm5, %v12345_v27  ;;  %v12368_v27 = vld [vmem:[%s21940_s1 + $0x20] sm:$0xff] }
0x10e5   : > { %14949 = vmatpush3.msra.mxu1 %v20032_v60  ;;  %14950 = vmatprep.mubr.msk.f32.mxu1 %vm930_vm5, %v12350_v31  ;;  %v16544_v31 = vpack.c.bf16 %v12366_v54, %v12365_v43  ;;  %v12379_v43 = vld [vmem:[%s21940_s1 + $0x38] sm:$0xff] }
0x10e8   : > { %14951 = vmatmul.mubr.msk.f32.vlgmr.msra.gmra.mrb[172].mxu1 %vm930_vm5, %v12351_v36 }
0x10e9   : > { %14953 = vmatprep.mubr.msk.f32.mxu1 %vm930_vm5, %v12352_v30  ;;  %v12369_v30 = vld [vmem:[%s21940_s1 + $0x28] sm:$0xff] }
0x10ec   : > { %14954 = vmatmul.mubr.msk.f32.gmra.mrb[174].mxu1 %vm930_vm5, %v12353_v39 }
0x10ed   : > { %14964 = vmatprep.mubr.msk.f32.mxu1 %vm3214_vm9, %v18055_v40 }
0x11bb   : > { %v14952_v44 = vpop.f32.mrb[172].mxu1 }
0x11bc   : > { %v6059_v53 = vrot.slane %v14952_v44, 1  ;;  %v6031_v48 = vpop.f32.mrb[173].mxu1 }
0x11bd   : > { %v6058_v41 = vrot.slane %v6031_v48, 1 }
0x11bf   : > { %v6060_v34 = vsel %vm1709_vm6, %v6058_v41, %v6059_v53  ;;  %v14955_v51 = vpop.f32.mrb[174].mxu1 }
0x11c0   : > { %v6069_v46 = vmax.f32 %v6031_v48, %v6060_v34  ;;  %v6063_v56 = vrot.slane %v14955_v51, 1  ;;  %v6041_v7 = vpop.f32.mrb[175].mxu1  ;;  %v6173_v48 = vld [vmem:[%s21940_s1] sm:$0xff] }
0x11c1   : > { %v6061_v49 = vrot.slane %v6041_v7, 1 }
0x11c2   : > { %v6072_v38 = vmax.f32 %v14955_v51, %v6063_v56 }
0x11c3   : > { %v6064_v60 = vsel %vm1709_vm6, %v6061_v49, %v6063_v56  ;;  %v6062_v61 = vsel %vm1709_vm6, %v6059_v53, %v6061_v49 }
0x11c4   : > { %v6071_v50 = vmax.f32 %v6041_v7, %v6064_v60  ;;  %v6070_v21 = vmax.f32 %v14952_v44, %v6062_v61  ;;  %v6175_v7 = vld [vmem:[%s21940_s1 + $0x10] sm:$0xff] }
0x11c6   : > { %v17610_v58 = vpack.i.bf16 %v6072_v38, %v6071_v50  ;;  %v17605_v62 = vpack.i.bf16 %v6070_v21, %v6069_v46 }
0x11c8   : > { %17611 = vrot.lane.b32.xlu1 %v17610_v58, %s18112_s16  ;;  %17606 = vrot.lane.b32.xlu0 %v17605_v62, %s18112_s16  ;;  %v12380_v58 = vld [vmem:[%s21940_s1 + $0x40] sm:$0xff] }
0x11cc   : > { %17616 = vrot.lane.b32.xlu0 %v17615_v57, %s18112_s16  ;;  %17621 = vrot.lane.b32.xlu1 %v17620_v42, %s18112_s16 }
0x11d0   : > { %17626 = vrot.lane.b32.xlu0 %v17615_v57, %s18113_s17  ;;  %17631 = vrot.lane.b32.xlu1 %v17620_v42, %s18113_s17 }
0x11d4   : > { %17636 = vrot.lane.b32.xlu0 %v17615_v57, %s18114_s18  ;;  %17641 = vrot.lane.b32.xlu1 %v17620_v42, %s18114_s18 }
0x11d8   : > { %17646 = vrot.lane.b32.xlu0 %v17615_v57, %s18115_s19  ;;  %17651 = vrot.lane.b32.xlu1 %v17620_v42, %s18115_s19 }
0x123a   : > { %v17612_v5 = vpop.permute.xlu1 %17611  ;;  %v17607_v4 = vpop.permute.xlu0 %17606 }
0x123b   : > { %v17614_v15 = vunpack.i.h.bf16 %v17612_v5  ;;  %v17613_v45 = vunpack.i.l.bf16 %v17612_v5  ;;  %v17609_v25 = vunpack.i.h.bf16 %v17607_v4  ;;  %v17608_v11 = vunpack.i.l.bf16 %v17607_v4  ;;  %v12385_v4 = vld [vmem:[%s21940_s1 + $0x48] sm:$0xff] }
0x123d   : > { %v6084_v29 = vmax.f32 %v6072_v38, %v17614_v15  ;;  %v6083_v2 = vmax.f32 %v6071_v50, %v17613_v45  ;;  %v6082_v19 = vmax.f32 %v6070_v21, %v17609_v25  ;;  %v6081_v3 = vmax.f32 %v6069_v46, %v17608_v11  ;;  %v6174_v46 = vld [vmem:[%s21940_s1 + $0x8] sm:$0xff]  ;;  %v12378_v50 = vld [vmem:[%s21940_s1 + $0x30] sm:$0xff] }
0x123e   : > { %v17617_v6 = vpop.permute.xlu0 %17616  ;;  %v17622_v24 = vpop.permute.xlu1 %17621  ;;  %v12386_v11 = vld [vmem:[%s21940_s1 + $0x50] sm:$0xff] }
0x123f   : > { %v16523_v22 = vpack.c.bf16 %v6082_v19, %v6081_v3  ;;  %v16527_v8 = vpack.c.bf16 %v6084_v29, %v6083_v2  ;;  %v17619_v59 = vunpack.i.h.bf16 %v17617_v6  ;;  %v17618_v13 = vunpack.i.l.bf16 %v17617_v6  ;;  %v12387_v29 = vld [vmem:[%s21940_s1 + $0x58] sm:$0xff]  ;;  %v12392_v2 = vld [vmem:[%s21940_s1 + $0x60] sm:$0xff]  ;;  %v12393_v19 = vld [vmem:[%s21940_s1 + $0x68] sm:$0xff] }
0x1240   : > { %v17624_v16 = vunpack.i.h.bf16 %v17622_v24  ;;  %v17623_v23 = vunpack.i.l.bf16 %v17622_v24  ;;  %v12394_v3 = vld [vmem:[%s21940_s1 + $0x70] sm:$0xff] }
0x1241   : > { %16524 = vmatprep.subr.bf16.mxu1 %v16523_v22  ;;  %v16534_v9 = vpack.c.bf16 %v17619_v59, %v17618_v13 }
0x1242   : > { %16526 = vmatpush3.bf16.msra.mxu1 %v16523_v22  ;;  %v16537_v55 = vpack.c.bf16 %v17624_v16, %v17623_v23  ;;  %v17627_v36 = vpop.permute.xlu0 %17626  ;;  %v17632_v44 = vpop.permute.xlu1 %17631 }
0x1243   : > { %16529 = vmatprep.subr.msk.bf16.mxu1 %vm19238_vm11, %v16527_v8  ;;  %v17629_v39 = vunpack.i.h.bf16 %v17627_v36  ;;  %v17628_v40 = vunpack.i.l.bf16 %v17627_v36  ;;  %v17634_v41 = vunpack.i.h.bf16 %v17632_v44  ;;  %v17633_v34 = vunpack.i.l.bf16 %v17632_v44  ;;  %v6692_v36 = vld [vmem:[%s21941_s2 + $0x18] sm:$0xff] }
0x1244   : > { %v6696_v44 = vld [vmem:[%s21941_s2 + $0x38] sm:$0xff] }
0x1245   : > { %v16548_v53 = vpack.c.bf16 %v17629_v39, %v17628_v40  ;;  %v16551_v51 = vpack.c.bf16 %v17634_v41, %v17633_v34  ;;  %v6694_v39 = vld [vmem:[%s21941_s2 + $0x28] sm:$0xff]  ;;  %v6695_v40 = vld [vmem:[%s21941_s2 + $0x30] sm:$0xff] }
0x1246   : > { %16532 = vmatpush3.bf16.msk.msra.mxu1 %vm19238_vm11, %v16527_v8  ;;  %v17637_v56 = vpop.permute.xlu0 %17636  ;;  %v17642_v61 = vpop.permute.xlu1 %17641 }
0x1247   : > { %16533 = vmatprep.subr.bf16.mxu1 %v18109_v0  ;;  %v17639_v49 = vunpack.i.h.bf16 %v17637_v56  ;;  %v17638_v60 = vunpack.i.l.bf16 %v17637_v56  ;;  %v17644_v21 = vunpack.i.h.bf16 %v17642_v61  ;;  %v17643_v52 = vunpack.i.l.bf16 %v17642_v61 }
0x1249   : > { %14965 = vmatmul.mubr.msk.f32.vlgmr.msra.gmra.mrb[176].mxu1 %vm3214_vm9, %v18056_v63  ;;  %v16555_v38 = vpack.c.bf16 %v17639_v49, %v17638_v60  ;;  %v16558_v28 = vpack.c.bf16 %v17644_v21, %v17643_v52  ;;  %v12399_v49 = vld [vmem:[%s21941_s2 + $0x48] sm:$0xff] }
0x124a   : > { %16535 = vmatpush3.bf16.msra.mxu1 %v16534_v9  ;;  %14975 = vmatprep.mubr.msk.f32.mxu1 %vm18110_vm0, %v18111_v1  ;;  %v17647_v54 = vpop.permute.xlu0 %17646  ;;  %v17652_v42 = vpop.permute.xlu1 %17651 }
0x124b   : > { %16536 = vmatprep.subr.bf16.mxu1 %v18109_v0  ;;  %v17649_v62 = vunpack.i.h.bf16 %v17647_v54  ;;  %v17648_v57 = vunpack.i.l.bf16 %v17647_v54  ;;  %v17654_v15 = vunpack.i.h.bf16 %v17652_v42  ;;  %v17653_v45 = vunpack.i.l.bf16 %v17652_v42  ;;  %v12401_v54 = vld [vmem:[%s21941_s2 + $0x58] sm:$0xff]  ;;  %v12445_v42 = vld [vmem:[%s21941_s2 + $0xe0] sm:$0xff] }
0x124d   : > { %v16562_v5 = vpack.c.bf16 %v17649_v62, %v17648_v57  ;;  %v16565_v25 = vpack.c.bf16 %v17654_v15, %v17653_v45  ;;  %v12402_v57 = vld [vmem:[%s21941_s2 + $0x60] sm:$0xff]  ;;  %v12404_v15 = vld [vmem:[%s21941_s2 + $0x70] sm:$0xff] }
0x124e   : > { %16539 = vmatpush3.bf16.msk.msra.mxu1 %vm18208_vm3, %v16537_v55  ;;  %v12447_v45 = vld [vmem:[%s21941_s2 + $0xf0] sm:$0xff] }
0x124f   : > { %16540 = vmatprep.subr.bf16.mxu1 %v18109_v0 }
0x1251   : > { %14976 = vmatmul.mubr.msk.f32.vlgmr.msra.gmra.mrb[178].mxu1 %vm398_vm4, %v12367_v18 }
0x1252   : > { %14978 = vmatprep.mubr.msk.f32.mxu1 %vm18110_vm0, %v18111_v1  ;;  %16542 = vmatpush3.bf16.msra.mxu1 %v16541_v32  ;;  %v6689_v32 = vld [vmem:[%s21941_s2] sm:$0xff] }
0x1253   : > { %16543 = vmatprep.subr.bf16.mxu1 %v18109_v0 }
0x1255   : > { %14979 = vmatmul.mubr.msk.f32.gmra.mrb[180].mxu1 %vm398_vm4, %v12368_v27  ;;  %v6690_v27 = vld [vmem:[%s21941_s2 + $0x8] sm:$0xff] }
0x1256   : > { %14981 = vmatprep.mubr.msk.f32.mxu1 %vm18110_vm0, %v18111_v1  ;;  %16546 = vmatpush3.bf16.msk.msra.mxu1 %vm18208_vm3, %v16544_v31  ;;  %v6691_v31 = vld [vmem:[%s21941_s2 + $0x10] sm:$0xff] }
0x1257   : > { %16547 = vmatprep.subr.bf16.mxu1 %v18109_v0 }
0x1259   : > { %14982 = vmatmul.mubr.msk.f32.gmra.mrb[182].mxu1 %vm398_vm4, %v12369_v30  ;;  %v6693_v30 = vld [vmem:[%s21941_s2 + $0x20] sm:$0xff] }
0x125a   : > { %14992 = vmatprep.mubr.msk.f32.mxu1 %vm18110_vm0, %v18111_v1 }
0x125d   : > { %14993 = vmatmul.mubr.msk.f32.vlgmr.msra.gmra.mrb[178].mxu1 %vm398_vm4, %v6173_v48 }
0x125e   : > { %14995 = vmatprep.mubr.msk.f32.mxu1 %vm18110_vm0, %v18111_v1  ;;  %16549 = vmatpush3.bf16.msra.mxu1 %v16548_v53  ;;  %v6697_v53 = vld [vmem:[%s21941_s2 + $0x40] sm:$0xff] }
0x125f   : > { %16550 = vmatprep.subr.bf16.mxu1 %v18109_v0 }
0x1261   : > { %14996 = vmatmul.mubr.msk.f32.gmra.mrb[180].mxu1 %vm398_vm4, %v6174_v46 }
0x1262   : > { %14998 = vmatprep.mubr.msk.f32.mxu1 %vm18110_vm0, %v18111_v1  ;;  %16553 = vmatpush3.bf16.msk.msra.mxu1 %vm18208_vm3, %v16551_v51 }
0x1263   : > { %16554 = vmatprep.subr.bf16.mxu1 %v18109_v0 }
0x1265   : > { %14999 = vmatmul.mubr.msk.f32.gmra.mrb[182].mxu1 %vm398_vm4, %v6175_v7 }
0x1266   : > { %15009 = vmatprep.mubr.msk.f32.mxu1 %vm18110_vm0, %v18111_v1 }
0x1269   : > { %15010 = vmatmul.mubr.msk.f32.vlgmr.msra.gmra.mrb[178].mxu1 %vm398_vm4, %v12378_v50 }
0x126a   : > { %15012 = vmatprep.mubr.msk.f32.mxu1 %vm18110_vm0, %v18111_v1  ;;  %16556 = vmatpush3.bf16.msra.mxu1 %v16555_v38 }
0x126b   : > { %16557 = vmatprep.subr.bf16.mxu1 %v18109_v0 }
0x126d   : > { %15013 = vmatmul.mubr.msk.f32.gmra.mrb[180].mxu1 %vm398_vm4, %v12379_v43 }
0x126e   : > { %15015 = vmatprep.mubr.msk.f32.mxu1 %vm18110_vm0, %v18111_v1  ;;  %16560 = vmatpush3.bf16.msk.msra.mxu1 %vm18208_vm3, %v16558_v28  ;;  %v12400_v28 = vld [vmem:[%s21941_s2 + $0x50] sm:$0xff] }
0x126f   : > { %16561 = vmatprep.subr.bf16.mxu1 %v18109_v0 }
0x1271   : > { %15016 = vmatmul.mubr.msk.f32.gmra.mrb[182].mxu1 %vm398_vm4, %v12380_v58  ;;  %v12444_v58 = vld [vmem:[%s21941_s2 + $0xd8] sm:$0xff] }
0x1272   : > { %15026 = vmatprep.mubr.msk.f32.mxu1 %vm18110_vm0, %v18111_v1 }
0x1275   : > { %15027 = vmatmul.mubr.msk.f32.vlgmr.msra.gmra.mrb[178].mxu1 %vm398_vm4, %v12385_v4  ;;  %v12446_v4 = vld [vmem:[%s21941_s2 + $0xe8] sm:$0xff] }
0x1276   : > { %15029 = vmatprep.mubr.msk.f32.mxu1 %vm18110_vm0, %v18111_v1  ;;  %16563 = vmatpush3.bf16.msra.mxu1 %v16562_v5  ;;  %v12403_v5 = vld [vmem:[%s21941_s2 + $0x68] sm:$0xff] }
0x1277   : > { %16564 = vmatprep.subr.bf16.mxu1 %v18109_v0 }
0x1279   : > { %15030 = vmatmul.mubr.msk.f32.gmra.mrb[180].mxu1 %vm398_vm4, %v12386_v11  ;;  %v12448_v11 = vld [vmem:[%s21941_s2 + $0xf8] sm:$0xff] }
0x127a   : > { %15032 = vmatprep.mubr.msk.f32.mxu1 %vm18110_vm0, %v18111_v1  ;;  %16567 = vmatpush3.bf16.msk.msra.mxu1 %vm18208_vm3, %v16565_v25  ;;  %v12405_v25 = vld [vmem:[%s21941_s2 + $0x78] sm:$0xff] }
0x127b   : > { %16571 = vmatprep.subr.bf16.mxu1 %v18109_v0 }
0x127d   : > { %15033 = vmatmul.mubr.msk.f32.gmra.mrb[182].mxu1 %vm398_vm4, %v12387_v29  ;;  %v12406_v29 = vld [vmem:[%s21941_s2 + $0x80] sm:$0xff] }
0x127e   : > { %15043 = vmatprep.mubr.msk.f32.mxu1 %vm18110_vm0, %v18111_v1 }
0x1281   : > { %15044 = vmatmul.mubr.msk.f32.vlgmr.msra.gmra.mrb[178].mxu1 %vm398_vm4, %v12392_v2  ;;  %v12449_v2 = vld [vmem:[%s21941_s2 + $0x100] sm:$0xff] }
0x1282   : > { %15046 = vmatprep.mubr.msk.f32.mxu1 %vm18110_vm0, %v18111_v1 }
0x1285   : > { %15047 = vmatmul.mubr.msk.f32.gmra.mrb[180].mxu1 %vm398_vm4, %v12393_v19 }
0x1286   : > { %15049 = vmatprep.mubr.msk.f32.mxu1 %vm18110_vm0, %v18111_v1 }
0x1289   : > { %15050 = vmatmul.mubr.msk.f32.gmra.mrb[182].mxu1 %vm398_vm4, %v12394_v3  ;;  %v12407_v3 = vld [vmem:[%s21941_s2 + $0x88] sm:$0xff] }
0x128a   : > { %15091 = vmatprep.mubr.msk.f32.mxu1 %vm18110_vm0, %v18111_v1 }
0x131c   : > { %v14966_v22 = vpop.f32.mrb[176].mxu1 }
0x131d   : > { %v6164_v6 = vmax.f32 %v14966_v22, 0.0  ;;  %v6154_v8 = vpop.f32.mrb[177].mxu1  ;;  %v12450_v22 = vld [vmem:[%s21941_s2 + $0x108] sm:$0xff] }
0x131e   : > { %v6163_v59 = vmax.f32 %v6154_v8, 0.0 }
0x131f   : > { %12362 = vst [vmem:[%s19369_s29 + $0x18] sm:$0x3f] %v6164_v6 }
0x1320   : > { %12361 = vst [vmem:[%s19369_s29 + $0x10] sm:$0xff] %v6163_v59  ;;  %v12426_v59 = vld [vmem:[%s21941_s2 + $0x90] sm:$0xff] }
0x1354   : > { %v6672_v13 = vpop.f32.mrb[178].mxu1 }
0x1355   : > { %v15045_v24 = vpop.f32.mrb[179].mxu1 }
0x1358   : > { %v6677_v9 = vpop.f32.mrb[180].mxu1 }
0x1359   : > { %v15048_v16 = vpop.f32.mrb[181].mxu1  ;;  %v17655_v23 = vpack.i.bf16 %v6677_v9, %v6672_v13  ;;  %v16572_v63 = vpack.c.bf16 %v6677_v9, %v6672_v13  ;;  %v12451_v13 = vld [vmem:[%s21941_s2 + $0x110] sm:$0xff]  ;;  %v12427_v9 = vld [vmem:[%s21941_s2 + $0x98] sm:$0xff] }
0x135a   : > { %v12452_v16 = vld [vmem:[%s21941_s2 + $0x118] sm:$0xff] }
0x135b   : > { %17656 = vrot.lane.b32.xlu0 %v17655_v23, %s18112_s16  ;;  %16573 = vmatpush3.bf16.msra.mxu1 %v16572_v63  ;;  %v12428_v63 = vld [vmem:[%s21941_s2 + $0xa0] sm:$0xff] }
0x135c   : > { %v6682_v55 = vpop.f32.mrb[182].mxu1  ;;  %15089 = vmatprep.subr.mxu1 %v18111_v1 }
0x135d   : > { %6711 = vrot.lane.b32.xlu1 %v6682_v55, %s18112_s16  ;;  %v15051_v18 = vpop.f32.mrb[183].mxu1 }
0x135e   : > { %v12430_v18 = vld [vmem:[%s21941_s2 + $0xb0] sm:$0xff] }
0x135f   : > { %17661 = vrot.lane.b32.xlu0 %v17655_v23, %s18113_s17  ;;  %15090 = vmatpush3.msra.mxu1 %v6682_v55 }
0x1360   : > { %15092 = vmatmul.mubr.msk.f32.vlgmr.msra.gmra.mrb[184].mxu1 %vm930_vm5, %v6689_v32  ;;  %16577 = vmatprep.subr.bf16.mxu1 %v18109_v0  ;;  %v12431_v32 = vld [vmem:[%s21941_s2 + $0xb8] sm:$0xff] }
0x1361   : > { %7000 = vrot.lane.b32.xlu1 %v6682_v55, %s18113_s17  ;;  %15094 = vmatprep.mubr.msk.f32.mxu1 %vm18110_vm0, %v18111_v1 }
0x1363   : > { %17666 = vrot.lane.b32.xlu0 %v17655_v23, %s18114_s18 }
0x1364   : > { %15095 = vmatmul.mubr.msk.f32.gmra.mrb[186].mxu1 %vm930_vm5, %v6690_v27  ;;  %v12432_v27 = vld [vmem:[%s21941_s2 + $0xc0] sm:$0xff] }
0x1365   : > { %17671 = vrot.lane.b32.xlu1 %v17655_v23, %s18115_s19  ;;  %15097 = vmatprep.mubr.msk.f32.mxu1 %vm18110_vm0, %v18111_v1 }
0x1367   : > { %7161 = vrot.lane.b32.xlu0 %v6682_v55, %s18114_s18 }
0x1368   : > { %15098 = vmatmul.mubr.msk.f32.gmra.mrb[188].mxu1 %vm930_vm5, %v6691_v31  ;;  %v12433_v31 = vld [vmem:[%s21941_s2 + $0xc8] sm:$0xff] }
0x1369   : > { %7322 = vrot.lane.b32.xlu1 %v6682_v55, %s18115_s19  ;;  %15100 = vmatprep.mubr.msk.f32.mxu1 %vm18110_vm0, %v18111_v1  ;;  %v12429_v55 = vld [vmem:[%s21941_s2 + $0xa8] sm:$0xff] }
0x136c   : > { %15101 = vmatmul.mubr.msk.f32.gmra.mrb[190].mxu1 %vm930_vm5, %v6692_v36  ;;  %v12434_v36 = vld [vmem:[%s21941_s2 + $0xd0] sm:$0xff] }
0x136d   : > { %15103 = vmatprep.mubr.msk.f32.mxu1 %vm18110_vm0, %v18111_v1 }
0x1370   : > { %15104 = vmatmul.mubr.msk.f32.gmra.mrb[192].mxu1 %vm930_vm5, %v6693_v30  ;;  %v12462_v30 = vld [vmem:[%s21941_s2 + $0x120] sm:$0xff] }
0x1371   : > { %15106 = vmatprep.mubr.msk.f32.mxu1 %vm18110_vm0, %v18111_v1 }
0x1374   : > { %15107 = vmatmul.mubr.msk.f32.gmra.mrb[194].mxu1 %vm930_vm5, %v6694_v39  ;;  %v12463_v39 = vld [vmem:[%s21941_s2 + $0x128] sm:$0xff] }
0x1375   : > { %15109 = vmatprep.mubr.msk.f32.mxu1 %vm18110_vm0, %v18111_v1 }
0x1378   : > { %15110 = vmatmul.mubr.msk.f32.gmra.mrb[196].mxu1 %vm930_vm5, %v6695_v40  ;;  %v12464_v40 = vld [vmem:[%s21941_s2 + $0x130] sm:$0xff] }
0x1379   : > { %15112 = vmatprep.mubr.msk.f32.mxu1 %vm18110_vm0, %v18111_v1 }
0x137c   : > { %15113 = vmatmul.mubr.msk.f32.gmra.mrb[198].mxu1 %vm930_vm5, %v6696_v44  ;;  %v12465_v44 = vld [vmem:[%s21941_s2 + $0x138] sm:$0xff] }
0x137d   : > { %15115 = vmatprep.mubr.msk.f32.mxu1 %vm18110_vm0, %v18111_v1 }
0x1380   : > { %15116 = vmatmul.mubr.msk.f32.gmra.mrb[200].mxu1 %vm930_vm5, %v6697_v53  ;;  %v12466_v53 = vld [vmem:[%s21941_s2 + $0x140] sm:$0xff] }
0x1381   : > { %15157 = vmatprep.mubr.msk.f32.mxu1 %vm18110_vm0, %v18111_v1 }
0x13cd   : > { %v17657_v48 = vpop.permute.xlu0 %17656 }
0x13ce   : > { %v17659_v41 = vunpack.i.h.bf16 %v17657_v48  ;;  %v17658_v34 = vunpack.i.l.bf16 %v17657_v48  ;;  %v12467_v48 = vld [vmem:[%s21941_s2 + $0x148] sm:$0xff] }
0x13cf   : > { %v6712_v60 = vpop.permute.xlu1 %6711 }
0x13d0   : > { %v16569_v51 = vpack.c.bf16 %v17659_v41, %v17658_v34  ;;  %v12468_v34 = vld [vmem:[%s21941_s2 + $0x150] sm:$0xff] }
0x13d1   : > { %v17662_v46 = vpop.permute.xlu0 %17661 }
0x13d2   : > { %v17664_v56 = vunpack.i.h.bf16 %v17662_v46  ;;  %v17663_v7 = vunpack.i.l.bf16 %v17662_v46  ;;  %16570 = vmatpush3.bf16.msra.mxu0 %v16569_v51 }
0x13d3   : > { %15056 = vmatprep.subr.mxu0 %v18111_v1  ;;  %v7001_v43 = vpop.permute.xlu1 %7000 }
0x13d4   : > { %v16575_v38 = vpack.c.bf16 %v17664_v56, %v17663_v7  ;;  %v12469_v56 = vld [vmem:[%s21941_s2 + $0x158] sm:$0xff] }
0x13d5   : > { %v17667_v61 = vpop.permute.xlu0 %17666 }
0x13d6   : > { %v17669_v50 = vunpack.i.h.bf16 %v17667_v61  ;;  %v17668_v21 = vunpack.i.l.bf16 %v17667_v61  ;;  %15057 = vmatpush3.msra.mxu0 %v6712_v60  ;;  %v12470_v60 = vld [vmem:[%s21941_s2 + $0x160] sm:$0xff] }
0x13d7   : > { %15059 = vmatmul.mubr.msk.f32.vlgmr.msra.gmra.mrb[126].mxu0 %vm930_vm5, %v12399_v49  ;;  %16574 = vmatprep.subr.bf16.mxu0 %v18109_v0  ;;  %v17672_v19 = vpop.permute.xlu1 %17671 }
0x13d8   : > { %v16578_v52 = vpack.c.bf16 %v17669_v50, %v17668_v21  ;;  %16576 = vmatpush3.bf16.msra.mxu0 %v16575_v38  ;;  %15061 = vmatprep.mubr.msk.f32.mxu0 %vm18110_vm0, %v18111_v1  ;;  %v17674_v6 = vunpack.i.h.bf16 %v17672_v19  ;;  %v17673_v8 = vunpack.i.l.bf16 %v17672_v19 }
0x13d9   : > { %15122 = vmatprep.subr.mxu0 %v18111_v1  ;;  %v7162_v62 = vpop.permute.xlu0 %7161 }
0x13da   : > { %16579 = vmatpush3.bf16.msra.mxu1 %v16578_v52  ;;  %v16581_v24 = vpack.c.bf16 %v17674_v6, %v17673_v8 }
0x13db   : > { %15062 = vmatmul.mubr.msk.f32.gmra.mrb[128].mxu0 %vm930_vm5, %v12400_v28  ;;  %15155 = vmatprep.subr.mxu1 %v18111_v1  ;;  %v7323_v23 = vpop.permute.xlu1 %7322 }
0x13dc   : > { %15123 = vmatpush3.msra.mxu0 %v7001_v43  ;;  %15064 = vmatprep.mubr.msk.f32.mxu0 %vm18110_vm0, %v18111_v1 }
0x13dd   : > { %16580 = vmatprep.subr.bf16.mxu0 %v18109_v0 }
0x13de   : > { %15156 = vmatpush3.msra.mxu1 %v7162_v62 }
0x13df   : > { %15065 = vmatmul.mubr.msk.f32.gmra.mrb[130].mxu0 %vm930_vm5, %v12401_v54  ;;  %15158 = vmatmul.mubr.msk.f32.vlgmr.msra.gmra.mrb[202].mxu1 %vm930_vm5, %v12444_v58 }
0x13e0   : > { %15067 = vmatprep.mubr.msk.f32.mxu0 %vm18110_vm0, %v18111_v1  ;;  %15160 = vmatprep.mubr.msk.f32.mxu1 %vm18110_vm0, %v18111_v1 }
0x13e1   : > { %16583 = vmatprep.subr.bf16.mxu1 %v18109_v0 }
0x13e3   : > { %15068 = vmatmul.mubr.msk.f32.gmra.mrb[132].mxu0 %vm930_vm5, %v12402_v57  ;;  %15161 = vmatmul.mubr.msk.f32.gmra.mrb[204].mxu1 %vm930_vm5, %v12445_v42 }
0x13e4   : > { %15070 = vmatprep.mubr.msk.f32.mxu0 %vm18110_vm0, %v18111_v1  ;;  %15163 = vmatprep.mubr.msk.f32.mxu1 %vm18110_vm0, %v18111_v1 }
0x13e7   : > { %15071 = vmatmul.mubr.msk.f32.gmra.mrb[134].mxu0 %vm930_vm5, %v12403_v5  ;;  %15164 = vmatmul.mubr.msk.f32.gmra.mrb[206].mxu1 %vm930_vm5, %v12446_v4 }
0x13e8   : > { %15073 = vmatprep.mubr.msk.f32.mxu0 %vm18110_vm0, %v18111_v1  ;;  %15166 = vmatprep.mubr.msk.f32.mxu1 %vm18110_vm0, %v18111_v1 }
0x13eb   : > { %15074 = vmatmul.mubr.msk.f32.gmra.mrb[136].mxu0 %vm930_vm5, %v12404_v15  ;;  %15167 = vmatmul.mubr.msk.f32.gmra.mrb[208].mxu1 %vm930_vm5, %v12447_v45 }
0x13ec   : > { %15076 = vmatprep.mubr.msk.f32.mxu0 %vm18110_vm0, %v18111_v1  ;;  %15169 = vmatprep.mubr.msk.f32.mxu1 %vm18110_vm0, %v18111_v1 }
0x13ef   : > { %15077 = vmatmul.mubr.msk.f32.gmra.mrb[138].mxu0 %vm930_vm5, %v12405_v25  ;;  %15170 = vmatmul.mubr.msk.f32.gmra.mrb[210].mxu1 %vm930_vm5, %v12448_v11 }
0x13f0   : > { %15079 = vmatprep.mubr.msk.f32.mxu0 %vm18110_vm0, %v18111_v1  ;;  %15172 = vmatprep.mubr.msk.f32.mxu1 %vm18110_vm0, %v18111_v1 }
0x13f3   : > { %15080 = vmatmul.mubr.msk.f32.gmra.mrb[140].mxu0 %vm930_vm5, %v12406_v29  ;;  %15173 = vmatmul.mubr.msk.f32.gmra.mrb[212].mxu1 %vm930_vm5, %v12449_v2 }
0x13f4   : > { %15082 = vmatprep.mubr.msk.f32.mxu0 %vm18110_vm0, %v18111_v1  ;;  %15175 = vmatprep.mubr.msk.f32.mxu1 %vm18110_vm0, %v18111_v1 }
0x13f7   : > { %15083 = vmatmul.mubr.msk.f32.gmra.mrb[142].mxu0 %vm930_vm5, %v12407_v3  ;;  %15176 = vmatmul.mubr.msk.f32.gmra.mrb[214].mxu1 %vm930_vm5, %v12450_v22 }
0x13f8   : > { %15124 = vmatprep.mubr.msk.f32.mxu0 %vm18110_vm0, %v18111_v1  ;;  %15178 = vmatprep.mubr.msk.f32.mxu1 %vm18110_vm0, %v18111_v1 }
0x13fb   : > { %15125 = vmatmul.mubr.msk.f32.vlgmr.msra.gmra.mrb[144].mxu0 %vm930_vm5, %v12426_v59  ;;  %15179 = vmatmul.mubr.msk.f32.gmra.mrb[216].mxu1 %vm930_vm5, %v12451_v13 }
0x13fc   : > { %16582 = vmatpush3.bf16.msra.mxu0 %v16581_v24  ;;  %15127 = vmatprep.mubr.msk.f32.mxu0 %vm18110_vm0, %v18111_v1 }
0x13fd   : > { %15188 = vmatprep.subr.mxu0 %v18111_v1  ;;  %15181 = vmatprep.mubr.msk.f32.mxu1 %vm18110_vm0, %v18111_v1 }
0x13ff   : > { %15128 = vmatmul.mubr.msk.f32.gmra.mrb[146].mxu0 %vm930_vm5, %v12427_v9  ;;  %15182 = vmatmul.mubr.msk.f32.gmra.mrb[218].mxu1 %vm930_vm5, %v12452_v16 }
0x1400   : > { %15189 = vmatpush3.msra.mxu0 %v7323_v23  ;;  %15130 = vmatprep.mubr.msk.f32.mxu0 %vm18110_vm0, %v18111_v1 }
0x1401   : > { %15235 = vmatprep.mubr.msk.f32.mxu1 %vm18110_vm0, %v18111_v1  ;;  %16595 = vmatprep.subr.bf16.mxu0 %v18109_v0 }
0x1403   : > { %15131 = vmatmul.mubr.msk.f32.gmra.mrb[148].mxu0 %vm930_vm5, %v12428_v63 }
0x1404   : > { %15133 = vmatprep.mubr.msk.f32.mxu0 %vm18110_vm0, %v18111_v1 }
0x1407   : > { %15134 = vmatmul.mubr.msk.f32.gmra.mrb[150].mxu0 %vm930_vm5, %v12429_v55 }
0x1408   : > { %15136 = vmatprep.mubr.msk.f32.mxu0 %vm18110_vm0, %v18111_v1 }
0x140b   : > { %15137 = vmatmul.mubr.msk.f32.gmra.mrb[152].mxu0 %vm930_vm5, %v12430_v18 }
0x140c   : > { %15139 = vmatprep.mubr.msk.f32.mxu0 %vm18110_vm0, %v18111_v1 }
0x140f   : > { %15140 = vmatmul.mubr.msk.f32.gmra.mrb[154].mxu0 %vm930_vm5, %v12431_v32 }
0x1410   : > { %15142 = vmatprep.mubr.msk.f32.mxu0 %vm18110_vm0, %v18111_v1 }
0x1413   : > { %15143 = vmatmul.mubr.msk.f32.gmra.mrb[156].mxu0 %vm930_vm5, %v12432_v27 }
0x1414   : > { %15145 = vmatprep.mubr.msk.f32.mxu0 %vm18110_vm0, %v18111_v1 }
0x1417   : > { %15146 = vmatmul.mubr.msk.f32.gmra.mrb[158].mxu0 %vm930_vm5, %v12433_v31 }
0x1418   : > { %15148 = vmatprep.mubr.msk.f32.mxu0 %vm18110_vm0, %v18111_v1 }
0x141b   : > { %15149 = vmatmul.mubr.msk.f32.gmra.mrb[160].mxu0 %vm930_vm5, %v12434_v36 }
0x141c   : > { %15190 = vmatprep.mubr.msk.f32.mxu0 %vm18110_vm0, %v18111_v1 }
0x141f   : > { %15191 = vmatmul.mubr.msk.f32.vlgmr.msra.gmra.mrb[162].mxu0 %vm930_vm5, %v12462_v30 }
0x1420   : > { %15193 = vmatprep.mubr.msk.f32.mxu0 %vm18110_vm0, %v18111_v1  ;;  %16597 = vmatpush3.bf16.msra.mxu0 %v18728_v10 }
0x1421   : > { %16598 = vmatprep.subr.bf16.mxu0 %v18109_v0 }
0x1423   : > { %15194 = vmatmul.mubr.msk.f32.gmra.mrb[164].mxu0 %vm930_vm5, %v12463_v39 }
0x1424   : > { %15196 = vmatprep.mubr.msk.f32.mxu0 %vm18110_vm0, %v18111_v1  ;;  %16600 = vmatpush3.bf16.msra.mxu0 %v18734_v12 }
0x1425   : > { %16601 = vmatprep.subr.bf16.mxu0 %v18109_v0 }
0x1427   : > { %15197 = vmatmul.mubr.msk.f32.gmra.mrb[166].mxu0 %vm930_vm5, %v12464_v40 }
0x1428   : > { %15199 = vmatprep.mubr.msk.f32.mxu0 %vm18110_vm0, %v18111_v1  ;;  %16603 = vmatpush3.bf16.msra.mxu0 %v18744_v14 }
0x1429   : > { %16604 = vmatprep.subr.bf16.mxu0 %v18109_v0 }
0x142b   : > { %15200 = vmatmul.mubr.msk.f32.gmra.mrb[168].mxu0 %vm930_vm5, %v12465_v44 }
0x142c   : > { %15202 = vmatprep.mubr.msk.f32.mxu0 %vm18110_vm0, %v18111_v1  ;;  %16606 = vmatpush3.bf16.msra.mxu0 %v18754_v20 }
0x142d   : > { %16607 = vmatprep.subr.bf16.mxu0 %v18109_v0 }
0x142f   : > { %15203 = vmatmul.mubr.msk.f32.gmra.mrb[170].mxu0 %vm930_vm5, %v12466_v53 }
0x1430   : > { %15205 = vmatprep.mubr.msk.f32.mxu0 %vm18110_vm0, %v18111_v1  ;;  %16609 = vmatpush3.bf16.msra.mxu0 %v18764_v33 }
0x1431   : > { %16610 = vmatprep.subr.bf16.mxu0 %v18109_v0 }
0x1433   : > { %15206 = vmatmul.mubr.msk.f32.gmra.mrb[172].mxu0 %vm930_vm5, %v12467_v48  ;;  %v6943_v41 = vpop.f32.mrb[184].mxu1 }
0x1434   : > { %15208 = vmatprep.mubr.msk.f32.mxu0 %vm18110_vm0, %v18111_v1  ;;  %v15093_v51 = vpop.f32.mrb[185].mxu1  ;;  %16612 = vmatpush3.bf16.msra.mxu0 %v18774_v26 }
0x1435   : > { %16613 = vmatprep.subr.bf16.mxu0 %v18109_v0 }
0x1437   : > { %15209 = vmatmul.mubr.msk.f32.gmra.mrb[174].mxu0 %vm930_vm5, %v12468_v34  ;;  %v6948_v46 = vpop.f32.mrb[186].mxu1 }
0x1438   : > { %15211 = vmatprep.mubr.msk.f32.mxu0 %vm18110_vm0, %v18111_v1  ;;  %v15096_v7 = vpop.f32.mrb[187].mxu1  ;;  %16615 = vmatpush3.bf16.msra.mxu0 %v18784_v37 }
0x1439   : > { %16616 = vmatprep.subr.bf16.mxu0 %v18109_v0 }
0x143b   : > { %15212 = vmatmul.mubr.msk.f32.gmra.mrb[176].mxu0 %vm930_vm5, %v12469_v56  ;;  %v6953_v49 = vpop.f32.mrb[188].mxu1 }
0x143c   : > { %15214 = vmatprep.mubr.msk.f32.mxu0 %vm18110_vm0, %v18111_v1  ;;  %v15099_v61 = vpop.f32.mrb[189].mxu1  ;;  %16618 = vmatpush3.bf16.msra.mxu0 %v18794_v35 }
0x143f   : > { %15215 = vmatmul.mubr.msk.f32.gmra.mrb[178].mxu0 %vm930_vm5, %v12470_v60  ;;  %v6958_v38 = vpop.f32.mrb[190].mxu1 }
0x1440   : > { %v15102_v50 = vpop.f32.mrb[191].mxu1  ;;  %15300 = vmatprep.mubr.msk.f32.mxu0 %vm18110_vm0, %v18111_v1 }
0x1443   : > { %v6963_v21 = vpop.f32.mrb[192].mxu1 }
0x1444   : > { %v15105_v52 = vpop.f32.mrb[193].mxu1 }
0x1447   : > { %v6968_v28 = vpop.f32.mrb[194].mxu1 }
0x1448   : > { %v15108_v43 = vpop.f32.mrb[195].mxu1 }
0x144b   : > { %v6973_v54 = vpop.f32.mrb[196].mxu1 }
0x144c   : > { %v15111_v58 = vpop.f32.mrb[197].mxu1 }
0x144f   : > { %v6978_v62 = vpop.f32.mrb[198].mxu1 }
0x1450   : > { %v15114_v57 = vpop.f32.mrb[199].mxu1 }
0x1453   : > { %v6983_v42 = vpop.f32.mrb[200].mxu1 }
0x1454   : > { %v15117_v5 = vpop.f32.mrb[201].mxu1 }
0x14aa   : > { %v6806_v4 = vpop.f32.mrb[126].mxu0 }
0x14ab   : > { %v6944_v15 = vadd.f32 %v6943_v41, %v6806_v4  ;;  %v15060_v45 = vpop.f32.mrb[127].mxu0 }
0x14ae   : > { %v6811_v25 = vpop.f32.mrb[128].mxu0 }
0x14af   : > { %v6949_v11 = vadd.f32 %v6948_v46, %v6811_v25  ;;  %v15063_v29 = vpop.f32.mrb[129].mxu0 }
0x14b2   : > { %v6816_v2 = vpop.f32.mrb[130].mxu0  ;;  %v7256_v19 = vpop.f32.mrb[202].mxu1 }
0x14b3   : > { %v6954_v3 = vadd.f32 %v6953_v49, %v6816_v2  ;;  %v15066_v22 = vpop.f32.mrb[131].mxu0  ;;  %v15159_v6 = vpop.f32.mrb[203].mxu1 }
0x14b6   : > { %v6821_v8 = vpop.f32.mrb[132].mxu0  ;;  %v7261_v59 = vpop.f32.mrb[204].mxu1 }
0x14b7   : > { %v6959_v13 = vadd.f32 %v6958_v38, %v6821_v8  ;;  %v15069_v24 = vpop.f32.mrb[133].mxu0  ;;  %v15162_v9 = vpop.f32.mrb[205].mxu1 }
0x14ba   : > { %v6826_v16 = vpop.f32.mrb[134].mxu0  ;;  %v7266_v23 = vpop.f32.mrb[206].mxu1 }
0x14bb   : > { %v6964_v63 = vadd.f32 %v6963_v21, %v6826_v16  ;;  %v15072_v55 = vpop.f32.mrb[135].mxu0  ;;  %v15165_v18 = vpop.f32.mrb[207].mxu1 }
0x14be   : > { %v6831_v32 = vpop.f32.mrb[136].mxu0  ;;  %v7271_v27 = vpop.f32.mrb[208].mxu1 }
0x14bf   : > { %v6969_v31 = vadd.f32 %v6968_v28, %v6831_v32  ;;  %v15075_v36 = vpop.f32.mrb[137].mxu0  ;;  %v15168_v30 = vpop.f32.mrb[209].mxu1 }
0x14c2   : > { %v6836_v39 = vpop.f32.mrb[138].mxu0  ;;  %v7276_v40 = vpop.f32.mrb[210].mxu1 }
0x14c3   : > { %v6974_v44 = vadd.f32 %v6973_v54, %v6836_v39  ;;  %v15078_v53 = vpop.f32.mrb[139].mxu0  ;;  %v15171_v48 = vpop.f32.mrb[211].mxu1 }
0x14c6   : > { %v6841_v41 = vpop.f32.mrb[140].mxu0  ;;  %v7281_v34 = vpop.f32.mrb[212].mxu1 }
0x14c7   : > { %v6979_v51 = vadd.f32 %v6978_v62, %v6841_v41  ;;  %v15081_v46 = vpop.f32.mrb[141].mxu0  ;;  %v15174_v56 = vpop.f32.mrb[213].mxu1 }
0x14ca   : > { %v6846_v7 = vpop.f32.mrb[142].mxu0  ;;  %v7286_v49 = vpop.f32.mrb[214].mxu1 }
0x14cb   : > { %v6984_v60 = vadd.f32 %v6983_v42, %v6846_v7  ;;  %v15084_v61 = vpop.f32.mrb[143].mxu0  ;;  %v15177_v38 = vpop.f32.mrb[215].mxu1 }
0x14ce   : > { %v7095_v50 = vpop.f32.mrb[144].mxu0  ;;  %v7291_v21 = vpop.f32.mrb[216].mxu1 }
0x14cf   : > { %v7139_v52 = vadd.f32 %v7095_v50, %v6944_v15  ;;  %v15126_v28 = vpop.f32.mrb[145].mxu0  ;;  %v15180_v43 = vpop.f32.mrb[217].mxu1 }
0x14d0   : > { %v18059_v43 = vld [vmem:[%s21942_s3 + $0x10] sm:$0xff] }
0x14d1   : > { %v7300_v58 = vadd.f32 %v7256_v19, %v7139_v52 }
0x14d2   : > { %v7100_v57 = vpop.f32.mrb[146].mxu0  ;;  %v7296_v54 = vpop.f32.mrb[218].mxu1 }
0x14d3   : > { %v7140_v5 = vadd.f32 %v7100_v57, %v6949_v11  ;;  %v15129_v4 = vpop.f32.mrb[147].mxu0  ;;  %v15183_v45 = vpop.f32.mrb[219].mxu1 }
0x14d5   : > { %v7301_v25 = vadd.f32 %v7261_v59, %v7140_v5 }
0x14d6   : > { %v7105_v62 = vpop.f32.mrb[148].mxu0 }
0x14d7   : > { %v7141_v29 = vadd.f32 %v7105_v62, %v6954_v3  ;;  %v15132_v2 = vpop.f32.mrb[149].mxu0  ;;  %v18060_v62 = vld [vmem:[%s21942_s3 + $0x18] sm:$0xff] }
0x14d9   : > { %v7302_v22 = vadd.f32 %v7266_v23, %v7141_v29 }
0x14da   : > { %v7110_v6 = vpop.f32.mrb[150].mxu0 }
0x14db   : > { %v7142_v42 = vadd.f32 %v7110_v6, %v6959_v13  ;;  %v15135_v8 = vpop.f32.mrb[151].mxu0 }
0x14dd   : > { %v7303_v24 = vadd.f32 %v7271_v27, %v7142_v42 }
0x14de   : > { %v7115_v9 = vpop.f32.mrb[152].mxu0 }
0x14df   : > { %v7143_v16 = vadd.f32 %v7115_v9, %v6964_v63  ;;  %v15138_v15 = vpop.f32.mrb[153].mxu0 }
0x14e1   : > { %v7304_v55 = vadd.f32 %v7276_v40, %v7143_v16 }
0x14e2   : > { %v7120_v18 = vpop.f32.mrb[154].mxu0 }
0x14e3   : > { %v7144_v19 = vadd.f32 %v7120_v18, %v6969_v31  ;;  %v15141_v32 = vpop.f32.mrb[155].mxu0  ;;  %v18057_v31 = vld [vmem:[%s21942_s3] sm:$0xff] }
0x14e5   : > { %v7305_v36 = vadd.f32 %v7281_v34, %v7144_v19 }
0x14e6   : > { %v7125_v11 = vpop.f32.mrb[156].mxu0 }
0x14e7   : > { %v7145_v30 = vadd.f32 %v7125_v11, %v6974_v44  ;;  %v15144_v39 = vpop.f32.mrb[157].mxu0 }
0x14e9   : > { %v7306_v59 = vadd.f32 %v7286_v49, %v7145_v30 }
0x14ea   : > { %v7130_v53 = vpop.f32.mrb[158].mxu0 }
0x14eb   : > { %v7146_v3 = vadd.f32 %v7130_v53, %v6979_v51  ;;  %v15147_v48 = vpop.f32.mrb[159].mxu0  ;;  %v18058_v51 = vld [vmem:[%s21942_s3 + $0x8] sm:$0xff] }
0x14ed   : > { %v7307_v23 = vadd.f32 %v7291_v21, %v7146_v3 }
0x14ee   : > { %v7135_v41 = vpop.f32.mrb[160].mxu0 }
0x14ef   : > { %v7147_v13 = vadd.f32 %v7135_v41, %v6984_v60  ;;  %v15150_v46 = vpop.f32.mrb[161].mxu0 }
0x14f1   : > { %v20573_v27 = vadd.f32 %v7296_v54, %v7147_v13 }
0x14f2   : > { %v7417_v63 = vpop.f32.mrb[162].mxu0 }
0x14f3   : > { %v7461_v56 = vadd.f32 %v7417_v63, %v7300_v58  ;;  %v15192_v40 = vpop.f32.mrb[163].mxu0 }
0x14f5   : > { %v7470_v44 = vadd.f32 %v18057_v31, %v7461_v56 }
0x14f6   : > { %v7422_v7 = vpop.f32.mrb[164].mxu0 }
0x14f7   : > { %v7462_v34 = vadd.f32 %v7422_v7, %v7301_v25  ;;  %v15195_v49 = vpop.f32.mrb[165].mxu0  ;;  %v7488_v38 = vrot.slane %v7470_v44, 1 }
0x14f9   : > { %v7471_v61 = vadd.f32 %v18058_v51, %v7462_v34 }
0x14fa   : > { %v7427_v60 = vpop.f32.mrb[166].mxu0 }
0x14fb   : > { %v7489_v50 = vrot.slane %v7471_v61, 1  ;;  %v7463_v21 = vadd.f32 %v7427_v60, %v7302_v22  ;;  %v15198_v52 = vpop.f32.mrb[167].mxu0 }
0x14fd   : > { %v7490_v28 = vsel %vm1709_vm6, %v7488_v38, %v7489_v50  ;;  %v7472_v58 = vadd.f32 %v18059_v43, %v7463_v21 }
0x14fe   : > { %v7432_v57 = vpop.f32.mrb[168].mxu0  ;;  %v20585_v54 = vmax.f32 %v7470_v44, %v7490_v28 }
0x14ff   : > { %v7491_v5 = vrot.slane %v7472_v58, 1  ;;  %v7464_v4 = vadd.f32 %v7432_v57, %v7303_v24  ;;  %v15201_v45 = vpop.f32.mrb[169].mxu0  ;;  %v18061_v24 = vld [vmem:[%s21942_s3 + $0x20] sm:$0xff] }
0x1501   : > { %v7492_v25 = vsel %vm1709_vm6, %v7489_v50, %v7491_v5  ;;  %v7473_v29 = vadd.f32 %v18060_v62, %v7464_v4 }
0x1502   : > { %v7437_v2 = vpop.f32.mrb[170].mxu0  ;;  %v7515_v22 = vmax.f32 %v7471_v61, %v7492_v25 }
0x1503   : > { %v7493_v6 = vrot.slane %v7473_v29, 1  ;;  %v7465_v42 = vadd.f32 %v7437_v2, %v7304_v55  ;;  %v15204_v8 = vpop.f32.mrb[171].mxu0  ;;  %v18062_v55 = vld [vmem:[%s21942_s3 + $0x28] sm:$0xff] }
0x1504   : > { %v17675_v9 = vpack.i.bf16 %v7515_v22, %v20585_v54 }
0x1505   : > { %v7494_v16 = vsel %vm1709_vm6, %v7491_v5, %v7493_v6  ;;  %v7474_v15 = vadd.f32 %v18061_v24, %v7465_v42 }
0x1506   : > { %17676 = vrot.lane.b32.xlu0 %v17675_v9, %s18112_s16  ;;  %v7442_v18 = vpop.f32.mrb[172].mxu0  ;;  %v7516_v19 = vmax.f32 %v7472_v58, %v7494_v16 }
0x1507   : > { %v7495_v32 = vrot.slane %v7474_v15, 1  ;;  %v7466_v11 = vadd.f32 %v7442_v18, %v7305_v36  ;;  %v15207_v30 = vpop.f32.mrb[173].mxu0  ;;  %v18063_v36 = vld [vmem:[%s21942_s3 + $0x30] sm:$0xff] }
0x1509   : > { %v7496_v39 = vsel %vm1709_vm6, %v7493_v6, %v7495_v32  ;;  %v7475_v53 = vadd.f32 %v18062_v55, %v7466_v11 }
0x150a   : > { %v7447_v3 = vpop.f32.mrb[174].mxu0  ;;  %v7517_v48 = vmax.f32 %v7473_v29, %v7496_v39 }
0x150b   : > { %v7497_v41 = vrot.slane %v7475_v53, 1  ;;  %v7467_v13 = vadd.f32 %v7447_v3, %v7306_v59  ;;  %v15210_v46 = vpop.f32.mrb[175].mxu0  ;;  %v18064_v59 = vld [vmem:[%s21942_s3 + $0x38] sm:$0xff] }
0x150c   : > { %v17680_v63 = vpack.i.bf16 %v7517_v48, %v7516_v19 }
0x150d   : > { %v7498_v56 = vsel %vm1709_vm6, %v7495_v32, %v7497_v41  ;;  %v7476_v40 = vadd.f32 %v18063_v36, %v7467_v13 }
0x150e   : > { %17681 = vrot.lane.b32.xlu1 %v17680_v63, %s18112_s16  ;;  %v7452_v7 = vpop.f32.mrb[176].mxu0  ;;  %v7518_v31 = vmax.f32 %v7474_v15, %v7498_v56 }
0x150f   : > { %v7499_v44 = vrot.slane %v7476_v40, 1  ;;  %v7468_v34 = vadd.f32 %v7452_v7, %v7307_v23  ;;  %v15213_v49 = vpop.f32.mrb[177].mxu0  ;;  %v18065_v23 = vld [vmem:[%s21942_s3 + $0x40] sm:$0xff] }
0x1511   : > { %v7500_v51 = vsel %vm1709_vm6, %v7497_v41, %v7499_v44  ;;  %v7477_v61 = vadd.f32 %v18064_v59, %v7468_v34  ;;  %v18066_v59 = vld [vmem:[%s21943_s4] sm:$0xff] }
0x1512   : > { %v7457_v60 = vpop.f32.mrb[178].mxu0  ;;  %v7519_v38 = vmax.f32 %v7475_v53, %v7500_v51 }
0x1513   : > { %v7501_v50 = vrot.slane %v7477_v61, 1  ;;  %v7469_v21 = vadd.f32 %v7457_v60, %v20573_v27  ;;  %v15216_v52 = vpop.f32.mrb[179].mxu0  ;;  %v18068_v60 = vld [vmem:[%s21943_s4 + $0x10] sm:$0xff] }
0x1514   : > { %v17685_v28 = vpack.i.bf16 %v7519_v38, %v7518_v31  ;;  %v18072_v52 = vld [vmem:[%s21943_s4 + $0x30] sm:$0xff] }
0x1515   : > { %v7502_v43 = vsel %vm1709_vm6, %v7499_v44, %v7501_v50  ;;  %v7478_v58 = vadd.f32 %v18065_v23, %v7469_v21  ;;  %v18071_v21 = vld [vmem:[%s21943_s4 + $0x28] sm:$0xff] }
0x1516   : > { %17686 = vrot.lane.b32.xlu0 %v17685_v28, %s18112_s16  ;;  %v7520_v57 = vmax.f32 %v7476_v40, %v7502_v43  ;;  %v18073_v28 = vld [vmem:[%s21943_s4 + $0x38] sm:$0xff]  ;;  %v18074_v43 = vld [vmem:[%s21943_s4 + $0x40] sm:$0xff]  ;;  %v18075_v23 = vld [vmem:[%s21943_s4 + $0x48] sm:$0xff] }
0x1517   : > { %v7503_v5 = vrot.slane %v7478_v58, 1 }
0x1519   : > { %v7504_v4 = vsel %vm1709_vm6, %v7501_v50, %v7503_v5  ;;  %v7522_v45 = vmax.f32 %v7478_v58, %v7503_v5  ;;  %v18070_v50 = vld [vmem:[%s21943_s4 + $0x20] sm:$0xff]  ;;  %v18076_v58 = vld [vmem:[%s21943_s4 + $0x50] sm:$0xf] }
0x151a   : > { %v7521_v25 = vmax.f32 %v7477_v61, %v7504_v4  ;;  %v18067_v61 = vld [vmem:[%s21943_s4 + $0x8] sm:$0xff] }
0x151b   : > { %7539 = vrot.lane.b32.xlu0 %v7522_v45, %s18112_s16 }
0x151c   : > { %v17690_v27 = vpack.i.bf16 %v7521_v25, %v7520_v57 }
0x151e   : > { %17691 = vrot.lane.b32.xlu1 %v17690_v27, %s18112_s16 }
0x1578   : > { %v17677_v62 = vpop.permute.xlu0 %17676 }
0x1579   : > { %v17679_v29 = vunpack.i.h.bf16 %v17677_v62  ;;  %v17678_v2 = vunpack.i.l.bf16 %v17677_v62 }
0x157b   : > { %v7542_v6 = vmax.f32 %v7515_v22, %v17679_v29  ;;  %v7541_v42 = vmax.f32 %v20585_v54, %v17678_v2 }
0x157d   : > { %v7551_v8 = vmax.f32 %v7542_v6, 0.0  ;;  %v7550_v9 = vmax.f32 %v7541_v42, 0.0 }
0x157f   : > { %v16584_v16 = vpack.c.bf16 %v7551_v8, %v7550_v9 }
0x1580   : > { %v17682_v24 = vpop.permute.xlu1 %17681 }
0x1581   : > { %v17684_v15 = vunpack.i.h.bf16 %v17682_v24  ;;  %v17683_v18 = vunpack.i.l.bf16 %v17682_v24  ;;  %16585 = vmatpush3.bf16.msra.mxu1 %v16584_v16 }
0x1582   : > { %16586 = vmatprep.subr.bf16.mxu1 %v18109_v0 }
0x1583   : > { %v7544_v32 = vmax.f32 %v7517_v48, %v17684_v15  ;;  %v7543_v11 = vmax.f32 %v7516_v19, %v17683_v18 }
0x1585   : > { %v7553_v30 = vmax.f32 %v7544_v32, 0.0  ;;  %v7552_v39 = vmax.f32 %v7543_v11, 0.0 }
0x1587   : > { %v16587_v55 = vpack.c.bf16 %v7553_v30, %v7552_v39 }
0x1588   : > { %v17687_v53 = vpop.permute.xlu0 %17686 }
0x1589   : > { %v17689_v3 = vunpack.i.h.bf16 %v17687_v53  ;;  %v17688_v41 = vunpack.i.l.bf16 %v17687_v53  ;;  %16588 = vmatpush3.bf16.msra.mxu1 %v16587_v55 }
0x158a   : > { %16589 = vmatprep.subr.bf16.mxu1 %v18109_v0 }
0x158b   : > { %v7546_v54 = vmax.f32 %v7519_v38, %v17689_v3  ;;  %v7545_v22 = vmax.f32 %v7518_v31, %v17688_v41  ;;  %v18069_v38 = vld [vmem:[%s21943_s4 + $0x18] sm:$0xff] }
0x158d   : > { %v7555_v13 = vmax.f32 %v7546_v54, 0.0  ;;  %v7554_v46 = vmax.f32 %v7545_v22, 0.0  ;;  %v7540_v7 = vpop.permute.xlu0 %7539 }
0x158e   : > { %v7549_v49 = vmax.f32 %v7522_v45, %v7540_v7 }
0x158f   : > { %v16590_v63 = vpack.c.bf16 %v7555_v13, %v7554_v46 }
0x1590   : > { %v17692_v56 = vpop.permute.xlu1 %17691  ;;  %v7558_v31 = vmax.f32 %v7549_v49, 0.0 }
0x1591   : > { %v17694_v36 = vunpack.i.h.bf16 %v17692_v56  ;;  %v17693_v40 = vunpack.i.l.bf16 %v17692_v56  ;;  %16591 = vmatpush3.bf16.msra.mxu1 %v16590_v63 }
0x1592   : > { %16592 = vmatprep.subr.bf16.mxu1 %v18109_v0 }
0x1593   : > { %v7548_v19 = vmax.f32 %v7521_v25, %v17694_v36  ;;  %v7547_v48 = vmax.f32 %v7520_v57, %v17693_v40 }
0x1595   : > { %v7557_v44 = vmax.f32 %v7548_v19, 0.0  ;;  %v7556_v34 = vmax.f32 %v7547_v48, 0.0 }
0x1597   : > { %v16593_v51 = vpack.c.bf16 %v7557_v44, %v7556_v34 }
0x1599   : > { %16594 = vmatpush3.bf16.msra.mxu1 %v16593_v51 }
0x159a   : > { %15233 = vmatprep.subr.mxu1 %v18111_v1 }
0x159d   : > { %15234 = vmatpush3.msk.msra.mxu1 %vm1709_vm6, %v7558_v31 }
0x159e   : > { %15236 = vmatmul.mubr.msk.f32.vlgmr.msra.gmra.mrb[220].mxu1 %vm1781_vm7, %v18066_v59  ;;  %16619 = vmatprep.subr.bf16.mxu1 %v18109_v0 }
0x159f   : > { %15238 = vmatprep.mubr.msk.f32.mxu1 %vm18110_vm0, %v18111_v1 }
0x15a2   : > { %15239 = vmatmul.mubr.msk.f32.gmra.mrb[222].mxu1 %vm1781_vm7, %v18067_v61 }
0x15a3   : > { %15241 = vmatprep.mubr.msk.f32.mxu1 %vm18110_vm0, %v18111_v1 }
0x15a6   : > { %15242 = vmatmul.mubr.msk.f32.gmra.mrb[224].mxu1 %vm1781_vm7, %v18068_v60 }
0x15a7   : > { %15244 = vmatprep.mubr.msk.f32.mxu1 %vm18110_vm0, %v18111_v1 }
0x15aa   : > { %15245 = vmatmul.mubr.msk.f32.gmra.mrb[226].mxu1 %vm1781_vm7, %v18069_v38 }
0x15ab   : > { %15247 = vmatprep.mubr.msk.f32.mxu1 %vm18110_vm0, %v18111_v1 }
0x15ae   : > { %15248 = vmatmul.mubr.msk.f32.gmra.mrb[228].mxu1 %vm1781_vm7, %v18070_v50 }
0x15af   : > { %15250 = vmatprep.mubr.msk.f32.mxu1 %vm18110_vm0, %v18111_v1 }
0x15b2   : > { %15251 = vmatmul.mubr.msk.f32.gmra.mrb[230].mxu1 %vm1781_vm7, %v18071_v21 }
0x15b3   : > { %15253 = vmatprep.mubr.msk.f32.mxu1 %vm18110_vm0, %v18111_v1 }
0x15b6   : > { %15254 = vmatmul.mubr.msk.f32.gmra.mrb[232].mxu1 %vm1781_vm7, %v18072_v52 }
0x15b7   : > { %15256 = vmatprep.mubr.msk.f32.mxu1 %vm18110_vm0, %v18111_v1 }
0x15ba   : > { %15257 = vmatmul.mubr.msk.f32.gmra.mrb[234].mxu1 %vm1781_vm7, %v18073_v28 }
0x15bb   : > { %15259 = vmatprep.mubr.msk.f32.mxu1 %vm18110_vm0, %v18111_v1 }
0x15be   : > { %15260 = vmatmul.mubr.msk.f32.gmra.mrb[236].mxu1 %vm1781_vm7, %v18074_v43 }
0x15bf   : > { %15262 = vmatprep.mubr.msk.f32.mxu1 %vm18110_vm0, %v18111_v1 }
0x15c2   : > { %15263 = vmatmul.mubr.msk.f32.gmra.mrb[238].mxu1 %vm1781_vm7, %v18075_v23 }
0x15c3   : > { %15265 = vmatprep.mubr.msk.f32.mxu1 %vm18110_vm0, %v18111_v1 }
0x15c6   : > { %15266 = vmatmul.mubr.msk.f32.gmra.mrb[240].mxu1 %vm1781_vm7, %v18076_v58 }
0x15c7   : > { %15355 = vmatprep.mubr.msk.f32.mxu1 %vm18110_vm0, %v18111_v1 }
0x1671   : > { %v7628_v57 = vpop.f32.mrb[220].mxu1 }
0x1672   : > { %v15237_v5 = vpop.f32.mrb[221].mxu1  ;;  %15301 = vmatmul.mubr.f32.vlgmr.msra.gmra.mrb[180].mxu0 %v7628_v57 }
0x1673   : > { %15303 = vmatprep.mubr.msk.f32.mxu0 %vm18110_vm0, %v18111_v1 }
0x1675   : > { %v7633_v4 = vpop.f32.mrb[222].mxu1 }
0x1676   : > { %v15240_v45 = vpop.f32.mrb[223].mxu1  ;;  %15304 = vmatmul.mubr.f32.gmra.mrb[182].mxu0 %v7633_v4 }
0x1677   : > { %15306 = vmatprep.mubr.msk.f32.mxu0 %vm18110_vm0, %v18111_v1 }
0x1679   : > { %v7638_v25 = vpop.f32.mrb[224].mxu1 }
0x167a   : > { %v15243_v27 = vpop.f32.mrb[225].mxu1  ;;  %15307 = vmatmul.mubr.f32.gmra.mrb[184].mxu0 %v7638_v25 }
0x167b   : > { %15309 = vmatprep.mubr.msk.f32.mxu0 %vm18110_vm0, %v18111_v1 }
0x167d   : > { %v7643_v62 = vpop.f32.mrb[226].mxu1 }
0x167e   : > { %v15246_v29 = vpop.f32.mrb[227].mxu1  ;;  %15310 = vmatmul.mubr.f32.gmra.mrb[186].mxu0 %v7643_v62 }
0x167f   : > { %15312 = vmatprep.mubr.msk.f32.mxu0 %vm18110_vm0, %v18111_v1 }
0x1681   : > { %v7648_v2 = vpop.f32.mrb[228].mxu1 }
0x1682   : > { %v15249_v6 = vpop.f32.mrb[229].mxu1  ;;  %15313 = vmatmul.mubr.f32.gmra.mrb[188].mxu0 %v7648_v2 }
0x1683   : > { %15315 = vmatprep.mubr.msk.f32.mxu0 %vm18110_vm0, %v18111_v1 }
0x1685   : > { %v7653_v42 = vpop.f32.mrb[230].mxu1 }
0x1686   : > { %v15252_v8 = vpop.f32.mrb[231].mxu1  ;;  %15316 = vmatmul.mubr.f32.gmra.mrb[190].mxu0 %v7653_v42 }
0x1687   : > { %15318 = vmatprep.mubr.msk.f32.mxu0 %vm18110_vm0, %v18111_v1 }
0x1689   : > { %v7658_v9 = vpop.f32.mrb[232].mxu1 }
0x168a   : > { %v15255_v16 = vpop.f32.mrb[233].mxu1  ;;  %15319 = vmatmul.mubr.f32.gmra.mrb[192].mxu0 %v7658_v9 }
0x168b   : > { %15321 = vmatprep.mubr.msk.f32.mxu0 %vm18110_vm0, %v18111_v1 }
0x168d   : > { %v7663_v24 = vpop.f32.mrb[234].mxu1 }
0x168e   : > { %v15258_v15 = vpop.f32.mrb[235].mxu1  ;;  %15322 = vmatmul.mubr.f32.gmra.mrb[194].mxu0 %v7663_v24 }
0x168f   : > { %15324 = vmatprep.mubr.msk.f32.mxu0 %vm18110_vm0, %v18111_v1 }
0x1691   : > { %v7668_v18 = vpop.f32.mrb[236].mxu1 }
0x1692   : > { %v15261_v32 = vpop.f32.mrb[237].mxu1  ;;  %15325 = vmatmul.mubr.f32.gmra.mrb[196].mxu0 %v7668_v18 }
0x1693   : > { %15327 = vmatprep.mubr.msk.f32.mxu0 %vm18110_vm0, %v18111_v1 }
0x1695   : > { %v7673_v11 = vpop.f32.mrb[238].mxu1 }
0x1696   : > { %v15264_v30 = vpop.f32.mrb[239].mxu1  ;;  %15328 = vmatmul.mubr.f32.gmra.mrb[198].mxu0 %v7673_v11 }
0x1697   : > { %15330 = vmatprep.mubr.msk.f32.mxu0 %vm18110_vm0, %v18111_v1 }
0x1699   : > { %v7678_v39 = vpop.f32.mrb[240].mxu1 }
0x169a   : > { %15331 = vmatmul.mubr.f32.gmra.mrb[200].mxu0 %v7678_v39  ;;  %v15267_v55 = vpop.f32.mrb[241].mxu1 }
0x1745   : > { %v20712_v53 = vpop.f32.mrb[180].mxu0 }
0x1746   : > { %v15302_v3 = vpop.f32.mrb[181].mxu0 }
0x1747   : > { %v12492_v3 = vld [vmem:[%s21945_s6 + $0x18] sm:$0xff] }
0x1749   : > { %v20714_v41 = vpop.f32.mrb[182].mxu0 }
0x174a   : > { %v15305_v54 = vpop.f32.mrb[183].mxu0  ;;  %v17695_v22 = vpack.i.bf16 %v20714_v41, %v20712_v53  ;;  %v16635_v13 = vpack.c.bf16 %v20714_v41, %v20712_v53  ;;  %v12494_v53 = vld [vmem:[%s21945_s6 + $0x28] sm:$0xff] }
0x174c   : > { %17696 = vrot.lane.b32.xlu1 %v17695_v22, %s18112_s16 }
0x174d   : > { %v20721_v46 = vpop.f32.mrb[184].mxu0 }
0x174e   : > { %v15308_v63 = vpop.f32.mrb[185].mxu0 }
0x1751   : > { %v20723_v56 = vpop.f32.mrb[186].mxu0 }
0x1752   : > { %v15311_v36 = vpop.f32.mrb[187].mxu0  ;;  %v17700_v40 = vpack.i.bf16 %v20723_v56, %v20721_v46  ;;  %v16638_v19 = vpack.c.bf16 %v20723_v56, %v20721_v46  ;;  %v7802_v56 = vld [vmem:[%s21945_s6] sm:$0xff] }
0x1754   : > { %17701 = vrot.lane.b32.xlu0 %v17700_v40, %s18112_s16 }
0x1755   : > { %v20730_v48 = vpop.f32.mrb[188].mxu0 }
0x1756   : > { %v15314_v7 = vpop.f32.mrb[189].mxu0 }
0x1757   : > { %v7803_v7 = vld [vmem:[%s21945_s6 + $0x8] sm:$0xff] }
0x1759   : > { %v20732_v44 = vpop.f32.mrb[190].mxu0 }
0x175a   : > { %v15317_v34 = vpop.f32.mrb[191].mxu0  ;;  %v17705_v49 = vpack.i.bf16 %v20732_v44, %v20730_v48  ;;  %v16641_v51 = vpack.c.bf16 %v20732_v44, %v20730_v48 }
0x175c   : > { %17706 = vrot.lane.b32.xlu1 %v17705_v49, %s18112_s16 }
0x175d   : > { %v20739_v31 = vpop.f32.mrb[192].mxu0 }
0x175e   : > { %v15320_v59 = vpop.f32.mrb[193].mxu0 }
0x1761   : > { %v20741_v61 = vpop.f32.mrb[194].mxu0 }
0x1762   : > { %v15323_v60 = vpop.f32.mrb[195].mxu0  ;;  %v17710_v38 = vpack.i.bf16 %v20741_v61, %v20739_v31  ;;  %v16644_v50 = vpack.c.bf16 %v20741_v61, %v20739_v31  ;;  %v7804_v31 = vld [vmem:[%s21945_s6 + $0x10] sm:$0xff] }
0x1764   : > { %17711 = vrot.lane.b32.xlu0 %v17710_v38, %s18112_s16 }
0x1765   : > { %v20748_v21 = vpop.f32.mrb[196].mxu0 }
0x1766   : > { %v15326_v52 = vpop.f32.mrb[197].mxu0 }
0x1769   : > { %v20750_v28 = vpop.f32.mrb[198].mxu0 }
0x176a   : > { %v15329_v43 = vpop.f32.mrb[199].mxu0  ;;  %v17715_v23 = vpack.i.bf16 %v20750_v28, %v20748_v21  ;;  %v16647_v58 = vpack.c.bf16 %v20750_v28, %v20748_v21 }
0x176c   : > { %17716 = vrot.lane.b32.xlu1 %v17715_v23, %s18112_s16 }
0x176d   : > { %v20757_v57 = vpop.f32.mrb[200].mxu0 }
0x176e   : > { %7828 = vrot.lane.b32.xlu0 %v20757_v57, %s18112_s16  ;;  %v15332_v5 = vpop.f32.mrb[201].mxu0 }
0x1770   : > { %17721 = vrot.lane.b32.xlu1 %v17695_v22, %s18113_s17 }
0x1772   : > { %17726 = vrot.lane.b32.xlu0 %v17700_v40, %s18113_s17 }
0x1774   : > { %17731 = vrot.lane.b32.xlu1 %v17705_v49, %s18113_s17 }
0x1776   : > { %17736 = vrot.lane.b32.xlu0 %v17710_v38, %s18113_s17 }
0x1778   : > { %17741 = vrot.lane.b32.xlu1 %v17715_v23, %s18113_s17 }
0x177a   : > { %8037 = vrot.lane.b32.xlu0 %v20757_v57, %s18113_s17 }
0x177c   : > { %17746 = vrot.lane.b32.xlu1 %v17695_v22, %s18114_s18 }
0x177e   : > { %17751 = vrot.lane.b32.xlu0 %v17700_v40, %s18114_s18 }
0x1780   : > { %17756 = vrot.lane.b32.xlu1 %v17705_v49, %s18114_s18 }
0x1782   : > { %17761 = vrot.lane.b32.xlu0 %v17710_v38, %s18114_s18 }
0x1784   : > { %17766 = vrot.lane.b32.xlu1 %v17715_v23, %s18114_s18 }
0x1786   : > { %8157 = vrot.lane.b32.xlu0 %v20757_v57, %s18114_s18 }
0x1788   : > { %17771 = vrot.lane.b32.xlu1 %v17695_v22, %s18115_s19  ;;  %v12493_v22 = vld [vmem:[%s21945_s6 + $0x20] sm:$0xff] }
0x178a   : > { %17776 = vrot.lane.b32.xlu0 %v17700_v40, %s18115_s19 }
0x178c   : > { %17781 = vrot.lane.b32.xlu1 %v17705_v49, %s18115_s19 }
0x178e   : > { %17786 = vrot.lane.b32.xlu0 %v17710_v38, %s18115_s19 }
0x1790   : > { %17791 = vrot.lane.b32.xlu1 %v17715_v23, %s18115_s19 }
0x1792   : > { %8277 = vrot.lane.b32.xlu0 %v20757_v57, %s18115_s19 }
0x17be   : > { %v17697_v4 = vpop.permute.xlu1 %17696 }
0x17bf   : > { %v17699_v45 = vunpack.i.h.bf16 %v17697_v4  ;;  %v17698_v25 = vunpack.i.l.bf16 %v17697_v4  ;;  %v12503_v4 = vld [vmem:[%s21945_s6 + $0x30] sm:$0xff] }
0x17c1   : > { %v16620_v27 = vpack.c.bf16 %v17699_v45, %v17698_v25 }
0x17c3   : > { %16621 = vmatpush3.bf16.msra.mxu1 %v16620_v27 }
0x17c4   : > { %16622 = vmatprep.subr.bf16.mxu1 %v18109_v0 }
0x17c6   : > { %v17702_v62 = vpop.permute.xlu0 %17701 }
0x17c7   : > { %v17704_v29 = vunpack.i.h.bf16 %v17702_v62  ;;  %v17703_v2 = vunpack.i.l.bf16 %v17702_v62 }
0x17c9   : > { %v16623_v6 = vpack.c.bf16 %v17704_v29, %v17703_v2  ;;  %v12504_v29 = vld [vmem:[%s21945_s6 + $0x38] sm:$0xff] }
0x17cb   : > { %16624 = vmatpush3.bf16.msra.mxu1 %v16623_v6 }
0x17cc   : > { %16625 = vmatprep.subr.bf16.mxu1 %v18109_v0 }
0x17ce   : > { %v17707_v42 = vpop.permute.xlu1 %17706 }
0x17cf   : > { %v17709_v8 = vunpack.i.h.bf16 %v17707_v42  ;;  %v17708_v9 = vunpack.i.l.bf16 %v17707_v42 }
0x17d1   : > { %v16626_v16 = vpack.c.bf16 %v17709_v8, %v17708_v9  ;;  %v12505_v9 = vld [vmem:[%s21945_s6 + $0x40] sm:$0xff] }
0x17d3   : > { %16627 = vmatpush3.bf16.msra.mxu1 %v16626_v16 }
0x17d4   : > { %16628 = vmatprep.subr.bf16.mxu1 %v18109_v0 }
0x17d6   : > { %v17712_v24 = vpop.permute.xlu0 %17711 }
0x17d7   : > { %v17714_v15 = vunpack.i.h.bf16 %v17712_v24  ;;  %v17713_v18 = vunpack.i.l.bf16 %v17712_v24 }
0x17d9   : > { %v16629_v32 = vpack.c.bf16 %v17714_v15, %v17713_v18 }
0x17db   : > { %16630 = vmatpush3.bf16.msra.mxu1 %v16629_v32 }
0x17dc   : > { %16631 = vmatprep.subr.bf16.mxu1 %v18109_v0 }
0x17de   : > { %v17717_v11 = vpop.permute.xlu1 %17716 }
0x17df   : > { %v17719_v30 = vunpack.i.h.bf16 %v17717_v11  ;;  %v17718_v39 = vunpack.i.l.bf16 %v17717_v11 }
0x17e0   : > { %v7829_v54 = vpop.permute.xlu0 %7828 }
0x17e1   : > { %v16632_v55 = vpack.c.bf16 %v17719_v30, %v17718_v39 }
0x17e2   : > { %v17722_v41 = vpop.permute.xlu1 %17721 }
0x17e3   : > { %16633 = vmatpush3.bf16.msra.mxu1 %v16632_v55  ;;  %v17723_v46 = vunpack.i.l.bf16 %v17722_v41 }
0x17e4   : > { %15353 = vmatprep.subr.mxu1 %v18111_v1  ;;  %v17727_v63 = vpop.permute.xlu0 %17726 }
0x17e5   : > { %v17729_v40 = vunpack.i.h.bf16 %v17727_v63 }
0x17e6   : > { %v17732_v48 = vpop.permute.xlu1 %17731 }
0x17e7   : > { %15354 = vmatpush3.msk.msra.mxu1 %vm408_vm1, %v7829_v54  ;;  %v17734_v34 = vunpack.i.h.bf16 %v17732_v48  ;;  %v17733_v49 = vunpack.i.l.bf16 %v17732_v48 }
0x17e8   : > { %16634 = vmatprep.subr.bf16.mxu1 %v18109_v0  ;;  %15356 = vmatmul.mubr.msk.f32.vlgmr.msra.gmra.mrb[242].mxu1 %vm2087_vm8, %v12492_v3 }
0x17e9   : > { %16636 = vmatpush3.bf16.msra.mxu1 %v16635_v13  ;;  %15358 = vmatprep.mubr.msk.f32.mxu1 %vm18110_vm0, %v18111_v1  ;;  %v17724_v13 = vunpack.i.h.bf16 %v17722_v41  ;;  %v16656_v59 = vpack.c.bf16 %v17734_v34, %v17733_v49  ;;  %v12510_v41 = vld [vmem:[%s21945_s6 + $0x48] sm:$0xff] }
0x17ea   : > { %16637 = vmatprep.subr.bf16.mxu1 %v18109_v0  ;;  %v17742_v38 = vpop.permute.xlu1 %17741 }
0x17eb   : > { %v16650_v36 = vpack.c.bf16 %v17724_v13, %v17723_v46  ;;  %v17744_v21 = vunpack.i.h.bf16 %v17742_v38  ;;  %v17743_v52 = vunpack.i.l.bf16 %v17742_v38 }
0x17ec   : > { %15359 = vmatmul.mubr.msk.f32.gmra.mrb[244].mxu1 %vm2087_vm8, %v12493_v22 }
0x17ed   : > { %16639 = vmatpush3.bf16.msra.mxu1 %v16638_v19  ;;  %15361 = vmatprep.mubr.msk.f32.mxu1 %vm18110_vm0, %v18111_v1  ;;  %v17728_v19 = vunpack.i.l.bf16 %v17727_v63  ;;  %v16662_v23 = vpack.c.bf16 %v17744_v21, %v17743_v52  ;;  %v12518_v52 = vld [vmem:[%s21945_s6 + $0x68] sm:$0xff] }
0x17ee   : > { %16640 = vmatprep.subr.bf16.mxu1 %v18109_v0  ;;  %v17747_v43 = vpop.permute.xlu1 %17746 }
0x17ef   : > { %v16653_v44 = vpack.c.bf16 %v17729_v40, %v17728_v19 }
0x17f0   : > { %15362 = vmatmul.mubr.msk.f32.gmra.mrb[246].mxu1 %vm2087_vm8, %v12494_v53 }
0x17f1   : > { %16642 = vmatpush3.bf16.msra.mxu1 %v16641_v51  ;;  %15386 = vmatprep.mubr.msk.f32.mxu1 %vm18110_vm0, %v18111_v1  ;;  %v17737_v51 = vpop.permute.xlu0 %17736 }
0x17f2   : > { %16643 = vmatprep.subr.bf16.mxu1 %v18109_v0  ;;  %v17739_v61 = vunpack.i.h.bf16 %v17737_v51  ;;  %v17738_v60 = vunpack.i.l.bf16 %v17737_v51  ;;  %v17757_v62 = vpop.permute.xlu1 %17756 }
0x17f3   : > { %v17759_v6 = vunpack.i.h.bf16 %v17757_v62  ;;  %v17758_v42 = vunpack.i.l.bf16 %v17757_v62 }
0x17f5   : > { %16645 = vmatpush3.bf16.msra.mxu1 %v16644_v50  ;;  %v16659_v50 = vpack.c.bf16 %v17739_v61, %v17738_v60  ;;  %v8038_v28 = vpop.permute.xlu0 %8037  ;;  %v16671_v16 = vpack.c.bf16 %v17759_v6, %v17758_v42 }
0x17f6   : > { %16646 = vmatprep.subr.bf16.mxu1 %v18109_v0  ;;  %v17767_v18 = vpop.permute.xlu1 %17766 }
0x17f7   : > { %v17769_v11 = vunpack.i.h.bf16 %v17767_v18  ;;  %v17768_v30 = vunpack.i.l.bf16 %v17767_v18 }
0x17f9   : > { %16648 = vmatpush3.bf16.msra.mxu1 %v16647_v58  ;;  %v17749_v58 = vunpack.i.h.bf16 %v17747_v43  ;;  %v17752_v5 = vpop.permute.xlu0 %17751  ;;  %v16677_v3 = vpack.c.bf16 %v17769_v11, %v17768_v30  ;;  %v12525_v11 = vld [vmem:[%s21946_s7 + $0x28] sm:$0xff] }
0x17fa   : > { %15384 = vmatprep.subr.mxu1 %v18111_v1  ;;  %v17754_v25 = vunpack.i.h.bf16 %v17752_v5  ;;  %v17753_v27 = vunpack.i.l.bf16 %v17752_v5  ;;  %v17772_v55 = vpop.permute.xlu1 %17771 }
0x17fb   : > { %v17774_v54 = vunpack.i.h.bf16 %v17772_v55  ;;  %v17773_v22 = vunpack.i.l.bf16 %v17772_v55 }
0x17fc   : > { %v16668_v2 = vpack.c.bf16 %v17754_v25, %v17753_v27 }
0x17fd   : > { %15385 = vmatpush3.msk.msra.mxu1 %vm408_vm1, %v20757_v57  ;;  %v17748_v57 = vunpack.i.l.bf16 %v17747_v43  ;;  %v17762_v8 = vpop.permute.xlu0 %17761  ;;  %v16680_v13 = vpack.c.bf16 %v17774_v54, %v17773_v22  ;;  %v12527_v22 = vld [vmem:[%s21946_s7 + $0x38] sm:$0xf] }
0x17fe   : > { %16649 = vmatprep.subr.bf16.mxu1 %v18109_v0  ;;  %15387 = vmatmul.mubr.msk.f32.vlgmr.msra.gmra.mrb[242].mxu1 %vm2087_vm8, %v7802_v56  ;;  %v17764_v24 = vunpack.i.h.bf16 %v17762_v8  ;;  %v17763_v15 = vunpack.i.l.bf16 %v17762_v8  ;;  %v17782_v56 = vpop.permute.xlu1 %17781 }
0x17ff   : > { %16651 = vmatpush3.bf16.msra.mxu1 %v16650_v36  ;;  %15389 = vmatprep.mubr.msk.f32.mxu1 %vm18110_vm0, %v18111_v1  ;;  %v16665_v45 = vpack.c.bf16 %v17749_v58, %v17748_v57  ;;  %v12511_v36 = vld [vmem:[%s21945_s6 + $0x50] sm:$0xff]  ;;  %v17784_v19 = vunpack.i.h.bf16 %v17782_v56  ;;  %v17783_v48 = vunpack.i.l.bf16 %v17782_v56 }
0x1800   : > { %16652 = vmatprep.subr.bf16.mxu1 %v18109_v0  ;;  %v16674_v32 = vpack.c.bf16 %v17764_v24, %v17763_v15 }
0x1801   : > { %v8158_v39 = vpop.permute.xlu0 %8157  ;;  %v16686_v34 = vpack.c.bf16 %v17784_v19, %v17783_v48  ;;  %v8380_v19 = vld [vmem:[%s21946_s7 + $0x18] sm:$0xf]  ;;  %v12536_v48 = vld [vmem:[%s21946_s7 + $0x40] sm:$0xff] }
0x1802   : > { %15390 = vmatmul.mubr.msk.f32.gmra.mrb[244].mxu1 %vm2087_vm8, %v7803_v7 }
0x1803   : > { %16654 = vmatpush3.bf16.msra.mxu1 %v16653_v44  ;;  %15392 = vmatprep.mubr.msk.f32.mxu1 %vm18110_vm0, %v18111_v1  ;;  %v12512_v44 = vld [vmem:[%s21945_s6 + $0x58] sm:$0xff] }
0x1804   : > { %16655 = vmatprep.subr.bf16.mxu1 %v18109_v0 }
0x1805   : > { %v17777_v53 = vpop.permute.xlu0 %17776 }
0x1806   : > { %15393 = vmatmul.mubr.msk.f32.gmra.mrb[246].mxu1 %vm2087_vm8, %v7804_v31  ;;  %v17779_v46 = vunpack.i.h.bf16 %v17777_v53  ;;  %v17778_v63 = vunpack.i.l.bf16 %v17777_v53  ;;  %v17792_v31 = vpop.permute.xlu1 %17791  ;;  %v8377_v53 = vld [vmem:[%s21946_s7] sm:$0xff] }
0x1807   : > { %16657 = vmatpush3.bf16.msra.mxu1 %v16656_v59  ;;  %15417 = vmatprep.mubr.msk.f32.mxu1 %vm18110_vm0, %v18111_v1  ;;  %v17794_v61 = vunpack.i.h.bf16 %v17792_v31  ;;  %v17793_v60 = vunpack.i.l.bf16 %v17792_v31  ;;  %v12544_v31 = vld [vmem:[%s21946_s7 + $0x60] sm:$0xff] }
0x1808   : > { %16658 = vmatprep.subr.bf16.mxu1 %v18109_v0  ;;  %v16683_v40 = vpack.c.bf16 %v17779_v46, %v17778_v63  ;;  %v8378_v46 = vld [vmem:[%s21946_s7 + $0x8] sm:$0xff]  ;;  %v8379_v63 = vld [vmem:[%s21946_s7 + $0x10] sm:$0xff] }
0x1809   : > { %v17787_v7 = vpop.permute.xlu0 %17786  ;;  %v16692_v38 = vpack.c.bf16 %v17794_v61, %v17793_v60  ;;  %v12546_v61 = vld [vmem:[%s21946_s7 + $0x70] sm:$0xff]  ;;  %v12547_v60 = vld [vmem:[%s21946_s7 + $0x78] sm:$0xf] }
0x180a   : > { %v17789_v49 = vunpack.i.h.bf16 %v17787_v7  ;;  %v17788_v51 = vunpack.i.l.bf16 %v17787_v7 }
0x180b   : > { %16660 = vmatpush3.bf16.msra.mxu1 %v16659_v50  ;;  %v12517_v50 = vld [vmem:[%s21945_s6 + $0x60] sm:$0xff] }
0x180c   : > { %16661 = vmatprep.subr.bf16.mxu1 %v18109_v0  ;;  %v16689_v59 = vpack.c.bf16 %v17789_v49, %v17788_v51  ;;  %v12539_v51 = vld [vmem:[%s21946_s7 + $0x58] sm:$0xf] }
0x180d   : > { %v8278_v21 = vpop.permute.xlu0 %8277 }
0x180f   : > { %16663 = vmatpush3.bf16.msra.mxu1 %v16662_v23 }
0x1810   : > { %15415 = vmatprep.subr.mxu1 %v18111_v1 }
0x1813   : > { %15416 = vmatpush3.msk.msra.mxu1 %vm408_vm1, %v8038_v28  ;;  %v12519_v28 = vld [vmem:[%s21945_s6 + $0x70] sm:$0xff] }
0x1814   : > { %16664 = vmatprep.subr.bf16.mxu1 %v18109_v0  ;;  %15418 = vmatmul.mubr.msk.f32.vlgmr.msra.gmra.mrb[242].mxu1 %vm2087_vm8, %v12503_v4 }
0x1815   : > { %16666 = vmatpush3.bf16.msra.mxu1 %v16665_v45  ;;  %15420 = vmatprep.mubr.msk.f32.mxu1 %vm18110_vm0, %v18111_v1  ;;  %v12524_v45 = vld [vmem:[%s21946_s7 + $0x20] sm:$0xff] }
0x1816   : > { %16667 = vmatprep.subr.bf16.mxu1 %v18109_v0  ;;  %15494 = vmatprep.mubr.msk.f32.mxu0 %vm930_vm5, %v12524_v45 }
0x1818   : > { %15421 = vmatmul.mubr.msk.f32.gmra.mrb[244].mxu1 %vm2087_vm8, %v12504_v29 }
0x1819   : > { %16669 = vmatpush3.bf16.msra.mxu1 %v16668_v2  ;;  %15423 = vmatprep.mubr.msk.f32.mxu1 %vm18110_vm0, %v18111_v1 }
0x181a   : > { %16670 = vmatprep.subr.bf16.mxu1 %v18109_v0 }
0x181c   : > { %15424 = vmatmul.mubr.msk.f32.gmra.mrb[246].mxu1 %vm2087_vm8, %v12505_v9 }
0x181d   : > { %16672 = vmatpush3.bf16.msra.mxu1 %v16671_v16  ;;  %15448 = vmatprep.mubr.msk.f32.mxu1 %vm18110_vm0, %v18111_v1 }
0x181e   : > { %16673 = vmatprep.subr.bf16.mxu1 %v18109_v0 }
0x1821   : > { %16675 = vmatpush3.bf16.msra.mxu1 %v16674_v32 }
0x1822   : > { %16676 = vmatprep.subr.bf16.mxu1 %v18109_v0 }
0x1825   : > { %16678 = vmatpush3.bf16.msra.mxu1 %v16677_v3 }
0x1826   : > { %15446 = vmatprep.subr.mxu1 %v18111_v1 }
0x1829   : > { %15447 = vmatpush3.msk.msra.mxu1 %vm408_vm1, %v8158_v39  ;;  %v12526_v39 = vld [vmem:[%s21946_s7 + $0x30] sm:$0xff] }
0x182a   : > { %16679 = vmatprep.subr.bf16.mxu1 %v18109_v0  ;;  %15449 = vmatmul.mubr.msk.f32.vlgmr.msra.gmra.mrb[242].mxu1 %vm2087_vm8, %v12510_v41 }
0x182b   : > { %16681 = vmatpush3.bf16.msra.mxu1 %v16680_v13  ;;  %15451 = vmatprep.mubr.msk.f32.mxu1 %vm18110_vm0, %v18111_v1 }
0x182c   : > { %16682 = vmatprep.subr.bf16.mxu1 %v18109_v0 }
0x182e   : > { %15452 = vmatmul.mubr.msk.f32.gmra.mrb[244].mxu1 %vm2087_vm8, %v12511_v36 }
0x182f   : > { %16684 = vmatpush3.bf16.msra.mxu1 %v16683_v40  ;;  %15454 = vmatprep.mubr.msk.f32.mxu1 %vm18110_vm0, %v18111_v1 }
0x1830   : > { %16685 = vmatprep.subr.bf16.mxu1 %v18109_v0 }
0x1832   : > { %15455 = vmatmul.mubr.msk.f32.gmra.mrb[246].mxu1 %vm2087_vm8, %v12512_v44  ;;  %v12537_v44 = vld [vmem:[%s21946_s7 + $0x48] sm:$0xff] }
0x1833   : > { %16687 = vmatpush3.bf16.msra.mxu1 %v16686_v34  ;;  %15479 = vmatprep.mubr.msk.f32.mxu1 %vm18110_vm0, %v18111_v1  ;;  %v12538_v34 = vld [vmem:[%s21946_s7 + $0x50] sm:$0xff] }
0x1834   : > { %16688 = vmatprep.subr.bf16.mxu1 %v18109_v0 }
0x1837   : > { %16690 = vmatpush3.bf16.msra.mxu1 %v16689_v59  ;;  %v12545_v59 = vld [vmem:[%s21946_s7 + $0x68] sm:$0xff] }
0x1838   : > { %16691 = vmatprep.subr.bf16.mxu1 %v18109_v0 }
0x183b   : > { %16693 = vmatpush3.bf16.msra.mxu1 %v16692_v38  ;;  %v12552_v38 = vld [vmem:[%s21946_s7 + $0x80] sm:$0xff] }
0x183c   : > { %15477 = vmatprep.subr.mxu1 %v18111_v1 }
0x183f   : > { %15478 = vmatpush3.msk.msra.mxu1 %vm408_vm1, %v8278_v21  ;;  %v12554_v21 = vld [vmem:[%s21946_s7 + $0x90] sm:$0xff] }
0x1840   : > { %15480 = vmatmul.mubr.msk.f32.vlgmr.msra.gmra.mrb[242].mxu1 %vm2087_vm8, %v12517_v50  ;;  %16759 = vmatprep.subr.bf16.mxu1 %v18109_v0  ;;  %v12553_v50 = vld [vmem:[%s21946_s7 + $0x88] sm:$0xff] }
0x1841   : > { %15482 = vmatprep.mubr.msk.f32.mxu1 %vm18110_vm0, %v18111_v1 }
0x1844   : > { %15483 = vmatmul.mubr.msk.f32.gmra.mrb[244].mxu1 %vm2087_vm8, %v12518_v52  ;;  %v12555_v52 = vld [vmem:[%s21946_s7 + $0x98] sm:$0xf] }
0x1845   : > { %15485 = vmatprep.mubr.msk.f32.mxu1 %vm18110_vm0, %v18111_v1 }
0x1848   : > { %15486 = vmatmul.mubr.msk.f32.gmra.mrb[246].mxu1 %vm2087_vm8, %v12519_v28  ;;  %v18077_v28 = vld [vmem:[%s21947_s8] sm:$0xff] }
0x1849   : > { %15650 = vmatprep.mubr.msk.f32.mxu1 %vm18110_vm0, %v18111_v1 }
0x1913   : > { %v8357_v43 = vpop.f32.mrb[242].mxu1 }
0x1914   : > { %v15481_v23 = vpop.f32.mrb[243].mxu1  ;;  %v8374_v57 = vmax.f32 %v8357_v43, 0.0 }
0x1917   : > { %v8362_v58 = vpop.f32.mrb[244].mxu1 }
0x1918   : > { %v8375_v5 = vmax.f32 %v8362_v58, 0.0  ;;  %v15484_v4 = vpop.f32.mrb[245].mxu1 }
0x191a   : > { %v17795_v25 = vpack.i.bf16 %v8375_v5, %v8374_v57  ;;  %v20927_v62 = vpack.c.bf16 %v8375_v5, %v8374_v57 }
0x191b   : > { %v8367_v27 = vpop.f32.mrb[246].mxu1 }
0x191c   : > { %v20929_v29 = vmax.f32 %v8367_v27, 0.0  ;;  %17796 = vrot.lane.b32.xlu1 %v17795_v25, %s18117_s20  ;;  %v15487_v2 = vpop.f32.mrb[247].mxu1 }
0x191e   : > { %8395 = vrot.lane.b32.xlu0 %v20929_v29, %s18117_s20 }
0x1920   : > { %17801 = vrot.lane.b32.xlu1 %v17795_v25, %s18118_s21 }
0x1922   : > { %8385 = vrot.lane.b32.xlu0 %v20929_v29, %s18118_s21 }
0x1924   : > { %17806 = vrot.lane.b32.xlu1 %v17795_v25, %s18119_s22 }
0x1926   : > { %8599 = vrot.lane.b32.xlu0 %v20929_v29, %s18119_s22 }
0x1928   : > { %17811 = vrot.lane.b32.xlu1 %v17795_v25, %s18120_s23 }
0x192a   : > { %8710 = vrot.lane.b32.xlu0 %v20929_v29, %s18120_s23 }
0x198e   : > { %v17797_v6 = vpop.permute.xlu1 %17796 }
0x198f   : > { %v17799_v42 = vunpack.i.h.bf16 %v17797_v6  ;;  %v17798_v8 = vunpack.i.l.bf16 %v17797_v6 }
0x1990   : > { %v8396_v18 = vpop.permute.xlu0 %8395 }
0x1991   : > { %v16694_v9 = vpack.c.bf16 %v17799_v42, %v17798_v8 }
0x1992   : > { %v17802_v16 = vpop.permute.xlu1 %17801 }
0x1993   : > { %v17804_v24 = vunpack.i.h.bf16 %v17802_v16  ;;  %v17803_v15 = vunpack.i.l.bf16 %v17802_v16  ;;  %16695 = vmatprep.subr.bf16.mxu0 %v16694_v9  ;;  %v12566_v16 = vld [vmem:[%s18187_s15 + $0x68] sm:$0xff] }
0x1994   : > { %16697 = vmatpush3.bf16.msra.mxu0 %v16694_v9  ;;  %v8386_v54 = vpop.permute.xlu0 %8385  ;;  %v12565_v9 = vld [vmem:[%s18187_s15 + $0x60] sm:$0xff] }
0x1995   : > { %15492 = vmatprep.subr.mxu0 %v8396_v18  ;;  %v16698_v30 = vpack.c.bf16 %v17804_v24, %v17803_v15  ;;  %v12567_v24 = vld [vmem:[%s18187_s15 + $0x70] sm:$0xff]  ;;  %v12568_v15 = vld [vmem:[%s18187_s15 + $0x78] sm:$0xf] }
0x1996   : > { %v17807_v32 = vpop.permute.xlu1 %17806 }
0x1997   : > { %v17809_v55 = vunpack.i.h.bf16 %v17807_v32  ;;  %v17808_v3 = vunpack.i.l.bf16 %v17807_v32 }
0x1998   : > { %15493 = vmatpush3.msra.mxu0 %v8396_v18  ;;  %v8600_v40 = vpop.permute.xlu0 %8599 }
0x1999   : > { %15495 = vmatmul.mubr.msk.f32.vlgmr.msra.gmra.mrb[202].mxu0 %vm930_vm5, %v12525_v11  ;;  %16699 = vmatprep.subr.bf16.mxu0 %v16698_v30  ;;  %v16702_v41 = vpack.c.bf16 %v17809_v55, %v17808_v3  ;;  %v17825_v11 = vpack.i.bf16 %v12566_v16, %v12565_v9 }
0x199a   : > { %16701 = vmatpush3.bf16.msra.mxu0 %v16698_v30  ;;  %15497 = vmatprep.mubr.msk.f32.mxu0 %vm930_vm5, %v12526_v39  ;;  %v17812_v13 = vpop.permute.xlu1 %17811  ;;  %v17830_v30 = vpack.i.bf16 %v12568_v15, %v12567_v24 }
0x199b   : > { %15504 = vmatprep.subr.mxu0 %v8386_v54  ;;  %v17814_v56 = vunpack.i.h.bf16 %v17812_v13  ;;  %v17813_v36 = vunpack.i.l.bf16 %v17812_v13 }
0x199c   : > { %v8711_v49 = vpop.permute.xlu0 %8710 }
0x199d   : > { %15498 = vmatmul.mubr.msk.f32.gmra.mrb[204].mxu0 %vm930_vm5, %v12527_v22  ;;  %v16706_v7 = vpack.c.bf16 %v17814_v56, %v17813_v36 }
0x199e   : > { %15505 = vmatpush3.msra.mxu0 %v8386_v54  ;;  %15506 = vmatprep.mubr.msk.f32.mxu0 %vm930_vm5, %v8377_v53 }
0x199f   : > { %16703 = vmatprep.subr.bf16.mxu0 %v16702_v41 }
0x19a1   : > { %15507 = vmatmul.mubr.msk.f32.vlgmr.msra.gmra.mrb[202].mxu0 %vm930_vm5, %v8378_v46 }
0x19a2   : > { %16705 = vmatpush3.bf16.msra.mxu0 %v16702_v41  ;;  %15509 = vmatprep.mubr.msk.f32.mxu0 %vm930_vm5, %v8379_v63 }
0x19a3   : > { %15516 = vmatprep.subr.mxu0 %v8600_v40 }
0x19a5   : > { %15510 = vmatmul.mubr.msk.f32.gmra.mrb[204].mxu0 %vm930_vm5, %v8380_v19 }
0x19a6   : > { %15517 = vmatpush3.msra.mxu0 %v8600_v40  ;;  %15518 = vmatprep.mubr.msk.f32.mxu0 %vm930_vm5, %v12536_v48 }
0x19a7   : > { %16707 = vmatprep.subr.bf16.mxu0 %v16706_v7 }
0x19a9   : > { %15519 = vmatmul.mubr.msk.f32.vlgmr.msra.gmra.mrb[202].mxu0 %vm930_vm5, %v12537_v44 }
0x19aa   : > { %16709 = vmatpush3.bf16.msra.mxu0 %v16706_v7  ;;  %15521 = vmatprep.mubr.msk.f32.mxu0 %vm930_vm5, %v12538_v34 }
0x19ab   : > { %15528 = vmatprep.subr.mxu0 %v8711_v49 }
0x19ad   : > { %15522 = vmatmul.mubr.msk.f32.gmra.mrb[204].mxu0 %vm930_vm5, %v12539_v51  ;;  %v18078_v51 = vld [vmem:[%s21947_s8 + $0x8] sm:$0x3f] }
0x19ae   : > { %15529 = vmatpush3.msra.mxu0 %v8711_v49  ;;  %15530 = vmatprep.mubr.msk.f32.mxu0 %vm930_vm5, %v12544_v31 }
0x19af   : > { %16711 = vmatprep.subr.bf16.mxu0 %v20927_v62 }
0x19b1   : > { %15531 = vmatmul.mubr.msk.f32.vlgmr.msra.gmra.mrb[202].mxu0 %vm930_vm5, %v12545_v59  ;;  %v12569_v59 = vld [vmem:[%s21940_s1 + $0x18] sm:$0xff] }
0x19b2   : > { %16713 = vmatpush3.bf16.msra.mxu0 %v20927_v62  ;;  %15533 = vmatprep.mubr.msk.f32.mxu0 %vm930_vm5, %v12546_v61  ;;  %v16732_v61 = vpack.c.bf16 %v12566_v16, %v12565_v9 }
0x19b3   : > { %15540 = vmatprep.subr.mxu0 %v20929_v29 }
0x19b5   : > { %15534 = vmatmul.mubr.msk.f32.gmra.mrb[204].mxu0 %vm930_vm5, %v12547_v60  ;;  %v12570_v60 = vld [vmem:[%s21940_s1 + $0x20] sm:$0xff] }
0x19b6   : > { %15541 = vmatpush3.msra.mxu0 %v20929_v29  ;;  %15542 = vmatprep.mubr.msk.f32.mxu0 %vm930_vm5, %v12552_v38  ;;  %v16735_v38 = vpack.c.bf16 %v12568_v15, %v12567_v24  ;;  %v12581_v24 = vld [vmem:[%s21940_s1 + $0x38] sm:$0xff] }
0x19b9   : > { %15543 = vmatmul.mubr.msk.f32.vlgmr.msra.gmra.mrb[202].mxu0 %vm930_vm5, %v12553_v50 }
0x19ba   : > { %15545 = vmatprep.mubr.msk.f32.mxu0 %vm930_vm5, %v12554_v21  ;;  %v12571_v21 = vld [vmem:[%s21940_s1 + $0x28] sm:$0xff] }
0x19bd   : > { %15546 = vmatmul.mubr.msk.f32.gmra.mrb[204].mxu0 %vm930_vm5, %v12555_v52 }
0x19be   : > { %15556 = vmatprep.mubr.msk.f32.mxu0 %vm3214_vm9, %v18077_v28 }
0x1a8c   : > { %v15544_v43 = vpop.f32.mrb[202].mxu0 }
0x1a8d   : > { %v8923_v23 = vrot.slane %v15544_v43, 1  ;;  %v8895_v58 = vpop.f32.mrb[203].mxu0 }
0x1a8e   : > { %v8922_v57 = vrot.slane %v8895_v58, 1 }
0x1a90   : > { %v8924_v5 = vsel %vm1709_vm6, %v8922_v57, %v8923_v23  ;;  %v15547_v4 = vpop.f32.mrb[204].mxu0 }
0x1a91   : > { %v8933_v45 = vmax.f32 %v8895_v58, %v8924_v5  ;;  %v8927_v25 = vrot.slane %v15547_v4, 1  ;;  %v8905_v27 = vpop.f32.mrb[205].mxu0  ;;  %v9037_v58 = vld [vmem:[%s21940_s1] sm:$0xff] }
0x1a92   : > { %v8925_v62 = vrot.slane %v8905_v27, 1 }
0x1a93   : > { %v8936_v6 = vmax.f32 %v15547_v4, %v8927_v25 }
0x1a94   : > { %v8928_v29 = vsel %vm1709_vm6, %v8925_v62, %v8927_v25  ;;  %v8926_v2 = vsel %vm1709_vm6, %v8923_v23, %v8925_v62 }
0x1a95   : > { %v8935_v42 = vmax.f32 %v8905_v27, %v8928_v29  ;;  %v8934_v8 = vmax.f32 %v15544_v43, %v8926_v2  ;;  %v9039_v27 = vld [vmem:[%s21940_s1 + $0x10] sm:$0xff] }
0x1a97   : > { %v17820_v18 = vpack.i.bf16 %v8936_v6, %v8935_v42  ;;  %v17815_v32 = vpack.i.bf16 %v8934_v8, %v8933_v45 }
0x1a99   : > { %17821 = vrot.lane.b32.xlu0 %v17820_v18, %s18112_s16  ;;  %17816 = vrot.lane.b32.xlu1 %v17815_v32, %s18112_s16  ;;  %v12582_v18 = vld [vmem:[%s21940_s1 + $0x40] sm:$0xff] }
0x1a9d   : > { %17826 = vrot.lane.b32.xlu1 %v17825_v11, %s18112_s16  ;;  %17831 = vrot.lane.b32.xlu0 %v17830_v30, %s18112_s16 }
0x1aa1   : > { %17836 = vrot.lane.b32.xlu1 %v17825_v11, %s18113_s17  ;;  %17841 = vrot.lane.b32.xlu0 %v17830_v30, %s18113_s17 }
0x1aa5   : > { %17846 = vrot.lane.b32.xlu1 %v17825_v11, %s18114_s18  ;;  %17851 = vrot.lane.b32.xlu0 %v17830_v30, %s18114_s18 }
0x1aa9   : > { %17856 = vrot.lane.b32.xlu1 %v17825_v11, %s18115_s19  ;;  %17861 = vrot.lane.b32.xlu0 %v17830_v30, %s18115_s19 }
0x1b0b   : > { %v17822_v39 = vpop.permute.xlu0 %17821  ;;  %v17817_v55 = vpop.permute.xlu1 %17816 }
0x1b0c   : > { %v17824_v3 = vunpack.i.h.bf16 %v17822_v39  ;;  %v17823_v54 = vunpack.i.l.bf16 %v17822_v39  ;;  %v17819_v22 = vunpack.i.h.bf16 %v17817_v55  ;;  %v17818_v53 = vunpack.i.l.bf16 %v17817_v55  ;;  %v12587_v55 = vld [vmem:[%s21940_s1 + $0x48] sm:$0xff] }
0x1b0e   : > { %v8948_v41 = vmax.f32 %v8936_v6, %v17824_v3  ;;  %v8947_v13 = vmax.f32 %v8935_v42, %v17823_v54  ;;  %v8946_v46 = vmax.f32 %v8934_v8, %v17819_v22  ;;  %v8945_v63 = vmax.f32 %v8933_v45, %v17818_v53  ;;  %v9038_v45 = vld [vmem:[%s21940_s1 + $0x8] sm:$0xff]  ;;  %v12580_v42 = vld [vmem:[%s21940_s1 + $0x30] sm:$0xff] }
0x1b0f   : > { %v17827_v36 = vpop.permute.xlu1 %17826  ;;  %v17832_v7 = vpop.permute.xlu0 %17831  ;;  %v12588_v53 = vld [vmem:[%s21940_s1 + $0x50] sm:$0xff] }
0x1b10   : > { %v16714_v56 = vpack.c.bf16 %v8946_v46, %v8945_v63  ;;  %v16718_v40 = vpack.c.bf16 %v8948_v41, %v8947_v13  ;;  %v17829_v19 = vunpack.i.h.bf16 %v17827_v36  ;;  %v17828_v48 = vunpack.i.l.bf16 %v17827_v36  ;;  %v12589_v41 = vld [vmem:[%s21940_s1 + $0x58] sm:$0xff]  ;;  %v12594_v13 = vld [vmem:[%s21940_s1 + $0x60] sm:$0xff]  ;;  %v12596_v46 = vld [vmem:[%s21940_s1 + $0x70] sm:$0xff] }
0x1b11   : > { %v17834_v34 = vunpack.i.h.bf16 %v17832_v7  ;;  %v17833_v49 = vunpack.i.l.bf16 %v17832_v7 }
0x1b12   : > { %16715 = vmatprep.subr.bf16.mxu0 %v16714_v56  ;;  %v16725_v44 = vpack.c.bf16 %v17829_v19, %v17828_v48 }
0x1b13   : > { %16717 = vmatpush3.bf16.msra.mxu0 %v16714_v56  ;;  %v16728_v31 = vpack.c.bf16 %v17834_v34, %v17833_v49  ;;  %v17837_v50 = vpop.permute.xlu1 %17836  ;;  %v17842_v43 = vpop.permute.xlu0 %17841 }
0x1b14   : > { %16720 = vmatprep.subr.msk.bf16.mxu0 %vm19238_vm11, %v16718_v40  ;;  %v17839_v52 = vunpack.i.h.bf16 %v17837_v50  ;;  %v17838_v28 = vunpack.i.l.bf16 %v17837_v50  ;;  %v17844_v57 = vunpack.i.h.bf16 %v17842_v43  ;;  %v17843_v5 = vunpack.i.l.bf16 %v17842_v43  ;;  %v9557_v50 = vld [vmem:[%s21941_s2 + $0x20] sm:$0xff] }
0x1b15   : > { %v9561_v43 = vld [vmem:[%s21941_s2 + $0x40] sm:$0xff] }
0x1b16   : > { %v16739_v23 = vpack.c.bf16 %v17839_v52, %v17838_v28  ;;  %v16742_v4 = vpack.c.bf16 %v17844_v57, %v17843_v5  ;;  %v9559_v52 = vld [vmem:[%s21941_s2 + $0x30] sm:$0xff]  ;;  %v9560_v28 = vld [vmem:[%s21941_s2 + $0x38] sm:$0xff] }
0x1b17   : > { %16723 = vmatpush3.bf16.msk.msra.mxu0 %vm19238_vm11, %v16718_v40  ;;  %v17847_v25 = vpop.permute.xlu1 %17846  ;;  %v17852_v2 = vpop.permute.xlu0 %17851 }
0x1b18   : > { %16724 = vmatprep.subr.bf16.mxu0 %v18109_v0  ;;  %v17849_v62 = vunpack.i.h.bf16 %v17847_v25  ;;  %v17848_v29 = vunpack.i.l.bf16 %v17847_v25  ;;  %v17854_v8 = vunpack.i.h.bf16 %v17852_v2  ;;  %v17853_v9 = vunpack.i.l.bf16 %v17852_v2 }
0x1b1a   : > { %15557 = vmatmul.mubr.msk.f32.vlgmr.msra.gmra.mrb[206].mxu0 %vm3214_vm9, %v18078_v51  ;;  %v16746_v6 = vpack.c.bf16 %v17849_v62, %v17848_v29  ;;  %v16749_v16 = vpack.c.bf16 %v17854_v8, %v17853_v9  ;;  %v12602_v9 = vld [vmem:[%s21941_s2 + $0x50] sm:$0xff] }
0x1b1b   : > { %16726 = vmatpush3.bf16.msra.mxu0 %v16725_v44  ;;  %15567 = vmatprep.mubr.msk.f32.mxu0 %vm18110_vm0, %v18111_v1  ;;  %v17857_v15 = vpop.permute.xlu1 %17856  ;;  %v17862_v30 = vpop.permute.xlu0 %17861 }
0x1b1c   : > { %16727 = vmatprep.subr.bf16.mxu0 %v18109_v0  ;;  %v17859_v32 = vunpack.i.h.bf16 %v17857_v15  ;;  %v17858_v11 = vunpack.i.l.bf16 %v17857_v15  ;;  %v17864_v3 = vunpack.i.h.bf16 %v17862_v30  ;;  %v17863_v54 = vunpack.i.l.bf16 %v17862_v30  ;;  %v12646_v15 = vld [vmem:[%s21941_s2 + $0xd8] sm:$0xff]  ;;  %v12605_v30 = vld [vmem:[%s21941_s2 + $0x68] sm:$0xff] }
0x1b1e   : > { %v16753_v39 = vpack.c.bf16 %v17859_v32, %v17858_v11  ;;  %v16756_v22 = vpack.c.bf16 %v17864_v3, %v17863_v54  ;;  %v12604_v32 = vld [vmem:[%s21941_s2 + $0x60] sm:$0xff]  ;;  %v12649_v3 = vld [vmem:[%s21941_s2 + $0xf0] sm:$0xff]  ;;  %v12607_v54 = vld [vmem:[%s21941_s2 + $0x78] sm:$0xff] }
0x1b1f   : > { %16730 = vmatpush3.bf16.msk.msra.mxu0 %vm18208_vm3, %v16728_v31  ;;  %v12647_v11 = vld [vmem:[%s21941_s2 + $0xe0] sm:$0xff] }
0x1b20   : > { %16731 = vmatprep.subr.bf16.mxu0 %v18109_v0 }
0x1b22   : > { %15568 = vmatmul.mubr.msk.f32.vlgmr.msra.gmra.mrb[208].mxu0 %vm398_vm4, %v12569_v59  ;;  %v9553_v59 = vld [vmem:[%s21941_s2] sm:$0xff] }
0x1b23   : > { %15570 = vmatprep.mubr.msk.f32.mxu0 %vm18110_vm0, %v18111_v1  ;;  %16733 = vmatpush3.bf16.msra.mxu0 %v16732_v61  ;;  %v9554_v61 = vld [vmem:[%s21941_s2 + $0x8] sm:$0xff] }
0x1b24   : > { %16734 = vmatprep.subr.bf16.mxu0 %v18109_v0 }
0x1b26   : > { %15571 = vmatmul.mubr.msk.f32.gmra.mrb[210].mxu0 %vm398_vm4, %v12570_v60  ;;  %v9555_v60 = vld [vmem:[%s21941_s2 + $0x10] sm:$0xff] }
0x1b27   : > { %15573 = vmatprep.mubr.msk.f32.mxu0 %vm18110_vm0, %v18111_v1  ;;  %16737 = vmatpush3.bf16.msk.msra.mxu0 %vm18208_vm3, %v16735_v38  ;;  %v9556_v38 = vld [vmem:[%s21941_s2 + $0x18] sm:$0xff] }
0x1b28   : > { %16738 = vmatprep.subr.bf16.mxu0 %v18109_v0 }
0x1b2a   : > { %15574 = vmatmul.mubr.msk.f32.gmra.mrb[212].mxu0 %vm398_vm4, %v12571_v21  ;;  %v9558_v21 = vld [vmem:[%s21941_s2 + $0x28] sm:$0xff] }
0x1b2b   : > { %15584 = vmatprep.mubr.msk.f32.mxu0 %vm18110_vm0, %v18111_v1 }
0x1b2e   : > { %15585 = vmatmul.mubr.msk.f32.vlgmr.msra.gmra.mrb[208].mxu0 %vm398_vm4, %v9037_v58 }
0x1b2f   : > { %15587 = vmatprep.mubr.msk.f32.mxu0 %vm18110_vm0, %v18111_v1  ;;  %16740 = vmatpush3.bf16.msra.mxu0 %v16739_v23 }
0x1b30   : > { %16741 = vmatprep.subr.bf16.mxu0 %v18109_v0 }
0x1b32   : > { %15588 = vmatmul.mubr.msk.f32.gmra.mrb[210].mxu0 %vm398_vm4, %v9038_v45 }
0x1b33   : > { %15590 = vmatprep.mubr.msk.f32.mxu0 %vm18110_vm0, %v18111_v1  ;;  %16744 = vmatpush3.bf16.msk.msra.mxu0 %vm18208_vm3, %v16742_v4 }
0x1b34   : > { %16745 = vmatprep.subr.bf16.mxu0 %v18109_v0 }
0x1b36   : > { %15591 = vmatmul.mubr.msk.f32.gmra.mrb[212].mxu0 %vm398_vm4, %v9039_v27  ;;  %v12601_v27 = vld [vmem:[%s21941_s2 + $0x48] sm:$0xff] }
0x1b37   : > { %15601 = vmatprep.mubr.msk.f32.mxu0 %vm18110_vm0, %v18111_v1 }
0x1b3a   : > { %15602 = vmatmul.mubr.msk.f32.vlgmr.msra.gmra.mrb[208].mxu0 %vm398_vm4, %v12580_v42 }
0x1b3b   : > { %15604 = vmatprep.mubr.msk.f32.mxu0 %vm18110_vm0, %v18111_v1  ;;  %16747 = vmatpush3.bf16.msra.mxu0 %v16746_v6 }
0x1b3c   : > { %16748 = vmatprep.subr.bf16.mxu0 %v18109_v0 }
0x1b3e   : > { %15605 = vmatmul.mubr.msk.f32.gmra.mrb[210].mxu0 %vm398_vm4, %v12581_v24  ;;  %v12603_v24 = vld [vmem:[%s21941_s2 + $0x58] sm:$0xff] }
0x1b3f   : > { %15607 = vmatprep.mubr.msk.f32.mxu0 %vm18110_vm0, %v18111_v1  ;;  %16751 = vmatpush3.bf16.msk.msra.mxu0 %vm18208_vm3, %v16749_v16 }
0x1b40   : > { %16752 = vmatprep.subr.bf16.mxu0 %v18109_v0 }
0x1b42   : > { %15608 = vmatmul.mubr.msk.f32.gmra.mrb[212].mxu0 %vm398_vm4, %v12582_v18 }
0x1b43   : > { %15618 = vmatprep.mubr.msk.f32.mxu0 %vm18110_vm0, %v18111_v1 }
0x1b46   : > { %15619 = vmatmul.mubr.msk.f32.vlgmr.msra.gmra.mrb[208].mxu0 %vm398_vm4, %v12587_v55  ;;  %v12606_v55 = vld [vmem:[%s21941_s2 + $0x70] sm:$0xff] }
0x1b47   : > { %15621 = vmatprep.mubr.msk.f32.mxu0 %vm18110_vm0, %v18111_v1  ;;  %16754 = vmatpush3.bf16.msra.mxu0 %v16753_v39  ;;  %v12648_v39 = vld [vmem:[%s21941_s2 + $0xe8] sm:$0xff] }
0x1b48   : > { %16755 = vmatprep.subr.bf16.mxu0 %v18109_v0 }
0x1b4a   : > { %15622 = vmatmul.mubr.msk.f32.gmra.mrb[210].mxu0 %vm398_vm4, %v12588_v53  ;;  %v12608_v53 = vld [vmem:[%s21941_s2 + $0x80] sm:$0xff] }
0x1b4b   : > { %15624 = vmatprep.mubr.msk.f32.mxu0 %vm18110_vm0, %v18111_v1  ;;  %16758 = vmatpush3.bf16.msk.msra.mxu0 %vm18208_vm3, %v16756_v22  ;;  %v12650_v22 = vld [vmem:[%s21941_s2 + $0xf8] sm:$0xff] }
0x1b4c   : > { %16762 = vmatprep.subr.bf16.mxu0 %v18109_v0 }
0x1b4e   : > { %15625 = vmatmul.mubr.msk.f32.gmra.mrb[212].mxu0 %vm398_vm4, %v12589_v41  ;;  %v12651_v41 = vld [vmem:[%s21941_s2 + $0x100] sm:$0xff] }
0x1b4f   : > { %15635 = vmatprep.mubr.msk.f32.mxu0 %vm18110_vm0, %v18111_v1 }
0x1b52   : > { %15636 = vmatmul.mubr.msk.f32.vlgmr.msra.gmra.mrb[208].mxu0 %vm398_vm4, %v12594_v13 }
0x1b53   : > { %15638 = vmatprep.mubr.msk.f32.mxu0 %vm18110_vm0, %v18111_v1 }
0x1b56   : > { %15639 = vmatmul.mubr.msk.f32.gmra.mrb[210].mxu0 %vm398_vm4, %v12595_v17  ;;  %v12609_v17 = vld [vmem:[%s21941_s2 + $0x88] sm:$0xff] }
0x1b57   : > { %15641 = vmatprep.mubr.msk.f32.mxu0 %vm18110_vm0, %v18111_v1 }
0x1b5a   : > { %15642 = vmatmul.mubr.msk.f32.gmra.mrb[212].mxu0 %vm398_vm4, %v12596_v46  ;;  %v12652_v46 = vld [vmem:[%s21941_s2 + $0x108] sm:$0xff] }
0x1b5b   : > { %15683 = vmatprep.mubr.msk.f32.mxu0 %vm18110_vm0, %v18111_v1 }
0x1bed   : > { %v15558_v63 = vpop.f32.mrb[206].mxu0 }
0x1bee   : > { %v9028_v56 = vmax.f32 %v15558_v63, 0.0  ;;  %v9018_v36 = vpop.f32.mrb[207].mxu0 }
0x1bef   : > { %v9027_v40 = vmax.f32 %v9018_v36, 0.0  ;;  %v12628_v36 = vld [vmem:[%s21941_s2 + $0x90] sm:$0xff] }
0x1bf0   : > { %12564 = vst [vmem:[%s19369_s29 + $0x28] sm:$0x3f] %v9028_v56 }
0x1bf1   : > { %12563 = vst [vmem:[%s19369_s29 + $0x20] sm:$0xff] %v9027_v40  ;;  %v12653_v40 = vld [vmem:[%s21941_s2 + $0x110] sm:$0xff] }
0x1c25   : > { %v9536_v19 = vpop.f32.mrb[208].mxu0 }
0x1c26   : > { %v15637_v48 = vpop.f32.mrb[209].mxu0 }
0x1c27   : > { %v12629_v48 = vld [vmem:[%s21941_s2 + $0x98] sm:$0xff] }
0x1c29   : > { %v9541_v7 = vpop.f32.mrb[210].mxu0 }
0x1c2a   : > { %v15640_v44 = vpop.f32.mrb[211].mxu0  ;;  %v17865_v34 = vpack.i.bf16 %v9541_v7, %v9536_v19  ;;  %v16763_v49 = vpack.c.bf16 %v9541_v7, %v9536_v19  ;;  %v12654_v7 = vld [vmem:[%s21941_s2 + $0x118] sm:$0xff] }
0x1c2c   : > { %17866 = vrot.lane.b32.xlu1 %v17865_v34, %s18112_s16  ;;  %16764 = vmatpush3.bf16.msra.mxu0 %v16763_v49  ;;  %v12631_v49 = vld [vmem:[%s21941_s2 + $0xa8] sm:$0xff] }
0x1c2d   : > { %v9546_v51 = vpop.f32.mrb[212].mxu0  ;;  %15681 = vmatprep.subr.mxu0 %v18111_v1 }
0x1c2e   : > { %9575 = vrot.lane.b32.xlu0 %v9546_v51, %s18112_s16  ;;  %v15643_v31 = vpop.f32.mrb[213].mxu0 }
0x1c2f   : > { %v12633_v31 = vld [vmem:[%s21941_s2 + $0xb8] sm:$0xff] }
0x1c30   : > { %17871 = vrot.lane.b32.xlu1 %v17865_v34, %s18113_s17  ;;  %15682 = vmatpush3.msra.mxu0 %v9546_v51 }
0x1c31   : > { %15684 = vmatmul.mubr.msk.f32.vlgmr.msra.gmra.mrb[214].mxu0 %vm930_vm5, %v9553_v59  ;;  %16768 = vmatprep.subr.bf16.mxu0 %v18109_v0  ;;  %v12634_v59 = vld [vmem:[%s21941_s2 + $0xc0] sm:$0xff] }
0x1c32   : > { %9864 = vrot.lane.b32.xlu0 %v9546_v51, %s18113_s17  ;;  %15686 = vmatprep.mubr.msk.f32.mxu0 %vm18110_vm0, %v18111_v1 }
0x1c34   : > { %17876 = vrot.lane.b32.xlu1 %v17865_v34, %s18114_s18 }
0x1c35   : > { %15687 = vmatmul.mubr.msk.f32.gmra.mrb[216].mxu0 %vm930_vm5, %v9554_v61  ;;  %v12635_v61 = vld [vmem:[%s21941_s2 + $0xc8] sm:$0xff] }
0x1c36   : > { %17881 = vrot.lane.b32.xlu0 %v17865_v34, %s18115_s19  ;;  %15689 = vmatprep.mubr.msk.f32.mxu0 %vm18110_vm0, %v18111_v1  ;;  %v12630_v34 = vld [vmem:[%s21941_s2 + $0xa0] sm:$0xff] }
0x1c38   : > { %10025 = vrot.lane.b32.xlu1 %v9546_v51, %s18114_s18 }
0x1c39   : > { %15690 = vmatmul.mubr.msk.f32.gmra.mrb[218].mxu0 %vm930_vm5, %v9555_v60  ;;  %v12636_v60 = vld [vmem:[%s21941_s2 + $0xd0] sm:$0xff] }
0x1c3a   : > { %10186 = vrot.lane.b32.xlu0 %v9546_v51, %s18115_s19  ;;  %15692 = vmatprep.mubr.msk.f32.mxu0 %vm18110_vm0, %v18111_v1  ;;  %v12632_v51 = vld [vmem:[%s21941_s2 + $0xb0] sm:$0xff] }
0x1c3d   : > { %15693 = vmatmul.mubr.msk.f32.gmra.mrb[220].mxu0 %vm930_vm5, %v9556_v38  ;;  %v12664_v38 = vld [vmem:[%s21941_s2 + $0x120] sm:$0xff] }
0x1c3e   : > { %15695 = vmatprep.mubr.msk.f32.mxu0 %vm18110_vm0, %v18111_v1 }
0x1c41   : > { %15696 = vmatmul.mubr.msk.f32.gmra.mrb[222].mxu0 %vm930_vm5, %v9557_v50  ;;  %v12665_v50 = vld [vmem:[%s21941_s2 + $0x128] sm:$0xff] }
0x1c42   : > { %15698 = vmatprep.mubr.msk.f32.mxu0 %vm18110_vm0, %v18111_v1 }
0x1c45   : > { %15699 = vmatmul.mubr.msk.f32.gmra.mrb[224].mxu0 %vm930_vm5, %v9558_v21  ;;  %v12666_v21 = vld [vmem:[%s21941_s2 + $0x130] sm:$0xff] }
0x1c46   : > { %15701 = vmatprep.mubr.msk.f32.mxu0 %vm18110_vm0, %v18111_v1 }
0x1c49   : > { %15702 = vmatmul.mubr.msk.f32.gmra.mrb[226].mxu0 %vm930_vm5, %v9559_v52 }
0x1c4a   : > { %15704 = vmatprep.mubr.msk.f32.mxu0 %vm18110_vm0, %v18111_v1 }
0x1c4d   : > { %15705 = vmatmul.mubr.msk.f32.gmra.mrb[228].mxu0 %vm930_vm5, %v9560_v28 }
0x1c4e   : > { %15707 = vmatprep.mubr.msk.f32.mxu0 %vm18110_vm0, %v18111_v1 }
0x1c51   : > { %15708 = vmatmul.mubr.msk.f32.gmra.mrb[230].mxu0 %vm930_vm5, %v9561_v43  ;;  %v12671_v43 = vld [vmem:[%s21941_s2 + $0x158] sm:$0xff] }
0x1c52   : > { %15749 = vmatprep.mubr.msk.f32.mxu0 %vm18110_vm0, %v18111_v1 }
0x1c9e   : > { %v17867_v23 = vpop.permute.xlu1 %17866 }
0x1c9f   : > { %v17869_v58 = vunpack.i.h.bf16 %v17867_v23  ;;  %v17868_v57 = vunpack.i.l.bf16 %v17867_v23 }
0x1ca0   : > { %v9576_v62 = vpop.permute.xlu0 %9575 }
0x1ca1   : > { %v16760_v5 = vpack.c.bf16 %v17869_v58, %v17868_v57  ;;  %v12672_v58 = vld [vmem:[%s21941_s2 + $0x160] sm:$0xff] }
0x1ca2   : > { %v17872_v4 = vpop.permute.xlu1 %17871 }
0x1ca3   : > { %v17874_v45 = vunpack.i.h.bf16 %v17872_v4  ;;  %v17873_v25 = vunpack.i.l.bf16 %v17872_v4  ;;  %16761 = vmatpush3.bf16.msra.mxu1 %v16760_v5 }
0x1ca4   : > { %15648 = vmatprep.subr.mxu1 %v18111_v1  ;;  %v9865_v16 = vpop.permute.xlu0 %9864 }
0x1ca5   : > { %v16766_v2 = vpack.c.bf16 %v17874_v45, %v17873_v25 }
0x1ca6   : > { %v17877_v29 = vpop.permute.xlu1 %17876 }
0x1ca7   : > { %v17879_v6 = vunpack.i.h.bf16 %v17877_v29  ;;  %v17878_v42 = vunpack.i.l.bf16 %v17877_v29  ;;  %15649 = vmatpush3.msra.mxu1 %v9576_v62 }
0x1ca8   : > { %15651 = vmatmul.mubr.msk.f32.vlgmr.msra.gmra.mrb[248].mxu1 %vm930_vm5, %v12601_v27  ;;  %16765 = vmatprep.subr.bf16.mxu1 %v18109_v0  ;;  %v17882_v13 = vpop.permute.xlu0 %17881 }
0x1ca9   : > { %v16769_v8 = vpack.c.bf16 %v17879_v6, %v17878_v42  ;;  %16767 = vmatpush3.bf16.msra.mxu1 %v16766_v2  ;;  %15653 = vmatprep.mubr.msk.f32.mxu1 %vm18110_vm0, %v18111_v1  ;;  %v17884_v63 = vunpack.i.h.bf16 %v17882_v13  ;;  %v17883_v56 = vunpack.i.l.bf16 %v17882_v13 }
0x1caa   : > { %15714 = vmatprep.subr.mxu1 %v18111_v1  ;;  %v10026_v18 = vpop.permute.xlu1 %10025 }
0x1cab   : > { %16770 = vmatpush3.bf16.msra.mxu0 %v16769_v8  ;;  %v16772_v19 = vpack.c.bf16 %v17884_v63, %v17883_v56 }
0x1cac   : > { %15654 = vmatmul.mubr.msk.f32.gmra.mrb[250].mxu1 %vm930_vm5, %v12602_v9  ;;  %15747 = vmatprep.subr.mxu0 %v18111_v1  ;;  %v10187_v44 = vpop.permute.xlu0 %10186 }
0x1cad   : > { %15715 = vmatpush3.msra.mxu1 %v9865_v16  ;;  %15656 = vmatprep.mubr.msk.f32.mxu1 %vm18110_vm0, %v18111_v1 }
0x1cae   : > { %16771 = vmatprep.subr.bf16.mxu1 %v18109_v0 }
0x1caf   : > { %15748 = vmatpush3.msra.mxu0 %v10026_v18 }
0x1cb0   : > { %15657 = vmatmul.mubr.msk.f32.gmra.mrb[252].mxu1 %vm930_vm5, %v12603_v24  ;;  %15750 = vmatmul.mubr.msk.f32.vlgmr.msra.gmra.mrb[232].mxu0 %vm930_vm5, %v12646_v15 }
0x1cb1   : > { %15659 = vmatprep.mubr.msk.f32.mxu1 %vm18110_vm0, %v18111_v1  ;;  %15752 = vmatprep.mubr.msk.f32.mxu0 %vm18110_vm0, %v18111_v1 }
0x1cb2   : > { %16774 = vmatprep.subr.bf16.mxu0 %v18109_v0 }
0x1cb4   : > { %15660 = vmatmul.mubr.msk.f32.gmra.mrb[254].mxu1 %vm930_vm5, %v12604_v32  ;;  %15753 = vmatmul.mubr.msk.f32.gmra.mrb[234].mxu0 %vm930_vm5, %v12647_v11 }
0x1cb5   : > { %15662 = vmatprep.mubr.msk.f32.mxu1 %vm18110_vm0, %v18111_v1  ;;  %15755 = vmatprep.mubr.msk.f32.mxu0 %vm18110_vm0, %v18111_v1 }
0x1cb8   : > { %15663 = vmatmul.mubr.msk.f32.gmra.mrb[0].mxu1 %vm930_vm5, %v12605_v30  ;;  %15756 = vmatmul.mubr.msk.f32.gmra.mrb[236].mxu0 %vm930_vm5, %v12648_v39 }
0x1cb9   : > { %15665 = vmatprep.mubr.msk.f32.mxu1 %vm18110_vm0, %v18111_v1  ;;  %15758 = vmatprep.mubr.msk.f32.mxu0 %vm18110_vm0, %v18111_v1 }
0x1cbc   : > { %15666 = vmatmul.mubr.msk.f32.gmra.mrb[2].mxu1 %vm930_vm5, %v12606_v55  ;;  %15759 = vmatmul.mubr.msk.f32.gmra.mrb[238].mxu0 %vm930_vm5, %v12649_v3 }
0x1cbd   : > { %15668 = vmatprep.mubr.msk.f32.mxu1 %vm18110_vm0, %v18111_v1  ;;  %15761 = vmatprep.mubr.msk.f32.mxu0 %vm18110_vm0, %v18111_v1 }
0x1cc0   : > { %15669 = vmatmul.mubr.msk.f32.gmra.mrb[4].mxu1 %vm930_vm5, %v12607_v54  ;;  %15762 = vmatmul.mubr.msk.f32.gmra.mrb[240].mxu0 %vm930_vm5, %v12650_v22 }
0x1cc1   : > { %15671 = vmatprep.mubr.msk.f32.mxu1 %vm18110_vm0, %v18111_v1  ;;  %15764 = vmatprep.mubr.msk.f32.mxu0 %vm18110_vm0, %v18111_v1 }
0x1cc4   : > { %15672 = vmatmul.mubr.msk.f32.gmra.mrb[6].mxu1 %vm930_vm5, %v12608_v53  ;;  %15765 = vmatmul.mubr.msk.f32.gmra.mrb[242].mxu0 %vm930_vm5, %v12651_v41 }
0x1cc5   : > { %15674 = vmatprep.mubr.msk.f32.mxu1 %vm18110_vm0, %v18111_v1  ;;  %15767 = vmatprep.mubr.msk.f32.mxu0 %vm18110_vm0, %v18111_v1 }
0x1cc8   : > { %15675 = vmatmul.mubr.msk.f32.gmra.mrb[8].mxu1 %vm930_vm5, %v12609_v17  ;;  %15768 = vmatmul.mubr.msk.f32.gmra.mrb[244].mxu0 %vm930_vm5, %v12652_v46 }
0x1cc9   : > { %15716 = vmatprep.mubr.msk.f32.mxu1 %vm18110_vm0, %v18111_v1  ;;  %15770 = vmatprep.mubr.msk.f32.mxu0 %vm18110_vm0, %v18111_v1 }
0x1ccc   : > { %15717 = vmatmul.mubr.msk.f32.vlgmr.msra.gmra.mrb[10].mxu1 %vm930_vm5, %v12628_v36  ;;  %15771 = vmatmul.mubr.msk.f32.gmra.mrb[246].mxu0 %vm930_vm5, %v12653_v40 }
0x1ccd   : > { %16773 = vmatpush3.bf16.msra.mxu1 %v16772_v19  ;;  %15719 = vmatprep.mubr.msk.f32.mxu1 %vm18110_vm0, %v18111_v1 }
0x1cce   : > { %15780 = vmatprep.subr.mxu1 %v18111_v1  ;;  %15773 = vmatprep.mubr.msk.f32.mxu0 %vm18110_vm0, %v18111_v1 }
0x1cd0   : > { %15720 = vmatmul.mubr.msk.f32.gmra.mrb[12].mxu1 %vm930_vm5, %v12629_v48  ;;  %15774 = vmatmul.mubr.msk.f32.gmra.mrb[248].mxu0 %vm930_vm5, %v12654_v7 }
0x1cd1   : > { %15781 = vmatpush3.msra.mxu1 %v10187_v44  ;;  %15722 = vmatprep.mubr.msk.f32.mxu1 %vm18110_vm0, %v18111_v1 }
0x1cd2   : > { %15827 = vmatprep.mubr.msk.f32.mxu0 %vm18110_vm0, %v18111_v1  ;;  %16786 = vmatprep.subr.bf16.mxu1 %v18109_v0 }
0x1cd4   : > { %15723 = vmatmul.mubr.msk.f32.gmra.mrb[14].mxu1 %vm930_vm5, %v12630_v34 }
0x1cd5   : > { %15725 = vmatprep.mubr.msk.f32.mxu1 %vm18110_vm0, %v18111_v1 }
0x1cd8   : > { %15726 = vmatmul.mubr.msk.f32.gmra.mrb[16].mxu1 %vm930_vm5, %v12631_v49 }
0x1cd9   : > { %15728 = vmatprep.mubr.msk.f32.mxu1 %vm18110_vm0, %v18111_v1 }
0x1cdc   : > { %15729 = vmatmul.mubr.msk.f32.gmra.mrb[18].mxu1 %vm930_vm5, %v12632_v51 }
0x1cdd   : > { %15731 = vmatprep.mubr.msk.f32.mxu1 %vm18110_vm0, %v18111_v1 }
0x1ce0   : > { %15732 = vmatmul.mubr.msk.f32.gmra.mrb[20].mxu1 %vm930_vm5, %v12633_v31 }
0x1ce1   : > { %15734 = vmatprep.mubr.msk.f32.mxu1 %vm18110_vm0, %v18111_v1 }
0x1ce4   : > { %15735 = vmatmul.mubr.msk.f32.gmra.mrb[22].mxu1 %vm930_vm5, %v12634_v59 }
0x1ce5   : > { %15737 = vmatprep.mubr.msk.f32.mxu1 %vm18110_vm0, %v18111_v1 }
0x1ce8   : > { %15738 = vmatmul.mubr.msk.f32.gmra.mrb[24].mxu1 %vm930_vm5, %v12635_v61 }
0x1ce9   : > { %15740 = vmatprep.mubr.msk.f32.mxu1 %vm18110_vm0, %v18111_v1 }
0x1cec   : > { %15741 = vmatmul.mubr.msk.f32.gmra.mrb[26].mxu1 %vm930_vm5, %v12636_v60 }
0x1ced   : > { %15782 = vmatprep.mubr.msk.f32.mxu1 %vm18110_vm0, %v18111_v1 }
0x1cf0   : > { %15783 = vmatmul.mubr.msk.f32.vlgmr.msra.gmra.mrb[28].mxu1 %vm930_vm5, %v12664_v38 }
0x1cf1   : > { %15785 = vmatprep.mubr.msk.f32.mxu1 %vm18110_vm0, %v18111_v1  ;;  %16788 = vmatpush3.bf16.msra.mxu1 %v18728_v10  ;;  %v12667_v10 = vld [vmem:[%s21941_s2 + $0x138] sm:$0xff] }
0x1cf2   : > { %16789 = vmatprep.subr.bf16.mxu1 %v18109_v0 }
0x1cf4   : > { %15786 = vmatmul.mubr.msk.f32.gmra.mrb[30].mxu1 %vm930_vm5, %v12665_v50 }
0x1cf5   : > { %15788 = vmatprep.mubr.msk.f32.mxu1 %vm18110_vm0, %v18111_v1  ;;  %16791 = vmatpush3.bf16.msra.mxu1 %v18734_v12  ;;  %v12668_v12 = vld [vmem:[%s21941_s2 + $0x140] sm:$0xff] }
0x1cf6   : > { %16792 = vmatprep.subr.bf16.mxu1 %v18109_v0 }
0x1cf8   : > { %15789 = vmatmul.mubr.msk.f32.gmra.mrb[32].mxu1 %vm930_vm5, %v12666_v21 }
0x1cf9   : > { %15791 = vmatprep.mubr.msk.f32.mxu1 %vm18110_vm0, %v18111_v1  ;;  %16794 = vmatpush3.bf16.msra.mxu1 %v18744_v14  ;;  %v12669_v14 = vld [vmem:[%s21941_s2 + $0x148] sm:$0xff] }
0x1cfa   : > { %16795 = vmatprep.subr.bf16.mxu1 %v18109_v0 }
0x1cfc   : > { %15792 = vmatmul.mubr.msk.f32.gmra.mrb[34].mxu1 %vm930_vm5, %v12667_v10 }
0x1cfd   : > { %15794 = vmatprep.mubr.msk.f32.mxu1 %vm18110_vm0, %v18111_v1  ;;  %16797 = vmatpush3.bf16.msra.mxu1 %v18754_v20  ;;  %v12670_v20 = vld [vmem:[%s21941_s2 + $0x150] sm:$0xff] }
0x1cfe   : > { %16798 = vmatprep.subr.bf16.mxu1 %v18109_v0 }
0x1d00   : > { %15795 = vmatmul.mubr.msk.f32.gmra.mrb[36].mxu1 %vm930_vm5, %v12668_v12 }
0x1d01   : > { %15797 = vmatprep.mubr.msk.f32.mxu1 %vm18110_vm0, %v18111_v1  ;;  %16800 = vmatpush3.bf16.msra.mxu1 %v18764_v33 }
0x1d02   : > { %16801 = vmatprep.subr.bf16.mxu1 %v18109_v0 }
0x1d04   : > { %15798 = vmatmul.mubr.msk.f32.gmra.mrb[38].mxu1 %vm930_vm5, %v12669_v14  ;;  %v9807_v52 = vpop.f32.mrb[214].mxu0 }
0x1d05   : > { %15800 = vmatprep.mubr.msk.f32.mxu1 %vm18110_vm0, %v18111_v1  ;;  %v15685_v28 = vpop.f32.mrb[215].mxu0  ;;  %16803 = vmatpush3.bf16.msra.mxu1 %v18774_v26 }
0x1d06   : > { %16804 = vmatprep.subr.bf16.mxu1 %v18109_v0 }
0x1d08   : > { %15801 = vmatmul.mubr.msk.f32.gmra.mrb[40].mxu1 %vm930_vm5, %v12670_v20  ;;  %v9812_v33 = vpop.f32.mrb[216].mxu0 }
0x1d09   : > { %15803 = vmatprep.mubr.msk.f32.mxu1 %vm18110_vm0, %v18111_v1  ;;  %v15688_v23 = vpop.f32.mrb[217].mxu0  ;;  %16806 = vmatpush3.bf16.msra.mxu1 %v18784_v37 }
0x1d0a   : > { %16807 = vmatprep.subr.bf16.mxu1 %v18109_v0 }
0x1d0c   : > { %15804 = vmatmul.mubr.msk.f32.gmra.mrb[42].mxu1 %vm930_vm5, %v12671_v43  ;;  %v9817_v26 = vpop.f32.mrb[218].mxu0 }
0x1d0d   : > { %15806 = vmatprep.mubr.msk.f32.mxu1 %vm18110_vm0, %v18111_v1  ;;  %v15691_v57 = vpop.f32.mrb[219].mxu0  ;;  %16809 = vmatpush3.bf16.msra.mxu1 %v18794_v35 }
0x1d10   : > { %15807 = vmatmul.mubr.msk.f32.gmra.mrb[44].mxu1 %vm930_vm5, %v12672_v58  ;;  %v9822_v5 = vpop.f32.mrb[220].mxu0 }
0x1d11   : > { %v15694_v4 = vpop.f32.mrb[221].mxu0  ;;  %15892 = vmatprep.mubr.msk.f32.mxu1 %vm18110_vm0, %v18111_v1 }
0x1d14   : > { %v9827_v37 = vpop.f32.mrb[222].mxu0 }
0x1d15   : > { %v15697_v45 = vpop.f32.mrb[223].mxu0 }
0x1d18   : > { %v9832_v25 = vpop.f32.mrb[224].mxu0 }
0x1d19   : > { %v15700_v27 = vpop.f32.mrb[225].mxu0 }
0x1d1c   : > { %v9837_v62 = vpop.f32.mrb[226].mxu0 }
0x1d1d   : > { %v15703_v29 = vpop.f32.mrb[227].mxu0 }
0x1d20   : > { %v9842_v2 = vpop.f32.mrb[228].mxu0 }
0x1d21   : > { %v15706_v6 = vpop.f32.mrb[229].mxu0 }
0x1d24   : > { %v9847_v42 = vpop.f32.mrb[230].mxu0 }
0x1d25   : > { %v15709_v8 = vpop.f32.mrb[231].mxu0 }
0x1d7b   : > { %v9670_v9 = vpop.f32.mrb[248].mxu1 }
0x1d7c   : > { %v9808_v16 = vadd.f32 %v9807_v52, %v9670_v9  ;;  %v15652_v35 = vpop.f32.mrb[249].mxu1 }
0x1d7f   : > { %v9675_v24 = vpop.f32.mrb[250].mxu1 }
0x1d80   : > { %v9813_v15 = vadd.f32 %v9812_v33, %v9675_v24  ;;  %v15655_v18 = vpop.f32.mrb[251].mxu1 }
0x1d83   : > { %v9680_v32 = vpop.f32.mrb[252].mxu1  ;;  %v10120_v11 = vpop.f32.mrb[232].mxu0 }
0x1d84   : > { %v9818_v30 = vadd.f32 %v9817_v26, %v9680_v32  ;;  %v15658_v39 = vpop.f32.mrb[253].mxu1  ;;  %v15751_v55 = vpop.f32.mrb[233].mxu0 }
0x1d87   : > { %v9685_v3 = vpop.f32.mrb[254].mxu1  ;;  %v10125_v54 = vpop.f32.mrb[234].mxu0 }
0x1d88   : > { %v9823_v22 = vadd.f32 %v9822_v5, %v9685_v3  ;;  %v15661_v53 = vpop.f32.mrb[255].mxu1  ;;  %v15754_v41 = vpop.f32.mrb[235].mxu0 }
0x1d8b   : > { %v9690_v13 = vpop.f32.mrb[0].mxu1  ;;  %v10130_v17 = vpop.f32.mrb[236].mxu0 }
0x1d8c   : > { %v9828_v46 = vadd.f32 %v9827_v37, %v9690_v13  ;;  %v15664_v63 = vpop.f32.mrb[1].mxu1  ;;  %v15757_v56 = vpop.f32.mrb[237].mxu0 }
0x1d8f   : > { %v9695_v36 = vpop.f32.mrb[2].mxu1  ;;  %v10135_v40 = vpop.f32.mrb[238].mxu0 }
0x1d90   : > { %v9833_v19 = vadd.f32 %v9832_v25, %v9695_v36  ;;  %v15667_v48 = vpop.f32.mrb[3].mxu1  ;;  %v15760_v7 = vpop.f32.mrb[239].mxu0 }
0x1d93   : > { %v9700_v44 = vpop.f32.mrb[4].mxu1  ;;  %v10140_v34 = vpop.f32.mrb[240].mxu0 }
0x1d94   : > { %v9838_v49 = vadd.f32 %v9837_v62, %v9700_v44  ;;  %v15670_v51 = vpop.f32.mrb[5].mxu1  ;;  %v15763_v31 = vpop.f32.mrb[241].mxu0 }
0x1d97   : > { %v9705_v59 = vpop.f32.mrb[6].mxu1  ;;  %v10145_v61 = vpop.f32.mrb[242].mxu0 }
0x1d98   : > { %v9843_v60 = vadd.f32 %v9842_v2, %v9705_v59  ;;  %v15673_v38 = vpop.f32.mrb[7].mxu1  ;;  %v15766_v50 = vpop.f32.mrb[243].mxu0 }
0x1d9b   : > { %v9710_v21 = vpop.f32.mrb[8].mxu1  ;;  %v10150_v10 = vpop.f32.mrb[244].mxu0 }
0x1d9c   : > { %v9848_v12 = vadd.f32 %v9847_v42, %v9710_v21  ;;  %v15676_v14 = vpop.f32.mrb[9].mxu1  ;;  %v15769_v52 = vpop.f32.mrb[245].mxu0  ;;  %v18081_v21 = vld [vmem:[%s21942_s3 + $0x10] sm:$0xff] }
0x1d9f   : > { %v9959_v20 = vpop.f32.mrb[10].mxu1  ;;  %v10155_v28 = vpop.f32.mrb[246].mxu0 }
0x1da0   : > { %v10003_v33 = vadd.f32 %v9959_v20, %v9808_v16  ;;  %v15718_v43 = vpop.f32.mrb[11].mxu1  ;;  %v15772_v23 = vpop.f32.mrb[247].mxu0 }
0x1da1   : > { %v18082_v43 = vld [vmem:[%s21942_s3 + $0x18] sm:$0xff] }
0x1da2   : > { %v10164_v26 = vadd.f32 %v10120_v11, %v10003_v33 }
0x1da3   : > { %v9964_v58 = vpop.f32.mrb[12].mxu1  ;;  %v10160_v57 = vpop.f32.mrb[248].mxu0 }
0x1da4   : > { %v10004_v5 = vadd.f32 %v9964_v58, %v9813_v15  ;;  %v15721_v4 = vpop.f32.mrb[13].mxu1  ;;  %v15775_v37 = vpop.f32.mrb[249].mxu0 }
0x1da6   : > { %v10165_v45 = vadd.f32 %v10125_v54, %v10004_v5 }
0x1da7   : > { %v9969_v25 = vpop.f32.mrb[14].mxu1 }
0x1da8   : > { %v10005_v27 = vadd.f32 %v9969_v25, %v9818_v30  ;;  %v15724_v62 = vpop.f32.mrb[15].mxu1  ;;  %v18083_v25 = vld [vmem:[%s21942_s3 + $0x20] sm:$0xff] }
0x1daa   : > { %v10166_v29 = vadd.f32 %v10130_v17, %v10005_v27 }
0x1dab   : > { %v9974_v2 = vpop.f32.mrb[16].mxu1 }
0x1dac   : > { %v10006_v6 = vadd.f32 %v9974_v2, %v9823_v22  ;;  %v15727_v42 = vpop.f32.mrb[17].mxu1 }
0x1dae   : > { %v10167_v8 = vadd.f32 %v10135_v40, %v10006_v6 }
0x1daf   : > { %v9979_v9 = vpop.f32.mrb[18].mxu1 }
0x1db0   : > { %v10007_v35 = vadd.f32 %v9979_v9, %v9828_v46  ;;  %v15730_v16 = vpop.f32.mrb[19].mxu1  ;;  %v18084_v9 = vld [vmem:[%s21942_s3 + $0x28] sm:$0xff] }
0x1db2   : > { %v10168_v24 = vadd.f32 %v10140_v34, %v10007_v35 }
0x1db3   : > { %v9984_v18 = vpop.f32.mrb[20].mxu1 }
0x1db4   : > { %v10008_v32 = vadd.f32 %v9984_v18, %v9833_v19  ;;  %v15733_v11 = vpop.f32.mrb[21].mxu1  ;;  %v18079_v19 = vld [vmem:[%s21942_s3] sm:$0xff] }
0x1db6   : > { %v10169_v39 = vadd.f32 %v10145_v61, %v10008_v32 }
0x1db7   : > { %v9989_v15 = vpop.f32.mrb[22].mxu1 }
0x1db8   : > { %v10009_v55 = vadd.f32 %v9989_v15, %v9838_v49  ;;  %v15736_v3 = vpop.f32.mrb[23].mxu1  ;;  %v18080_v49 = vld [vmem:[%s21942_s3 + $0x8] sm:$0xff] }
0x1dba   : > { %v10170_v54 = vadd.f32 %v10150_v10, %v10009_v55 }
0x1dbb   : > { %v9994_v53 = vpop.f32.mrb[24].mxu1 }
0x1dbc   : > { %v10010_v30 = vadd.f32 %v9994_v53, %v9843_v60  ;;  %v15739_v41 = vpop.f32.mrb[25].mxu1 }
0x1dbe   : > { %v10171_v13 = vadd.f32 %v10155_v28, %v10010_v30 }
0x1dbf   : > { %v9999_v17 = vpop.f32.mrb[26].mxu1 }
0x1dc0   : > { %v10011_v22 = vadd.f32 %v9999_v17, %v9848_v12  ;;  %v15742_v63 = vpop.f32.mrb[27].mxu1 }
0x1dc2   : > { %v21470_v56 = vadd.f32 %v10160_v57, %v10011_v22 }
0x1dc3   : > { %v10281_v46 = vpop.f32.mrb[28].mxu1 }
0x1dc4   : > { %v10325_v36 = vadd.f32 %v10281_v46, %v10164_v26  ;;  %v15784_v40 = vpop.f32.mrb[29].mxu1 }
0x1dc6   : > { %v10334_v7 = vadd.f32 %v18079_v19, %v10325_v36 }
0x1dc7   : > { %v10286_v48 = vpop.f32.mrb[30].mxu1 }
0x1dc8   : > { %v10326_v44 = vadd.f32 %v10286_v48, %v10165_v45  ;;  %v15787_v34 = vpop.f32.mrb[31].mxu1  ;;  %v10352_v59 = vrot.slane %v10334_v7, 1 }
0x1dca   : > { %v10335_v51 = vadd.f32 %v18080_v49, %v10326_v44 }
0x1dcb   : > { %v10291_v31 = vpop.f32.mrb[32].mxu1 }
0x1dcc   : > { %v10353_v61 = vrot.slane %v10335_v51, 1  ;;  %v10327_v60 = vadd.f32 %v10291_v31, %v10166_v29  ;;  %v15790_v38 = vpop.f32.mrb[33].mxu1 }
0x1dce   : > { %v10354_v50 = vsel %vm1709_vm6, %v10352_v59, %v10353_v61  ;;  %v10336_v10 = vadd.f32 %v18081_v21, %v10327_v60 }
0x1dcf   : > { %v10296_v12 = vpop.f32.mrb[34].mxu1  ;;  %v21482_v14 = vmax.f32 %v10334_v7, %v10354_v50 }
0x1dd0   : > { %v10355_v52 = vrot.slane %v10336_v10, 1  ;;  %v10328_v20 = vadd.f32 %v10296_v12, %v10167_v8  ;;  %v15793_v28 = vpop.f32.mrb[35].mxu1 }
0x1dd2   : > { %v10356_v33 = vsel %vm1709_vm6, %v10353_v61, %v10355_v52  ;;  %v10337_v23 = vadd.f32 %v18082_v43, %v10328_v20 }
0x1dd3   : > { %v10301_v26 = vpop.f32.mrb[36].mxu1  ;;  %v10379_v58 = vmax.f32 %v10335_v51, %v10356_v33 }
0x1dd4   : > { %v10357_v57 = vrot.slane %v10337_v23, 1  ;;  %v10329_v5 = vadd.f32 %v10301_v26, %v10168_v24  ;;  %v15796_v4 = vpop.f32.mrb[37].mxu1 }
0x1dd5   : > { %v17885_v37 = vpack.i.bf16 %v10379_v58, %v21482_v14 }
0x1dd6   : > { %v10358_v45 = vsel %vm1709_vm6, %v10355_v52, %v10357_v57  ;;  %v10338_v27 = vadd.f32 %v18083_v25, %v10329_v5 }
0x1dd7   : > { %v10306_v62 = vpop.f32.mrb[38].mxu1  ;;  %17886 = vrot.lane.b32.xlu1 %v17885_v37, %s18112_s16  ;;  %v10380_v29 = vmax.f32 %v10336_v10, %v10358_v45 }
0x1dd8   : > { %v10359_v2 = vrot.slane %v10338_v27, 1  ;;  %v10330_v6 = vadd.f32 %v10306_v62, %v10169_v39  ;;  %v15799_v42 = vpop.f32.mrb[39].mxu1  ;;  %v18085_v39 = vld [vmem:[%s21942_s3 + $0x30] sm:$0xff] }
0x1dda   : > { %v10360_v8 = vsel %vm1709_vm6, %v10357_v57, %v10359_v2  ;;  %v10339_v35 = vadd.f32 %v18084_v9, %v10330_v6 }
0x1ddb   : > { %v10311_v16 = vpop.f32.mrb[40].mxu1  ;;  %v10381_v24 = vmax.f32 %v10337_v23, %v10360_v8 }
0x1ddc   : > { %v10361_v18 = vrot.slane %v10339_v35, 1  ;;  %v10331_v32 = vadd.f32 %v10311_v16, %v10170_v54  ;;  %v15802_v11 = vpop.f32.mrb[41].mxu1  ;;  %v18086_v54 = vld [vmem:[%s21942_s3 + $0x38] sm:$0xff] }
0x1ddd   : > { %v17890_v15 = vpack.i.bf16 %v10381_v24, %v10380_v29 }
0x1dde   : > { %v10362_v55 = vsel %vm1709_vm6, %v10359_v2, %v10361_v18  ;;  %v10340_v3 = vadd.f32 %v18085_v39, %v10331_v32  ;;  %v18089_v39 = vld [vmem:[%s21943_s4 + $0x8] sm:$0xff] }
0x1ddf   : > { %v10316_v53 = vpop.f32.mrb[42].mxu1  ;;  %17891 = vrot.lane.b32.xlu0 %v17890_v15, %s18112_s16  ;;  %v10382_v30 = vmax.f32 %v10338_v27, %v10362_v55  ;;  %v18088_v55 = vld [vmem:[%s21943_s4] sm:$0xff] }
0x1de0   : > { %v10363_v41 = vrot.slane %v10340_v3, 1  ;;  %v10332_v17 = vadd.f32 %v10316_v53, %v10171_v13  ;;  %v15805_v22 = vpop.f32.mrb[43].mxu1  ;;  %v18087_v13 = vld [vmem:[%s21942_s3 + $0x40] sm:$0xff]  ;;  %v18091_v53 = vld [vmem:[%s21943_s4 + $0x18] sm:$0xff] }
0x1de1   : > { %v18095_v22 = vld [vmem:[%s21943_s4 + $0x38] sm:$0xff] }
0x1de2   : > { %v10364_v63 = vsel %vm1709_vm6, %v10361_v18, %v10363_v41  ;;  %v10341_v46 = vadd.f32 %v18086_v54, %v10332_v17  ;;  %v18094_v17 = vld [vmem:[%s21943_s4 + $0x30] sm:$0xff]  ;;  %v18097_v54 = vld [vmem:[%s21943_s4 + $0x48] sm:$0xff] }
0x1de3   : > { %v10321_v36 = vpop.f32.mrb[44].mxu1  ;;  %v10383_v40 = vmax.f32 %v10339_v35, %v10364_v63  ;;  %v18096_v63 = vld [vmem:[%s21943_s4 + $0x40] sm:$0xff] }
0x1de4   : > { %v10365_v48 = vrot.slane %v10341_v46, 1  ;;  %v10333_v19 = vadd.f32 %v10321_v36, %v21470_v56  ;;  %v15808_v7 = vpop.f32.mrb[45].mxu1 }
0x1de5   : > { %v17895_v44 = vpack.i.bf16 %v10383_v40, %v10382_v30 }
0x1de6   : > { %v10366_v34 = vsel %vm1709_vm6, %v10363_v41, %v10365_v48  ;;  %v10342_v49 = vadd.f32 %v18087_v13, %v10333_v19  ;;  %v18093_v41 = vld [vmem:[%s21943_s4 + $0x28] sm:$0xff] }
0x1de7   : > { %17896 = vrot.lane.b32.xlu1 %v17895_v44, %s18112_s16  ;;  %v10384_v51 = vmax.f32 %v10340_v3, %v10366_v34  ;;  %v18090_v3 = vld [vmem:[%s21943_s4 + $0x10] sm:$0xff] }
0x1de8   : > { %v10367_v31 = vrot.slane %v10342_v49, 1 }
0x1dea   : > { %v10368_v59 = vsel %vm1709_vm6, %v10365_v48, %v10367_v31  ;;  %v10386_v61 = vmax.f32 %v10342_v49, %v10367_v31 }
0x1deb   : > { %v10385_v60 = vmax.f32 %v10341_v46, %v10368_v59  ;;  %v18098_v46 = vld [vmem:[%s21943_s4 + $0x50] sm:$0xf] }
0x1dec   : > { %10403 = vrot.lane.b32.xlu1 %v10386_v61, %s18112_s16 }
0x1ded   : > { %v17900_v56 = vpack.i.bf16 %v10385_v60, %v10384_v51 }
0x1def   : > { %17901 = vrot.lane.b32.xlu0 %v17900_v56, %s18112_s16 }
0x1e49   : > { %v17887_v38 = vpop.permute.xlu1 %17886 }
0x1e4a   : > { %v17889_v50 = vunpack.i.h.bf16 %v17887_v38  ;;  %v17888_v21 = vunpack.i.l.bf16 %v17887_v38 }
0x1e4c   : > { %v10406_v10 = vmax.f32 %v10379_v58, %v17889_v50  ;;  %v10405_v12 = vmax.f32 %v21482_v14, %v17888_v21 }
0x1e4e   : > { %v10415_v52 = vmax.f32 %v10406_v10, 0.0  ;;  %v10414_v20 = vmax.f32 %v10405_v12, 0.0 }
0x1e50   : > { %v16775_v28 = vpack.c.bf16 %v10415_v52, %v10414_v20 }
0x1e51   : > { %v17892_v33 = vpop.permute.xlu0 %17891 }
0x1e52   : > { %v17894_v43 = vunpack.i.h.bf16 %v17892_v33  ;;  %v17893_v23 = vunpack.i.l.bf16 %v17892_v33  ;;  %16776 = vmatpush3.bf16.msra.mxu0 %v16775_v28 }
0x1e53   : > { %16777 = vmatprep.subr.bf16.mxu0 %v18109_v0 }
0x1e54   : > { %v10408_v26 = vmax.f32 %v10381_v24, %v17894_v43  ;;  %v10407_v57 = vmax.f32 %v10380_v29, %v17893_v23 }
0x1e56   : > { %v10417_v5 = vmax.f32 %v10408_v26, 0.0  ;;  %v10416_v4 = vmax.f32 %v10407_v57, 0.0 }
0x1e58   : > { %v16778_v37 = vpack.c.bf16 %v10417_v5, %v10416_v4 }
0x1e59   : > { %v17897_v45 = vpop.permute.xlu1 %17896 }
0x1e5a   : > { %v17899_v25 = vunpack.i.h.bf16 %v17897_v45  ;;  %v17898_v27 = vunpack.i.l.bf16 %v17897_v45  ;;  %16779 = vmatpush3.bf16.msra.mxu0 %v16778_v37 }
0x1e5b   : > { %16780 = vmatprep.subr.bf16.mxu0 %v18109_v0 }
0x1e5c   : > { %v10410_v14 = vmax.f32 %v10383_v40, %v17899_v25  ;;  %v10409_v58 = vmax.f32 %v10382_v30, %v17898_v27  ;;  %v18092_v30 = vld [vmem:[%s21943_s4 + $0x20] sm:$0xff] }
0x1e5e   : > { %v10419_v62 = vmax.f32 %v10410_v14, 0.0  ;;  %v10418_v2 = vmax.f32 %v10409_v58, 0.0  ;;  %v10404_v16 = vpop.permute.xlu1 %10403 }
0x1e5f   : > { %v10413_v32 = vmax.f32 %v10386_v61, %v10404_v16 }
0x1e60   : > { %v16781_v6 = vpack.c.bf16 %v10419_v62, %v10418_v2 }
0x1e61   : > { %v17902_v42 = vpop.permute.xlu0 %17901  ;;  %v10422_v15 = vmax.f32 %v10413_v32, 0.0 }
0x1e62   : > { %v17904_v8 = vunpack.i.h.bf16 %v17902_v42  ;;  %v17903_v9 = vunpack.i.l.bf16 %v17902_v42  ;;  %16782 = vmatpush3.bf16.msra.mxu0 %v16781_v6 }
0x1e63   : > { %16783 = vmatprep.subr.bf16.mxu0 %v18109_v0 }
0x1e64   : > { %v10412_v29 = vmax.f32 %v10385_v60, %v17904_v8  ;;  %v10411_v35 = vmax.f32 %v10384_v51, %v17903_v9 }
0x1e66   : > { %v10421_v24 = vmax.f32 %v10412_v29, 0.0  ;;  %v10420_v18 = vmax.f32 %v10411_v35, 0.0 }
0x1e68   : > { %v16784_v11 = vpack.c.bf16 %v10421_v24, %v10420_v18 }
0x1e6a   : > { %16785 = vmatpush3.bf16.msra.mxu0 %v16784_v11 }
0x1e6b   : > { %15825 = vmatprep.subr.mxu0 %v18111_v1 }
0x1e6e   : > { %15826 = vmatpush3.msk.msra.mxu0 %vm1709_vm6, %v10422_v15 }
0x1e6f   : > { %15828 = vmatmul.mubr.msk.f32.vlgmr.msra.gmra.mrb[250].mxu0 %vm1781_vm7, %v18088_v55  ;;  %16810 = vmatprep.subr.bf16.mxu0 %v18109_v0 }
0x1e70   : > { %15830 = vmatprep.mubr.msk.f32.mxu0 %vm18110_vm0, %v18111_v1 }
0x1e73   : > { %15831 = vmatmul.mubr.msk.f32.gmra.mrb[252].mxu0 %vm1781_vm7, %v18089_v39 }
0x1e74   : > { %15833 = vmatprep.mubr.msk.f32.mxu0 %vm18110_vm0, %v18111_v1 }
0x1e77   : > { %15834 = vmatmul.mubr.msk.f32.gmra.mrb[254].mxu0 %vm1781_vm7, %v18090_v3 }
0x1e78   : > { %15836 = vmatprep.mubr.msk.f32.mxu0 %vm18110_vm0, %v18111_v1 }
0x1e7b   : > { %15837 = vmatmul.mubr.msk.f32.gmra.mrb[0].mxu0 %vm1781_vm7, %v18091_v53 }
0x1e7c   : > { %15839 = vmatprep.mubr.msk.f32.mxu0 %vm18110_vm0, %v18111_v1 }
0x1e7f   : > { %15840 = vmatmul.mubr.msk.f32.gmra.mrb[2].mxu0 %vm1781_vm7, %v18092_v30 }
0x1e80   : > { %15842 = vmatprep.mubr.msk.f32.mxu0 %vm18110_vm0, %v18111_v1 }
0x1e83   : > { %15843 = vmatmul.mubr.msk.f32.gmra.mrb[4].mxu0 %vm1781_vm7, %v18093_v41 }
0x1e84   : > { %15845 = vmatprep.mubr.msk.f32.mxu0 %vm18110_vm0, %v18111_v1 }
0x1e87   : > { %15846 = vmatmul.mubr.msk.f32.gmra.mrb[6].mxu0 %vm1781_vm7, %v18094_v17 }
0x1e88   : > { %15848 = vmatprep.mubr.msk.f32.mxu0 %vm18110_vm0, %v18111_v1 }
0x1e8b   : > { %15849 = vmatmul.mubr.msk.f32.gmra.mrb[8].mxu0 %vm1781_vm7, %v18095_v22 }
0x1e8c   : > { %15851 = vmatprep.mubr.msk.f32.mxu0 %vm18110_vm0, %v18111_v1 }
0x1e8f   : > { %15852 = vmatmul.mubr.msk.f32.gmra.mrb[10].mxu0 %vm1781_vm7, %v18096_v63 }
0x1e90   : > { %15854 = vmatprep.mubr.msk.f32.mxu0 %vm18110_vm0, %v18111_v1 }
0x1e93   : > { %15855 = vmatmul.mubr.msk.f32.gmra.mrb[12].mxu0 %vm1781_vm7, %v18097_v54 }
0x1e94   : > { %15857 = vmatprep.mubr.msk.f32.mxu0 %vm18110_vm0, %v18111_v1 }
0x1e97   : > { %15858 = vmatmul.mubr.msk.f32.gmra.mrb[14].mxu0 %vm1781_vm7, %v18098_v46 }
0x1e98   : > { %15947 = vmatprep.mubr.msk.f32.mxu0 %vm18110_vm0, %v18111_v1 }
0x1f42   : > { %v10492_v36 = vpop.f32.mrb[250].mxu0 }
0x1f43   : > { %v15829_v40 = vpop.f32.mrb[251].mxu0  ;;  %15893 = vmatmul.mubr.f32.vlgmr.msra.gmra.mrb[46].mxu1 %v10492_v36 }
0x1f44   : > { %15895 = vmatprep.mubr.msk.f32.mxu1 %vm18110_vm0, %v18111_v1 }
0x1f46   : > { %v10497_v48 = vpop.f32.mrb[252].mxu0 }
0x1f47   : > { %v15832_v19 = vpop.f32.mrb[253].mxu0  ;;  %15896 = vmatmul.mubr.f32.gmra.mrb[48].mxu1 %v10497_v48 }
0x1f48   : > { %15898 = vmatprep.mubr.msk.f32.mxu1 %vm18110_vm0, %v18111_v1 }
0x1f4a   : > { %v10502_v7 = vpop.f32.mrb[254].mxu0 }
0x1f4b   : > { %v15835_v44 = vpop.f32.mrb[255].mxu0  ;;  %15899 = vmatmul.mubr.f32.gmra.mrb[50].mxu1 %v10502_v7 }
0x1f4c   : > { %15901 = vmatprep.mubr.msk.f32.mxu1 %vm18110_vm0, %v18111_v1 }
0x1f4e   : > { %v10507_v34 = vpop.f32.mrb[0].mxu0 }
0x1f4f   : > { %v15838_v13 = vpop.f32.mrb[1].mxu0  ;;  %15902 = vmatmul.mubr.f32.gmra.mrb[52].mxu1 %v10507_v34 }
0x1f50   : > { %15904 = vmatprep.mubr.msk.f32.mxu1 %vm18110_vm0, %v18111_v1 }
0x1f52   : > { %v10512_v49 = vpop.f32.mrb[2].mxu0 }
0x1f53   : > { %v15841_v51 = vpop.f32.mrb[3].mxu0  ;;  %15905 = vmatmul.mubr.f32.gmra.mrb[54].mxu1 %v10512_v49 }
0x1f54   : > { %15907 = vmatprep.mubr.msk.f32.mxu1 %vm18110_vm0, %v18111_v1 }
0x1f56   : > { %v10517_v31 = vpop.f32.mrb[4].mxu0 }
0x1f57   : > { %v15844_v59 = vpop.f32.mrb[5].mxu0  ;;  %15908 = vmatmul.mubr.f32.gmra.mrb[56].mxu1 %v10517_v31 }
0x1f58   : > { %15910 = vmatprep.mubr.msk.f32.mxu1 %vm18110_vm0, %v18111_v1 }
0x1f5a   : > { %v10522_v61 = vpop.f32.mrb[6].mxu0 }
0x1f5b   : > { %v15847_v60 = vpop.f32.mrb[7].mxu0  ;;  %15911 = vmatmul.mubr.f32.gmra.mrb[58].mxu1 %v10522_v61 }
0x1f5c   : > { %15913 = vmatprep.mubr.msk.f32.mxu1 %vm18110_vm0, %v18111_v1  ;;  %v12694_v60 = vld [vmem:[%s21945_s6 + $0x18] sm:$0xff] }
0x1f5e   : > { %v10527_v56 = vpop.f32.mrb[8].mxu0 }
0x1f5f   : > { %v15850_v38 = vpop.f32.mrb[9].mxu0  ;;  %15914 = vmatmul.mubr.f32.gmra.mrb[60].mxu1 %v10527_v56 }
0x1f60   : > { %15916 = vmatprep.mubr.msk.f32.mxu1 %vm18110_vm0, %v18111_v1  ;;  %v12695_v38 = vld [vmem:[%s21945_s6 + $0x20] sm:$0xff] }
0x1f62   : > { %v10532_v50 = vpop.f32.mrb[10].mxu0 }
0x1f63   : > { %v15853_v21 = vpop.f32.mrb[11].mxu0  ;;  %15917 = vmatmul.mubr.f32.gmra.mrb[62].mxu1 %v10532_v50  ;;  %v12696_v50 = vld [vmem:[%s21945_s6 + $0x28] sm:$0xff] }
0x1f64   : > { %15919 = vmatprep.mubr.msk.f32.mxu1 %vm18110_vm0, %v18111_v1 }
0x1f66   : > { %v10537_v10 = vpop.f32.mrb[12].mxu0 }
0x1f67   : > { %v15856_v12 = vpop.f32.mrb[13].mxu0  ;;  %15920 = vmatmul.mubr.f32.gmra.mrb[64].mxu1 %v10537_v10 }
0x1f68   : > { %15922 = vmatprep.mubr.msk.f32.mxu1 %vm18110_vm0, %v18111_v1 }
0x1f6a   : > { %v10542_v52 = vpop.f32.mrb[14].mxu0 }
0x1f6b   : > { %15923 = vmatmul.mubr.f32.gmra.mrb[66].mxu1 %v10542_v52  ;;  %v15859_v20 = vpop.f32.mrb[15].mxu0 }
0x1f6c   : > { %v10666_v20 = vld [vmem:[%s21945_s6] sm:$0xff] }
0x2016   : > { %v21609_v28 = vpop.f32.mrb[46].mxu1 }
0x2017   : > { %v15894_v33 = vpop.f32.mrb[47].mxu1 }
0x201a   : > { %v21611_v43 = vpop.f32.mrb[48].mxu1 }
0x201b   : > { %v15897_v23 = vpop.f32.mrb[49].mxu1  ;;  %v17905_v26 = vpack.i.bf16 %v21611_v43, %v21609_v28  ;;  %v16826_v57 = vpack.c.bf16 %v21611_v43, %v21609_v28 }
0x201d   : > { %17906 = vrot.lane.b32.xlu0 %v17905_v26, %s18112_s16 }
0x201e   : > { %v21618_v5 = vpop.f32.mrb[50].mxu1 }
0x201f   : > { %v15900_v4 = vpop.f32.mrb[51].mxu1 }
0x2022   : > { %v21620_v37 = vpop.f32.mrb[52].mxu1 }
0x2023   : > { %v15903_v45 = vpop.f32.mrb[53].mxu1  ;;  %v17910_v25 = vpack.i.bf16 %v21620_v37, %v21618_v5  ;;  %v16829_v27 = vpack.c.bf16 %v21620_v37, %v21618_v5 }
0x2024   : > { %v10668_v45 = vld [vmem:[%s21945_s6 + $0x10] sm:$0xff] }
0x2025   : > { %17911 = vrot.lane.b32.xlu1 %v17910_v25, %s18112_s16 }
0x2026   : > { %v21627_v14 = vpop.f32.mrb[54].mxu1 }
0x2027   : > { %v15906_v58 = vpop.f32.mrb[55].mxu1 }
0x202a   : > { %v21629_v62 = vpop.f32.mrb[56].mxu1 }
0x202b   : > { %v15909_v2 = vpop.f32.mrb[57].mxu1  ;;  %v17915_v6 = vpack.i.bf16 %v21629_v62, %v21627_v14  ;;  %v16832_v42 = vpack.c.bf16 %v21629_v62, %v21627_v14 }
0x202d   : > { %17916 = vrot.lane.b32.xlu0 %v17915_v6, %s18112_s16 }
0x202e   : > { %v21636_v8 = vpop.f32.mrb[58].mxu1 }
0x202f   : > { %v15912_v9 = vpop.f32.mrb[59].mxu1 }
0x2032   : > { %v21638_v29 = vpop.f32.mrb[60].mxu1 }
0x2033   : > { %v15915_v35 = vpop.f32.mrb[61].mxu1  ;;  %v17920_v16 = vpack.i.bf16 %v21638_v29, %v21636_v8  ;;  %v16835_v24 = vpack.c.bf16 %v21638_v29, %v21636_v8 }
0x2035   : > { %17921 = vrot.lane.b32.xlu1 %v17920_v16, %s18112_s16 }
0x2036   : > { %v21645_v18 = vpop.f32.mrb[62].mxu1 }
0x2037   : > { %v15918_v32 = vpop.f32.mrb[63].mxu1 }
0x203a   : > { %v21647_v11 = vpop.f32.mrb[64].mxu1 }
0x203b   : > { %v15921_v15 = vpop.f32.mrb[65].mxu1  ;;  %v17925_v55 = vpack.i.bf16 %v21647_v11, %v21645_v18  ;;  %v16838_v39 = vpack.c.bf16 %v21647_v11, %v21645_v18 }
0x203d   : > { %17926 = vrot.lane.b32.xlu0 %v17925_v55, %s18112_s16 }
0x203e   : > { %v21654_v3 = vpop.f32.mrb[66].mxu1 }
0x203f   : > { %10692 = vrot.lane.b32.xlu1 %v21654_v3, %s18112_s16  ;;  %v15924_v53 = vpop.f32.mrb[67].mxu1 }
0x2041   : > { %17931 = vrot.lane.b32.xlu0 %v17905_v26, %s18113_s17 }
0x2043   : > { %17936 = vrot.lane.b32.xlu1 %v17910_v25, %s18113_s17 }
0x2045   : > { %17941 = vrot.lane.b32.xlu0 %v17915_v6, %s18113_s17 }
0x2047   : > { %17946 = vrot.lane.b32.xlu1 %v17920_v16, %s18113_s17 }
0x2049   : > { %17951 = vrot.lane.b32.xlu0 %v17925_v55, %s18113_s17 }
0x204b   : > { %10901 = vrot.lane.b32.xlu1 %v21654_v3, %s18113_s17 }
0x204d   : > { %17956 = vrot.lane.b32.xlu0 %v17905_v26, %s18114_s18 }
0x204f   : > { %17961 = vrot.lane.b32.xlu1 %v17910_v25, %s18114_s18 }
0x2051   : > { %17966 = vrot.lane.b32.xlu0 %v17915_v6, %s18114_s18 }
0x2053   : > { %17971 = vrot.lane.b32.xlu1 %v17920_v16, %s18114_s18 }
0x2055   : > { %17976 = vrot.lane.b32.xlu0 %v17925_v55, %s18114_s18 }
0x2057   : > { %11021 = vrot.lane.b32.xlu1 %v21654_v3, %s18114_s18 }
0x2059   : > { %17981 = vrot.lane.b32.xlu0 %v17905_v26, %s18115_s19  ;;  %v10667_v26 = vld [vmem:[%s21945_s6 + $0x8] sm:$0xff] }
0x205b   : > { %17986 = vrot.lane.b32.xlu1 %v17910_v25, %s18115_s19 }
0x205d   : > { %17991 = vrot.lane.b32.xlu0 %v17915_v6, %s18115_s19 }
0x205f   : > { %17996 = vrot.lane.b32.xlu1 %v17920_v16, %s18115_s19 }
0x2061   : > { %18001 = vrot.lane.b32.xlu0 %v17925_v55, %s18115_s19  ;;  %v12706_v55 = vld [vmem:[%s21945_s6 + $0x38] sm:$0xff] }
0x2063   : > { %11141 = vrot.lane.b32.xlu1 %v21654_v3, %s18115_s19 }
0x208f   : > { %v17907_v30 = vpop.permute.xlu0 %17906 }
0x2090   : > { %v17909_v41 = vunpack.i.h.bf16 %v17907_v30  ;;  %v17908_v17 = vunpack.i.l.bf16 %v17907_v30 }
0x2092   : > { %v16811_v22 = vpack.c.bf16 %v17909_v41, %v17908_v17  ;;  %v12707_v41 = vld [vmem:[%s21945_s6 + $0x40] sm:$0xff] }
0x2094   : > { %16812 = vmatpush3.bf16.msra.mxu0 %v16811_v22 }
0x2095   : > { %16813 = vmatprep.subr.bf16.mxu0 %v18109_v0 }
0x2097   : > { %v17912_v63 = vpop.permute.xlu1 %17911 }
0x2098   : > { %v17914_v54 = vunpack.i.h.bf16 %v17912_v63  ;;  %v17913_v46 = vunpack.i.l.bf16 %v17912_v63 }
0x209a   : > { %v16814_v36 = vpack.c.bf16 %v17914_v54, %v17913_v46 }
0x209c   : > { %16815 = vmatpush3.bf16.msra.mxu0 %v16814_v36 }
0x209d   : > { %16816 = vmatprep.subr.bf16.mxu0 %v18109_v0 }
0x209f   : > { %v17917_v40 = vpop.permute.xlu0 %17916 }
0x20a0   : > { %v17919_v48 = vunpack.i.h.bf16 %v17917_v40  ;;  %v17918_v19 = vunpack.i.l.bf16 %v17917_v40 }
0x20a2   : > { %v16817_v7 = vpack.c.bf16 %v17919_v48, %v17918_v19 }
0x20a4   : > { %16818 = vmatpush3.bf16.msra.mxu0 %v16817_v7 }
0x20a5   : > { %16819 = vmatprep.subr.bf16.mxu0 %v18109_v0 }
0x20a7   : > { %v17922_v44 = vpop.permute.xlu1 %17921 }
0x20a8   : > { %v17924_v34 = vunpack.i.h.bf16 %v17922_v44  ;;  %v17923_v13 = vunpack.i.l.bf16 %v17922_v44 }
0x20aa   : > { %v16820_v49 = vpack.c.bf16 %v17924_v34, %v17923_v13 }
0x20ac   : > { %16821 = vmatpush3.bf16.msra.mxu0 %v16820_v49  ;;  %v12712_v49 = vld [vmem:[%s21945_s6 + $0x48] sm:$0xff] }
0x20ad   : > { %16822 = vmatprep.subr.bf16.mxu0 %v18109_v0 }
0x20af   : > { %v17927_v51 = vpop.permute.xlu0 %17926 }
0x20b0   : > { %v17929_v31 = vunpack.i.h.bf16 %v17927_v51  ;;  %v17928_v59 = vunpack.i.l.bf16 %v17927_v51 }
0x20b1   : > { %v10693_v56 = vpop.permute.xlu1 %10692 }
0x20b2   : > { %v16823_v61 = vpack.c.bf16 %v17929_v31, %v17928_v59 }
0x20b3   : > { %v17932_v21 = vpop.permute.xlu0 %17931 }
0x20b4   : > { %16824 = vmatpush3.bf16.msra.mxu0 %v16823_v61  ;;  %v17934_v10 = vunpack.i.h.bf16 %v17932_v21  ;;  %v17933_v12 = vunpack.i.l.bf16 %v17932_v21 }
0x20b5   : > { %15945 = vmatprep.subr.mxu0 %v18111_v1  ;;  %v17937_v52 = vpop.permute.xlu1 %17936 }
0x20b6   : > { %v16841_v28 = vpack.c.bf16 %v17934_v10, %v17933_v12  ;;  %v17939_v33 = vunpack.i.h.bf16 %v17937_v52  ;;  %v17938_v43 = vunpack.i.l.bf16 %v17937_v52  ;;  %v12714_v10 = vld [vmem:[%s21945_s6 + $0x58] sm:$0xff] }
0x20b7   : > { %v17942_v23 = vpop.permute.xlu0 %17941 }
0x20b8   : > { %15946 = vmatpush3.msk.msra.mxu0 %vm408_vm1, %v10693_v56  ;;  %v17944_v5 = vunpack.i.h.bf16 %v17942_v23  ;;  %v17943_v4 = vunpack.i.l.bf16 %v17942_v23 }
0x20b9   : > { %16825 = vmatprep.subr.bf16.mxu0 %v18109_v0  ;;  %15948 = vmatmul.mubr.msk.f32.vlgmr.msra.gmra.mrb[16].mxu0 %vm2087_vm8, %v12694_v60  ;;  %v17947_v37 = vpop.permute.xlu1 %17946  ;;  %v12713_v60 = vld [vmem:[%s21945_s6 + $0x50] sm:$0xff] }
0x20ba   : > { %16827 = vmatpush3.bf16.msra.mxu0 %v16826_v57  ;;  %15950 = vmatprep.mubr.msk.f32.mxu0 %vm18110_vm0, %v18111_v1  ;;  %v16844_v57 = vpack.c.bf16 %v17939_v33, %v17938_v43  ;;  %v16847_v25 = vpack.c.bf16 %v17944_v5, %v17943_v4  ;;  %v17948_v14 = vunpack.i.l.bf16 %v17947_v37  ;;  %v12721_v4 = vld [vmem:[%s21945_s6 + $0x70] sm:$0xff] }
0x20bb   : > { %16828 = vmatprep.subr.bf16.mxu0 %v18109_v0  ;;  %v17952_v58 = vpop.permute.xlu0 %17951 }
0x20bc   : > { %v17954_v2 = vunpack.i.h.bf16 %v17952_v58  ;;  %v17953_v6 = vunpack.i.l.bf16 %v17952_v58 }
0x20bd   : > { %15951 = vmatmul.mubr.msk.f32.gmra.mrb[18].mxu0 %vm2087_vm8, %v12695_v38 }
0x20be   : > { %16830 = vmatpush3.bf16.msra.mxu0 %v16829_v27  ;;  %15953 = vmatprep.mubr.msk.f32.mxu0 %vm18110_vm0, %v18111_v1  ;;  %v17949_v27 = vunpack.i.h.bf16 %v17947_v37  ;;  %v16853_v9 = vpack.c.bf16 %v17954_v2, %v17953_v6 }
0x20bf   : > { %16831 = vmatprep.subr.bf16.mxu0 %v18109_v0  ;;  %v17957_v8 = vpop.permute.xlu0 %17956 }
0x20c0   : > { %v16850_v62 = vpack.c.bf16 %v17949_v27, %v17948_v14  ;;  %v17959_v29 = vunpack.i.h.bf16 %v17957_v8  ;;  %v17958_v35 = vunpack.i.l.bf16 %v17957_v8 }
0x20c1   : > { %15954 = vmatmul.mubr.msk.f32.gmra.mrb[20].mxu0 %vm2087_vm8, %v12696_v50 }
0x20c2   : > { %16833 = vmatpush3.bf16.msra.mxu0 %v16832_v42  ;;  %15978 = vmatprep.mubr.msk.f32.mxu0 %vm18110_vm0, %v18111_v1  ;;  %v10902_v42 = vpop.permute.xlu1 %10901  ;;  %v16856_v18 = vpack.c.bf16 %v17959_v29, %v17958_v35 }
0x20c3   : > { %16834 = vmatprep.subr.bf16.mxu0 %v18109_v0  ;;  %v17967_v15 = vpop.permute.xlu0 %17966 }
0x20c4   : > { %v17968_v53 = vunpack.i.l.bf16 %v17967_v15 }
0x20c6   : > { %16836 = vmatpush3.bf16.msra.mxu0 %v16835_v24  ;;  %v17962_v16 = vpop.permute.xlu1 %17961  ;;  %v12705_v24 = vld [vmem:[%s21945_s6 + $0x30] sm:$0xff] }
0x20c7   : > { %16837 = vmatprep.subr.bf16.mxu0 %v18109_v0  ;;  %v17964_v32 = vunpack.i.h.bf16 %v17962_v16  ;;  %v17963_v11 = vunpack.i.l.bf16 %v17962_v16  ;;  %v17977_v54 = vpop.permute.xlu0 %17976 }
0x20c8   : > { %v17979_v36 = vunpack.i.h.bf16 %v17977_v54  ;;  %v17978_v40 = vunpack.i.l.bf16 %v17977_v54 }
0x20ca   : > { %16839 = vmatpush3.bf16.msra.mxu0 %v16838_v39  ;;  %v16859_v39 = vpack.c.bf16 %v17964_v32, %v17963_v11  ;;  %v17972_v30 = vpop.permute.xlu1 %17971  ;;  %v16868_v7 = vpack.c.bf16 %v17979_v36, %v17978_v40  ;;  %v11243_v36 = vld [vmem:[%s21946_s7 + $0x10] sm:$0xff] }
0x20cb   : > { %15976 = vmatprep.subr.mxu0 %v18111_v1  ;;  %v17974_v22 = vunpack.i.h.bf16 %v17972_v30  ;;  %v17973_v63 = vunpack.i.l.bf16 %v17972_v30  ;;  %v17982_v19 = vpop.permute.xlu0 %17981 }
0x20cc   : > { %v17984_v44 = vunpack.i.h.bf16 %v17982_v19  ;;  %v17983_v34 = vunpack.i.l.bf16 %v17982_v19 }
0x20cd   : > { %v16865_v46 = vpack.c.bf16 %v17974_v22, %v17973_v63  ;;  %v11241_v22 = vld [vmem:[%s21946_s7] sm:$0xff] }
0x20ce   : > { %15977 = vmatpush3.msk.msra.mxu0 %vm408_vm1, %v21654_v3  ;;  %v17969_v3 = vunpack.i.h.bf16 %v17967_v15  ;;  %v11022_v48 = vpop.permute.xlu1 %11021  ;;  %v16871_v51 = vpack.c.bf16 %v17984_v44, %v17983_v34  ;;  %v12738_v44 = vld [vmem:[%s21946_s7 + $0x40] sm:$0xff] }
0x20cf   : > { %16840 = vmatprep.subr.bf16.mxu0 %v18109_v0  ;;  %15979 = vmatmul.mubr.msk.f32.vlgmr.msra.gmra.mrb[16].mxu0 %vm2087_vm8, %v10666_v20  ;;  %v17992_v61 = vpop.permute.xlu0 %17991 }
0x20d0   : > { %16842 = vmatpush3.bf16.msra.mxu0 %v16841_v28  ;;  %15981 = vmatprep.mubr.msk.f32.mxu0 %vm18110_vm0, %v18111_v1  ;;  %v16862_v17 = vpack.c.bf16 %v17969_v3, %v17968_v53  ;;  %v17994_v38 = vunpack.i.h.bf16 %v17992_v61  ;;  %v17993_v50 = vunpack.i.l.bf16 %v17992_v61  ;;  %v12728_v3 = vld [vmem:[%s21946_s7 + $0x30] sm:$0xff]  ;;  %v12747_v61 = vld [vmem:[%s21946_s7 + $0x68] sm:$0xff] }
0x20d1   : > { %16843 = vmatprep.subr.bf16.mxu0 %v18109_v0 }
0x20d2   : > { %v17987_v13 = vpop.permute.xlu1 %17986  ;;  %v16877_v12 = vpack.c.bf16 %v17994_v38, %v17993_v50  ;;  %v12754_v38 = vld [vmem:[%s21946_s7 + $0x80] sm:$0xff]  ;;  %v12755_v50 = vld [vmem:[%s21946_s7 + $0x88] sm:$0xff] }
0x20d3   : > { %15982 = vmatmul.mubr.msk.f32.gmra.mrb[18].mxu0 %vm2087_vm8, %v10667_v26  ;;  %v17989_v31 = vunpack.i.h.bf16 %v17987_v13  ;;  %v17988_v59 = vunpack.i.l.bf16 %v17987_v13  ;;  %v18002_v28 = vpop.permute.xlu0 %18001  ;;  %v12739_v13 = vld [vmem:[%s21946_s7 + $0x48] sm:$0xff] }
0x20d4   : > { %16845 = vmatpush3.bf16.msra.mxu0 %v16844_v57  ;;  %15984 = vmatprep.mubr.msk.f32.mxu0 %vm18110_vm0, %v18111_v1  ;;  %v18004_v43 = vunpack.i.h.bf16 %v18002_v28  ;;  %v18003_v23 = vunpack.i.l.bf16 %v18002_v28  ;;  %v12719_v57 = vld [vmem:[%s21945_s6 + $0x60] sm:$0xff] }
0x20d5   : > { %16846 = vmatprep.subr.bf16.mxu0 %v18109_v0  ;;  %v16874_v56 = vpack.c.bf16 %v17989_v31, %v17988_v59  ;;  %v12741_v31 = vld [vmem:[%s21946_s7 + $0x58] sm:$0xf]  ;;  %v12746_v59 = vld [vmem:[%s21946_s7 + $0x60] sm:$0xff] }
0x20d6   : > { %v17997_v21 = vpop.permute.xlu1 %17996  ;;  %v16883_v26 = vpack.c.bf16 %v18004_v43, %v18003_v23 }
0x20d7   : > { %15985 = vmatmul.mubr.msk.f32.gmra.mrb[20].mxu0 %vm2087_vm8, %v10668_v45  ;;  %v17999_v52 = vunpack.i.h.bf16 %v17997_v21  ;;  %v17998_v20 = vunpack.i.l.bf16 %v17997_v21  ;;  %v12756_v21 = vld [vmem:[%s21946_s7 + $0x90] sm:$0xff] }
0x20d8   : > { %16848 = vmatpush3.bf16.msra.mxu0 %v16847_v25  ;;  %16009 = vmatprep.mubr.msk.f32.mxu0 %vm18110_vm0, %v18111_v1 }
0x20d9   : > { %16849 = vmatprep.subr.bf16.mxu0 %v18109_v0  ;;  %v16880_v33 = vpack.c.bf16 %v17999_v52, %v17998_v20 }
0x20da   : > { %v11142_v5 = vpop.permute.xlu1 %11141 }
0x20dc   : > { %16851 = vmatpush3.bf16.msra.mxu0 %v16850_v62  ;;  %v12726_v62 = vld [vmem:[%s21946_s7 + $0x20] sm:$0xff] }
0x20dd   : > { %16852 = vmatprep.subr.bf16.mxu0 %v18109_v0  ;;  %16086 = vmatprep.mubr.msk.f32.mxu1 %vm930_vm5, %v12726_v62 }
0x20e0   : > { %16854 = vmatpush3.bf16.msra.mxu0 %v16853_v9 }
0x20e1   : > { %16007 = vmatprep.subr.mxu0 %v18111_v1 }
0x20e4   : > { %16008 = vmatpush3.msk.msra.mxu0 %vm408_vm1, %v10902_v42 }
0x20e5   : > { %16855 = vmatprep.subr.bf16.mxu0 %v18109_v0  ;;  %16010 = vmatmul.mubr.msk.f32.vlgmr.msra.gmra.mrb[16].mxu0 %vm2087_vm8, %v12705_v24 }
0x20e6   : > { %16857 = vmatpush3.bf16.msra.mxu0 %v16856_v18  ;;  %16012 = vmatprep.mubr.msk.f32.mxu0 %vm18110_vm0, %v18111_v1 }
0x20e7   : > { %16858 = vmatprep.subr.bf16.mxu0 %v18109_v0 }
0x20e9   : > { %16013 = vmatmul.mubr.msk.f32.gmra.mrb[18].mxu0 %vm2087_vm8, %v12706_v55  ;;  %v12727_v55 = vld [vmem:[%s21946_s7 + $0x28] sm:$0xff] }
0x20ea   : > { %16860 = vmatpush3.bf16.msra.mxu0 %v16859_v39  ;;  %16015 = vmatprep.mubr.msk.f32.mxu0 %vm18110_vm0, %v18111_v1 }
0x20eb   : > { %16861 = vmatprep.subr.bf16.mxu0 %v18109_v0 }
0x20ed   : > { %16016 = vmatmul.mubr.msk.f32.gmra.mrb[20].mxu0 %vm2087_vm8, %v12707_v41 }
0x20ee   : > { %16863 = vmatpush3.bf16.msra.mxu0 %v16862_v17  ;;  %16040 = vmatprep.mubr.msk.f32.mxu0 %vm18110_vm0, %v18111_v1  ;;  %v12729_v17 = vld [vmem:[%s21946_s7 + $0x38] sm:$0xf] }
0x20ef   : > { %16864 = vmatprep.subr.bf16.mxu0 %v18109_v0 }
0x20f2   : > { %16866 = vmatpush3.bf16.msra.mxu0 %v16865_v46  ;;  %v11242_v46 = vld [vmem:[%s21946_s7 + $0x8] sm:$0xff] }
0x20f3   : > { %16867 = vmatprep.subr.bf16.mxu0 %v18109_v0 }
0x20f6   : > { %16869 = vmatpush3.bf16.msra.mxu0 %v16868_v7  ;;  %v11244_v7 = vld [vmem:[%s21946_s7 + $0x18] sm:$0xf] }
0x20f7   : > { %16038 = vmatprep.subr.mxu0 %v18111_v1 }
0x20fa   : > { %16039 = vmatpush3.msk.msra.mxu0 %vm408_vm1, %v11022_v48 }
0x20fb   : > { %16870 = vmatprep.subr.bf16.mxu0 %v18109_v0  ;;  %16041 = vmatmul.mubr.msk.f32.vlgmr.msra.gmra.mrb[16].mxu0 %vm2087_vm8, %v12712_v49  ;;  %v12740_v49 = vld [vmem:[%s21946_s7 + $0x50] sm:$0xff] }
0x20fc   : > { %16872 = vmatpush3.bf16.msra.mxu0 %v16871_v51  ;;  %16043 = vmatprep.mubr.msk.f32.mxu0 %vm18110_vm0, %v18111_v1 }
0x20fd   : > { %16873 = vmatprep.subr.bf16.mxu0 %v18109_v0 }
0x20ff   : > { %16044 = vmatmul.mubr.msk.f32.gmra.mrb[18].mxu0 %vm2087_vm8, %v12713_v60  ;;  %v12748_v60 = vld [vmem:[%s21946_s7 + $0x70] sm:$0xff] }
0x2100   : > { %16875 = vmatpush3.bf16.msra.mxu0 %v16874_v56  ;;  %16046 = vmatprep.mubr.msk.f32.mxu0 %vm18110_vm0, %v18111_v1  ;;  %v12749_v56 = vld [vmem:[%s21946_s7 + $0x78] sm:$0xf] }
0x2101   : > { %16876 = vmatprep.subr.bf16.mxu0 %v18109_v0 }
0x2103   : > { %16047 = vmatmul.mubr.msk.f32.gmra.mrb[20].mxu0 %vm2087_vm8, %v12714_v10  ;;  %v12757_v10 = vld [vmem:[%s21946_s7 + $0x98] sm:$0xf] }
0x2104   : > { %16878 = vmatpush3.bf16.msra.mxu0 %v16877_v12  ;;  %16071 = vmatprep.mubr.msk.f32.mxu0 %vm18110_vm0, %v18111_v1  ;;  %v18099_v12 = vld [vmem:[%s21947_s8] sm:$0xff] }
0x2105   : > { %16879 = vmatprep.subr.bf16.mxu0 %v18109_v0 }
0x2108   : > { %16881 = vmatpush3.bf16.msra.mxu0 %v16880_v33 }
0x2109   : > { %16882 = vmatprep.subr.bf16.mxu0 %v18109_v0  ;;  %v12720_v0 = vld [vmem:[%s21945_s6 + $0x68] sm:$0xff] }
0x210c   : > { %16884 = vmatpush3.bf16.msra.mxu0 %v16883_v26 }
0x210d   : > { %16069 = vmatprep.subr.mxu0 %v18111_v1 }
0x2110   : > { %16070 = vmatpush3.msk.msra.mxu0 %vm408_vm1, %v11142_v5 }
0x2111   : > { %16072 = vmatmul.mubr.msk.f32.vlgmr.msra.gmra.mrb[16].mxu0 %vm2087_vm8, %v12719_v57 }
0x2112   : > { %16074 = vmatprep.mubr.msk.f32.mxu0 %vm18110_vm0, %v18111_v1 }
0x2115   : > { %16075 = vmatmul.mubr.msk.f32.gmra.mrb[18].mxu0 %vm2087_vm8, %v12720_v0 }
0x2116   : > { %16077 = vmatprep.mubr.msk.f32.mxu0 %vm18110_vm0, %v18111_v1 }
0x2119   : > { %16078 = vmatmul.mubr.msk.f32.gmra.mrb[20].mxu0 %vm2087_vm8, %v12721_v4 }
0x21e4   : > { %v11221_v37 = vpop.f32.mrb[16].mxu0 }
0x21e5   : > { %v16073_v45 = vpop.f32.mrb[17].mxu0  ;;  %v11238_v27 = vmax.f32 %v11221_v37, 0.0 }
0x21e8   : > { %v11226_v25 = vpop.f32.mrb[18].mxu0 }
0x21e9   : > { %v11239_v14 = vmax.f32 %v11226_v25, 0.0  ;;  %v16076_v58 = vpop.f32.mrb[19].mxu0 }
0x21eb   : > { %v18005_v2 = vpack.i.bf16 %v11239_v14, %v11238_v27  ;;  %v21821_v6 = vpack.c.bf16 %v11239_v14, %v11238_v27 }
0x21ec   : > { %v11231_v1 = vpop.f32.mrb[20].mxu0 }
0x21ed   : > { %v21823_v42 = vmax.f32 %v11231_v1, 0.0  ;;  %18006 = vrot.lane.b32.xlu0 %v18005_v2, %s18117_s20  ;;  %v16079_v8 = vpop.f32.mrb[21].mxu0 }
0x21ef   : > { %11259 = vrot.lane.b32.xlu1 %v21823_v42, %s18117_s20 }
0x21f1   : > { %18011 = vrot.lane.b32.xlu0 %v18005_v2, %s18118_s21 }
0x21f3   : > { %11249 = vrot.lane.b32.xlu1 %v21823_v42, %s18118_s21 }
0x21f5   : > { %18016 = vrot.lane.b32.xlu0 %v18005_v2, %s18119_s22 }
0x21f7   : > { %11463 = vrot.lane.b32.xlu1 %v21823_v42, %s18119_s22 }
0x21f9   : > { %18021 = vrot.lane.b32.xlu0 %v18005_v2, %s18120_s23 }
0x21fb   : > { %11574 = vrot.lane.b32.xlu1 %v21823_v42, %s18120_s23 }
0x225f   : > { %v18007_v9 = vpop.permute.xlu0 %18006 }
0x2260   : > { %v18009_v29 = vunpack.i.h.bf16 %v18007_v9  ;;  %v18008_v35 = vunpack.i.l.bf16 %v18007_v9 }
0x2261   : > { %v11260_v11 = vpop.permute.xlu1 %11259 }
0x2262   : > { %v16885_v16 = vpack.c.bf16 %v18009_v29, %v18008_v35 }
0x2263   : > { %v18012_v24 = vpop.permute.xlu0 %18011 }
0x2264   : > { %v18014_v18 = vunpack.i.h.bf16 %v18012_v24  ;;  %v18013_v32 = vunpack.i.l.bf16 %v18012_v24  ;;  %16886 = vmatprep.subr.bf16.mxu1 %v16885_v16 }
0x2265   : > { %16888 = vmatpush3.bf16.msra.mxu1 %v16885_v16  ;;  %v11250_v41 = vpop.permute.xlu1 %11249 }
0x2266   : > { %16084 = vmatprep.subr.mxu1 %v11260_v11  ;;  %v16889_v39 = vpack.c.bf16 %v18014_v18, %v18013_v32  ;;  %v18100_v32 = vld [vmem:[%s21947_s8 + $0x8] sm:$0x3f] }
0x2267   : > { %v18017_v15 = vpop.permute.xlu0 %18016 }
0x2268   : > { %v18019_v53 = vunpack.i.h.bf16 %v18017_v15  ;;  %v18018_v30 = vunpack.i.l.bf16 %v18017_v15 }
0x2269   : > { %16085 = vmatpush3.msra.mxu1 %v11260_v11  ;;  %v11464_v19 = vpop.permute.xlu1 %11463 }
0x226a   : > { %16087 = vmatmul.mubr.msk.f32.vlgmr.msra.gmra.mrb[68].mxu1 %vm930_vm5, %v12727_v55  ;;  %16890 = vmatprep.subr.bf16.mxu1 %v16889_v39  ;;  %v16893_v63 = vpack.c.bf16 %v18019_v53, %v18018_v30 }
0x226b   : > { %16892 = vmatpush3.bf16.msra.mxu1 %v16889_v39  ;;  %16089 = vmatprep.mubr.msk.f32.mxu1 %vm930_vm5, %v12728_v3  ;;  %v18022_v54 = vpop.permute.xlu0 %18021 }
0x226c   : > { %16096 = vmatprep.subr.mxu1 %v11250_v41  ;;  %v18024_v40 = vunpack.i.h.bf16 %v18022_v54  ;;  %v18023_v48 = vunpack.i.l.bf16 %v18022_v54 }
0x226d   : > { %v11575_v51 = vpop.permute.xlu1 %11574 }
0x226e   : > { %16090 = vmatmul.mubr.msk.f32.gmra.mrb[70].mxu1 %vm930_vm5, %v12729_v17  ;;  %v16897_v34 = vpack.c.bf16 %v18024_v40, %v18023_v48 }
0x226f   : > { %16097 = vmatpush3.msra.mxu1 %v11250_v41  ;;  %16098 = vmatprep.mubr.msk.f32.mxu1 %vm930_vm5, %v11241_v22 }
0x2270   : > { %16894 = vmatprep.subr.bf16.mxu1 %v16893_v63 }
0x2272   : > { %16099 = vmatmul.mubr.msk.f32.vlgmr.msra.gmra.mrb[68].mxu1 %vm930_vm5, %v11242_v46 }
0x2273   : > { %16896 = vmatpush3.bf16.msra.mxu1 %v16893_v63  ;;  %16101 = vmatprep.mubr.msk.f32.mxu1 %vm930_vm5, %v11243_v36 }
0x2274   : > { %16108 = vmatprep.subr.mxu1 %v11464_v19 }
0x2276   : > { %16102 = vmatmul.mubr.msk.f32.gmra.mrb[70].mxu1 %vm930_vm5, %v11244_v7 }
0x2277   : > { %16109 = vmatpush3.msra.mxu1 %v11464_v19  ;;  %16110 = vmatprep.mubr.msk.f32.mxu1 %vm930_vm5, %v12738_v44 }
0x2278   : > { %16898 = vmatprep.subr.bf16.mxu1 %v16897_v34 }
0x227a   : > { %16111 = vmatmul.mubr.msk.f32.vlgmr.msra.gmra.mrb[68].mxu1 %vm930_vm5, %v12739_v13 }
0x227b   : > { %16900 = vmatpush3.bf16.msra.mxu1 %v16897_v34  ;;  %16113 = vmatprep.mubr.msk.f32.mxu1 %vm930_vm5, %v12740_v49 }
0x227c   : > { %16120 = vmatprep.subr.mxu1 %v11575_v51 }
0x227e   : > { %16114 = vmatmul.mubr.msk.f32.gmra.mrb[70].mxu1 %vm930_vm5, %v12741_v31 }
0x227f   : > { %16121 = vmatpush3.msra.mxu1 %v11575_v51  ;;  %16122 = vmatprep.mubr.msk.f32.mxu1 %vm930_vm5, %v12746_v59 }
0x2280   : > { %16902 = vmatprep.subr.bf16.mxu1 %v21821_v6 }
0x2282   : > { %16123 = vmatmul.mubr.msk.f32.vlgmr.msra.gmra.mrb[68].mxu1 %vm930_vm5, %v12747_v61 }
0x2283   : > { %16904 = vmatpush3.bf16.msra.mxu1 %v21821_v6  ;;  %16125 = vmatprep.mubr.msk.f32.mxu1 %vm930_vm5, %v12748_v60 }
0x2284   : > { %16132 = vmatprep.subr.mxu1 %v21823_v42 }
0x2286   : > { %16126 = vmatmul.mubr.msk.f32.gmra.mrb[70].mxu1 %vm930_vm5, %v12749_v56 }
0x2287   : > { %16133 = vmatpush3.msra.mxu1 %v21823_v42  ;;  %16134 = vmatprep.mubr.msk.f32.mxu1 %vm930_vm5, %v12754_v38 }
0x228a   : > { %16135 = vmatmul.mubr.msk.f32.vlgmr.msra.gmra.mrb[68].mxu1 %vm930_vm5, %v12755_v50 }
0x228b   : > { %16137 = vmatprep.mubr.msk.f32.mxu1 %vm930_vm5, %v12756_v21 }
0x228e   : > { %16138 = vmatmul.mubr.msk.f32.gmra.mrb[70].mxu1 %vm930_vm5, %v12757_v10 }
0x228f   : > { %16148 = vmatprep.mubr.msk.f32.mxu1 %vm3214_vm9, %v18099_v12 }
0x235d   : > { %v16136_v52 = vpop.f32.mrb[68].mxu1 }
0x235e   : > { %v11787_v20 = vrot.slane %v16136_v52, 1  ;;  %v11759_v28 = vpop.f32.mrb[69].mxu1 }
0x235f   : > { %v11786_v33 = vrot.slane %v11759_v28, 1 }
0x2361   : > { %v11788_v43 = vsel %vm1709_vm6, %v11786_v33, %v11787_v20  ;;  %v16139_v23 = vpop.f32.mrb[70].mxu1 }
0x2362   : > { %v11797_v26 = vmax.f32 %v11759_v28, %v11788_v43  ;;  %v11791_v57 = vrot.slane %v16139_v23, 1  ;;  %v11769_v5 = vpop.f32.mrb[71].mxu1 }
0x2363   : > { %v11789_v0 = vrot.slane %v11769_v5, 1 }
0x2364   : > { %v11800_v45 = vmax.f32 %v16139_v23, %v11791_v57 }
0x2365   : > { %v11792_v4 = vsel %vm1709_vm6, %v11789_v0, %v11791_v57  ;;  %v11790_v37 = vsel %vm1709_vm6, %v11787_v20, %v11789_v0 }
0x2366   : > { %v11799_v25 = vmax.f32 %v11769_v5, %v11792_v4  ;;  %v11798_v27 = vmax.f32 %v16136_v52, %v11790_v37 }
0x2368   : > { %v18030_v14 = vpack.i.bf16 %v11800_v45, %v11799_v25  ;;  %v18025_v58 = vpack.i.bf16 %v11798_v27, %v11797_v26 }
0x236a   : > { %18031 = vrot.lane.b32.xlu1 %v18030_v14, %s18112_s16  ;;  %18026 = vrot.lane.b32.xlu0 %v18025_v58, %s18112_s16 }
0x23dc   : > { %v18032_v62 = vpop.permute.xlu1 %18031  ;;  %v18027_v2 = vpop.permute.xlu0 %18026 }
0x23dd   : > { %v18034_v1 = vunpack.i.h.bf16 %v18032_v62  ;;  %v18033_v6 = vunpack.i.l.bf16 %v18032_v62  ;;  %v18029_v42 = vunpack.i.h.bf16 %v18027_v2  ;;  %v18028_v8 = vunpack.i.l.bf16 %v18027_v2 }
0x23df   : > { %v11812_v9 = vmax.f32 %v11800_v45, %v18034_v1  ;;  %v11811_v29 = vmax.f32 %v11799_v25, %v18033_v6  ;;  %v11810_v35 = vmax.f32 %v11798_v27, %v18029_v42  ;;  %v11809_v16 = vmax.f32 %v11797_v26, %v18028_v8 }
0x23e1   : > { %v16905_v24 = vpack.c.bf16 %v11810_v35, %v11809_v16  ;;  %v16909_v18 = vpack.c.bf16 %v11812_v9, %v11811_v29 }
0x23e3   : > { %16906 = vmatprep.subr.bf16.mxu1 %v16905_v24 }
0x23e4   : > { %16908 = vmatpush3.bf16.msra.mxu1 %v16905_v24 }
0x23e5   : > { %16911 = vmatprep.subr.msk.bf16.mxu1 %vm19238_vm11, %v16909_v18 }
0x23e8   : > { %16914 = vmatpush3.bf16.msk.msra.mxu1 %vm19238_vm11, %v16909_v18 }
0x23eb   : > { %16149 = vmatmul.mubr.msk.f32.vlgmr.msra.gmra.mrb[72].mxu1 %vm3214_vm9, %v18100_v32 }
0x24be   : > { %v16150_v11 = vpop.f32.mrb[72].mxu1 }
0x24bf   : > { %v11892_v15 = vmax.f32 %v16150_v11, 0.0  ;;  %v11882_v55 = vpop.f32.mrb[73].mxu1 }
0x24c0   : > { %v11891_v39 = vmax.f32 %v11882_v55, 0.0 }
0x24c1   : > { %12766 = vst [vmem:[%s19369_s29 + $0x38] sm:$0x3f] %v11892_v15 }
0x24c2   : > { %12765 = vst [vmem:[%s19369_s29 + $0x30] sm:$0xff] %v11891_v39 }
0x24c3 PF: > { %s19_s30 = sadd.s32 1, %s18107_s30  }
0x24c4   : > { %p16_p4 = scmp.ge.s32.totalorder %s19_s30, 4  }
0x24c6   :  { %18 = sbr.rel (!%p16_p4) target bundleno = 1 (0x1), region = 108 }

</bundles_post_ra>
